<compile_context>
chip_gen: v7x
topology: tpu7x:2x2x1
jax: 0.10.0
libtpu: 0.0.40
codegen_flags: <defaults>
</compile_context>

<pallas_src>
import numpy as np
import jax
import jax.numpy as jnp
from jax.experimental import pallas as pl
from jax.experimental.pallas import tpu as pltpu

LATENT = 100
LATENT_PAD = 128           # pad K of the first matmul to a full lane tile
GBF = 16                   # gen_base_filters
C1, C2, C3 = GBF * 8, GBF * 4, GBF * 2        # 128, 64, 32
EPS = 1e-5                 # PyTorch BatchNorm2d default eps
BT = 16                    # batch tile: one full packed bf16 sublane tile

# spatial width of each stride-2 deconv's INPUT
W_L2, W_L3, W_L4 = 4, 8, 16

# lane widths of the raster scratches (input_width * input_channels)
LW1 = W_L2 * C1            # 512  (layer-2 input rows)
LW2 = W_L3 * C2            # 512  (layer-3 input rows)
LW3 = W_L4 * C3            # 512  (layer-4 input rows)
NOUT = 4 * 2 * W_L4        # 128  (4 output rows x 32 cols, Cout=1)

# output-row parity r -> 4x4-kernel tap used by row-window offset d in {0,1}
_KH = ((3, 1), (2, 0))


# ---------------------------------------------------------------------------
# Fused kernel: the whole generator for BT images per grid step.
# Scratch layout: xp[p, b, iw*Cin + ci] = padded-row-p activation of image b.
# Row p=0 / p=last are the zero halo; W padding is folded into the RHS.
# ---------------------------------------------------------------------------
def _fused_kernel(z_ref, w1_ref, s1_ref, b1_ref,
                  rhs2_ref, s2_ref, b2_ref,
                  rhs3_ref, s3_ref, b3_ref,
                  rhs4_ref, o_ref,
                  xp1, xp2, xp3a, xp3b):
    f32, bf16 = jnp.float32, jnp.bfloat16
    zero_slab = jnp.zeros((BT, LW1), bf16)

    # Zero only the row-halo slabs.  Re-done every step (cheap: 6 full-tile
    # stores) so it stays correct when megacore splits the grid across cores.
    xp1[0] = zero_slab
    xp1[5] = zero_slab
    xp2[0] = zero_slab
    xp2[9] = zero_slab
    xp3a[0] = zero_slab      # padded row 0   (even parity)
    xp3b[8] = zero_slab      # padded row 17  (odd parity)

    # ---- Layer 1: ConvT(100->128, k4, s1, p0) == z @ W1, + ReLU + folded BN.
    y1 = jnp.dot(z_ref[...], w1_ref[...], preferred_element_type=f32)  # (BT,2048)
    y1 = (jnp.maximum(y1, 0.0) * s1_ref[...] + b1_ref[...]).astype(bf16)
    for kh in range(4):                              # 4 lane-aligned slab stores
        xp1[1 + kh] = y1[:, kh * LW1:(kh + 1) * LW1]

    # ---- Layer 2: ConvT(128->64, k4, s2, p1): 4x4 -> 8x8 ------------------
    # For each output-row parity r, output row 2m+r needs padded input rows
    # m+r (window d=0) and m+r+1 (d=1); the W taps live inside rhs2[r,d].
    for r in range(2):
        y = jnp.dot(xp1[r:r + 4].reshape(4 * BT, LW1), rhs2_ref[r, 0],
                    preferred_element_type=f32)
        y = y + jnp.dot(xp1[r + 1:r + 5].reshape(4 * BT, LW1), rhs2_ref[r, 1],
                        preferred_element_type=f32)
        y = (jnp.maximum(y, 0.0) * s2_ref[...] + b2_ref[...]).astype(bf16)
        y = y.reshape(4, BT, LW2)
        for m in range(4):
            xp2[1 + 2 * m + r] = y[m]                # full-tile slab store

    # ---- Layer 3: ConvT(64->32, k4, s2, p1): 8x8 -> 16x16 -----------------
    # Layer-4 input scratch is split by padded-row parity so layer 4 can read
    # contiguous (stride-1) leading slices: xp3a holds even padded rows 2a,
    # xp3b holds odd padded rows 2a+1.
    for r in range(2):
        y = jnp.dot(xp2[r:r + 8].reshape(8 * BT, LW2), rhs3_ref[r, 0],
                    preferred_element_type=f32)
        y = y + jnp.dot(xp2[r + 1:r + 9].reshape(8 * BT, LW2), rhs3_ref[r, 1],
                        preferred_element_type=f32)
        y = (jnp.maximum(y, 0.0) * s3_ref[...] + b3_ref[...]).astype(bf16)
        y = y.reshape(8, BT, LW3)
        for m in range(8):
            if r == 0:
                xp3b[m] = y[m]        # padded row 2m+1
            else:
                xp3a[m + 1] = y[m]    # padded row 2m+2

    # ---- Layer 4: ConvT(32->1, k4, s2, p1) + Tanh --------------------------
    # Output row-block j = image rows 4j..4j+3 (folded into N=128 with the 32
    # output columns) reads padded input rows 2j..2j+3 (dr = 0..3).
    xp3_pair = (xp3a, xp3b)
    acc = None
    for dr in range(4):
        lhs = xp3_pair[dr % 2][dr // 2:dr // 2 + 8].reshape(8 * BT, LW3)
        part = jnp.dot(lhs, rhs4_ref[dr], preferred_element_type=f32)
        acc = part if acc is None else acc + part
    # Lane-dense raster output: o[j, b, ohl*32+ow] = img[b, 4j+ohl, ow].
    o_ref[...] = jnp.tanh(acc).reshape(8, BT, NOUT)


# ---------------------------------------------------------------------------
# One-time weight repacking (host-side numpy).
# ---------------------------------------------------------------------------
def _fold_bn(bn):
    gamma, beta, mean, var = bn
    scale = gamma / jnp.sqrt(var + EPS)
    bias = beta - mean * scale
    return np.asarray(scale, np.float32), np.asarray(bias, np.float32)


def _build_rhs_s2(w, win, r, d):
    """Per-(row-parity r, row-window d) RHS for a k4/s2/p1 ConvTranspose.

    w: (Cin, Cout, 4, 4).  Returns (win*Cin, 2*win*Cout):
      row = iw*Cin + ci   (unpadded input column; W halo folded in as zeros)
      col = ow*Cout + co  (output column of the 2*win-wide output row)
    Row 2m+r of the output uses padded input row m+r+d with kh = _KH[r][d];
    column ow uses input column (ow//2 + ow%2 + dw - 1) with kw = _KH[ow%2][dw].
    """
    w = np.asarray(w, np.float32)
    cin, cout = w.shape[0], w.shape[1]
    wout = 2 * win
    kh = _KH[r][d]
    rhs = np.zeros((win, cin, wout, cout), np.float32)
    for ow in range(wout):
        rw, mw = ow % 2, ow // 2
        for dw in range(2):
            iw = mw + rw + dw - 1
            if 0 <= iw < win:
                rhs[iw, :, ow, :] = w[:, :, kh, _KH[rw][dw]]
    return rhs.reshape(win * cin, wout * cout)


def _build_rhs_l4(w, win):
    """Row-block Toeplitz RHS for the last deconv: N = 4 output rows x 32 cols.

    Returns (4, win*Cin, 4*2*win*Cout) indexed by dr (padded input row offset
    within the 4-row window feeding output rows 4j..4j+3).
    """
    w = np.asarray(w, np.float32)
    cin, cout = w.shape[0], w.shape[1]
    wout = 2 * win
    rhs = np.zeros((4, win, cin, 4, wout, cout), np.float32)
    for dr in range(4):
        for ohl in range(4):                    # output row 4j + ohl
            r = ohl % 2
            d = dr - ohl // 2 - r
            if d not in (0, 1):
                continue
            kh = _KH[r][d]
            for ow in range(wout):
                rw, mw = ow % 2, ow // 2
                for dw in range(2):
                    iw = mw + rw + dw - 1
                    if 0 <= iw < win:
                        rhs[dr, iw, :, ohl, ow, :] = w[:, :, kh, _KH[rw][dw]]
    return rhs.reshape(4, win * cin, 4 * wout * cout)


def prepare_params(params):
    """Repack PyTorch-layout weights into kernel-ready (bf16) arrays."""
    s1, b1 = _fold_bn(params["bn1"])
    s2, b2 = _fold_bn(params["bn2"])
    s3, b3 = _fold_bn(params["bn3"])

    # W1[ci, co, kh, kw] -> (ci, kh, kw, co) flattened, K padded 100 -> 128.
    w1 = np.asarray(params["w1"], np.float32)
    w1r = w1.transpose(0, 2, 3, 1).reshape(LATENT, 16 * C1)
    w1p = np.zeros((LATENT_PAD, 16 * C1), np.float32)
    w1p[:LATENT] = w1r

    rhs2 = np.stack([np.stack([_build_rhs_s2(params["w2"], W_L2, r, d)
                               for d in range(2)]) for r in range(2)])
    rhs3 = np.stack([np.stack([_build_rhs_s2(params["w3"], W_L3, r, d)
                               for d in range(2)]) for r in range(2)])
    rhs4 = _build_rhs_l4(params["w4"], W_L4)

    return {
        "w1": jnp.asarray(w1p, jnp.bfloat16),
        "s1": jnp.asarray(np.tile(s1, 16)[None, :], jnp.float32),
        "b1": jnp.asarray(np.tile(b1, 16)[None, :], jnp.float32),
        "rhs2": jnp.asarray(rhs2, jnp.bfloat16),          # (2,2,512,512)
        "s2": jnp.asarray(np.tile(s2, 2 * W_L2)[None, :], jnp.float32),
        "b2": jnp.asarray(np.tile(b2, 2 * W_L2)[None, :], jnp.float32),
        "rhs3": jnp.asarray(rhs3, jnp.bfloat16),          # (2,2,512,512)
        "s3": jnp.asarray(np.tile(s3, 2 * W_L3)[None, :], jnp.float32),
        "b3": jnp.asarray(np.tile(b3, 2 * W_L3)[None, :], jnp.float32),
        "rhs4": jnp.asarray(rhs4, jnp.bfloat16),          # (4,512,128)
    }


def position_gan_forward(z_nchw, prep):
    """Forward pass. Input (B, 100, 1, 1) NCHW, output (B, 1, 32, 32) NCHW."""
    B = z_nchw.shape[0]
    Bp = ((B + BT - 1) // BT) * BT          # pad batch to a multiple of BT
    grid = Bp // BT

    z = z_nchw.reshape(B, LATENT).astype(jnp.float32)
    z = jnp.pad(z, ((0, Bp - B), (0, LATENT_PAD - LATENT))).astype(jnp.bfloat16)

    out = pl.pallas_call(
        _fused_kernel,
        out_shape=jax.ShapeDtypeStruct((8, Bp, NOUT), jnp.float32),
        grid_spec=pltpu.PrefetchScalarGridSpec(
            num_scalar_prefetch=0,
            grid=(grid,),
            in_specs=[
                pl.BlockSpec((BT, LATENT_PAD), lambda g: (g, 0)),        # z
                pl.BlockSpec((LATENT_PAD, 16 * C1), lambda g: (0, 0)),   # w1
                pl.BlockSpec((1, 16 * C1), lambda g: (0, 0)),            # s1
                pl.BlockSpec((1, 16 * C1), lambda g: (0, 0)),            # b1
                pl.BlockSpec((2, 2, LW1, LW2), lambda g: (0, 0, 0, 0)),  # rhs2
                pl.BlockSpec((1, LW2), lambda g: (0, 0)),                # s2
                pl.BlockSpec((1, LW2), lambda g: (0, 0)),                # b2
                pl.BlockSpec((2, 2, LW2, LW3), lambda g: (0, 0, 0, 0)),  # rhs3
                pl.BlockSpec((1, LW3), lambda g: (0, 0)),                # s3
                pl.BlockSpec((1, LW3), lambda g: (0, 0)),                # b3
                pl.BlockSpec((4, LW3, NOUT), lambda g: (0, 0, 0)),       # rhs4
            ],
            out_specs=pl.BlockSpec((8, BT, NOUT), lambda g: (0, g, 0)),
            scratch_shapes=[
                pltpu.VMEM((6, BT, LW1), jnp.bfloat16),    # L2 input (row halo only)
                pltpu.VMEM((10, BT, LW2), jnp.bfloat16),   # L3 input
                pltpu.VMEM((9, BT, LW3), jnp.bfloat16),    # L4 input, even padded rows
                pltpu.VMEM((9, BT, LW3), jnp.bfloat16),    # L4 input, odd padded rows
            ]),
        compiler_params=pltpu.CompilerParams(
            dimension_semantics=("parallel",)),
    )(z, prep["w1"], prep["s1"], prep["b1"],
      prep["rhs2"], prep["s2"], prep["b2"],
      prep["rhs3"], prep["s3"], prep["b3"],
      prep["rhs4"])

    # out[j, b, ohl*32+ow] = img[b, 4j+ohl, ow]  -> tiny wrapper permute only.
    img = jnp.transpose(out, (1, 0, 2))[:B].reshape(B, 1, 32, 32)
    return img


# ---------------------------------------------------------------------------
# Deterministic parameter init (synthetic; no checkpoint loading).
# ---------------------------------------------------------------------------
def init_params(key):
    def wkey():
        nonlocal key
        key, k = jax.random.split(key)
        return k

    def conv_w(shape):
        return (0.02 * jax.random.normal(wkey(), shape)).astype(jnp.float32)

    def bn(c):
        gamma = (1.0 + 0.02 * jax.random.normal(wkey(), (c,))).astype(jnp.float32)
        beta = (0.01 * jax.random.normal(wkey(), (c,))).astype(jnp.float32)
        mean = (0.05 * jax.random.normal(wkey(), (c,))).astype(jnp.float32)
        var = jax.random.uniform(wkey(), (c,), minval=0.5, maxval=1.5).astype(jnp.float32)
        return (gamma, beta, mean, var)

    return {
        "w1": conv_w((LATENT, C1, 4, 4)),   # ConvTranspose2d weight: (Cin, Cout, kH, kW)
        "bn1": bn(C1),
        "w2": conv_w((C1, C2, 4, 4)),
        "bn2": bn(C2),
        "w3": conv_w((C2, C3, 4, 4)),
        "bn3": bn(C3),
        "w4": conv_w((C3, 1, 4, 4)),
    }


# ---------------------------------------------------------------------------
# Pure-JAX reference (lax.conv_general_dilated) for correctness check.
# ---------------------------------------------------------------------------
def _conv_transpose_ref(x, w, stride, pad):
    K = w.shape[2]
    wf = jnp.transpose(jnp.flip(w, axis=(2, 3)), (1, 0, 2, 3))  # (Cout, Cin, K, K)
    return jax.lax.conv_general_dilated(
        x, wf, window_strides=(1, 1),
        padding=[(K - 1 - pad, K - 1 - pad)] * 2,
        lhs_dilation=(stride, stride),
        dimension_numbers=("NCHW", "OIHW", "NCHW"),
        precision=jax.lax.Precision.HIGHEST)


def _bn_ref(x, bn):
    g, b, m, v = bn
    inv = (g / jnp.sqrt(v + EPS))[None, :, None, None]
    return (x - m[None, :, None, None]) * inv + b[None, :, None, None]


def reference_forward(z, params):
    x = _conv_transpose_ref(z, params["w1"], 1, 0)
    x = _bn_ref(jax.nn.relu(x), params["bn1"])
    x = _conv_transpose_ref(x, params["w2"], 2, 1)
    x = _bn_ref(jax.nn.relu(x), params["bn2"])
    x = _conv_transpose_ref(x, params["w3"], 2, 1)
    x = _bn_ref(jax.nn.relu(x), params["bn3"])
    x = _conv_transpose_ref(x, params["w4"], 2, 1)
    return jnp.tanh(x)


if __name__ == "__main__":
    key = jax.random.PRNGKey(0)
    pkey, zkey = jax.random.split(key)
    params = init_params(pkey)

    B = 32                       # 2 batch tiles -> grid=(2,): both v7x TCs busy
    z = jax.random.normal(zkey, (B, LATENT, 1, 1), dtype=jnp.float32)

    prep = prepare_params(params)                      # one-time weight repack
    fwd = jax.jit(lambda zz: position_gan_forward(zz, prep))
    out = jax.block_until_ready(fwd(z))
    assert out.shape == (B, 1, 32, 32) and out.dtype == jnp.float32

    ref = jax.block_until_ready(reference_forward(z, params))
    np.testing.assert_allclose(np.asarray(out), np.asarray(ref),
                               atol=3e-2, rtol=3e-2)

    # TODO(synk): generate()'s host-side thresholding / batching loop and the
    # checkpoint loading are not kernel concerns and are intentionally omitted.
    print("KERNEL_OK")
</pallas_src>

<mosaic_0001>
module attributes {stable_mosaic.version = 11 : i64} {
  func.func @_fused_kernel(%arg0: i32, %arg1: memref<16x128xbf16, #tpu.memory_space<vmem>>, %arg2: memref<128x2048xbf16, #tpu.memory_space<vmem>>, %arg3: memref<1x2048xf32, #tpu.memory_space<vmem>>, %arg4: memref<1x2048xf32, #tpu.memory_space<vmem>>, %arg5: memref<2x2x512x512xbf16, #tpu.memory_space<vmem>>, %arg6: memref<1x512xf32, #tpu.memory_space<vmem>>, %arg7: memref<1x512xf32, #tpu.memory_space<vmem>>, %arg8: memref<2x2x512x512xbf16, #tpu.memory_space<vmem>>, %arg9: memref<1x512xf32, #tpu.memory_space<vmem>>, %arg10: memref<1x512xf32, #tpu.memory_space<vmem>>, %arg11: memref<4x512x128xbf16, #tpu.memory_space<vmem>>, %arg12: memref<8x16x128xf32, #tpu.memory_space<vmem>>, %arg13: memref<6x16x512xbf16, #tpu.memory_space<vmem>>, %arg14: memref<10x16x512xbf16, #tpu.memory_space<vmem>>, %arg15: memref<9x16x512xbf16, #tpu.memory_space<vmem>>, %arg16: memref<9x16x512xbf16, #tpu.memory_space<vmem>>) attributes {dimension_semantics = [#tpu.dimension_semantics<parallel>], iteration_bounds = array<i64: 2>, scalar_prefetch = 0 : i64, scratch_operands = 4 : i64, tpu.core_type = #tpu.core_type<tc>, window_params = [{transform_indices = @transform_0, window_bounds = array<i64: 16, 128>}, {pipeline_mode = #tpu.pipeline_mode<synchronous>, transform_indices = @transform_1, window_bounds = array<i64: 128, 2048>}, {pipeline_mode = #tpu.pipeline_mode<synchronous>, transform_indices = @transform_2, window_bounds = array<i64: 1, 2048>}, {pipeline_mode = #tpu.pipeline_mode<synchronous>, transform_indices = @transform_3, window_bounds = array<i64: 1, 2048>}, {pipeline_mode = #tpu.pipeline_mode<synchronous>, transform_indices = @transform_4, window_bounds = array<i64: 2, 2, 512, 512>}, {pipeline_mode = #tpu.pipeline_mode<synchronous>, transform_indices = @transform_5, window_bounds = array<i64: 1, 512>}, {pipeline_mode = #tpu.pipeline_mode<synchronous>, transform_indices = @transform_6, window_bounds = array<i64: 1, 512>}, {pipeline_mode = #tpu.pipeline_mode<synchronous>, transform_indices = @transform_7, window_bounds = array<i64: 2, 2, 512, 512>}, {pipeline_mode = #tpu.pipeline_mode<synchronous>, transform_indices = @transform_8, window_bounds = array<i64: 1, 512>}, {pipeline_mode = #tpu.pipeline_mode<synchronous>, transform_indices = @transform_9, window_bounds = array<i64: 1, 512>}, {pipeline_mode = #tpu.pipeline_mode<synchronous>, transform_indices = @transform_10, window_bounds = array<i64: 4, 512, 128>}, {transform_indices = @transform_11, window_bounds = array<i64: 8, 16, 128>}]} {
    %cst = arith.constant 0.000000e+00 : bf16
    %0 = vector.broadcast %cst : bf16 to vector<16x512xbf16>
    %c0 = arith.constant 0 : index
    %c0_0 = arith.constant 0 : index
    %c0_1 = arith.constant 0 : index
    %1 = vector.load %arg13[%c0, %c0_0, %c0_1] : memref<6x16x512xbf16, #tpu.memory_space<vmem>>, vector<1x16x512xbf16>
    %2 = vector.shape_cast %1 : vector<1x16x512xbf16> to vector<16x512xbf16>
    %3 = vector.shape_cast %0 : vector<16x512xbf16> to vector<1x16x512xbf16>
    tpu.vector_store %arg13[%c0, %c0_0, %c0_1], %3 {strides = array<i32>} : memref<6x16x512xbf16, #tpu.memory_space<vmem>>, vector<1x16x512xbf16>,
    %c5 = arith.constant 5 : index
    %c0_2 = arith.constant 0 : index
    %c0_3 = arith.constant 0 : index
    %4 = vector.load %arg13[%c5, %c0_2, %c0_3] : memref<6x16x512xbf16, #tpu.memory_space<vmem>>, vector<1x16x512xbf16>
    %5 = vector.shape_cast %4 : vector<1x16x512xbf16> to vector<16x512xbf16>
    %6 = vector.shape_cast %0 : vector<16x512xbf16> to vector<1x16x512xbf16>
    tpu.vector_store %arg13[%c5, %c0_2, %c0_3], %6 {strides = array<i32>} : memref<6x16x512xbf16, #tpu.memory_space<vmem>>, vector<1x16x512xbf16>,
    %c0_4 = arith.constant 0 : index
    %c0_5 = arith.constant 0 : index
    %c0_6 = arith.constant 0 : index
    %7 = vector.load %arg14[%c0_4, %c0_5, %c0_6] : memref<10x16x512xbf16, #tpu.memory_space<vmem>>, vector<1x16x512xbf16>
    %8 = vector.shape_cast %7 : vector<1x16x512xbf16> to vector<16x512xbf16>
    %9 = vector.shape_cast %0 : vector<16x512xbf16> to vector<1x16x512xbf16>
    tpu.vector_store %arg14[%c0_4, %c0_5, %c0_6], %9 {strides = array<i32>} : memref<10x16x512xbf16, #tpu.memory_space<vmem>>, vector<1x16x512xbf16>,
    %c9 = arith.constant 9 : index
    %c0_7 = arith.constant 0 : index
    %c0_8 = arith.constant 0 : index
    %10 = vector.load %arg14[%c9, %c0_7, %c0_8] : memref<10x16x512xbf16, #tpu.memory_space<vmem>>, vector<1x16x512xbf16>
    %11 = vector.shape_cast %10 : vector<1x16x512xbf16> to vector<16x512xbf16>
    %12 = vector.shape_cast %0 : vector<16x512xbf16> to vector<1x16x512xbf16>
    tpu.vector_store %arg14[%c9, %c0_7, %c0_8], %12 {strides = array<i32>} : memref<10x16x512xbf16, #tpu.memory_space<vmem>>, vector<1x16x512xbf16>,
    %c0_9 = arith.constant 0 : index
    %c0_10 = arith.constant 0 : index
    %c0_11 = arith.constant 0 : index
    %13 = vector.load %arg15[%c0_9, %c0_10, %c0_11] : memref<9x16x512xbf16, #tpu.memory_space<vmem>>, vector<1x16x512xbf16>
    %14 = vector.shape_cast %13 : vector<1x16x512xbf16> to vector<16x512xbf16>
    %15 = vector.shape_cast %0 : vector<16x512xbf16> to vector<1x16x512xbf16>
    tpu.vector_store %arg15[%c0_9, %c0_10, %c0_11], %15 {strides = array<i32>} : memref<9x16x512xbf16, #tpu.memory_space<vmem>>, vector<1x16x512xbf16>,
    %c8 = arith.constant 8 : index
    %c0_12 = arith.constant 0 : index
    %c0_13 = arith.constant 0 : index
    %16 = vector.load %arg16[%c8, %c0_12, %c0_13] : memref<9x16x512xbf16, #tpu.memory_space<vmem>>, vector<1x16x512xbf16>
    %17 = vector.shape_cast %16 : vector<1x16x512xbf16> to vector<16x512xbf16>
    %18 = vector.shape_cast %0 : vector<16x512xbf16> to vector<1x16x512xbf16>
    tpu.vector_store %arg16[%c8, %c0_12, %c0_13], %18 {strides = array<i32>} : memref<9x16x512xbf16, #tpu.memory_space<vmem>>, vector<1x16x512xbf16>,
    %c0_14 = arith.constant 0 : index
    %c0_15 = arith.constant 0 : index
    %19 = vector.load %arg1[%c0_14, %c0_15] : memref<16x128xbf16, #tpu.memory_space<vmem>>, vector<16x128xbf16>
    %c0_16 = arith.constant 0 : index
    %c0_17 = arith.constant 0 : index
    %20 = vector.load %arg2[%c0_16, %c0_17] : memref<128x2048xbf16, #tpu.memory_space<vmem>>, vector<128x2048xbf16>
    %cst_18 = arith.constant dense<0.000000e+00> : vector<16x2048xf32>
    %21 = tpu.matmul %19, %20, %cst_18 {dimension_numbers = #tpu.dot_dimension_numbers<[1], [0], [0], [1], [0, 0, 1, 1], [], []>} : vector<16x128xbf16>, vector<128x2048xbf16>, vector<16x2048xf32> -> vector<16x2048xf32>
    %cst_19 = arith.constant 0.000000e+00 : f32
    %22 = vector.broadcast %cst_19 : f32 to vector<16x2048xf32>
    %23 = arith.maximumf %21, %22 : vector<16x2048xf32>
    %c0_20 = arith.constant 0 : index
    %c0_21 = arith.constant 0 : index
    %24 = vector.load %arg3[%c0_20, %c0_21] : memref<1x2048xf32, #tpu.memory_space<vmem>>, vector<1x2048xf32>
    %25 = vector.broadcast %24 : vector<1x2048xf32> to vector<16x2048xf32>
    %26 = arith.mulf %23, %25 : vector<16x2048xf32>
    %c0_22 = arith.constant 0 : index
    %c0_23 = arith.constant 0 : index
    %27 = vector.load %arg4[%c0_22, %c0_23] : memref<1x2048xf32, #tpu.memory_space<vmem>>, vector<1x2048xf32>
    %28 = vector.broadcast %27 : vector<1x2048xf32> to vector<16x2048xf32>
    %29 = arith.addf %26, %28 : vector<16x2048xf32>
    %30 = arith.truncf %29 : vector<16x2048xf32> to vector<16x2048xbf16>
    %31 = vector.extract_strided_slice %30 {offsets = [0, 0], sizes = [16, 512], strides = [1, 1]} : vector<16x2048xbf16> to vector<16x512xbf16>
    %c1 = arith.constant 1 : index
    %c0_24 = arith.constant 0 : index
    %c0_25 = arith.constant 0 : index
    %32 = vector.load %arg13[%c1, %c0_24, %c0_25] : memref<6x16x512xbf16, #tpu.memory_space<vmem>>, vector<1x16x512xbf16>
    %33 = vector.shape_cast %32 : vector<1x16x512xbf16> to vector<16x512xbf16>
    %34 = vector.shape_cast %31 : vector<16x512xbf16> to vector<1x16x512xbf16>
    tpu.vector_store %arg13[%c1, %c0_24, %c0_25], %34 {strides = array<i32>} : memref<6x16x512xbf16, #tpu.memory_space<vmem>>, vector<1x16x512xbf16>,
    %35 = vector.extract_strided_slice %30 {offsets = [0, 512], sizes = [16, 512], strides = [1, 1]} : vector<16x2048xbf16> to vector<16x512xbf16>
    %c2 = arith.constant 2 : index
    %c0_26 = arith.constant 0 : index
    %c0_27 = arith.constant 0 : index
    %36 = vector.load %arg13[%c2, %c0_26, %c0_27] : memref<6x16x512xbf16, #tpu.memory_space<vmem>>, vector<1x16x512xbf16>
    %37 = vector.shape_cast %36 : vector<1x16x512xbf16> to vector<16x512xbf16>
    %38 = vector.shape_cast %35 : vector<16x512xbf16> to vector<1x16x512xbf16>
    tpu.vector_store %arg13[%c2, %c0_26, %c0_27], %38 {strides = array<i32>} : memref<6x16x512xbf16, #tpu.memory_space<vmem>>, vector<1x16x512xbf16>,
    %39 = vector.extract_strided_slice %30 {offsets = [0, 1024], sizes = [16, 512], strides = [1, 1]} : vector<16x2048xbf16> to vector<16x512xbf16>
    %c3 = arith.constant 3 : index
    %c0_28 = arith.constant 0 : index
    %c0_29 = arith.constant 0 : index
    %40 = vector.load %arg13[%c3, %c0_28, %c0_29] : memref<6x16x512xbf16, #tpu.memory_space<vmem>>, vector<1x16x512xbf16>
    %41 = vector.shape_cast %40 : vector<1x16x512xbf16> to vector<16x512xbf16>
    %42 = vector.shape_cast %39 : vector<16x512xbf16> to vector<1x16x512xbf16>
    tpu.vector_store %arg13[%c3, %c0_28, %c0_29], %42 {strides = array<i32>} : memref<6x16x512xbf16, #tpu.memory_space<vmem>>, vector<1x16x512xbf16>,
    %43 = vector.extract_strided_slice %30 {offsets = [0, 1536], sizes = [16, 512], strides = [1, 1]} : vector<16x2048xbf16> to vector<16x512xbf16>
    %c4 = arith.constant 4 : index
    %c0_30 = arith.constant 0 : index
    %c0_31 = arith.constant 0 : index
    %44 = vector.load %arg13[%c4, %c0_30, %c0_31] : memref<6x16x512xbf16, #tpu.memory_space<vmem>>, vector<1x16x512xbf16>
    %45 = vector.shape_cast %44 : vector<1x16x512xbf16> to vector<16x512xbf16>
    %46 = vector.shape_cast %43 : vector<16x512xbf16> to vector<1x16x512xbf16>
    tpu.vector_store %arg13[%c4, %c0_30, %c0_31], %46 {strides = array<i32>} : memref<6x16x512xbf16, #tpu.memory_space<vmem>>, vector<1x16x512xbf16>,
    %c0_32 = arith.constant 0 : index
    %c0_33 = arith.constant 0 : index
    %c0_34 = arith.constant 0 : index
    %47 = vector.load %arg13[%c0_32, %c0_33, %c0_34] : memref<6x16x512xbf16, #tpu.memory_space<vmem>>, vector<4x16x512xbf16>
    %48 = vector.shape_cast %47 : vector<4x16x512xbf16> to vector<64x512xbf16>
    %c0_35 = arith.constant 0 : index
    %c0_36 = arith.constant 0 : index
    %c0_37 = arith.constant 0 : index
    %c0_38 = arith.constant 0 : index
    %49 = vector.load %arg5[%c0_35, %c0_36, %c0_37, %c0_38] : memref<2x2x512x512xbf16, #tpu.memory_space<vmem>>, vector<1x1x512x512xbf16>
    %50 = vector.shape_cast %49 : vector<1x1x512x512xbf16> to vector<512x512xbf16>
    %cst_39 = arith.constant dense<0.000000e+00> : vector<64x512xf32>
    %51 = tpu.matmul %48, %50, %cst_39 {dimension_numbers = #tpu.dot_dimension_numbers<[1], [0], [0], [1], [0, 0, 1, 1], [], []>} : vector<64x512xbf16>, vector<512x512xbf16>, vector<64x512xf32> -> vector<64x512xf32>
    %c1_40 = arith.constant 1 : index
    %c0_41 = arith.constant 0 : index
    %c0_42 = arith.constant 0 : index
    %52 = vector.load %arg13[%c1_40, %c0_41, %c0_42] : memref<6x16x512xbf16, #tpu.memory_space<vmem>>, vector<4x16x512xbf16>
    %53 = vector.shape_cast %52 : vector<4x16x512xbf16> to vector<64x512xbf16>
    %c0_43 = arith.constant 0 : index
    %c1_44 = arith.constant 1 : index
    %c0_45 = arith.constant 0 : index
    %c0_46 = arith.constant 0 : index
    %54 = vector.load %arg5[%c0_43, %c1_44, %c0_45, %c0_46] : memref<2x2x512x512xbf16, #tpu.memory_space<vmem>>, vector<1x1x512x512xbf16>
    %55 = vector.shape_cast %54 : vector<1x1x512x512xbf16> to vector<512x512xbf16>
    %cst_47 = arith.constant dense<0.000000e+00> : vector<64x512xf32>
    %56 = tpu.matmul %53, %55, %cst_47 {dimension_numbers = #tpu.dot_dimension_numbers<[1], [0], [0], [1], [0, 0, 1, 1], [], []>} : vector<64x512xbf16>, vector<512x512xbf16>, vector<64x512xf32> -> vector<64x512xf32>
    %57 = arith.addf %51, %56 : vector<64x512xf32>
    %cst_48 = arith.constant 0.000000e+00 : f32
    %58 = vector.broadcast %cst_48 : f32 to vector<64x512xf32>
    %59 = arith.maximumf %57, %58 : vector<64x512xf32>
    %c0_49 = arith.constant 0 : index
    %c0_50 = arith.constant 0 : index
    %60 = vector.load %arg6[%c0_49, %c0_50] : memref<1x512xf32, #tpu.memory_space<vmem>>, vector<1x512xf32>
    %61 = vector.broadcast %60 : vector<1x512xf32> to vector<64x512xf32>
    %62 = arith.mulf %59, %61 : vector<64x512xf32>
    %c0_51 = arith.constant 0 : index
    %c0_52 = arith.constant 0 : index
    %63 = vector.load %arg7[%c0_51, %c0_52] : memref<1x512xf32, #tpu.memory_space<vmem>>, vector<1x512xf32>
    %64 = vector.broadcast %63 : vector<1x512xf32> to vector<64x512xf32>
    %65 = arith.addf %62, %64 : vector<64x512xf32>
    %66 = arith.truncf %65 : vector<64x512xf32> to vector<64x512xbf16>
    %67 = vector.shape_cast %66 : vector<64x512xbf16> to vector<4x16x512xbf16>
    %68 = vector.extract_strided_slice %67 {offsets = [0, 0, 0], sizes = [1, 16, 512], strides = [1, 1, 1]} : vector<4x16x512xbf16> to vector<1x16x512xbf16>
    %69 = vector.shape_cast %68 : vector<1x16x512xbf16> to vector<16x512xbf16>
    %c1_53 = arith.constant 1 : index
    %c0_54 = arith.constant 0 : index
    %c0_55 = arith.constant 0 : index
    %70 = vector.load %arg14[%c1_53, %c0_54, %c0_55] : memref<10x16x512xbf16, #tpu.memory_space<vmem>>, vector<1x16x512xbf16>
    %71 = vector.shape_cast %70 : vector<1x16x512xbf16> to vector<16x512xbf16>
    %72 = vector.shape_cast %69 : vector<16x512xbf16> to vector<1x16x512xbf16>
    tpu.vector_store %arg14[%c1_53, %c0_54, %c0_55], %72 {strides = array<i32>} : memref<10x16x512xbf16, #tpu.memory_space<vmem>>, vector<1x16x512xbf16>,
    %73 = vector.extract_strided_slice %67 {offsets = [1, 0, 0], sizes = [1, 16, 512], strides = [1, 1, 1]} : vector<4x16x512xbf16> to vector<1x16x512xbf16>
    %74 = vector.shape_cast %73 : vector<1x16x512xbf16> to vector<16x512xbf16>
    %c3_56 = arith.constant 3 : index
    %c0_57 = arith.constant 0 : index
    %c0_58 = arith.constant 0 : index
    %75 = vector.load %arg14[%c3_56, %c0_57, %c0_58] : memref<10x16x512xbf16, #tpu.memory_space<vmem>>, vector<1x16x512xbf16>
    %76 = vector.shape_cast %75 : vector<1x16x512xbf16> to vector<16x512xbf16>
    %77 = vector.shape_cast %74 : vector<16x512xbf16> to vector<1x16x512xbf16>
    tpu.vector_store %arg14[%c3_56, %c0_57, %c0_58], %77 {strides = array<i32>} : memref<10x16x512xbf16, #tpu.memory_space<vmem>>, vector<1x16x512xbf16>,
    %78 = vector.extract_strided_slice %67 {offsets = [2, 0, 0], sizes = [1, 16, 512], strides = [1, 1, 1]} : vector<4x16x512xbf16> to vector<1x16x512xbf16>
    %79 = vector.shape_cast %78 : vector<1x16x512xbf16> to vector<16x512xbf16>
    %c5_59 = arith.constant 5 : index
    %c0_60 = arith.constant 0 : index
    %c0_61 = arith.constant 0 : index
    %80 = vector.load %arg14[%c5_59, %c0_60, %c0_61] : memref<10x16x512xbf16, #tpu.memory_space<vmem>>, vector<1x16x512xbf16>
    %81 = vector.shape_cast %80 : vector<1x16x512xbf16> to vector<16x512xbf16>
    %82 = vector.shape_cast %79 : vector<16x512xbf16> to vector<1x16x512xbf16>
    tpu.vector_store %arg14[%c5_59, %c0_60, %c0_61], %82 {strides = array<i32>} : memref<10x16x512xbf16, #tpu.memory_space<vmem>>, vector<1x16x512xbf16>,
    %83 = vector.extract_strided_slice %67 {offsets = [3, 0, 0], sizes = [1, 16, 512], strides = [1, 1, 1]} : vector<4x16x512xbf16> to vector<1x16x512xbf16>
    %84 = vector.shape_cast %83 : vector<1x16x512xbf16> to vector<16x512xbf16>
    %c7 = arith.constant 7 : index
    %c0_62 = arith.constant 0 : index
    %c0_63 = arith.constant 0 : index
    %85 = vector.load %arg14[%c7, %c0_62, %c0_63] : memref<10x16x512xbf16, #tpu.memory_space<vmem>>, vector<1x16x512xbf16>
    %86 = vector.shape_cast %85 : vector<1x16x512xbf16> to vector<16x512xbf16>
    %87 = vector.shape_cast %84 : vector<16x512xbf16> to vector<1x16x512xbf16>
    tpu.vector_store %arg14[%c7, %c0_62, %c0_63], %87 {strides = array<i32>} : memref<10x16x512xbf16, #tpu.memory_space<vmem>>, vector<1x16x512xbf16>,
    %c1_64 = arith.constant 1 : index
    %c0_65 = arith.constant 0 : index
    %c0_66 = arith.constant 0 : index
    %88 = vector.load %arg13[%c1_64, %c0_65, %c0_66] : memref<6x16x512xbf16, #tpu.memory_space<vmem>>, vector<4x16x512xbf16>
    %89 = vector.shape_cast %88 : vector<4x16x512xbf16> to vector<64x512xbf16>
    %c1_67 = arith.constant 1 : index
    %c0_68 = arith.constant 0 : index
    %c0_69 = arith.constant 0 : index
    %c0_70 = arith.constant 0 : index
    %90 = vector.load %arg5[%c1_67, %c0_68, %c0_69, %c0_70] : memref<2x2x512x512xbf16, #tpu.memory_space<vmem>>, vector<1x1x512x512xbf16>
    %91 = vector.shape_cast %90 : vector<1x1x512x512xbf16> to vector<512x512xbf16>
    %cst_71 = arith.constant dense<0.000000e+00> : vector<64x512xf32>
    %92 = tpu.matmul %89, %91, %cst_71 {dimension_numbers = #tpu.dot_dimension_numbers<[1], [0], [0], [1], [0, 0, 1, 1], [], []>} : vector<64x512xbf16>, vector<512x512xbf16>, vector<64x512xf32> -> vector<64x512xf32>
    %c2_72 = arith.constant 2 : index
    %c0_73 = arith.constant 0 : index
    %c0_74 = arith.constant 0 : index
    %93 = vector.load %arg13[%c2_72, %c0_73, %c0_74] : memref<6x16x512xbf16, #tpu.memory_space<vmem>>, vector<4x16x512xbf16>
    %94 = vector.shape_cast %93 : vector<4x16x512xbf16> to vector<64x512xbf16>
    %c1_75 = arith.constant 1 : index
    %c1_76 = arith.constant 1 : index
    %c0_77 = arith.constant 0 : index
    %c0_78 = arith.constant 0 : index
    %95 = vector.load %arg5[%c1_75, %c1_76, %c0_77, %c0_78] : memref<2x2x512x512xbf16, #tpu.memory_space<vmem>>, vector<1x1x512x512xbf16>
    %96 = vector.shape_cast %95 : vector<1x1x512x512xbf16> to vector<512x512xbf16>
    %cst_79 = arith.constant dense<0.000000e+00> : vector<64x512xf32>
    %97 = tpu.matmul %94, %96, %cst_79 {dimension_numbers = #tpu.dot_dimension_numbers<[1], [0], [0], [1], [0, 0, 1, 1], [], []>} : vector<64x512xbf16>, vector<512x512xbf16>, vector<64x512xf32> -> vector<64x512xf32>
    %98 = arith.addf %92, %97 : vector<64x512xf32>
    %cst_80 = arith.constant 0.000000e+00 : f32
    %99 = vector.broadcast %cst_80 : f32 to vector<64x512xf32>
    %100 = arith.maximumf %98, %99 : vector<64x512xf32>
    %c0_81 = arith.constant 0 : index
    %c0_82 = arith.constant 0 : index
    %101 = vector.load %arg6[%c0_81, %c0_82] : memref<1x512xf32, #tpu.memory_space<vmem>>, vector<1x512xf32>
    %102 = vector.broadcast %101 : vector<1x512xf32> to vector<64x512xf32>
    %103 = arith.mulf %100, %102 : vector<64x512xf32>
    %c0_83 = arith.constant 0 : index
    %c0_84 = arith.constant 0 : index
    %104 = vector.load %arg7[%c0_83, %c0_84] : memref<1x512xf32, #tpu.memory_space<vmem>>, vector<1x512xf32>
    %105 = vector.broadcast %104 : vector<1x512xf32> to vector<64x512xf32>
    %106 = arith.addf %103, %105 : vector<64x512xf32>
    %107 = arith.truncf %106 : vector<64x512xf32> to vector<64x512xbf16>
    %108 = vector.shape_cast %107 : vector<64x512xbf16> to vector<4x16x512xbf16>
    %109 = vector.extract_strided_slice %108 {offsets = [0, 0, 0], sizes = [1, 16, 512], strides = [1, 1, 1]} : vector<4x16x512xbf16> to vector<1x16x512xbf16>
    %110 = vector.shape_cast %109 : vector<1x16x512xbf16> to vector<16x512xbf16>
    %c2_85 = arith.constant 2 : index
    %c0_86 = arith.constant 0 : index
    %c0_87 = arith.constant 0 : index
    %111 = vector.load %arg14[%c2_85, %c0_86, %c0_87] : memref<10x16x512xbf16, #tpu.memory_space<vmem>>, vector<1x16x512xbf16>
    %112 = vector.shape_cast %111 : vector<1x16x512xbf16> to vector<16x512xbf16>
    %113 = vector.shape_cast %110 : vector<16x512xbf16> to vector<1x16x512xbf16>
    tpu.vector_store %arg14[%c2_85, %c0_86, %c0_87], %113 {strides = array<i32>} : memref<10x16x512xbf16, #tpu.memory_space<vmem>>, vector<1x16x512xbf16>,
    %114 = vector.extract_strided_slice %108 {offsets = [1, 0, 0], sizes = [1, 16, 512], strides = [1, 1, 1]} : vector<4x16x512xbf16> to vector<1x16x512xbf16>
    %115 = vector.shape_cast %114 : vector<1x16x512xbf16> to vector<16x512xbf16>
    %c4_88 = arith.constant 4 : index
    %c0_89 = arith.constant 0 : index
    %c0_90 = arith.constant 0 : index
    %116 = vector.load %arg14[%c4_88, %c0_89, %c0_90] : memref<10x16x512xbf16, #tpu.memory_space<vmem>>, vector<1x16x512xbf16>
    %117 = vector.shape_cast %116 : vector<1x16x512xbf16> to vector<16x512xbf16>
    %118 = vector.shape_cast %115 : vector<16x512xbf16> to vector<1x16x512xbf16>
    tpu.vector_store %arg14[%c4_88, %c0_89, %c0_90], %118 {strides = array<i32>} : memref<10x16x512xbf16, #tpu.memory_space<vmem>>, vector<1x16x512xbf16>,
    %119 = vector.extract_strided_slice %108 {offsets = [2, 0, 0], sizes = [1, 16, 512], strides = [1, 1, 1]} : vector<4x16x512xbf16> to vector<1x16x512xbf16>
    %120 = vector.shape_cast %119 : vector<1x16x512xbf16> to vector<16x512xbf16>
    %c6 = arith.constant 6 : index
    %c0_91 = arith.constant 0 : index
    %c0_92 = arith.constant 0 : index
    %121 = vector.load %arg14[%c6, %c0_91, %c0_92] : memref<10x16x512xbf16, #tpu.memory_space<vmem>>, vector<1x16x512xbf16>
    %122 = vector.shape_cast %121 : vector<1x16x512xbf16> to vector<16x512xbf16>
    %123 = vector.shape_cast %120 : vector<16x512xbf16> to vector<1x16x512xbf16>
    tpu.vector_store %arg14[%c6, %c0_91, %c0_92], %123 {strides = array<i32>} : memref<10x16x512xbf16, #tpu.memory_space<vmem>>, vector<1x16x512xbf16>,
    %124 = vector.extract_strided_slice %108 {offsets = [3, 0, 0], sizes = [1, 16, 512], strides = [1, 1, 1]} : vector<4x16x512xbf16> to vector<1x16x512xbf16>
    %125 = vector.shape_cast %124 : vector<1x16x512xbf16> to vector<16x512xbf16>
    %c8_93 = arith.constant 8 : index
    %c0_94 = arith.constant 0 : index
    %c0_95 = arith.constant 0 : index
    %126 = vector.load %arg14[%c8_93, %c0_94, %c0_95] : memref<10x16x512xbf16, #tpu.memory_space<vmem>>, vector<1x16x512xbf16>
    %127 = vector.shape_cast %126 : vector<1x16x512xbf16> to vector<16x512xbf16>
    %128 = vector.shape_cast %125 : vector<16x512xbf16> to vector<1x16x512xbf16>
    tpu.vector_store %arg14[%c8_93, %c0_94, %c0_95], %128 {strides = array<i32>} : memref<10x16x512xbf16, #tpu.memory_space<vmem>>, vector<1x16x512xbf16>,
    %c0_96 = arith.constant 0 : index
    %c0_97 = arith.constant 0 : index
    %c0_98 = arith.constant 0 : index
    %129 = vector.load %arg14[%c0_96, %c0_97, %c0_98] : memref<10x16x512xbf16, #tpu.memory_space<vmem>>, vector<8x16x512xbf16>
    %130 = vector.shape_cast %129 : vector<8x16x512xbf16> to vector<128x512xbf16>
    %c0_99 = arith.constant 0 : index
    %c0_100 = arith.constant 0 : index
    %c0_101 = arith.constant 0 : index
    %c0_102 = arith.constant 0 : index
    %131 = vector.load %arg8[%c0_99, %c0_100, %c0_101, %c0_102] : memref<2x2x512x512xbf16, #tpu.memory_space<vmem>>, vector<1x1x512x512xbf16>
    %132 = vector.shape_cast %131 : vector<1x1x512x512xbf16> to vector<512x512xbf16>
    %cst_103 = arith.constant dense<0.000000e+00> : vector<128x512xf32>
    %133 = tpu.matmul %130, %132, %cst_103 {dimension_numbers = #tpu.dot_dimension_numbers<[1], [0], [0], [1], [0, 0, 1, 1], [], []>} : vector<128x512xbf16>, vector<512x512xbf16>, vector<128x512xf32> -> vector<128x512xf32>
    %c1_104 = arith.constant 1 : index
    %c0_105 = arith.constant 0 : index
    %c0_106 = arith.constant 0 : index
    %134 = vector.load %arg14[%c1_104, %c0_105, %c0_106] : memref<10x16x512xbf16, #tpu.memory_space<vmem>>, vector<8x16x512xbf16>
    %135 = vector.shape_cast %134 : vector<8x16x512xbf16> to vector<128x512xbf16>
    %c0_107 = arith.constant 0 : index
    %c1_108 = arith.constant 1 : index
    %c0_109 = arith.constant 0 : index
    %c0_110 = arith.constant 0 : index
    %136 = vector.load %arg8[%c0_107, %c1_108, %c0_109, %c0_110] : memref<2x2x512x512xbf16, #tpu.memory_space<vmem>>, vector<1x1x512x512xbf16>
    %137 = vector.shape_cast %136 : vector<1x1x512x512xbf16> to vector<512x512xbf16>
    %cst_111 = arith.constant dense<0.000000e+00> : vector<128x512xf32>
    %138 = tpu.matmul %135, %137, %cst_111 {dimension_numbers = #tpu.dot_dimension_numbers<[1], [0], [0], [1], [0, 0, 1, 1], [], []>} : vector<128x512xbf16>, vector<512x512xbf16>, vector<128x512xf32> -> vector<128x512xf32>
    %139 = arith.addf %133, %138 : vector<128x512xf32>
    %cst_112 = arith.constant 0.000000e+00 : f32
    %140 = vector.broadcast %cst_112 : f32 to vector<128x512xf32>
    %141 = arith.maximumf %139, %140 : vector<128x512xf32>
    %c0_113 = arith.constant 0 : index
    %c0_114 = arith.constant 0 : index
    %142 = vector.load %arg9[%c0_113, %c0_114] : memref<1x512xf32, #tpu.memory_space<vmem>>, vector<1x512xf32>
    %143 = vector.broadcast %142 : vector<1x512xf32> to vector<128x512xf32>
    %144 = arith.mulf %141, %143 : vector<128x512xf32>
    %c0_115 = arith.constant 0 : index
    %c0_116 = arith.constant 0 : index
    %145 = vector.load %arg10[%c0_115, %c0_116] : memref<1x512xf32, #tpu.memory_space<vmem>>, vector<1x512xf32>
    %146 = vector.broadcast %145 : vector<1x512xf32> to vector<128x512xf32>
    %147 = arith.addf %144, %146 : vector<128x512xf32>
    %148 = arith.truncf %147 : vector<128x512xf32> to vector<128x512xbf16>
    %149 = vector.shape_cast %148 : vector<128x512xbf16> to vector<8x16x512xbf16>
    %150 = vector.extract_strided_slice %149 {offsets = [0, 0, 0], sizes = [1, 16, 512], strides = [1, 1, 1]} : vector<8x16x512xbf16> to vector<1x16x512xbf16>
    %151 = vector.shape_cast %150 : vector<1x16x512xbf16> to vector<16x512xbf16>
    %c0_117 = arith.constant 0 : index
    %c0_118 = arith.constant 0 : index
    %c0_119 = arith.constant 0 : index
    %152 = vector.load %arg16[%c0_117, %c0_118, %c0_119] : memref<9x16x512xbf16, #tpu.memory_space<vmem>>, vector<1x16x512xbf16>
    %153 = vector.shape_cast %152 : vector<1x16x512xbf16> to vector<16x512xbf16>
    %154 = vector.shape_cast %151 : vector<16x512xbf16> to vector<1x16x512xbf16>
    tpu.vector_store %arg16[%c0_117, %c0_118, %c0_119], %154 {strides = array<i32>} : memref<9x16x512xbf16, #tpu.memory_space<vmem>>, vector<1x16x512xbf16>,
    %155 = vector.extract_strided_slice %149 {offsets = [1, 0, 0], sizes = [1, 16, 512], strides = [1, 1, 1]} : vector<8x16x512xbf16> to vector<1x16x512xbf16>
    %156 = vector.shape_cast %155 : vector<1x16x512xbf16> to vector<16x512xbf16>
    %c1_120 = arith.constant 1 : index
    %c0_121 = arith.constant 0 : index
    %c0_122 = arith.constant 0 : index
    %157 = vector.load %arg16[%c1_120, %c0_121, %c0_122] : memref<9x16x512xbf16, #tpu.memory_space<vmem>>, vector<1x16x512xbf16>
    %158 = vector.shape_cast %157 : vector<1x16x512xbf16> to vector<16x512xbf16>
    %159 = vector.shape_cast %156 : vector<16x512xbf16> to vector<1x16x512xbf16>
    tpu.vector_store %arg16[%c1_120, %c0_121, %c0_122], %159 {strides = array<i32>} : memref<9x16x512xbf16, #tpu.memory_space<vmem>>, vector<1x16x512xbf16>,
    %160 = vector.extract_strided_slice %149 {offsets = [2, 0, 0], sizes = [1, 16, 512], strides = [1, 1, 1]} : vector<8x16x512xbf16> to vector<1x16x512xbf16>
    %161 = vector.shape_cast %160 : vector<1x16x512xbf16> to vector<16x512xbf16>
    %c2_123 = arith.constant 2 : index
    %c0_124 = arith.constant 0 : index
    %c0_125 = arith.constant 0 : index
    %162 = vector.load %arg16[%c2_123, %c0_124, %c0_125] : memref<9x16x512xbf16, #tpu.memory_space<vmem>>, vector<1x16x512xbf16>
    %163 = vector.shape_cast %162 : vector<1x16x512xbf16> to vector<16x512xbf16>
    %164 = vector.shape_cast %161 : vector<16x512xbf16> to vector<1x16x512xbf16>
    tpu.vector_store %arg16[%c2_123, %c0_124, %c0_125], %164 {strides = array<i32>} : memref<9x16x512xbf16, #tpu.memory_space<vmem>>, vector<1x16x512xbf16>,
    %165 = vector.extract_strided_slice %149 {offsets = [3, 0, 0], sizes = [1, 16, 512], strides = [1, 1, 1]} : vector<8x16x512xbf16> to vector<1x16x512xbf16>
    %166 = vector.shape_cast %165 : vector<1x16x512xbf16> to vector<16x512xbf16>
    %c3_126 = arith.constant 3 : index
    %c0_127 = arith.constant 0 : index
    %c0_128 = arith.constant 0 : index
    %167 = vector.load %arg16[%c3_126, %c0_127, %c0_128] : memref<9x16x512xbf16, #tpu.memory_space<vmem>>, vector<1x16x512xbf16>
    %168 = vector.shape_cast %167 : vector<1x16x512xbf16> to vector<16x512xbf16>
    %169 = vector.shape_cast %166 : vector<16x512xbf16> to vector<1x16x512xbf16>
    tpu.vector_store %arg16[%c3_126, %c0_127, %c0_128], %169 {strides = array<i32>} : memref<9x16x512xbf16, #tpu.memory_space<vmem>>, vector<1x16x512xbf16>,
    %170 = vector.extract_strided_slice %149 {offsets = [4, 0, 0], sizes = [1, 16, 512], strides = [1, 1, 1]} : vector<8x16x512xbf16> to vector<1x16x512xbf16>
    %171 = vector.shape_cast %170 : vector<1x16x512xbf16> to vector<16x512xbf16>
    %c4_129 = arith.constant 4 : index
    %c0_130 = arith.constant 0 : index
    %c0_131 = arith.constant 0 : index
    %172 = vector.load %arg16[%c4_129, %c0_130, %c0_131] : memref<9x16x512xbf16, #tpu.memory_space<vmem>>, vector<1x16x512xbf16>
    %173 = vector.shape_cast %172 : vector<1x16x512xbf16> to vector<16x512xbf16>
    %174 = vector.shape_cast %171 : vector<16x512xbf16> to vector<1x16x512xbf16>
    tpu.vector_store %arg16[%c4_129, %c0_130, %c0_131], %174 {strides = array<i32>} : memref<9x16x512xbf16, #tpu.memory_space<vmem>>, vector<1x16x512xbf16>,
    %175 = vector.extract_strided_slice %149 {offsets = [5, 0, 0], sizes = [1, 16, 512], strides = [1, 1, 1]} : vector<8x16x512xbf16> to vector<1x16x512xbf16>
    %176 = vector.shape_cast %175 : vector<1x16x512xbf16> to vector<16x512xbf16>
    %c5_132 = arith.constant 5 : index
    %c0_133 = arith.constant 0 : index
    %c0_134 = arith.constant 0 : index
    %177 = vector.load %arg16[%c5_132, %c0_133, %c0_134] : memref<9x16x512xbf16, #tpu.memory_space<vmem>>, vector<1x16x512xbf16>
    %178 = vector.shape_cast %177 : vector<1x16x512xbf16> to vector<16x512xbf16>
    %179 = vector.shape_cast %176 : vector<16x512xbf16> to vector<1x16x512xbf16>
    tpu.vector_store %arg16[%c5_132, %c0_133, %c0_134], %179 {strides = array<i32>} : memref<9x16x512xbf16, #tpu.memory_space<vmem>>, vector<1x16x512xbf16>,
    %180 = vector.extract_strided_slice %149 {offsets = [6, 0, 0], sizes = [1, 16, 512], strides = [1, 1, 1]} : vector<8x16x512xbf16> to vector<1x16x512xbf16>
    %181 = vector.shape_cast %180 : vector<1x16x512xbf16> to vector<16x512xbf16>
    %c6_135 = arith.constant 6 : index
    %c0_136 = arith.constant 0 : index
    %c0_137 = arith.constant 0 : index
    %182 = vector.load %arg16[%c6_135, %c0_136, %c0_137] : memref<9x16x512xbf16, #tpu.memory_space<vmem>>, vector<1x16x512xbf16>
    %183 = vector.shape_cast %182 : vector<1x16x512xbf16> to vector<16x512xbf16>
    %184 = vector.shape_cast %181 : vector<16x512xbf16> to vector<1x16x512xbf16>
    tpu.vector_store %arg16[%c6_135, %c0_136, %c0_137], %184 {strides = array<i32>} : memref<9x16x512xbf16, #tpu.memory_space<vmem>>, vector<1x16x512xbf16>,
    %185 = vector.extract_strided_slice %149 {offsets = [7, 0, 0], sizes = [1, 16, 512], strides = [1, 1, 1]} : vector<8x16x512xbf16> to vector<1x16x512xbf16>
    %186 = vector.shape_cast %185 : vector<1x16x512xbf16> to vector<16x512xbf16>
    %c7_138 = arith.constant 7 : index
    %c0_139 = arith.constant 0 : index
    %c0_140 = arith.constant 0 : index
    %187 = vector.load %arg16[%c7_138, %c0_139, %c0_140] : memref<9x16x512xbf16, #tpu.memory_space<vmem>>, vector<1x16x512xbf16>
    %188 = vector.shape_cast %187 : vector<1x16x512xbf16> to vector<16x512xbf16>
    %189 = vector.shape_cast %186 : vector<16x512xbf16> to vector<1x16x512xbf16>
    tpu.vector_store %arg16[%c7_138, %c0_139, %c0_140], %189 {strides = array<i32>} : memref<9x16x512xbf16, #tpu.memory_space<vmem>>, vector<1x16x512xbf16>,
    %c1_141 = arith.constant 1 : index
    %c0_142 = arith.constant 0 : index
    %c0_143 = arith.constant 0 : index
    %190 = vector.load %arg14[%c1_141, %c0_142, %c0_143] : memref<10x16x512xbf16, #tpu.memory_space<vmem>>, vector<8x16x512xbf16>
    %191 = vector.shape_cast %190 : vector<8x16x512xbf16> to vector<128x512xbf16>
    %c1_144 = arith.constant 1 : index
    %c0_145 = arith.constant 0 : index
    %c0_146 = arith.constant 0 : index
    %c0_147 = arith.constant 0 : index
    %192 = vector.load %arg8[%c1_144, %c0_145, %c0_146, %c0_147] : memref<2x2x512x512xbf16, #tpu.memory_space<vmem>>, vector<1x1x512x512xbf16>
    %193 = vector.shape_cast %192 : vector<1x1x512x512xbf16> to vector<512x512xbf16>
    %cst_148 = arith.constant dense<0.000000e+00> : vector<128x512xf32>
    %194 = tpu.matmul %191, %193, %cst_148 {dimension_numbers = #tpu.dot_dimension_numbers<[1], [0], [0], [1], [0, 0, 1, 1], [], []>} : vector<128x512xbf16>, vector<512x512xbf16>, vector<128x512xf32> -> vector<128x512xf32>
    %c2_149 = arith.constant 2 : index
    %c0_150 = arith.constant 0 : index
    %c0_151 = arith.constant 0 : index
    %195 = vector.load %arg14[%c2_149, %c0_150, %c0_151] : memref<10x16x512xbf16, #tpu.memory_space<vmem>>, vector<8x16x512xbf16>
    %196 = vector.shape_cast %195 : vector<8x16x512xbf16> to vector<128x512xbf16>
    %c1_152 = arith.constant 1 : index
    %c1_153 = arith.constant 1 : index
    %c0_154 = arith.constant 0 : index
    %c0_155 = arith.constant 0 : index
    %197 = vector.load %arg8[%c1_152, %c1_153, %c0_154, %c0_155] : memref<2x2x512x512xbf16, #tpu.memory_space<vmem>>, vector<1x1x512x512xbf16>
    %198 = vector.shape_cast %197 : vector<1x1x512x512xbf16> to vector<512x512xbf16>
    %cst_156 = arith.constant dense<0.000000e+00> : vector<128x512xf32>
    %199 = tpu.matmul %196, %198, %cst_156 {dimension_numbers = #tpu.dot_dimension_numbers<[1], [0], [0], [1], [0, 0, 1, 1], [], []>} : vector<128x512xbf16>, vector<512x512xbf16>, vector<128x512xf32> -> vector<128x512xf32>
    %200 = arith.addf %194, %199 : vector<128x512xf32>
    %cst_157 = arith.constant 0.000000e+00 : f32
    %201 = vector.broadcast %cst_157 : f32 to vector<128x512xf32>
    %202 = arith.maximumf %200, %201 : vector<128x512xf32>
    %c0_158 = arith.constant 0 : index
    %c0_159 = arith.constant 0 : index
    %203 = vector.load %arg9[%c0_158, %c0_159] : memref<1x512xf32, #tpu.memory_space<vmem>>, vector<1x512xf32>
    %204 = vector.broadcast %203 : vector<1x512xf32> to vector<128x512xf32>
    %205 = arith.mulf %202, %204 : vector<128x512xf32>
    %c0_160 = arith.constant 0 : index
    %c0_161 = arith.constant 0 : index
    %206 = vector.load %arg10[%c0_160, %c0_161] : memref<1x512xf32, #tpu.memory_space<vmem>>, vector<1x512xf32>
    %207 = vector.broadcast %206 : vector<1x512xf32> to vector<128x512xf32>
    %208 = arith.addf %205, %207 : vector<128x512xf32>
    %209 = arith.truncf %208 : vector<128x512xf32> to vector<128x512xbf16>
    %210 = vector.shape_cast %209 : vector<128x512xbf16> to vector<8x16x512xbf16>
    %211 = vector.extract_strided_slice %210 {offsets = [0, 0, 0], sizes = [1, 16, 512], strides = [1, 1, 1]} : vector<8x16x512xbf16> to vector<1x16x512xbf16>
    %212 = vector.shape_cast %211 : vector<1x16x512xbf16> to vector<16x512xbf16>
    %c1_162 = arith.constant 1 : index
    %c0_163 = arith.constant 0 : index
    %c0_164 = arith.constant 0 : index
    %213 = vector.load %arg15[%c1_162, %c0_163, %c0_164] : memref<9x16x512xbf16, #tpu.memory_space<vmem>>, vector<1x16x512xbf16>
    %214 = vector.shape_cast %213 : vector<1x16x512xbf16> to vector<16x512xbf16>
    %215 = vector.shape_cast %212 : vector<16x512xbf16> to vector<1x16x512xbf16>
    tpu.vector_store %arg15[%c1_162, %c0_163, %c0_164], %215 {strides = array<i32>} : memref<9x16x512xbf16, #tpu.memory_space<vmem>>, vector<1x16x512xbf16>,
    %216 = vector.extract_strided_slice %210 {offsets = [1, 0, 0], sizes = [1, 16, 512], strides = [1, 1, 1]} : vector<8x16x512xbf16> to vector<1x16x512xbf16>
    %217 = vector.shape_cast %216 : vector<1x16x512xbf16> to vector<16x512xbf16>
    %c2_165 = arith.constant 2 : index
    %c0_166 = arith.constant 0 : index
    %c0_167 = arith.constant 0 : index
    %218 = vector.load %arg15[%c2_165, %c0_166, %c0_167] : memref<9x16x512xbf16, #tpu.memory_space<vmem>>, vector<1x16x512xbf16>
    %219 = vector.shape_cast %218 : vector<1x16x512xbf16> to vector<16x512xbf16>
    %220 = vector.shape_cast %217 : vector<16x512xbf16> to vector<1x16x512xbf16>
    tpu.vector_store %arg15[%c2_165, %c0_166, %c0_167], %220 {strides = array<i32>} : memref<9x16x512xbf16, #tpu.memory_space<vmem>>, vector<1x16x512xbf16>,
    %221 = vector.extract_strided_slice %210 {offsets = [2, 0, 0], sizes = [1, 16, 512], strides = [1, 1, 1]} : vector<8x16x512xbf16> to vector<1x16x512xbf16>
    %222 = vector.shape_cast %221 : vector<1x16x512xbf16> to vector<16x512xbf16>
    %c3_168 = arith.constant 3 : index
    %c0_169 = arith.constant 0 : index
    %c0_170 = arith.constant 0 : index
    %223 = vector.load %arg15[%c3_168, %c0_169, %c0_170] : memref<9x16x512xbf16, #tpu.memory_space<vmem>>, vector<1x16x512xbf16>
    %224 = vector.shape_cast %223 : vector<1x16x512xbf16> to vector<16x512xbf16>
    %225 = vector.shape_cast %222 : vector<16x512xbf16> to vector<1x16x512xbf16>
    tpu.vector_store %arg15[%c3_168, %c0_169, %c0_170], %225 {strides = array<i32>} : memref<9x16x512xbf16, #tpu.memory_space<vmem>>, vector<1x16x512xbf16>,
    %226 = vector.extract_strided_slice %210 {offsets = [3, 0, 0], sizes = [1, 16, 512], strides = [1, 1, 1]} : vector<8x16x512xbf16> to vector<1x16x512xbf16>
    %227 = vector.shape_cast %226 : vector<1x16x512xbf16> to vector<16x512xbf16>
    %c4_171 = arith.constant 4 : index
    %c0_172 = arith.constant 0 : index
    %c0_173 = arith.constant 0 : index
    %228 = vector.load %arg15[%c4_171, %c0_172, %c0_173] : memref<9x16x512xbf16, #tpu.memory_space<vmem>>, vector<1x16x512xbf16>
    %229 = vector.shape_cast %228 : vector<1x16x512xbf16> to vector<16x512xbf16>
    %230 = vector.shape_cast %227 : vector<16x512xbf16> to vector<1x16x512xbf16>
    tpu.vector_store %arg15[%c4_171, %c0_172, %c0_173], %230 {strides = array<i32>} : memref<9x16x512xbf16, #tpu.memory_space<vmem>>, vector<1x16x512xbf16>,
    %231 = vector.extract_strided_slice %210 {offsets = [4, 0, 0], sizes = [1, 16, 512], strides = [1, 1, 1]} : vector<8x16x512xbf16> to vector<1x16x512xbf16>
    %232 = vector.shape_cast %231 : vector<1x16x512xbf16> to vector<16x512xbf16>
    %c5_174 = arith.constant 5 : index
    %c0_175 = arith.constant 0 : index
    %c0_176 = arith.constant 0 : index
    %233 = vector.load %arg15[%c5_174, %c0_175, %c0_176] : memref<9x16x512xbf16, #tpu.memory_space<vmem>>, vector<1x16x512xbf16>
    %234 = vector.shape_cast %233 : vector<1x16x512xbf16> to vector<16x512xbf16>
    %235 = vector.shape_cast %232 : vector<16x512xbf16> to vector<1x16x512xbf16>
    tpu.vector_store %arg15[%c5_174, %c0_175, %c0_176], %235 {strides = array<i32>} : memref<9x16x512xbf16, #tpu.memory_space<vmem>>, vector<1x16x512xbf16>,
    %236 = vector.extract_strided_slice %210 {offsets = [5, 0, 0], sizes = [1, 16, 512], strides = [1, 1, 1]} : vector<8x16x512xbf16> to vector<1x16x512xbf16>
    %237 = vector.shape_cast %236 : vector<1x16x512xbf16> to vector<16x512xbf16>
    %c6_177 = arith.constant 6 : index
    %c0_178 = arith.constant 0 : index
    %c0_179 = arith.constant 0 : index
    %238 = vector.load %arg15[%c6_177, %c0_178, %c0_179] : memref<9x16x512xbf16, #tpu.memory_space<vmem>>, vector<1x16x512xbf16>
    %239 = vector.shape_cast %238 : vector<1x16x512xbf16> to vector<16x512xbf16>
    %240 = vector.shape_cast %237 : vector<16x512xbf16> to vector<1x16x512xbf16>
    tpu.vector_store %arg15[%c6_177, %c0_178, %c0_179], %240 {strides = array<i32>} : memref<9x16x512xbf16, #tpu.memory_space<vmem>>, vector<1x16x512xbf16>,
    %241 = vector.extract_strided_slice %210 {offsets = [6, 0, 0], sizes = [1, 16, 512], strides = [1, 1, 1]} : vector<8x16x512xbf16> to vector<1x16x512xbf16>
    %242 = vector.shape_cast %241 : vector<1x16x512xbf16> to vector<16x512xbf16>
    %c7_180 = arith.constant 7 : index
    %c0_181 = arith.constant 0 : index
    %c0_182 = arith.constant 0 : index
    %243 = vector.load %arg15[%c7_180, %c0_181, %c0_182] : memref<9x16x512xbf16, #tpu.memory_space<vmem>>, vector<1x16x512xbf16>
    %244 = vector.shape_cast %243 : vector<1x16x512xbf16> to vector<16x512xbf16>
    %245 = vector.shape_cast %242 : vector<16x512xbf16> to vector<1x16x512xbf16>
    tpu.vector_store %arg15[%c7_180, %c0_181, %c0_182], %245 {strides = array<i32>} : memref<9x16x512xbf16, #tpu.memory_space<vmem>>, vector<1x16x512xbf16>,
    %246 = vector.extract_strided_slice %210 {offsets = [7, 0, 0], sizes = [1, 16, 512], strides = [1, 1, 1]} : vector<8x16x512xbf16> to vector<1x16x512xbf16>
    %247 = vector.shape_cast %246 : vector<1x16x512xbf16> to vector<16x512xbf16>
    %c8_183 = arith.constant 8 : index
    %c0_184 = arith.constant 0 : index
    %c0_185 = arith.constant 0 : index
    %248 = vector.load %arg15[%c8_183, %c0_184, %c0_185] : memref<9x16x512xbf16, #tpu.memory_space<vmem>>, vector<1x16x512xbf16>
    %249 = vector.shape_cast %248 : vector<1x16x512xbf16> to vector<16x512xbf16>
    %250 = vector.shape_cast %247 : vector<16x512xbf16> to vector<1x16x512xbf16>
    tpu.vector_store %arg15[%c8_183, %c0_184, %c0_185], %250 {strides = array<i32>} : memref<9x16x512xbf16, #tpu.memory_space<vmem>>, vector<1x16x512xbf16>,
    %c0_186 = arith.constant 0 : index
    %c0_187 = arith.constant 0 : index
    %c0_188 = arith.constant 0 : index
    %251 = vector.load %arg15[%c0_186, %c0_187, %c0_188] : memref<9x16x512xbf16, #tpu.memory_space<vmem>>, vector<8x16x512xbf16>
    %252 = vector.shape_cast %251 : vector<8x16x512xbf16> to vector<128x512xbf16>
    %c0_189 = arith.constant 0 : index
    %c0_190 = arith.constant 0 : index
    %c0_191 = arith.constant 0 : index
    %253 = vector.load %arg11[%c0_189, %c0_190, %c0_191] : memref<4x512x128xbf16, #tpu.memory_space<vmem>>, vector<1x512x128xbf16>
    %254 = vector.shape_cast %253 : vector<1x512x128xbf16> to vector<512x128xbf16>
    %cst_192 = arith.constant dense<0.000000e+00> : vector<128x128xf32>
    %255 = tpu.matmul %252, %254, %cst_192 {dimension_numbers = #tpu.dot_dimension_numbers<[1], [0], [0], [1], [0, 0, 1, 1], [], []>} : vector<128x512xbf16>, vector<512x128xbf16>, vector<128x128xf32> -> vector<128x128xf32>
    %c0_193 = arith.constant 0 : index
    %c0_194 = arith.constant 0 : index
    %c0_195 = arith.constant 0 : index
    %256 = vector.load %arg16[%c0_193, %c0_194, %c0_195] : memref<9x16x512xbf16, #tpu.memory_space<vmem>>, vector<8x16x512xbf16>
    %257 = vector.shape_cast %256 : vector<8x16x512xbf16> to vector<128x512xbf16>
    %c1_196 = arith.constant 1 : index
    %c0_197 = arith.constant 0 : index
    %c0_198 = arith.constant 0 : index
    %258 = vector.load %arg11[%c1_196, %c0_197, %c0_198] : memref<4x512x128xbf16, #tpu.memory_space<vmem>>, vector<1x512x128xbf16>
    %259 = vector.shape_cast %258 : vector<1x512x128xbf16> to vector<512x128xbf16>
    %cst_199 = arith.constant dense<0.000000e+00> : vector<128x128xf32>
    %260 = tpu.matmul %257, %259, %cst_199 {dimension_numbers = #tpu.dot_dimension_numbers<[1], [0], [0], [1], [0, 0, 1, 1], [], []>} : vector<128x512xbf16>, vector<512x128xbf16>, vector<128x128xf32> -> vector<128x128xf32>
    %261 = arith.addf %255, %260 : vector<128x128xf32>
    %c1_200 = arith.constant 1 : index
    %c0_201 = arith.constant 0 : index
    %c0_202 = arith.constant 0 : index
    %262 = vector.load %arg15[%c1_200, %c0_201, %c0_202] : memref<9x16x512xbf16, #tpu.memory_space<vmem>>, vector<8x16x512xbf16>
    %263 = vector.shape_cast %262 : vector<8x16x512xbf16> to vector<128x512xbf16>
    %c2_203 = arith.constant 2 : index
    %c0_204 = arith.constant 0 : index
    %c0_205 = arith.constant 0 : index
    %264 = vector.load %arg11[%c2_203, %c0_204, %c0_205] : memref<4x512x128xbf16, #tpu.memory_space<vmem>>, vector<1x512x128xbf16>
    %265 = vector.shape_cast %264 : vector<1x512x128xbf16> to vector<512x128xbf16>
    %cst_206 = arith.constant dense<0.000000e+00> : vector<128x128xf32>
    %266 = tpu.matmul %263, %265, %cst_206 {dimension_numbers = #tpu.dot_dimension_numbers<[1], [0], [0], [1], [0, 0, 1, 1], [], []>} : vector<128x512xbf16>, vector<512x128xbf16>, vector<128x128xf32> -> vector<128x128xf32>
    %267 = arith.addf %261, %266 : vector<128x128xf32>
    %c1_207 = arith.constant 1 : index
    %c0_208 = arith.constant 0 : index
    %c0_209 = arith.constant 0 : index
    %268 = vector.load %arg16[%c1_207, %c0_208, %c0_209] : memref<9x16x512xbf16, #tpu.memory_space<vmem>>, vector<8x16x512xbf16>
    %269 = vector.shape_cast %268 : vector<8x16x512xbf16> to vector<128x512xbf16>
    %c3_210 = arith.constant 3 : index
    %c0_211 = arith.constant 0 : index
    %c0_212 = arith.constant 0 : index
    %270 = vector.load %arg11[%c3_210, %c0_211, %c0_212] : memref<4x512x128xbf16, #tpu.memory_space<vmem>>, vector<1x512x128xbf16>
    %271 = vector.shape_cast %270 : vector<1x512x128xbf16> to vector<512x128xbf16>
    %cst_213 = arith.constant dense<0.000000e+00> : vector<128x128xf32>
    %272 = tpu.matmul %269, %271, %cst_213 {dimension_numbers = #tpu.dot_dimension_numbers<[1], [0], [0], [1], [0, 0, 1, 1], [], []>} : vector<128x512xbf16>, vector<512x128xbf16>, vector<128x128xf32> -> vector<128x128xf32>
    %273 = arith.addf %267, %272 : vector<128x128xf32>
    %274 = math.tanh %273 : vector<128x128xf32>
    %275 = vector.shape_cast %274 : vector<128x128xf32> to vector<8x16x128xf32>
    %c0_214 = arith.constant 0 : index
    %c0_215 = arith.constant 0 : index
    %c0_216 = arith.constant 0 : index
    %276 = vector.load %arg12[%c0_214, %c0_215, %c0_216] : memref<8x16x128xf32, #tpu.memory_space<vmem>>, vector<8x16x128xf32>
    tpu.vector_store %arg12[%c0_214, %c0_215, %c0_216], %275 {strides = array<i32>} : memref<8x16x128xf32, #tpu.memory_space<vmem>>, vector<8x16x128xf32>,
    return
  }
  func.func @transform_0(%arg0: i32) -> (i32, i32) {
    %c0_i32 = arith.constant 0 : i32
    %c0_i32_0 = arith.constant 0 : i32
    return %arg0, %c0_i32 : i32, i32
  }
  func.func @transform_1(%arg0: i32) -> (i32, i32) {
    %c0_i32 = arith.constant 0 : i32
    %c0_i32_0 = arith.constant 0 : i32
    %c0_i32_1 = arith.constant 0 : i32
    return %c0_i32, %c0_i32_0 : i32, i32
  }
  func.func @transform_2(%arg0: i32) -> (i32, i32) {
    %c0_i32 = arith.constant 0 : i32
    %c0_i32_0 = arith.constant 0 : i32
    %c0_i32_1 = arith.constant 0 : i32
    return %c0_i32, %c0_i32_0 : i32, i32
  }
  func.func @transform_3(%arg0: i32) -> (i32, i32) {
    %c0_i32 = arith.constant 0 : i32
    %c0_i32_0 = arith.constant 0 : i32
    %c0_i32_1 = arith.constant 0 : i32
    return %c0_i32, %c0_i32_0 : i32, i32
  }
  func.func @transform_4(%arg0: i32) -> (i32, i32, i32, i32) {
    %c0_i32 = arith.constant 0 : i32
    %c0_i32_0 = arith.constant 0 : i32
    %c0_i32_1 = arith.constant 0 : i32
    %c0_i32_2 = arith.constant 0 : i32
    %c0_i32_3 = arith.constant 0 : i32
    return %c0_i32, %c0_i32_0, %c0_i32_1, %c0_i32_2 : i32, i32, i32, i32
  }
  func.func @transform_5(%arg0: i32) -> (i32, i32) {
    %c0_i32 = arith.constant 0 : i32
    %c0_i32_0 = arith.constant 0 : i32
    %c0_i32_1 = arith.constant 0 : i32
    return %c0_i32, %c0_i32_0 : i32, i32
  }
  func.func @transform_6(%arg0: i32) -> (i32, i32) {
    %c0_i32 = arith.constant 0 : i32
    %c0_i32_0 = arith.constant 0 : i32
    %c0_i32_1 = arith.constant 0 : i32
    return %c0_i32, %c0_i32_0 : i32, i32
  }
  func.func @transform_7(%arg0: i32) -> (i32, i32, i32, i32) {
    %c0_i32 = arith.constant 0 : i32
    %c0_i32_0 = arith.constant 0 : i32
    %c0_i32_1 = arith.constant 0 : i32
    %c0_i32_2 = arith.constant 0 : i32
    %c0_i32_3 = arith.constant 0 : i32
    return %c0_i32, %c0_i32_0, %c0_i32_1, %c0_i32_2 : i32, i32, i32, i32
  }
  func.func @transform_8(%arg0: i32) -> (i32, i32) {
    %c0_i32 = arith.constant 0 : i32
    %c0_i32_0 = arith.constant 0 : i32
    %c0_i32_1 = arith.constant 0 : i32
    return %c0_i32, %c0_i32_0 : i32, i32
  }
  func.func @transform_9(%arg0: i32) -> (i32, i32) {
    %c0_i32 = arith.constant 0 : i32
    %c0_i32_0 = arith.constant 0 : i32
    %c0_i32_1 = arith.constant 0 : i32
    return %c0_i32, %c0_i32_0 : i32, i32
  }
  func.func @transform_10(%arg0: i32) -> (i32, i32, i32) {
    %c0_i32 = arith.constant 0 : i32
    %c0_i32_0 = arith.constant 0 : i32
    %c0_i32_1 = arith.constant 0 : i32
    %c0_i32_2 = arith.constant 0 : i32
    return %c0_i32, %c0_i32_0, %c0_i32_1 : i32, i32, i32
  }
  func.func @transform_11(%arg0: i32) -> (i32, i32, i32) {
    %c0_i32 = arith.constant 0 : i32
    %c0_i32_0 = arith.constant 0 : i32
    %c0_i32_1 = arith.constant 0 : i32
    return %c0_i32, %arg0, %c0_i32_0 : i32, i32, i32
  }
}

</mosaic_0001>

<bundles_post_ra>
// kernel: _lambda_.1
= control target key start
LH: loop header
LB: loop body
LE: loop exit
PB: predicated region body
PF: predicated region fallthrough
CT: control target
= control target key end

     0   :  { %s19415_s17 = smov 0   ;;  %s19417_s18 = smov 0   ;;  %s24902_s0 = inlined_call_operand.vmem [shape: bf16[32,128], index: 0, kind: input, shape index: {}]   ;;  %s24903_s1 = inlined_call_operand.vmem [shape: bf16[128,2048], index: 1, kind: input, shape index: {}]   ;;  %s24904_s2 = inlined_call_operand.vmem [shape: f32[1,2048], index: 2, kind: input, shape index: {}]   ;;  %s24905_s3 = inlined_call_operand.vmem [shape: f32[1,2048], index: 3, kind: input, shape index: {}]   ;;  %s24906_s4 = inlined_call_operand.vmem [shape: bf16[2,2,512,512], index: 4, kind: input, shape index: {}]   ;;  %s24907_s5 = inlined_call_operand.vmem [shape: f32[1,512], index: 5, kind: input, shape index: {}]   ;;  %s24908_s6 = inlined_call_operand.vmem [shape: f32[1,512], index: 6, kind: input, shape index: {}]   ;;  %s24909_s7 = inlined_call_operand.vmem [shape: bf16[2,2,512,512], index: 7, kind: input, shape index: {}]   ;;  %s24910_s8 = inlined_call_operand.vmem [shape: f32[1,512], index: 8, kind: input, shape index: {}]   ;;  %s24911_s9 = inlined_call_operand.vmem [shape: f32[1,512], index: 9, kind: input, shape index: {}]   ;;  %s24912_s10 = inlined_call_operand.vmem [shape: bf16[4,512,128], index: 10, kind: input, shape index: {}]   ;;  %s24913_s11 = inlined_call_operand.vmem [shape: f32[8,32,128], index: 11, kind: output, shape index: {}]  }
   0x1   :  { %s19419_s19 = smov 0  }
   0x2 LB: > { %s19428_s20 = sadd.s32 4294967295, %s19352_s19   ;;  %s19430_s21 = sadd.s32 1, %s19352_s19   ;;  %s19352_s19 = sphi %s19419_s19, %s25026_s19   ;;  %s19348_s18 = sphi %s19417_s18, %s25025_s18   ;;  %s19344_s17 = sphi %s19415_s17, %s25024_s17  }
   0x3   : > { %s261_s22 = ssub.s32 %s19352_s19, %s19430_s21  ;;  %s264_s23 = sadd.s32 1, %s19348_s18 }
   0x4   : > { %p262_p0 = scmp.eq.s32.totalorder %s261_s22, 0  ;;  %p274_p1 = scmp.ne.s32.totalorder %s19348_s18, %s19344_s17 }
   0x5   : > { %p275_p2 = scmp.eq.s32.totalorder %s19428_s20, 1  ;;  %p14268_p3 = scmp.ge.s32.totalorder %s19352_s19, 1 }
   0x6   : > { %s19438_s24 = scalar_select %p262_p0, %s19348_s18, %s264_s23  }
   0x7   : > { %p19440_p4 = por %p275_p2, %p274_p1  ;;  %p338_p5 = scmp.lt.s32.totalorder %s19352_s19, 3 }
   0x9   : > { %p339_p6 = pnand %p14268_p3, %p338_p5 }
   0xb   : > { %342 = sbr.rel (%p339_p6) target bundleno = 2077 (0x81d), region = 64 }
  0x12   : > { %v414_v0 = vld [vmem:[%s24903_s1] sm:$0xff]  ;;  %s14270_s13 = sshll.u32 %s19428_s20, 1  ;;  %v24914_v6 = vmov 0   ;;  %v415_v18 = vld [vmem:[%s24903_s1 + $0x8] sm:$0xff]  ;;  %v416_v53 = vld [vmem:[%s24903_s1 + $0x10] sm:$0xff]  ;;  %s374_s22 = sand.u32 1, %s19344_s17  }
  0x13   : > { %v422_v1 = vld [vmem:[%s24903_s1 + $0x40] sm:$0xff]  ;;  %1220 = vmatprep.mubr.bf16.mxu0 %v24914_v6  ;;  %p378_p7 = scmp.lt.s32.totalorder %s14270_s13, 3  ;;  %1263 = vmatprep.mubr.bf16.mxu1 %v24914_v6  ;;  %v423_v19 = vld [vmem:[%s24903_s1 + $0x48] sm:$0xff]  ;;  %v424_v54 = vld [vmem:[%s24903_s1 + $0x50] sm:$0xff]  ;;  %s14269_s23 = sshll.u32 %s374_s22, 7 }
  0x14   : > { %v430_v2 = vld [vmem:[%s24903_s1 + $0x80] sm:$0xff]  ;;  %v14274_v3 = vcombine.high %v414_v0, %v422_v1  ;;  %v14273_v4 = vcombine.low %v414_v0, %v422_v1  ;;  %v14276_v21 = vcombine.high %v415_v18, %v423_v19  ;;  %v14275_v22 = vcombine.low %v415_v18, %v423_v19  ;;  %v431_v23 = vld [vmem:[%s24903_s1 + $0x88] sm:$0xff]  ;;  %v432_v59 = vld [vmem:[%s24903_s1 + $0x90] sm:$0xff]  ;;  %s24840_s17 = scalar_lea.vmem [#allocation6], %s14269_s23  ;;  %s16518_s27 = sshll.u32 (%p19440_p4), %s19428_s20, 4 }
  0x15   : > { %v438_v5 = vld [vmem:[%s24903_s1 + $0xc0] sm:$0xff]  ;;  %s25028_s13 = smov (!%p378_p7, %s14270_s13), 3  ;;  %v439_v24 = vld [vmem:[%s24903_s1 + $0xc8] sm:$0xff]  ;;  %v14278_v58 = vcombine.high %v416_v53, %v424_v54  ;;  %v440_v60 = vld [vmem:[%s24903_s1 + $0xd0] sm:$0xff]  ;;  %v14277_v1 = vcombine.low %v416_v53, %v424_v54 }
  0x16   : > { %v14290_v7 = vcombine.high %v430_v2, %v438_v5  ;;  %v446_v8 = vld [vmem:[%s24903_s1 + $0x100] sm:$0xff]  ;;  %1188 = vmatprep.subr.bf16.mxu0 %v14274_v3  ;;  %v14289_v10 = vcombine.low %v430_v2, %v438_v5  ;;  %s14271_s26 = sshll.u32 %s25028_s13, 2  ;;  %v14292_v26 = vcombine.high %v431_v23, %v439_v24  ;;  %v447_v27 = vld [vmem:[%s24903_s1 + $0x108] sm:$0xff]  ;;  %1231 = vmatprep.subr.bf16.mxu1 %v14276_v21  ;;  %v433_v21 = vld [vmem:[%s24903_s1 + $0x98] sm:$0xff] }
  0x17   : > { %v454_v9 = vld [vmem:[%s24903_s1 + $0x140] sm:$0xff]  ;;  %1189 = vmatpush1.bf16.msra.mxu0 %v14273_v4  ;;  %s19474_s15 = scalar_lea.vmem %s24902_s0, %s14271_s26  ;;  %v455_v30 = vld [vmem:[%s24903_s1 + $0x148] sm:$0xff]  ;;  %1232 = vmatpush1.bf16.msra.mxu1 %v14275_v22  ;;  %v14291_v31 = vcombine.low %v431_v23, %v439_v24  ;;  %v14294_v2 = vcombine.high %v432_v59, %v440_v60  ;;  %v441_v22 = vld [vmem:[%s24903_s1 + $0xd8] sm:$0xff]  ;;  %s14121_s26 = scalar_lea.vmem (%p19440_p4), %s24913_s11, %s16518_s27 }
  0x18   : > { %1190 = vmatprep.subr.bf16.mxu0 %v14290_v7  ;;  %v14306_v11 = vcombine.high %v446_v8, %v454_v9  ;;  %v462_v12 = vld [vmem:[%s24903_s1 + $0x180] sm:$0xff]  ;;  %v14305_v14 = vcombine.low %v446_v8, %v454_v9  ;;  %1233 = vmatprep.subr.bf16.mxu1 %v14292_v26  ;;  %v14308_v33 = vcombine.high %v447_v27, %v455_v30  ;;  %v463_v35 = vld [vmem:[%s24903_s1 + $0x188] sm:$0xff]  ;;  %v448_v7 = vld [vmem:[%s24903_s1 + $0x110] sm:$0xff] }
  0x19   : > { %v470_v13 = vld [vmem:[%s24903_s1 + $0x1c0] sm:$0xff]  ;;  %v471_v36 = vld [vmem:[%s24903_s1 + $0x1c8] sm:$0xff]  ;;  %v14307_v39 = vcombine.low %v447_v27, %v455_v30  ;;  %v456_v8 = vld [vmem:[%s24903_s1 + $0x150] sm:$0xff] }
  0x1a   : > { %v14322_v15 = vcombine.high %v462_v12, %v470_v13  ;;  %v478_v16 = vld [vmem:[%s24903_s1 + $0x200] sm:$0xff]  ;;  %v14321_v20 = vcombine.low %v462_v12, %v470_v13  ;;  %v14324_v41 = vcombine.high %v463_v35, %v471_v36  ;;  %v479_v43 = vld [vmem:[%s24903_s1 + $0x208] sm:$0xff]  ;;  %v14323_v47 = vcombine.low %v463_v35, %v471_v36  ;;  %v417_v13 = vld [vmem:[%s24903_s1 + $0x18] sm:$0xff] }
  0x1b   : > { %1191 = vmatpush1.bf16.msra.mxu0 %v14289_v10  ;;  %v486_v17 = vld [vmem:[%s24903_s1 + $0x240] sm:$0xff]  ;;  %1234 = vmatpush1.bf16.msra.mxu1 %v14291_v31  ;;  %v487_v44 = vld [vmem:[%s24903_s1 + $0x248] sm:$0xff]  ;;  %v14293_v10 = vcombine.low %v432_v59, %v440_v60  ;;  %v14310_v12 = vcombine.high %v448_v7, %v456_v8  ;;  %v14309_v18 = vcombine.low %v448_v7, %v456_v8  ;;  %v480_v23 = vld [vmem:[%s24903_s1 + $0x210] sm:$0xff] }
  0x1c   : > { %1192 = vmatprep.subr.bf16.mxu0 %v14306_v11  ;;  %v14338_v25 = vcombine.high %v478_v16, %v486_v17  ;;  %v494_v28 = vld [vmem:[%s24903_s1 + $0x280] sm:$0xff]  ;;  %v14337_v32 = vcombine.low %v478_v16, %v486_v17  ;;  %1235 = vmatprep.subr.bf16.mxu1 %v14308_v33  ;;  %v14340_v49 = vcombine.high %v479_v43, %v487_v44  ;;  %v495_v51 = vld [vmem:[%s24903_s1 + $0x288] sm:$0xff]  ;;  %v472_v16 = vld [vmem:[%s24903_s1 + $0x1d0] sm:$0xff] }
  0x1d   : > { %v502_v29 = vld [vmem:[%s24903_s1 + $0x2c0] sm:$0xff]  ;;  %v503_v52 = vld [vmem:[%s24903_s1 + $0x2c8] sm:$0xff]  ;;  %v14339_v55 = vcombine.low %v479_v43, %v487_v44  ;;  %v488_v24 = vld [vmem:[%s24903_s1 + $0x250] sm:$0xff]  ;;  %v14295_v33 = vcombine.low %v433_v21, %v441_v22 }
  0x1e   : > { %v14354_v34 = vcombine.high %v494_v28, %v502_v29  ;;  %v510_v37 = vld [vmem:[%s24903_s1 + $0x300] sm:$0xff]  ;;  %v14353_v40 = vcombine.low %v494_v28, %v502_v29  ;;  %v14356_v57 = vcombine.high %v495_v51, %v503_v52  ;;  %v511_v61 = vld [vmem:[%s24903_s1 + $0x308] sm:$0xff]  ;;  %v14355_v0 = vcombine.low %v495_v51, %v503_v52  ;;  %v496_v27 = vld [vmem:[%s24903_s1 + $0x290] sm:$0xff] }
  0x1f   : > { %1193 = vmatpush1.bf16.msra.mxu0 %v14305_v14  ;;  %v518_v38 = vld [vmem:[%s24903_s1 + $0x340] sm:$0xff]  ;;  %1236 = vmatpush1.bf16.msra.mxu1 %v14307_v39  ;;  %v519_v62 = vld [vmem:[%s24903_s1 + $0x348] sm:$0xff]  ;;  %v425_v14 = vld [vmem:[%s24903_s1 + $0x58] sm:$0xff]  ;;  %v14296_v28 = vcombine.high %v433_v21, %v441_v22  ;;  %v14342_v30 = vcombine.high %v480_v23, %v488_v24 }
  0x20   : > { %1194 = vmatprep.subr.bf16.mxu0 %v14322_v15  ;;  %v14370_v42 = vcombine.high %v510_v37, %v518_v38  ;;  %v526_v45 = vld [vmem:[%s24903_s1 + $0x380] sm:$0xff]  ;;  %v14369_v48 = vcombine.low %v510_v37, %v518_v38  ;;  %1237 = vmatprep.subr.bf16.mxu1 %v14324_v41  ;;  %v14372_v3 = vcombine.high %v511_v61, %v519_v62  ;;  %v527_v4 = vld [vmem:[%s24903_s1 + $0x388] sm:$0xff]  ;;  %v464_v15 = vld [vmem:[%s24903_s1 + $0x190] sm:$0xff] }
  0x21   : > { %v534_v46 = vld [vmem:[%s24903_s1 + $0x3c0] sm:$0xff]  ;;  %v535_v5 = vld [vmem:[%s24903_s1 + $0x3c8] sm:$0xff]  ;;  %v14371_v9 = vcombine.low %v511_v61, %v519_v62  ;;  %v14280_v19 = vcombine.high %v417_v13, %v425_v14  ;;  %v14325_v26 = vcombine.low %v464_v15, %v472_v16  ;;  %v449_v29 = vld [vmem:[%s24903_s1 + $0x118] sm:$0xff] }
  0x22   : > { %v14386_v50 = vcombine.high %v526_v45, %v534_v46  ;;  %v14385_v56 = vcombine.low %v526_v45, %v534_v46  ;;  %v19555_v63 = vld [vmem:[%s19474_s15] sm:$0xff]   ;;  %v14388_v11 = vcombine.high %v527_v4, %v535_v5  ;;  %v14387_v17 = vcombine.low %v527_v4, %v535_v5  ;;  %v457_v31 = vld [vmem:[%s24903_s1 + $0x158] sm:$0xff]  ;;  %v512_v35 = vld [vmem:[%s24903_s1 + $0x310] sm:$0xff] }
  0x23   : > { %1195 = vmatpush1.bf16.msra.mxu0 %v14321_v20  ;;  %1238 = vmatpush1.bf16.msra.mxu1 %v14323_v47  ;;  %v14326_v20 = vcombine.high %v464_v15, %v472_v16  ;;  %v14312_v36 = vcombine.high %v449_v29, %v457_v31  ;;  %v465_v37 = vld [vmem:[%s24903_s1 + $0x198] sm:$0xff]  ;;  %v14311_v41 = vcombine.low %v449_v29, %v457_v31  ;;  %v528_v43 = vld [vmem:[%s24903_s1 + $0x390] sm:$0xff]  ;;  %v418_v51 = vld [vmem:[%s24903_s1 + $0x20] sm:$0xff] }
  0x24   : > { %1196 = vmatprep.subr.bf16.mxu0 %v14338_v25  ;;  %1239 = vmatprep.subr.bf16.mxu1 %v14340_v49  ;;  %v14279_v25 = vcombine.low %v417_v13, %v425_v14  ;;  %v473_v39 = vld [vmem:[%s24903_s1 + $0x1d8] sm:$0xff]  ;;  %v434_v59 = vld [vmem:[%s24903_s1 + $0xa0] sm:$0xff]  ;;  %v419_v15 = vld [vmem:[%s24903_s1 + $0x28] sm:$0xff] }
  0x25   : > { %v14328_v44 = vcombine.high %v465_v37, %v473_v39  ;;  %v481_v45 = vld [vmem:[%s24903_s1 + $0x218] sm:$0xff]  ;;  %v14327_v49 = vcombine.low %v465_v37, %v473_v39  ;;  %v442_v60 = vld [vmem:[%s24903_s1 + $0xe0] sm:$0xff]  ;;  %v451_v31 = vld [vmem:[%s24903_s1 + $0x128] sm:$0xff] }
  0x26   : > { %v489_v47 = vld [vmem:[%s24903_s1 + $0x258] sm:$0xff]  ;;  %v450_v4 = vld [vmem:[%s24903_s1 + $0x120] sm:$0xff]  ;;  %v14298_v7 = vcombine.high %v434_v59, %v442_v60  ;;  %v475_v37 = vld [vmem:[%s24903_s1 + $0x1e8] sm:$0xff] }
  0x27   : > { %1197 = vmatpush1.bf16.msra.mxu0 %v14337_v32  ;;  %1240 = vmatpush1.bf16.msra.mxu1 %v14339_v55  ;;  %v504_v32 = vld [vmem:[%s24903_s1 + $0x2d0] sm:$0xff]  ;;  %v14344_v52 = vcombine.high %v481_v45, %v489_v47  ;;  %v497_v53 = vld [vmem:[%s24903_s1 + $0x298] sm:$0xff]  ;;  %v466_v13 = vld [vmem:[%s24903_s1 + $0x1a0] sm:$0xff] }
  0x28   : > { %1198 = vmatprep.subr.bf16.mxu0 %v14354_v34  ;;  %1241 = vmatprep.subr.bf16.mxu1 %v14356_v57  ;;  %v14341_v34 = vcombine.low %v480_v23, %v488_v24  ;;  %v14358_v38 = vcombine.high %v496_v27, %v504_v32  ;;  %v505_v55 = vld [vmem:[%s24903_s1 + $0x2d8] sm:$0xff]  ;;  %v14343_v57 = vcombine.low %v481_v45, %v489_v47  ;;  %v482_v21 = vld [vmem:[%s24903_s1 + $0x220] sm:$0xff]  ;;  %v435_v23 = vld [vmem:[%s24903_s1 + $0xa8] sm:$0xff] }
  0x29   : > { %v14360_v61 = vcombine.high %v497_v53, %v505_v55  ;;  %v529_v5 = vld [vmem:[%s24903_s1 + $0x398] sm:$0xff]  ;;  %v498_v29 = vld [vmem:[%s24903_s1 + $0x2a0] sm:$0xff]  ;;  %v491_v45 = vld [vmem:[%s24903_s1 + $0x268] sm:$0xff] }
  0x2a   : > { %v514_v39 = vld [vmem:[%s24903_s1 + $0x320] sm:$0xff] }
  0x2b   : > { %1199 = vmatpush1.bf16.msra.mxu0 %v14353_v40  ;;  %1242 = vmatpush1.bf16.msra.mxu1 %v14355_v0  ;;  %v520_v40 = vld [vmem:[%s24903_s1 + $0x350] sm:$0xff]  ;;  %v513_v0 = vld [vmem:[%s24903_s1 + $0x318] sm:$0xff]  ;;  %v530_v47 = vld [vmem:[%s24903_s1 + $0x3a0] sm:$0xff] }
  0x2c   : > { %1200 = vmatprep.subr.bf16.mxu0 %v14370_v42  ;;  %1243 = vmatprep.subr.bf16.mxu1 %v14372_v3  ;;  %v14357_v42 = vcombine.low %v496_v27, %v504_v32  ;;  %v14374_v46 = vcombine.high %v512_v35, %v520_v40 }
  0x2f   : > { %1201 = vmatpush1.bf16.msra.mxu0 %v14369_v48  ;;  %1244 = vmatpush1.bf16.msra.mxu1 %v14371_v9  ;;  %v536_v48 = vld [vmem:[%s24903_s1 + $0x3d0] sm:$0xff]  ;;  %v537_v9 = vld [vmem:[%s24903_s1 + $0x3d8] sm:$0xff] }
  0x30   : > { %1202 = vmatprep.subr.bf16.mxu0 %v14386_v50  ;;  %1245 = vmatprep.subr.bf16.mxu1 %v14388_v11  ;;  %v14373_v50 = vcombine.low %v512_v35, %v520_v40  ;;  %v14390_v54 = vcombine.high %v528_v43, %v536_v48  ;;  %v14392_v14 = vcombine.high %v529_v5, %v537_v9  ;;  %v522_v40 = vld [vmem:[%s24903_s1 + $0x360] sm:$0xff] }
  0x33   : > { %1203 = vmatpush1.bf16.msra.mxu0 %v14385_v56  ;;  %1246 = vmatpush1.bf16.msra.mxu1 %v14387_v17  ;;  %v426_v56 = vld [vmem:[%s24903_s1 + $0x60] sm:$0xff]  ;;  %v427_v17 = vld [vmem:[%s24903_s1 + $0x68] sm:$0xff] }
  0x34   : > { %1274 = vmatprep.subr.bf16.mxu0 %v14278_v58  ;;  %1317 = vmatprep.subr.bf16.mxu1 %v14280_v19  ;;  %v14389_v58 = vcombine.low %v528_v43, %v536_v48  ;;  %v14282_v62 = vcombine.high %v418_v51, %v426_v56  ;;  %v14281_v3 = vcombine.low %v418_v51, %v426_v56  ;;  %v538_v48 = vld [vmem:[%s24903_s1 + $0x3e0] sm:$0xff]  ;;  %v428_v56 = vld [vmem:[%s24903_s1 + $0x70] sm:$0xff] }
  0x35   : > { %v14391_v19 = vcombine.low %v529_v5, %v537_v9  ;;  %v14284_v22 = vcombine.high %v419_v15, %v427_v17  ;;  %v14283_v27 = vcombine.low %v419_v15, %v427_v17  ;;  %v531_v5 = vld [vmem:[%s24903_s1 + $0x3a8] sm:$0xff]  ;;  %v452_v9 = vld [vmem:[%s24903_s1 + $0x130] sm:$0xff]  ;;  %v429_v15 = vld [vmem:[%s24903_s1 + $0x78] sm:$0xff] }
  0x36   : > { %1221 = vmatmul.mubr.bf16.vlgmr.msra.gmra.mrb[0].mxu0 %v19555_v63  ;;  %1264 = vmatmul.mubr.bf16.vlgmr.msra.gmra.mrb[0].mxu1 %v19555_v63  ;;  %v468_v17 = vld [vmem:[%s24903_s1 + $0x1b0] sm:$0xff] }
  0x37   : > { %1275 = vmatpush1.bf16.msra.mxu0 %v14277_v1  ;;  %1306 = vmatprep.mubr.bf16.mxu0 %v24914_v6  ;;  %v521_v1 = vld [vmem:[%s24903_s1 + $0x358] sm:$0xff] }
  0x38   : > { %1276 = vmatprep.subr.bf16.mxu0 %v14294_v2  ;;  %1318 = vmatpush1.bf16.msra.mxu1 %v14279_v25  ;;  %v14359_v2 = vcombine.low %v497_v53, %v505_v55  ;;  %v14376_v8 = vcombine.high %v513_v0, %v521_v1  ;;  %v14375_v11 = vcombine.low %v513_v0, %v521_v1  ;;  %v443_v25 = vld [vmem:[%s24903_s1 + $0xe8] sm:$0xff]  ;;  %v420_v55 = vld [vmem:[%s24903_s1 + $0x30] sm:$0xff] }
  0x39   : > { %1349 = vmatprep.mubr.bf16.mxu1 %v24914_v6  ;;  %1319 = vmatprep.subr.bf16.mxu1 %v14296_v28  ;;  %v14299_v35 = vcombine.low %v435_v23, %v443_v25  ;;  %v507_v53 = vld [vmem:[%s24903_s1 + $0x2e8] sm:$0xff] }
  0x3a   : > { %v515_v1 = vld [vmem:[%s24903_s1 + $0x328] sm:$0xff] }
  0x3b   : > { %1277 = vmatpush1.bf16.msra.mxu0 %v14293_v10  ;;  %v458_v10 = vld [vmem:[%s24903_s1 + $0x160] sm:$0xff] }
  0x3c   : > { %1278 = vmatprep.subr.bf16.mxu0 %v14310_v12  ;;  %1320 = vmatpush1.bf16.msra.mxu1 %v14295_v33  ;;  %v14297_v12 = vcombine.low %v434_v59, %v442_v60  ;;  %v14314_v16 = vcombine.high %v450_v4, %v458_v10  ;;  %v459_v33 = vld [vmem:[%s24903_s1 + $0x168] sm:$0xff]  ;;  %v14393_v60 = vcombine.low %v530_v47, %v538_v48 }
  0x3d   : > { %1321 = vmatprep.subr.bf16.mxu1 %v14312_v36  ;;  %v467_v36 = vld [vmem:[%s24903_s1 + $0x1a8] sm:$0xff]  ;;  %v14315_v43 = vcombine.low %v451_v31, %v459_v33 }
  0x3e   : > { %v14331_v51 = vcombine.low %v467_v36, %v475_v37 }
  0x3f   : > { %1279 = vmatpush1.bf16.msra.mxu0 %v14309_v18  ;;  %v474_v18 = vld [vmem:[%s24903_s1 + $0x1e0] sm:$0xff] }
  0x40   : > { %1280 = vmatprep.subr.bf16.mxu0 %v14326_v20  ;;  %1322 = vmatpush1.bf16.msra.mxu1 %v14311_v41  ;;  %v14313_v20 = vcombine.low %v450_v4, %v458_v10  ;;  %v14330_v24 = vcombine.high %v466_v13, %v474_v18  ;;  %v14329_v28 = vcombine.low %v466_v13, %v474_v18  ;;  %v460_v10 = vld [vmem:[%s24903_s1 + $0x170] sm:$0xff] }
  0x41   : > { %1323 = vmatprep.subr.bf16.mxu1 %v14328_v44  ;;  %v14316_v41 = vcombine.high %v451_v31, %v459_v33  ;;  %v483_v44 = vld [vmem:[%s24903_s1 + $0x228] sm:$0xff]  ;;  %v476_v18 = vld [vmem:[%s24903_s1 + $0x1f0] sm:$0xff]  ;;  %v461_v31 = vld [vmem:[%s24903_s1 + $0x178] sm:$0xff] }
  0x42   : > { %v14347_v59 = vcombine.low %v483_v44, %v491_v45  ;;  %v500_v33 = vld [vmem:[%s24903_s1 + $0x2b0] sm:$0xff] }
  0x43   : > { %1281 = vmatpush1.bf16.msra.mxu0 %v14325_v26  ;;  %v490_v26 = vld [vmem:[%s24903_s1 + $0x260] sm:$0xff] }
  0x44   : > { %1282 = vmatprep.subr.bf16.mxu0 %v14342_v30  ;;  %1324 = vmatpush1.bf16.msra.mxu1 %v14327_v49  ;;  %v14300_v30 = vcombine.high %v435_v23, %v443_v25  ;;  %v14346_v32 = vcombine.high %v482_v21, %v490_v26  ;;  %v14332_v49 = vcombine.high %v467_v36, %v475_v37  ;;  %v445_v23 = vld [vmem:[%s24903_s1 + $0xf8] sm:$0xff]  ;;  %v484_v25 = vld [vmem:[%s24903_s1 + $0x230] sm:$0xff] }
  0x45   : > { %1325 = vmatprep.subr.bf16.mxu1 %v14344_v52  ;;  %v499_v52 = vld [vmem:[%s24903_s1 + $0x2a8] sm:$0xff] }
  0x46   : > { %v14364_v0 = vcombine.high %v499_v52, %v507_v53  ;;  %v14363_v4 = vcombine.low %v499_v52, %v507_v53  ;;  %v540_v52 = vld [vmem:[%s24903_s1 + $0x3f0] sm:$0xff] }
  0x47   : > { %1283 = vmatpush1.bf16.msra.mxu0 %v14341_v34  ;;  %v506_v34 = vld [vmem:[%s24903_s1 + $0x2e0] sm:$0xff] }
  0x48   : > { %1284 = vmatprep.subr.bf16.mxu0 %v14358_v38  ;;  %1326 = vmatpush1.bf16.msra.mxu1 %v14343_v57  ;;  %v14345_v38 = vcombine.low %v482_v21, %v490_v26  ;;  %v14348_v57 = vcombine.high %v483_v44, %v491_v45  ;;  %v492_v26 = vld [vmem:[%s24903_s1 + $0x270] sm:$0xff] }
  0x49   : > { %1327 = vmatprep.subr.bf16.mxu1 %v14360_v61  ;;  %v436_v61 = vld [vmem:[%s24903_s1 + $0xb0] sm:$0xff]  ;;  %v14350_v36 = vcombine.high %v484_v25, %v492_v26 }
  0x4b   : > { %1285 = vmatpush1.bf16.msra.mxu0 %v14357_v42  ;;  %v14362_v42 = vcombine.high %v498_v29, %v506_v34 }
  0x4c   : > { %1286 = vmatprep.subr.bf16.mxu0 %v14374_v46  ;;  %1328 = vmatpush1.bf16.msra.mxu1 %v14359_v2  ;;  %v14361_v46 = vcombine.low %v498_v29, %v506_v34  ;;  %v523_v2 = vld [vmem:[%s24903_s1 + $0x368] sm:$0xff]  ;;  %v508_v34 = vld [vmem:[%s24903_s1 + $0x2f0] sm:$0xff] }
  0x4d   : > { %1329 = vmatprep.subr.bf16.mxu1 %v14376_v8  ;;  %v14285_v8 = vcombine.low %v420_v55, %v428_v56  ;;  %v14379_v13 = vcombine.low %v515_v1, %v523_v2  ;;  %v14366_v44 = vcombine.high %v500_v33, %v508_v34 }
  0x4f   : > { %1287 = vmatpush1.bf16.msra.mxu0 %v14373_v50  ;;  %v14378_v50 = vcombine.high %v514_v39, %v522_v40 }
  0x50   : > { %1288 = vmatprep.subr.bf16.mxu0 %v14390_v54  ;;  %1330 = vmatpush1.bf16.msra.mxu1 %v14375_v11  ;;  %v14377_v54 = vcombine.low %v514_v39, %v522_v40  ;;  %v477_v39 = vld [vmem:[%s24903_s1 + $0x1f8] sm:$0xff]  ;;  %v14349_v40 = vcombine.low %v484_v25, %v492_v26 }
  0x51   : > { %1331 = vmatprep.subr.bf16.mxu1 %v14392_v14  ;;  %v421_v14 = vld [vmem:[%s24903_s1 + $0x38] sm:$0xff] }
  0x52   : > { %v14287_v29 = vcombine.low %v421_v14, %v429_v15  ;;  %v17648_v25 = vld [vmem:[%s24906_s4 + $0x448] ss:$16 sps:$4 sm:$0xff]   ;;  %v17656_v26 = vld [vmem:[%s24906_s4 + $0x46c] ss:$16 sps:$4 sm:$0xff]  }
  0x53   : > { %1289 = vmatpush1.bf16.msra.mxu0 %v14389_v58  ;;  %v14394_v58 = vcombine.high %v530_v47, %v538_v48 }
  0x54   : > { %1360 = vmatprep.subr.bf16.mxu0 %v14282_v62  ;;  %1332 = vmatpush1.bf16.msra.mxu1 %v14391_v19  ;;  %v444_v62 = vld [vmem:[%s24903_s1 + $0xf0] sm:$0xff] }
  0x55   : > { %1403 = vmatprep.subr.bf16.mxu1 %v14284_v22  ;;  %v14302_v11 = vcombine.high %v436_v61, %v444_v62  ;;  %v437_v22 = vld [vmem:[%s24903_s1 + $0xb8] sm:$0xff] }
  0x56   : > { %1307 = vmatmul.mubr.bf16.vlgmr.msra.gmra.mrb[4].mxu0 %v19555_v63  ;;  %v14303_v37 = vcombine.low %v437_v22, %v445_v23 }
  0x57   : > { %1361 = vmatpush1.bf16.msra.mxu0 %v14281_v3  ;;  %1392 = vmatprep.mubr.bf16.mxu0 %v24914_v6  ;;  %v14286_v3 = vcombine.high %v420_v55, %v428_v56 }
  0x58   : > { %1362 = vmatprep.subr.bf16.mxu0 %v14298_v7  ;;  %1350 = vmatmul.mubr.bf16.vlgmr.msra.gmra.mrb[4].mxu1 %v19555_v63  ;;  %v539_v7 = vld [vmem:[%s24903_s1 + $0x3e8] sm:$0xff] }
  0x59   : > { %1404 = vmatpush1.bf16.msra.mxu1 %v14283_v27  ;;  %1435 = vmatprep.mubr.bf16.mxu1 %v24914_v6  ;;  %v14396_v19 = vcombine.high %v531_v5, %v539_v7  ;;  %v14395_v21 = vcombine.low %v531_v5, %v539_v7  ;;  %v14288_v27 = vcombine.high %v421_v14, %v429_v15  ;;  %v541_v5 = vld [vmem:[%s24903_s1 + $0x3f8] sm:$0xff]  ;;  %v17641_v7 = vld [vmem:[%s24906_s4 + $0x424] ss:$16 sps:$4 sm:$0xff]   ;;  %v17645_v14 = vld [vmem:[%s24906_s4 + $0x440] ss:$16 sps:$4 sm:$0xff]  }
  0x5a   : > { %1405 = vmatprep.subr.bf16.mxu1 %v14300_v30  ;;  %v453_v30 = vld [vmem:[%s24903_s1 + $0x138] sm:$0xff]  ;;  %v17653_v15 = vld [vmem:[%s24906_s4 + $0x464] ss:$16 sps:$4 sm:$0xff]  }
  0x5b   : > { %1363 = vmatpush1.bf16.msra.mxu0 %v14297_v12  ;;  %v14380_v12 = vcombine.high %v515_v1, %v523_v2  ;;  %v14319_v45 = vcombine.low %v453_v30, %v461_v31  ;;  %v17635_v1 = vld [vmem:[%s24906_s4 + $0x404] ss:$16 sps:$4 sm:$0xff]   ;;  %v17633_v2 = vld [vmem:[%s24906_s4 + $0x400] ss:$16 sps:$4 sm:$0xff]  }
  0x5c   : > { %1364 = vmatprep.subr.bf16.mxu0 %v14314_v16  ;;  %v14301_v16 = vcombine.low %v436_v61, %v444_v62 }
  0x5d   : > { %1406 = vmatpush1.bf16.msra.mxu1 %v14299_v35  ;;  %v14304_v35 = vcombine.high %v437_v22, %v445_v23  ;;  %v17650_v22 = vld [vmem:[%s24906_s4 + $0x44c] ss:$16 sps:$4 sm:$0xff]   ;;  %v17657_v23 = vld [vmem:[%s24906_s4 + $0x480] ss:$16 sps:$4 sm:$0xff]  }
  0x5e   : > { %1407 = vmatprep.subr.bf16.mxu1 %v14316_v41  ;;  %v516_v41 = vld [vmem:[%s24903_s1 + $0x330] sm:$0xff] }
  0x5f   : > { %1365 = vmatpush1.bf16.msra.mxu0 %v14313_v20  ;;  %v14318_v20 = vcombine.high %v452_v9, %v460_v10 }
  0x60   : > { %1366 = vmatprep.subr.bf16.mxu0 %v14330_v24  ;;  %v14317_v24 = vcombine.low %v452_v9, %v460_v10  ;;  %v17639_v9 = vld [vmem:[%s24906_s4 + $0x420] ss:$16 sps:$4 sm:$0xff]  }
  0x61   : > { %1408 = vmatpush1.bf16.msra.mxu1 %v14315_v43  ;;  %v14320_v43 = vcombine.high %v453_v30, %v461_v31  ;;  %v17662_v30 = vld [vmem:[%s24906_s4 + $0x48c] ss:$16 sps:$4 sm:$0xff]   ;;  %v17669_v31 = vld [vmem:[%s24906_s4 + $0x4c0] ss:$16 sps:$4 sm:$0xff]  }
  0x62   : > { %1409 = vmatprep.subr.bf16.mxu1 %v14332_v49  ;;  %v485_v49 = vld [vmem:[%s24903_s1 + $0x238] sm:$0xff] }
  0x63   : > { %1367 = vmatpush1.bf16.msra.mxu0 %v14329_v28  ;;  %v14334_v28 = vcombine.high %v468_v17, %v476_v18 }
  0x64   : > { %1368 = vmatprep.subr.bf16.mxu0 %v14346_v32  ;;  %v14333_v32 = vcombine.low %v468_v17, %v476_v18  ;;  %v17644_v17 = vld [vmem:[%s24906_s4 + $0x42c] ss:$16 sps:$4 sm:$0xff]   ;;  %v17651_v18 = vld [vmem:[%s24906_s4 + $0x460] ss:$16 sps:$4 sm:$0xff]  }
  0x65   : > { %1410 = vmatpush1.bf16.msra.mxu1 %v14331_v51  ;;  %v532_v51 = vld [vmem:[%s24903_s1 + $0x3b0] sm:$0xff] }
  0x66   : > { %1411 = vmatprep.subr.bf16.mxu1 %v14348_v57  ;;  %v14398_v56 = vcombine.high %v532_v51, %v540_v52  ;;  %v501_v57 = vld [vmem:[%s24903_s1 + $0x2b8] sm:$0xff]  ;;  %v14397_v61 = vcombine.low %v532_v51, %v540_v52  ;;  %v17699_v51 = vld [vmem:[%s24906_s4 + $0x560] ss:$16 sps:$4 sm:$0xff]   ;;  %v17707_v52 = vld [vmem:[%s24906_s4 + $0x584] ss:$16 sps:$4 sm:$0xff]  }
  0x67   : > { %1369 = vmatpush1.bf16.msra.mxu0 %v14345_v38  ;;  %v469_v38 = vld [vmem:[%s24903_s1 + $0x1b8] sm:$0xff] }
  0x68   : > { %1370 = vmatprep.subr.bf16.mxu0 %v14362_v42  ;;  %v524_v42 = vld [vmem:[%s24903_s1 + $0x370] sm:$0xff]  ;;  %v14336_v47 = vcombine.high %v469_v38, %v477_v39  ;;  %v14335_v53 = vcombine.low %v469_v38, %v477_v39  ;;  %v17674_v38 = vld [vmem:[%s24906_s4 + $0x4cc] ss:$16 sps:$4 sm:$0xff]  }
  0x69   : > { %1412 = vmatpush1.bf16.msra.mxu1 %v14347_v59  ;;  %v14382_v48 = vcombine.high %v516_v41, %v524_v42  ;;  %v17681_v39 = vld [vmem:[%s24906_s4 + $0x500] ss:$16 sps:$4 sm:$0xff]  }
  0x6a   : > { %1413 = vmatprep.subr.bf16.mxu1 %v14364_v0  ;;  %v525_v0 = vld [vmem:[%s24903_s1 + $0x378] sm:$0xff] }
  0x6b   : > { %1371 = vmatpush1.bf16.msra.mxu0 %v14361_v46  ;;  %v14365_v46 = vcombine.low %v500_v33, %v508_v34  ;;  %v17660_v33 = vld [vmem:[%s24906_s4 + $0x488] ss:$16 sps:$4 sm:$0xff]   ;;  %v17668_v34 = vld [vmem:[%s24906_s4 + $0x4ac] ss:$16 sps:$4 sm:$0xff]  }
  0x6c   : > { %1372 = vmatprep.subr.bf16.mxu0 %v14378_v50  ;;  %v493_v50 = vld [vmem:[%s24903_s1 + $0x278] sm:$0xff] }
  0x6d   : > { %1414 = vmatpush1.bf16.msra.mxu1 %v14363_v4  ;;  %v14352_v55 = vcombine.high %v485_v49, %v493_v50  ;;  %v14351_v59 = vcombine.low %v485_v49, %v493_v50  ;;  %v533_v4 = vld [vmem:[%s24903_s1 + $0x3b8] sm:$0xff] }
  0x6e   : > { %1415 = vmatprep.subr.bf16.mxu1 %v14380_v12  ;;  %v14400_v12 = vcombine.high %v533_v4, %v541_v5  ;;  %v17684_v49 = vld [vmem:[%s24906_s4 + $0x508] ss:$16 sps:$4 sm:$0xff]   ;;  %v17692_v50 = vld [vmem:[%s24906_s4 + $0x52c] ss:$16 sps:$4 sm:$0xff]  }
  0x6f   : > { %1373 = vmatpush1.bf16.msra.mxu0 %v14377_v54  ;;  %v14381_v54 = vcombine.low %v516_v41, %v524_v42  ;;  %v17672_v41 = vld [vmem:[%s24906_s4 + $0x4c8] ss:$16 sps:$4 sm:$0xff]   ;;  %v17680_v42 = vld [vmem:[%s24906_s4 + $0x4ec] ss:$16 sps:$4 sm:$0xff]  }
  0x70   : > { %1374 = vmatprep.subr.bf16.mxu0 %v14394_v58  ;;  %v509_v58 = vld [vmem:[%s24903_s1 + $0x2f8] sm:$0xff] }
  0x71   : > { %1416 = vmatpush1.bf16.msra.mxu1 %v14379_v13  ;;  %v14368_v62 = vcombine.high %v501_v57, %v509_v58  ;;  %v17638_v13 = vld [vmem:[%s24906_s4 + $0x40c] ss:$16 sps:$4 sm:$0xff]  }
  0x72   : > { %1417 = vmatprep.subr.bf16.mxu1 %v14396_v19  ;;  %v17659_v19 = vld [vmem:[%s24906_s4 + $0x484] ss:$16 sps:$4 sm:$0xff]  }
  0x73   : > { %1375 = vmatpush1.bf16.msra.mxu0 %v14393_v60  ;;  %v517_v60 = vld [vmem:[%s24903_s1 + $0x338] sm:$0xff] }
  0x74   : > { %1446 = vmatprep.subr.bf16.mxu0 %v14286_v3  ;;  %v14367_v3 = vcombine.low %v501_v57, %v509_v58  ;;  %v14383_v10 = vcombine.low %v517_v60, %v525_v0  ;;  %v17696_v57 = vld [vmem:[%s24906_s4 + $0x548] ss:$16 sps:$4 sm:$0xff]   ;;  %v17704_v58 = vld [vmem:[%s24906_s4 + $0x56c] ss:$16 sps:$4 sm:$0xff]  }
  0x75   : > { %1418 = vmatpush1.bf16.msra.mxu1 %v14395_v21  ;;  %v19329_v21 = vld [vmem:[%s19474_s15] sm:$0xff]  }
  0x76   : > { %1393 = vmatmul.mubr.bf16.vlgmr.msra.gmra.mrb[8].mxu0 %v19555_v63  ;;  %1489 = vmatprep.subr.bf16.mxu1 %v14288_v27  ;;  %v17663_v27 = vld [vmem:[%s24906_s4 + $0x4a0] ss:$16 sps:$4 sm:$0xff]  }
  0x77   : > { %1447 = vmatpush1.bf16.msra.mxu0 %v14285_v8  ;;  %1478 = vmatprep.mubr.bf16.mxu0 %v24914_v6  ;;  %v14384_v8 = vcombine.high %v517_v60, %v525_v0  ;;  %v17719_v60 = vld [vmem:[%s24906_s4 + $0x5c4] ss:$16 sps:$4 sm:$0xff]   ;;  %v17717_v0 = vld [vmem:[%s24906_s4 + $0x5c0] ss:$16 sps:$4 sm:$0xff]  }
  0x78   : > { %1448 = vmatprep.subr.bf16.mxu0 %v14302_v11  ;;  %1436 = vmatmul.mubr.bf16.vlgmr.msra.gmra.mrb[8].mxu1 %v19555_v63  ;;  %v17647_v11 = vld [vmem:[%s24906_s4 + $0x444] ss:$16 sps:$4 sm:$0xff]  }
  0x79   : > { %1490 = vmatpush1.bf16.msra.mxu1 %v14287_v29  ;;  %1521 = vmatprep.mubr.bf16.mxu1 %v24914_v6  ;;  %v17654_v29 = vld [vmem:[%s24906_s4 + $0x468] ss:$16 sps:$4 sm:$0xff]  }
  0x7a   : > { %1491 = vmatprep.subr.bf16.mxu1 %v14304_v35  ;;  %v17675_v35 = vld [vmem:[%s24906_s4 + $0x4e0] ss:$16 sps:$4 sm:$0xff]  }
  0x7b   : > { %1449 = vmatpush1.bf16.msra.mxu0 %v14301_v16  ;;  %v17636_v16 = vld [vmem:[%s24906_s4 + $0x408] ss:$16 sps:$4 sm:$0xff]  }
  0x7c   : > { %1450 = vmatprep.subr.bf16.mxu0 %v14318_v20  ;;  %v17642_v20 = vld [vmem:[%s24906_s4 + $0x428] ss:$16 sps:$4 sm:$0xff]  }
  0x7d   : > { %1492 = vmatpush1.bf16.msra.mxu1 %v14303_v37  ;;  %v17666_v37 = vld [vmem:[%s24906_s4 + $0x4a8] ss:$16 sps:$4 sm:$0xff]  }
  0x7e   : > { %1493 = vmatprep.subr.bf16.mxu1 %v14320_v43  ;;  %v17687_v43 = vld [vmem:[%s24906_s4 + $0x520] ss:$16 sps:$4 sm:$0xff]  }
  0x7f   : > { %1451 = vmatpush1.bf16.msra.mxu0 %v14317_v24  ;;  %v17665_v24 = vld [vmem:[%s24906_s4 + $0x4a4] ss:$16 sps:$4 sm:$0xff]  }
  0x80   : > { %1452 = vmatprep.subr.bf16.mxu0 %v14334_v28  ;;  %v17671_v28 = vld [vmem:[%s24906_s4 + $0x4c4] ss:$16 sps:$4 sm:$0xff]  }
  0x81   : > { %1494 = vmatpush1.bf16.msra.mxu1 %v14319_v45  ;;  %v17678_v45 = vld [vmem:[%s24906_s4 + $0x4e8] ss:$16 sps:$4 sm:$0xff]  }
  0x82   : > { %1495 = vmatprep.subr.bf16.mxu1 %v14336_v47  ;;  %v17693_v47 = vld [vmem:[%s24906_s4 + $0x540] ss:$16 sps:$4 sm:$0xff]  }
  0x83   : > { %1453 = vmatpush1.bf16.msra.mxu0 %v14333_v32  ;;  %v17677_v32 = vld [vmem:[%s24906_s4 + $0x4e4] ss:$16 sps:$4 sm:$0xff]  }
  0x84   : > { %1454 = vmatprep.subr.bf16.mxu0 %v14350_v36  ;;  %v17683_v36 = vld [vmem:[%s24906_s4 + $0x504] ss:$16 sps:$4 sm:$0xff]  }
  0x85   : > { %1496 = vmatpush1.bf16.msra.mxu1 %v14335_v53  ;;  %v17690_v53 = vld [vmem:[%s24906_s4 + $0x528] ss:$16 sps:$4 sm:$0xff]  }
  0x86   : > { %1497 = vmatprep.subr.bf16.mxu1 %v14352_v55  ;;  %v17705_v55 = vld [vmem:[%s24906_s4 + $0x580] ss:$16 sps:$4 sm:$0xff]  }
  0x87   : > { %1455 = vmatpush1.bf16.msra.mxu0 %v14349_v40  ;;  %v17689_v40 = vld [vmem:[%s24906_s4 + $0x524] ss:$16 sps:$4 sm:$0xff]  }
  0x88   : > { %1456 = vmatprep.subr.bf16.mxu0 %v14366_v44  ;;  %v17695_v44 = vld [vmem:[%s24906_s4 + $0x544] ss:$16 sps:$4 sm:$0xff]  }
  0x89   : > { %1498 = vmatpush1.bf16.msra.mxu1 %v14351_v59  ;;  %v17711_v59 = vld [vmem:[%s24906_s4 + $0x5a0] ss:$16 sps:$4 sm:$0xff]  }
  0x8a   : > { %1499 = vmatprep.subr.bf16.mxu1 %v14368_v62  ;;  %v17710_v62 = vld [vmem:[%s24906_s4 + $0x58c] ss:$16 sps:$4 sm:$0xff]  }
  0x8b   : > { %1457 = vmatpush1.bf16.msra.mxu0 %v14365_v46  ;;  %v17686_v46 = vld [vmem:[%s24906_s4 + $0x50c] ss:$16 sps:$4 sm:$0xff]  }
  0x8c   : > { %1458 = vmatprep.subr.bf16.mxu0 %v14382_v48  ;;  %v17701_v48 = vld [vmem:[%s24906_s4 + $0x564] ss:$16 sps:$4 sm:$0xff]  }
  0x8d   : > { %1500 = vmatpush1.bf16.msra.mxu1 %v14367_v3  ;;  %v17716_v3 = vld [vmem:[%s24906_s4 + $0x5ac] ss:$16 sps:$4 sm:$0xff]  }
  0x8e   : > { %1501 = vmatprep.subr.bf16.mxu1 %v14384_v8  ;;  %v17722_v8 = vld [vmem:[%s24906_s4 + $0x5cc] ss:$16 sps:$4 sm:$0xff]  }
  0x8f   : > { %1459 = vmatpush1.bf16.msra.mxu0 %v14381_v54  ;;  %v17698_v54 = vld [vmem:[%s24906_s4 + $0x54c] ss:$16 sps:$4 sm:$0xff]  }
  0x90   : > { %1460 = vmatprep.subr.bf16.mxu0 %v14398_v56  ;;  %v17713_v56 = vld [vmem:[%s24906_s4 + $0x5a4] ss:$16 sps:$4 sm:$0xff]  }
  0x91   : > { %1502 = vmatpush1.bf16.msra.mxu1 %v14383_v10  ;;  %v17728_v10 = vld [vmem:[%s24906_s4 + $0x5ec] ss:$16 sps:$4 sm:$0xff]  }
  0x92   : > { %1503 = vmatprep.subr.bf16.mxu1 %v14400_v12  ;;  %v17734_v12 = vld [vmem:[%s24906_s4 + $0x60c] ss:$16 sps:$4 sm:$0xff]  }
  0x93   : > { %1461 = vmatpush1.bf16.msra.mxu0 %v14397_v61  ;;  %v17702_v61 = vld [vmem:[%s24906_s4 + $0x568] ss:$16 sps:$4 sm:$0xff]  }
  0x94   : > { %2761 = vmatprep.subr.bf16.mxu0 %v17635_v1  ;;  %v17708_v1 = vld [vmem:[%s24906_s4 + $0x588] ss:$16 sps:$4 sm:$0xff]  }
  0x96   : > { %1479 = vmatmul.mubr.bf16.vlgmr.msra.gmra.mrb[12].mxu0 %v19555_v63  ;;  %v14399_v63 = vcombine.low %v533_v4, %v541_v5  ;;  %v17723_v4 = vld [vmem:[%s24906_s4 + $0x5e0] ss:$16 sps:$4 sm:$0xff]   ;;  %v17714_v5 = vld [vmem:[%s24906_s4 + $0x5a8] ss:$16 sps:$4 sm:$0xff]  }
  0x97   : > { %2762 = vmatpush1.bf16.msra.mxu0 %v17633_v2  ;;  %v17725_v2 = vld [vmem:[%s24906_s4 + $0x5e4] ss:$16 sps:$4 sm:$0xff]  }
  0x98   : > { %2763 = vmatprep.subr.bf16.mxu0 %v17641_v7  ;;  %1504 = vmatpush1.bf16.msra.mxu1 %v14399_v63  ;;  %v17731_v7 = vld [vmem:[%s24906_s4 + $0x604] ss:$16 sps:$4 sm:$0xff]  }
  0x99   : > { %2907 = vmatprep.subr.bf16.mxu1 %v17638_v13  ;;  %v1568_v13 = vlaneseq  ;;  %v20056_v63 = vld [vmem:[%s24904_s2] sm:$0xff] }
  0x9b   : > { %2764 = vmatpush1.bf16.msra.mxu0 %v17639_v9  ;;  %1522 = vmatmul.mubr.bf16.vlgmr.msra.gmra.mrb[12].mxu1 %v19329_v21  ;;  %v17720_v9 = vld [vmem:[%s24906_s4 + $0x5c8] ss:$16 sps:$4 sm:$0xff]  }
  0x9c   : > { %2765 = vmatprep.subr.bf16.mxu0 %v17647_v11  ;;  %2908 = vmatpush1.bf16.msra.mxu1 %v17636_v16  ;;  %v17726_v11 = vld [vmem:[%s24906_s4 + $0x5e8] ss:$16 sps:$4 sm:$0xff]  }
  0x9d   : > { %2909 = vmatprep.subr.bf16.mxu1 %v17644_v17  ;;  %v20067_v17 = vld [vmem:[%s24905_s3] sm:$0xff] }
  0x9f   : > { %2766 = vmatpush1.bf16.msra.mxu0 %v17645_v14  ;;  %v20051_v14 = vshrl.u32 %v1568_v13, 7 }
  0xa0   : > { %2767 = vmatprep.subr.bf16.mxu0 %v17653_v15  ;;  %2910 = vmatpush1.bf16.msra.mxu1 %v17642_v20 }
  0xa1   : > { %2911 = vmatprep.subr.bf16.mxu1 %v17650_v22  ;;  %v20059_v15 = vsub.s32 0, %v20051_v14  ;;  %v20062_v16 = vsub.s32 1, %v20051_v14 }
  0xa3   : > { %2768 = vmatpush1.bf16.msra.mxu0 %v17651_v18  ;;  %24952 = vst [vmem:[#allocation7_spill] sm:$0xff] %v20059_v15  ;;  %24953 = vst [vmem:[#allocation8_spill] sm:$0xff] %v20062_v16  ;;  %v1571_v18 = vrot.slane %v20056_v63, %v20059_v15  ;;  %v1575_v20 = vrot.slane %v20056_v63, %v20062_v16  ;;  %v1687_v22 = vrot.slane %v20067_v17, %v20059_v15 }
  0xa4   : > { %2769 = vmatprep.subr.bf16.mxu0 %v17659_v19  ;;  %2912 = vmatpush1.bf16.msra.mxu1 %v17648_v25 }
  0xa5   : > { %2913 = vmatprep.subr.bf16.mxu1 %v17656_v26 }
  0xa7   : > { %2770 = vmatpush1.bf16.msra.mxu0 %v17657_v23 }
  0xa8   : > { %2771 = vmatprep.subr.bf16.mxu0 %v17665_v24  ;;  %2914 = vmatpush1.bf16.msra.mxu1 %v17654_v29 }
  0xa9   : > { %2915 = vmatprep.subr.bf16.mxu1 %v17662_v30  ;;  %v1691_v30 = vrot.slane %v20067_v17, %v20062_v16 }
  0xab   : > { %2772 = vmatpush1.bf16.msra.mxu0 %v17663_v27 }
  0xac   : > { %2773 = vmatprep.subr.bf16.mxu0 %v17671_v28  ;;  %2916 = vmatpush1.bf16.msra.mxu1 %v17660_v33 }
  0xad   : > { %2917 = vmatprep.subr.bf16.mxu1 %v17668_v34 }
  0xaf   : > { %2774 = vmatpush1.bf16.msra.mxu0 %v17669_v31 }
  0xb0   : > { %2775 = vmatprep.subr.bf16.mxu0 %v17677_v32  ;;  %2918 = vmatpush1.bf16.msra.mxu1 %v17666_v37  ;;  %v20081_v37 = vsub.s32 3, %v20051_v14 }
  0xb1   : > { %2919 = vmatprep.subr.bf16.mxu1 %v17674_v38 }
  0xb2   : > { %24955 = vst [vmem:[#allocation10_spill] sm:$0xff] %v20081_v37 }
  0xb3   : > { %2776 = vmatpush1.bf16.msra.mxu0 %v17675_v35  ;;  %v20078_v35 = vsub.s32 2, %v20051_v14 }
  0xb4   : > { %2777 = vmatprep.subr.bf16.mxu0 %v17683_v36  ;;  %2920 = vmatpush1.bf16.msra.mxu1 %v17672_v41 }
  0xb5   : > { %2921 = vmatprep.subr.bf16.mxu1 %v17680_v42  ;;  %24954 = vst [vmem:[#allocation9_spill] sm:$0xff] %v20078_v35  ;;  %v17729_v42 = vld [vmem:[%s24906_s4 + $0x600] ss:$16 sps:$4 sm:$0xff]  }
  0xb7   : > { %2778 = vmatpush1.bf16.msra.mxu0 %v17681_v39 }
  0xb8   : > { %2779 = vmatprep.subr.bf16.mxu0 %v17689_v40  ;;  %2922 = vmatpush1.bf16.msra.mxu1 %v17678_v45  ;;  %v17737_v45 = vld [vmem:[%s24906_s4 + $0x624] ss:$16 sps:$4 sm:$0xff]  }
  0xb9   : > { %2923 = vmatprep.subr.bf16.mxu1 %v17686_v46  ;;  %v17740_v46 = vld [vmem:[%s24906_s4 + $0x62c] ss:$16 sps:$4 sm:$0xff]  }
  0xbb   : > { %2780 = vmatpush1.bf16.msra.mxu0 %v17687_v43  ;;  %v17732_v43 = vld [vmem:[%s24906_s4 + $0x608] ss:$16 sps:$4 sm:$0xff]  }
  0xbc   : > { %2781 = vmatprep.subr.bf16.mxu0 %v17695_v44  ;;  %2924 = vmatpush1.bf16.msra.mxu1 %v17684_v49  ;;  %v1579_v44 = vrot.slane %v20056_v63, %v20078_v35 }
  0xbd   : > { %2925 = vmatprep.subr.bf16.mxu1 %v17692_v50  ;;  %v1695_v50 = vrot.slane %v20067_v17, %v20078_v35 }
  0xbf   : > { %2782 = vmatpush1.bf16.msra.mxu0 %v17693_v47 }
  0xc0   : > { %2783 = vmatprep.subr.bf16.mxu0 %v17701_v48  ;;  %2926 = vmatpush1.bf16.msra.mxu1 %v17690_v53  ;;  %v1583_v48 = vrot.slane %v20056_v63, %v20081_v37  ;;  %v1699_v53 = vrot.slane %v20067_v17, %v20081_v37 }
  0xc1   : > { %2927 = vmatprep.subr.bf16.mxu1 %v17698_v54 }
  0xc3   : > { %2784 = vmatpush1.bf16.msra.mxu0 %v17699_v51 }
  0xc4   : > { %2785 = vmatprep.subr.bf16.mxu0 %v17707_v52  ;;  %2928 = vmatpush1.bf16.msra.mxu1 %v17696_v57 }
  0xc5   : > { %2929 = vmatprep.subr.bf16.mxu1 %v17704_v58 }
  0xc7   : > { %2786 = vmatpush1.bf16.msra.mxu0 %v17705_v55  ;;  %v17735_v55 = vld [vmem:[%s24906_s4 + $0x620] ss:$16 sps:$4 sm:$0xff]  }
  0xc8   : > { %2787 = vmatprep.subr.bf16.mxu0 %v17713_v56  ;;  %2930 = vmatpush1.bf16.msra.mxu1 %v17702_v61  ;;  %v17738_v56 = vld [vmem:[%s24906_s4 + $0x628] ss:$16 sps:$4 sm:$0xff]   ;;  %v17746_v61 = vld [vmem:[%s24906_s4 + $0x64c] ss:$16 sps:$4 sm:$0xff]  }
  0xc9   : > { %2931 = vmatprep.subr.bf16.mxu1 %v17710_v62 }
  0xcb   : > { %2788 = vmatpush1.bf16.msra.mxu0 %v17711_v59 }
  0xcc   : > { %2789 = vmatprep.subr.bf16.mxu0 %v17719_v60  ;;  %2932 = vmatpush1.bf16.msra.mxu1 %v17708_v1  ;;  %v17743_v60 = vld [vmem:[%s24906_s4 + $0x644] ss:$16 sps:$4 sm:$0xff]  }
  0xcd   : > { %2933 = vmatprep.subr.bf16.mxu1 %v17716_v3 }
  0xcf   : > { %2790 = vmatpush1.bf16.msra.mxu0 %v17717_v0 }
  0xd0   : > { %2791 = vmatprep.subr.bf16.mxu0 %v17725_v2  ;;  %2934 = vmatpush1.bf16.msra.mxu1 %v17714_v5  ;;  %v17741_v5 = vld [vmem:[%s24906_s4 + $0x640] ss:$16 sps:$4 sm:$0xff]  }
  0xd1   : > { %2935 = vmatprep.subr.bf16.mxu1 %v17722_v8 }
  0xd3   : > { %2792 = vmatpush1.bf16.msra.mxu0 %v17723_v4 }
  0xd4   : > { %2834 = vmatprep.subr.bf16.mxu0 %v17731_v7  ;;  %2936 = vmatpush1.bf16.msra.mxu1 %v17720_v9  ;;  %v17744_v7 = vld [vmem:[%s24906_s4 + $0x648] ss:$16 sps:$4 sm:$0xff]   ;;  %v17749_v9 = vld [vmem:[%s24906_s4 + $0x664] ss:$16 sps:$4 sm:$0xff]  }
  0xd5   : > { %2937 = vmatprep.subr.bf16.mxu1 %v17728_v10  ;;  %v17752_v10 = vld [vmem:[%s24906_s4 + $0x66c] ss:$16 sps:$4 sm:$0xff]  }
  0xd8   : > { %2938 = vmatpush1.bf16.msra.mxu1 %v17726_v11 }
  0xd9   : > { %2980 = vmatprep.subr.bf16.mxu1 %v17734_v12 }
 0x109   : > { %v1222_v19 = vpop.f32.mrb[0].mxu0  ;;  %v1265_v47 = vpop.f32.mrb[0].mxu1 }
 0x10a   : > { %v1532_v21 = vmax.f32 %v1222_v19, 0.0  ;;  %v1224_v23 = vpop.f32.mrb[1].mxu0  ;;  %v1534_v49 = vmax.f32 %v1265_v47, 0.0  ;;  %v1267_v51 = vpop.f32.mrb[1].mxu1  ;;  %v17750_v19 = vld [vmem:[%s24906_s4 + $0x668] ss:$16 sps:$4 sm:$0xff]  }
 0x10b   : > { %v1533_v24 = vmax.f32 %v1224_v23, 0.0  ;;  %v1226_v25 = vpop.f32.mrb[2].mxu0  ;;  %v1535_v52 = vmax.f32 %v1267_v51, 0.0  ;;  %v1269_v54 = vpop.f32.mrb[2].mxu1  ;;  %v17756_v23 = vld [vmem:[%s24906_s4 + $0x688] ss:$16 sps:$4 sm:$0xff]  }
 0x10c   : > { %v1648_v26 = vmul.f32 %v1571_v18, %v1532_v21  ;;  %v1548_v27 = vmax.f32 %v1226_v25, 0.0  ;;  %v1228_v28 = vpop.f32.mrb[3].mxu0  ;;  %v1650_v57 = vmul.f32 %v1579_v44, %v1534_v49  ;;  %v1550_v58 = vmax.f32 %v1269_v54, 0.0  ;;  %v1271_v59 = vpop.f32.mrb[3].mxu1  ;;  %v17758_v21 = vld [vmem:[%s24906_s4 + $0x68c] ss:$16 sps:$4 sm:$0xff]  }
 0x10d   : > { %v1649_v29 = vmul.f32 %v1575_v20, %v1533_v24  ;;  %v1549_v31 = vmax.f32 %v1228_v28, 0.0  ;;  %v1651_v62 = vmul.f32 %v1583_v48, %v1535_v52  ;;  %v1551_v0 = vmax.f32 %v1271_v59, 0.0  ;;  %v17761_v25 = vld [vmem:[%s24906_s4 + $0x6a4] ss:$16 sps:$4 sm:$0xff]   ;;  %v17759_v28 = vld [vmem:[%s24906_s4 + $0x6a0] ss:$16 sps:$4 sm:$0xff]  }
 0x10e   : > { %v1764_v32 = vadd.f32 %v1687_v22, %v1648_v26  ;;  %v1664_v33 = vmul.f32 %v1571_v18, %v1548_v27  ;;  %v1766_v1 = vadd.f32 %v1695_v50, %v1650_v57  ;;  %v1666_v2 = vmul.f32 %v1579_v44, %v1550_v58  ;;  %v17747_v18 = vld [vmem:[%s24906_s4 + $0x660] ss:$16 sps:$4 sm:$0xff]   ;;  %v17764_v26 = vld [vmem:[%s24906_s4 + $0x6ac] ss:$16 sps:$4 sm:$0xff]   ;;  %v17773_v49 = vld [vmem:[%s24906_s4 + $0x6e4] ss:$16 sps:$4 sm:$0xff]  }
 0x10f   : > { %v1665_v34 = vmul.f32 %v1575_v20, %v1549_v31  ;;  %v1765_v38 = vadd.f32 %v1691_v30, %v1649_v29  ;;  %v1767_v3 = vadd.f32 %v1699_v53, %v1651_v62  ;;  %v1667_v4 = vmul.f32 %v1583_v48, %v1551_v0  ;;  %v17755_v20 = vld [vmem:[%s24906_s4 + $0x684] ss:$16 sps:$4 sm:$0xff]   ;;  %v17762_v29 = vld [vmem:[%s24906_s4 + $0x6a8] ss:$16 sps:$4 sm:$0xff]   ;;  %v17765_v44 = vld [vmem:[%s24906_s4 + $0x6c0] ss:$16 sps:$4 sm:$0xff]  }
 0x110   : > { %v1780_v36 = vadd.f32 %v1687_v22, %v1664_v33  ;;  %v1782_v8 = vadd.f32 %v1695_v50, %v1666_v2  ;;  %v17753_v22 = vld [vmem:[%s24906_s4 + $0x680] ss:$16 sps:$4 sm:$0xff]   ;;  %v20158_v24 = vsub.s32 4, %v20051_v14  ;;  %v20167_v27 = vsub.s32 5, %v20051_v14  ;;  %v17767_v31 = vld [vmem:[%s24906_s4 + $0x6c4] ss:$16 sps:$4 sm:$0xff]  }
 0x111   : > { %v1781_v39 = vadd.f32 %v1691_v30, %v1665_v34  ;;  %v1783_v11 = vadd.f32 %v1699_v53, %v1667_v4  ;;  %v17776_v50 = vld [vmem:[%s24906_s4 + $0x6ec] ss:$16 sps:$4 sm:$0xff]   ;;  %v17771_v57 = vld [vmem:[%s24906_s4 + $0x6e0] ss:$16 sps:$4 sm:$0xff]   ;;  %v17774_v58 = vld [vmem:[%s24906_s4 + $0x6e8] ss:$16 sps:$4 sm:$0xff]  }
 0x112   : > { %v20083_v40 = vpack.c.bf16 %v1780_v36, %v1764_v32  ;;  %v20135_v12 = vpack.c.bf16 %v1782_v8, %v1766_v1  ;;  %v1587_v30 = vrot.slane %v20056_v63, %v20158_v24  ;;  %v17770_v32 = vld [vmem:[%s24906_s4 + $0x6cc] ss:$16 sps:$4 sm:$0xff]   ;;  %v1591_v34 = vrot.slane %v20056_v63, %v20167_v27  ;;  %v17785_v8 = vld [vmem:[%s24906_s4 + $0x724] ss:$16 sps:$4 sm:$0xff]  }
 0x113   : > { %v20085_v41 = vpack.c.bf16 %v1781_v39, %v1765_v38  ;;  %v20137_v13 = vpack.c.bf16 %v1783_v11, %v1767_v3  ;;  %v1703_v38 = vrot.slane %v20067_v17, %v20158_v24  ;;  %v1707_v52 = vrot.slane %v20067_v17, %v20167_v27  ;;  %v17782_v62 = vld [vmem:[%s24906_s4 + $0x70c] ss:$16 sps:$4 sm:$0xff]  }
 0x114   : > { %v20208_v59 = vsub.s32 6, %v20051_v14  ;;  %v20217_v0 = vsub.s32 7, %v20051_v14 }
 0x115   : > { %2793 = vmatprep.mubr.bf16.mxu0 %v20085_v41  ;;  %2939 = vmatprep.mubr.bf16.mxu1 %v20085_v41 }
 0x116   : > { %2794 = vmatmul.mubr.bf16.vlgmr.msra.gmra.mrb[16].mxu0 %v20083_v40  ;;  %2940 = vmatmul.mubr.bf16.vlgmr.msra.gmra.mrb[16].mxu1 %v20083_v40  ;;  %v1595_v14 = vrot.slane %v20056_v63, %v20208_v59  ;;  %v1599_v11 = vrot.slane %v20056_v63, %v20217_v0  ;;  %v17783_v63 = vld [vmem:[%s24906_s4 + $0x720] ss:$16 sps:$4 sm:$0xff]  }
 0x117   : > { %2835 = vmatpush1.bf16.msra.mxu0 %v17729_v42  ;;  %2981 = vmatpush1.bf16.msra.mxu1 %v17732_v43 }
 0x118   : > { %2836 = vmatprep.subr.bf16.mxu0 %v17737_v45  ;;  %2982 = vmatprep.subr.bf16.mxu1 %v17740_v46  ;;  %v17768_v45 = vld [vmem:[%s24906_s4 + $0x6c8] ss:$16 sps:$4 sm:$0xff]  }
 0x11b   : > { %2837 = vmatpush1.bf16.msra.mxu0 %v17735_v55  ;;  %2983 = vmatpush1.bf16.msra.mxu1 %v17738_v56 }
 0x11c   : > { %2838 = vmatprep.subr.bf16.mxu0 %v17743_v60  ;;  %2984 = vmatprep.subr.bf16.mxu1 %v17746_v61  ;;  %v17779_v61 = vld [vmem:[%s24906_s4 + $0x704] ss:$16 sps:$4 sm:$0xff]  }
 0x11f   : > { %2839 = vmatpush1.bf16.msra.mxu0 %v17741_v5  ;;  %2985 = vmatpush1.bf16.msra.mxu1 %v17744_v7  ;;  %v17777_v5 = vld [vmem:[%s24906_s4 + $0x700] ss:$16 sps:$4 sm:$0xff]   ;;  %v17780_v7 = vld [vmem:[%s24906_s4 + $0x708] ss:$16 sps:$4 sm:$0xff]  }
 0x120   : > { %2840 = vmatprep.subr.bf16.mxu0 %v17749_v9  ;;  %2986 = vmatprep.subr.bf16.mxu1 %v17752_v10  ;;  %v17788_v9 = vld [vmem:[%s24906_s4 + $0x72c] ss:$16 sps:$4 sm:$0xff]  }
 0x123   : > { %2841 = vmatpush1.bf16.msra.mxu0 %v17747_v18  ;;  %2987 = vmatpush1.bf16.msra.mxu1 %v17750_v19  ;;  %v1711_v19 = vrot.slane %v20067_v17, %v20208_v59 }
 0x124   : > { %2842 = vmatprep.subr.bf16.mxu0 %v17755_v20  ;;  %2988 = vmatprep.subr.bf16.mxu1 %v17758_v21 }
 0x127   : > { %2843 = vmatpush1.bf16.msra.mxu0 %v17753_v22  ;;  %2989 = vmatpush1.bf16.msra.mxu1 %v17756_v23  ;;  %v1715_v22 = vrot.slane %v20067_v17, %v20217_v0  ;;  %v17791_v17 = vld [vmem:[%s24906_s4 + $0x744] ss:$16 sps:$4 sm:$0xff]  }
 0x128   : > { %2844 = vmatprep.subr.bf16.mxu0 %v17761_v25  ;;  %2990 = vmatprep.subr.bf16.mxu1 %v17764_v26  ;;  %v17786_v25 = vld [vmem:[%s24906_s4 + $0x728] ss:$16 sps:$4 sm:$0xff]  }
 0x129   : > { %v1308_v33 = vpop.f32.mrb[4].mxu0 }
 0x12a   : > { %v1536_v36 = vmax.f32 %v1308_v33, 0.0  ;;  %v1310_v39 = vpop.f32.mrb[5].mxu0  ;;  %v17789_v33 = vld [vmem:[%s24906_s4 + $0x740] ss:$16 sps:$4 sm:$0xff]  }
 0x12b   : > { %v1537_v42 = vmax.f32 %v1310_v39, 0.0  ;;  %v1312_v43 = vpop.f32.mrb[6].mxu0  ;;  %2845 = vmatpush1.bf16.msra.mxu0 %v17759_v28  ;;  %2991 = vmatpush1.bf16.msra.mxu1 %v17762_v29  ;;  %v1351_v10 = vpop.f32.mrb[4].mxu1 }
 0x12c   : > { %v1652_v46 = vmul.f32 %v1587_v30, %v1536_v36  ;;  %v1552_v47 = vmax.f32 %v1312_v43, 0.0  ;;  %v1314_v48 = vpop.f32.mrb[7].mxu0  ;;  %2846 = vmatprep.subr.bf16.mxu0 %v17767_v31  ;;  %2992 = vmatprep.subr.bf16.mxu1 %v17770_v32  ;;  %v1538_v18 = vmax.f32 %v1351_v10, 0.0  ;;  %v1353_v20 = vpop.f32.mrb[5].mxu1 }
 0x12d   : > { %v1653_v51 = vmul.f32 %v1591_v34, %v1537_v42  ;;  %v1553_v53 = vmax.f32 %v1314_v48, 0.0  ;;  %v1539_v21 = vmax.f32 %v1353_v20, 0.0  ;;  %v1355_v23 = vpop.f32.mrb[6].mxu1  ;;  %v17795_v48 = vld [vmem:[%s24906_s4 + $0x760] ss:$16 sps:$4 sm:$0xff]  }
 0x12e   : > { %v1768_v54 = vadd.f32 %v1703_v38, %v1652_v46  ;;  %v1668_v55 = vmul.f32 %v1587_v30, %v1552_v47  ;;  %v1654_v26 = vmul.f32 %v1595_v14, %v1538_v18  ;;  %v1554_v28 = vmax.f32 %v1355_v23, 0.0  ;;  %v1357_v29 = vpop.f32.mrb[7].mxu1  ;;  %v17794_v30 = vld [vmem:[%s24906_s4 + $0x74c] ss:$16 sps:$4 sm:$0xff]   ;;  %v17821_v18 = vld [vmem:[%s24906_s4 + $0x7e4] ss:$16 sps:$4 sm:$0xff]  }
 0x12f   : > { %v1669_v56 = vmul.f32 %v1591_v34, %v1553_v53  ;;  %2847 = vmatpush1.bf16.msra.mxu0 %v17765_v44  ;;  %2993 = vmatpush1.bf16.msra.mxu1 %v17768_v45  ;;  %v1769_v1 = vadd.f32 %v1707_v52, %v1653_v51  ;;  %v1655_v31 = vmul.f32 %v1599_v11, %v1539_v21  ;;  %v1555_v32 = vmax.f32 %v1357_v29, 0.0  ;;  %v17792_v34 = vld [vmem:[%s24906_s4 + $0x748] ss:$16 sps:$4 sm:$0xff]   ;;  %v17797_v44 = vld [vmem:[%s24906_s4 + $0x764] ss:$16 sps:$4 sm:$0xff]  }
 0x130   : > { %v1784_v60 = vadd.f32 %v1703_v38, %v1668_v55  ;;  %2848 = vmatprep.subr.bf16.mxu0 %v17773_v49  ;;  %2994 = vmatprep.subr.bf16.mxu1 %v17776_v50  ;;  %v1770_v36 = vadd.f32 %v1711_v19, %v1654_v26  ;;  %v1670_v38 = vmul.f32 %v1595_v14, %v1554_v28  ;;  %v17800_v45 = vld [vmem:[%s24906_s4 + $0x76c] ss:$16 sps:$4 sm:$0xff]   ;;  %v17798_v49 = vld [vmem:[%s24906_s4 + $0x768] ss:$16 sps:$4 sm:$0xff]   ;;  %v17803_v51 = vld [vmem:[%s24906_s4 + $0x784] ss:$16 sps:$4 sm:$0xff]  }
 0x131   : > { %v1785_v2 = vadd.f32 %v1707_v52, %v1669_v56  ;;  %v1771_v39 = vadd.f32 %v1715_v22, %v1655_v31  ;;  %v1671_v42 = vmul.f32 %v1599_v11, %v1555_v32  ;;  %v17806_v52 = vld [vmem:[%s24906_s4 + $0x78c] ss:$16 sps:$4 sm:$0xff]   ;;  %v17801_v53 = vld [vmem:[%s24906_s4 + $0x780] ss:$16 sps:$4 sm:$0xff]   ;;  %v17809_v55 = vld [vmem:[%s24906_s4 + $0x7a4] ss:$16 sps:$4 sm:$0xff]  }
 0x132   : > { %v20219_v3 = vpack.c.bf16 %v1784_v60, %v1768_v54  ;;  %v1786_v43 = vadd.f32 %v1711_v19, %v1670_v38  ;;  %v17804_v54 = vld [vmem:[%s24906_s4 + $0x788] ss:$16 sps:$4 sm:$0xff]   ;;  %v17812_v56 = vld [vmem:[%s24906_s4 + $0x7ac] ss:$16 sps:$4 sm:$0xff]   ;;  %v17807_v60 = vld [vmem:[%s24906_s4 + $0x7a0] ss:$16 sps:$4 sm:$0xff]  }
 0x133   : > { %v20221_v4 = vpack.c.bf16 %v1785_v2, %v1769_v1  ;;  %2849 = vmatpush1.bf16.msra.mxu0 %v17771_v57  ;;  %2995 = vmatpush1.bf16.msra.mxu1 %v17774_v58  ;;  %v1787_v46 = vadd.f32 %v1715_v22, %v1671_v42  ;;  %v20302_v57 = vld [vmem:[%s24904_s2 + $0x8] sm:$0xff]  ;;  %v17815_v1 = vld [vmem:[%s24906_s4 + $0x7c4] ss:$16 sps:$4 sm:$0xff]   ;;  %v17813_v14 = vld [vmem:[%s24906_s4 + $0x7c0] ss:$16 sps:$4 sm:$0xff]  }
 0x134   : > { %2850 = vmatprep.subr.bf16.mxu0 %v17779_v61  ;;  %2996 = vmatprep.subr.bf16.mxu1 %v17782_v62  ;;  %v20271_v47 = vpack.c.bf16 %v1786_v43, %v1770_v36  ;;  %v20307_v58 = vld [vmem:[%s24905_s3 + $0x8] sm:$0xff]  ;;  %v1603_v62 = vrot.slane %v20302_v57, %v20059_v15 }
 0x135   : > { %2803 = vmatprep.mubr.bf16.mxu0 %v20221_v4  ;;  %2949 = vmatprep.mubr.bf16.mxu1 %v20221_v4  ;;  %v20279_v50 = vpack.c.bf16 %v1787_v46, %v1771_v39  ;;  %v17810_v61 = vld [vmem:[%s24906_s4 + $0x7a8] ss:$16 sps:$4 sm:$0xff]   ;;  %v17818_v2 = vld [vmem:[%s24906_s4 + $0x7cc] ss:$16 sps:$4 sm:$0xff]   ;;  %v1719_v10 = vrot.slane %v20307_v58, %v20059_v15  ;;  %v1723_v26 = vrot.slane %v20307_v58, %v20062_v16 }
 0x136   : > { %2804 = vmatmul.mubr.bf16.gmra.mrb[20].mxu0 %v20219_v3  ;;  %2950 = vmatmul.mubr.bf16.gmra.mrb[20].mxu1 %v20219_v3  ;;  %v17824_v19 = vld [vmem:[%s24906_s4 + $0x7ec] ss:$16 sps:$4 sm:$0xff]   ;;  %v17822_v31 = vld [vmem:[%s24906_s4 + $0x7e8] ss:$16 sps:$4 sm:$0xff]   ;;  %v1615_v46 = vrot.slane %v20302_v57, %v20081_v37 }
 0x137   : > { %2851 = vmatpush1.bf16.msra.mxu0 %v17777_v5  ;;  %2997 = vmatpush1.bf16.msra.mxu1 %v17780_v7  ;;  %v1607_v7 = vrot.slane %v20302_v57, %v20062_v16  ;;  %v17830_v36 = vld [vmem:[%s24906_s4 + $0xc] ss:$16 sps:$4 sm:$0xff]  }
 0x138   : > { %2852 = vmatprep.subr.bf16.mxu0 %v17785_v8  ;;  %2998 = vmatprep.subr.bf16.mxu1 %v17788_v9  ;;  %v17816_v8 = vld [vmem:[%s24906_s4 + $0x7c8] ss:$16 sps:$4 sm:$0xff]  }
 0x13b   : > { %2853 = vmatpush1.bf16.msra.mxu0 %v17783_v63  ;;  %2999 = vmatpush1.bf16.msra.mxu1 %v17786_v25 }
 0x13c   : > { %2854 = vmatprep.subr.bf16.mxu0 %v17791_v17  ;;  %3000 = vmatprep.subr.bf16.mxu1 %v17794_v30  ;;  %v17819_v30 = vld [vmem:[%s24906_s4 + $0x7e0] ss:$16 sps:$4 sm:$0xff]  }
 0x13f   : > { %2855 = vmatpush1.bf16.msra.mxu0 %v17789_v33  ;;  %3001 = vmatpush1.bf16.msra.mxu1 %v17792_v34  ;;  %v17827_v34 = vld [vmem:[%s24906_s4 + $0x4] ss:$16 sps:$4 sm:$0xff]  }
 0x140   : > { %2856 = vmatprep.subr.bf16.mxu0 %v17797_v44  ;;  %3002 = vmatprep.subr.bf16.mxu1 %v17800_v45  ;;  %v1611_v44 = vrot.slane %v20302_v57, %v20078_v35 }
 0x143   : > { %2857 = vmatpush1.bf16.msra.mxu0 %v17795_v48  ;;  %3003 = vmatpush1.bf16.msra.mxu1 %v17798_v49  ;;  %v1727_v49 = vrot.slane %v20307_v58, %v20078_v35 }
 0x144   : > { %2858 = vmatprep.subr.bf16.mxu0 %v17803_v51  ;;  %3004 = vmatprep.subr.bf16.mxu1 %v17806_v52 }
 0x147   : > { %2859 = vmatpush1.bf16.msra.mxu0 %v17801_v53  ;;  %3005 = vmatpush1.bf16.msra.mxu1 %v17804_v54  ;;  %v1731_v53 = vrot.slane %v20307_v58, %v20081_v37 }
 0x148   : > { %2860 = vmatprep.subr.bf16.mxu0 %v17809_v55  ;;  %3006 = vmatprep.subr.bf16.mxu1 %v17812_v56 }
 0x149   : > { %v1394_v5 = vpop.f32.mrb[8].mxu0 }
 0x14a   : > { %v1540_v9 = vmax.f32 %v1394_v5, 0.0  ;;  %v1396_v11 = vpop.f32.mrb[9].mxu0 }
 0x14b   : > { %v1541_v20 = vmax.f32 %v1396_v11, 0.0  ;;  %v1398_v21 = vpop.f32.mrb[10].mxu0  ;;  %2861 = vmatpush1.bf16.msra.mxu0 %v17807_v60  ;;  %3007 = vmatpush1.bf16.msra.mxu1 %v17810_v61  ;;  %v1437_v45 = vpop.f32.mrb[8].mxu1  ;;  %v1619_v11 = vrot.slane %v20302_v57, %v20158_v24 }
 0x14c   : > { %v1656_v22 = vmul.f32 %v1603_v62, %v1540_v9  ;;  %v1556_v23 = vmax.f32 %v1398_v21, 0.0  ;;  %v1400_v63 = vpop.f32.mrb[11].mxu0  ;;  %2862 = vmatprep.subr.bf16.mxu0 %v17815_v1  ;;  %3008 = vmatprep.subr.bf16.mxu1 %v17818_v2  ;;  %v1542_v48 = vmax.f32 %v1437_v45, 0.0  ;;  %v1439_v51 = vpop.f32.mrb[9].mxu1 }
 0x14d   : > { %v1657_v25 = vmul.f32 %v1607_v7, %v1541_v20  ;;  %v1557_v28 = vmax.f32 %v1400_v63, 0.0  ;;  %v1543_v52 = vmax.f32 %v1439_v51, 0.0  ;;  %v1441_v54 = vpop.f32.mrb[10].mxu1 }
 0x14e   : > { %v1772_v29 = vadd.f32 %v1719_v10, %v1656_v22  ;;  %v1672_v17 = vmul.f32 %v1603_v62, %v1556_v23  ;;  %v1658_v55 = vmul.f32 %v1611_v44, %v1542_v48  ;;  %v1558_v56 = vmax.f32 %v1441_v54, 0.0  ;;  %v1443_v60 = vpop.f32.mrb[11].mxu1 }
 0x14f   : > { %v1673_v32 = vmul.f32 %v1607_v7, %v1557_v28  ;;  %2863 = vmatpush1.bf16.msra.mxu0 %v17813_v14  ;;  %3009 = vmatpush1.bf16.msra.mxu1 %v17816_v8  ;;  %v1773_v38 = vadd.f32 %v1723_v26, %v1657_v25  ;;  %v1659_v61 = vmul.f32 %v1615_v46, %v1543_v52  ;;  %v1559_v62 = vmax.f32 %v1443_v60, 0.0 }
 0x150   : > { %v1788_v33 = vadd.f32 %v1719_v10, %v1672_v17  ;;  %2864 = vmatprep.subr.bf16.mxu0 %v17821_v18  ;;  %3010 = vmatprep.subr.bf16.mxu1 %v17824_v19  ;;  %v1774_v1 = vadd.f32 %v1727_v49, %v1658_v55  ;;  %v1674_v2 = vmul.f32 %v1611_v44, %v1558_v56 }
 0x151   : > { %v1789_v39 = vadd.f32 %v1723_v26, %v1673_v32  ;;  %v1775_v5 = vadd.f32 %v1731_v53, %v1659_v61  ;;  %v1675_v7 = vmul.f32 %v1615_v46, %v1559_v62  ;;  %v1623_v19 = vrot.slane %v20302_v57, %v20167_v27  ;;  %v17828_v61 = vld [vmem:[%s24906_s4 + $0x8] ss:$16 sps:$4 sm:$0xff]  }
 0x152   : > { %v20353_v42 = vpack.c.bf16 %v1788_v33, %v1772_v29  ;;  %v1790_v14 = vadd.f32 %v1727_v49, %v1674_v2  ;;  %v1735_v25 = vrot.slane %v20307_v58, %v20158_v24  ;;  %v1739_v17 = vrot.slane %v20307_v58, %v20167_v27  ;;  %v17833_v2 = vld [vmem:[%s24906_s4 + $0x24] ss:$16 sps:$4 sm:$0xff]  }
 0x153   : > { %v20355_v43 = vpack.c.bf16 %v1789_v39, %v1773_v38  ;;  %2865 = vmatpush1.bf16.msra.mxu0 %v17819_v30  ;;  %3011 = vmatpush1.bf16.msra.mxu1 %v17822_v31  ;;  %v1791_v8 = vadd.f32 %v1731_v53, %v1675_v7  ;;  %v1627_v24 = vrot.slane %v20302_v57, %v20208_v59 }
 0x154   : > { %3693 = vmatprep.subr.bf16.mxu0 %v17827_v34  ;;  %3839 = vmatprep.subr.bf16.mxu1 %v17830_v36  ;;  %v20369_v9 = vpack.c.bf16 %v1790_v14, %v1774_v1  ;;  %v1631_v46 = vrot.slane %v20302_v57, %v20217_v0  ;;  %v1743_v48 = vrot.slane %v20307_v58, %v20208_v59  ;;  %v17825_v59 = vld [vmem:[%s24906_s4] ss:$16 sps:$4 sm:$0xff]  }
 0x155   : > { %2813 = vmatprep.mubr.bf16.mxu0 %v20355_v43  ;;  %2959 = vmatprep.mubr.bf16.mxu1 %v20355_v43  ;;  %v20371_v10 = vpack.c.bf16 %v1791_v8, %v1775_v5  ;;  %v1747_v52 = vrot.slane %v20307_v58, %v20217_v0  ;;  %v17831_v14 = vld [vmem:[%s24906_s4 + $0x20] ss:$16 sps:$4 sm:$0xff]   ;;  %v17834_v8 = vld [vmem:[%s24906_s4 + $0x28] ss:$16 sps:$4 sm:$0xff]  }
 0x156   : > { %2814 = vmatmul.mubr.bf16.gmra.mrb[24].mxu0 %v20353_v42  ;;  %2960 = vmatmul.mubr.bf16.gmra.mrb[24].mxu1 %v20353_v42 }
 0x169   : > { %v1480_v18 = vpop.f32.mrb[12].mxu0 }
 0x16a   : > { %v1544_v20 = vmax.f32 %v1480_v18, 0.0  ;;  %v1482_v21 = vpop.f32.mrb[13].mxu0 }
 0x16b   : > { %v1545_v22 = vmax.f32 %v1482_v21, 0.0  ;;  %v1484_v23 = vpop.f32.mrb[14].mxu0 }
 0x16c   : > { %v1660_v63 = vmul.f32 %v1619_v11, %v1544_v20  ;;  %v1560_v26 = vmax.f32 %v1484_v23, 0.0  ;;  %v1486_v28 = vpop.f32.mrb[15].mxu0  ;;  %v17842_v20 = vld [vmem:[%s24906_s4 + $0x4c] ss:$16 sps:$4 sm:$0xff]   ;;  %v17840_v23 = vld [vmem:[%s24906_s4 + $0x48] ss:$16 sps:$4 sm:$0xff]  }
 0x16d   : > { %v1661_v29 = vmul.f32 %v1623_v19, %v1545_v22  ;;  %v1561_v30 = vmax.f32 %v1486_v28, 0.0  ;;  %v17837_v22 = vld [vmem:[%s24906_s4 + $0x40] ss:$16 sps:$4 sm:$0xff]   ;;  %v17846_v28 = vld [vmem:[%s24906_s4 + $0x68] ss:$16 sps:$4 sm:$0xff]  }
 0x16e   : > { %v1676_v31 = vmul.f32 %v1619_v11, %v1560_v26  ;;  %v1776_v33 = vadd.f32 %v1735_v25, %v1660_v63  ;;  %v1523_v45 = vpop.f32.mrb[12].mxu1  ;;  %v17836_v11 = vld [vmem:[%s24906_s4 + $0x2c] ss:$16 sps:$4 sm:$0xff]   ;;  %v17845_v63 = vld [vmem:[%s24906_s4 + $0x64] ss:$16 sps:$4 sm:$0xff]  }
 0x16f   : > { %v1677_v32 = vmul.f32 %v1623_v19, %v1561_v30  ;;  %v1777_v36 = vadd.f32 %v1739_v17, %v1661_v29  ;;  %v1546_v27 = vmax.f32 %v1523_v45, 0.0  ;;  %v1525_v49 = vpop.f32.mrb[13].mxu1  ;;  %v17839_v19 = vld [vmem:[%s24906_s4 + $0x44] ss:$16 sps:$4 sm:$0xff]   ;;  %v17843_v26 = vld [vmem:[%s24906_s4 + $0x60] ss:$16 sps:$4 sm:$0xff]  }
 0x170   : > { %v1792_v34 = vadd.f32 %v1735_v25, %v1676_v31  ;;  %v1547_v51 = vmax.f32 %v1525_v49, 0.0  ;;  %v1527_v53 = vpop.f32.mrb[14].mxu1  ;;  %v17848_v25 = vld [vmem:[%s24906_s4 + $0x6c] ss:$16 sps:$4 sm:$0xff]   ;;  %v17851_v29 = vld [vmem:[%s24906_s4 + $0x84] ss:$16 sps:$4 sm:$0xff]  }
 0x171   : > { %v1793_v38 = vadd.f32 %v1739_v17, %v1677_v32  ;;  %v1662_v57 = vmul.f32 %v1627_v24, %v1546_v27  ;;  %v1562_v54 = vmax.f32 %v1527_v53, 0.0  ;;  %v1529_v55 = vpop.f32.mrb[15].mxu1  ;;  %v17854_v17 = vld [vmem:[%s24906_s4 + $0x8c] ss:$16 sps:$4 sm:$0xff]   ;;  %v17849_v30 = vld [vmem:[%s24906_s4 + $0x80] ss:$16 sps:$4 sm:$0xff]  }
 0x172   : > { %v20381_v39 = vpack.c.bf16 %v1792_v34, %v1776_v33  ;;  %v1663_v56 = vmul.f32 %v1631_v46, %v1547_v51  ;;  %v1563_v60 = vmax.f32 %v1529_v55, 0.0  ;;  %v17852_v31 = vld [vmem:[%s24906_s4 + $0x88] ss:$16 sps:$4 sm:$0xff]   ;;  %v17857_v32 = vld [vmem:[%s24906_s4 + $0xa4] ss:$16 sps:$4 sm:$0xff]  }
 0x173   : > { %v20383_v44 = vpack.c.bf16 %v1793_v38, %v1777_v36  ;;  %v1778_v62 = vadd.f32 %v1743_v48, %v1662_v57  ;;  %v1678_v0 = vmul.f32 %v1627_v24, %v1562_v54  ;;  %v17860_v33 = vld [vmem:[%s24906_s4 + $0xac] ss:$16 sps:$4 sm:$0xff]   ;;  %v17855_v34 = vld [vmem:[%s24906_s4 + $0xa0] ss:$16 sps:$4 sm:$0xff]   ;;  %v17858_v36 = vld [vmem:[%s24906_s4 + $0xa8] ss:$16 sps:$4 sm:$0xff]  }
 0x174   : > { %v1779_v58 = vadd.f32 %v1747_v52, %v1663_v56  ;;  %v1679_v1 = vmul.f32 %v1631_v46, %v1563_v60  ;;  %v17863_v38 = vld [vmem:[%s24906_s4 + $0xc4] ss:$16 sps:$4 sm:$0xff]   ;;  %v17866_v24 = vld [vmem:[%s24906_s4 + $0xcc] ss:$16 sps:$4 sm:$0xff]   ;;  %v17861_v45 = vld [vmem:[%s24906_s4 + $0xc0] ss:$16 sps:$4 sm:$0xff]  }
 0x175   : > { %2823 = vmatprep.mubr.bf16.mxu0 %v20383_v44  ;;  %2969 = vmatprep.mubr.bf16.mxu1 %v20383_v44  ;;  %v1794_v5 = vadd.f32 %v1743_v48, %v1678_v0  ;;  %v17864_v46 = vld [vmem:[%s24906_s4 + $0xc8] ss:$16 sps:$4 sm:$0xff]   ;;  %v17869_v27 = vld [vmem:[%s24906_s4 + $0xe4] ss:$16 sps:$4 sm:$0xff]   ;;  %v17872_v48 = vld [vmem:[%s24906_s4 + $0xec] ss:$16 sps:$4 sm:$0xff]  }
 0x176   : > { %2824 = vmatmul.mubr.bf16.gmra.mrb[28].mxu0 %v20381_v39  ;;  %2970 = vmatmul.mubr.bf16.gmra.mrb[28].mxu1 %v20381_v39  ;;  %v1795_v7 = vadd.f32 %v1747_v52, %v1679_v1  ;;  %v17867_v49 = vld [vmem:[%s24906_s4 + $0xe0] ss:$16 sps:$4 sm:$0xff]   ;;  %v17870_v51 = vld [vmem:[%s24906_s4 + $0xe8] ss:$16 sps:$4 sm:$0xff]   ;;  %v17875_v52 = vld [vmem:[%s24906_s4 + $0x104] ss:$16 sps:$4 sm:$0xff]  }
 0x177   : > { %2866 = vmatprep.mubr.bf16.mxu0 %v20137_v13  ;;  %3012 = vmatprep.mubr.bf16.mxu1 %v20137_v13  ;;  %v20417_v18 = vpack.c.bf16 %v1794_v5, %v1778_v62  ;;  %v17878_v53 = vld [vmem:[%s24906_s4 + $0x10c] ss:$16 sps:$4 sm:$0xff]   ;;  %v17873_v57 = vld [vmem:[%s24906_s4 + $0x100] ss:$16 sps:$4 sm:$0xff]   ;;  %v17876_v54 = vld [vmem:[%s24906_s4 + $0x108] ss:$16 sps:$4 sm:$0xff]  }
 0x178   : > { %v20427_v21 = vpack.c.bf16 %v1795_v7, %v1779_v58  ;;  %v17881_v55 = vld [vmem:[%s24906_s4 + $0x124] ss:$16 sps:$4 sm:$0xff]   ;;  %v17884_v56 = vld [vmem:[%s24906_s4 + $0x12c] ss:$16 sps:$4 sm:$0xff]   ;;  %v17879_v60 = vld [vmem:[%s24906_s4 + $0x120] ss:$16 sps:$4 sm:$0xff]  }
 0x179   : > { %v17890_v62 = vld [vmem:[%s24906_s4 + $0x14c] ss:$16 sps:$4 sm:$0xff]   ;;  %v17885_v0 = vld [vmem:[%s24906_s4 + $0x140] ss:$16 sps:$4 sm:$0xff]   ;;  %v17888_v58 = vld [vmem:[%s24906_s4 + $0x148] ss:$16 sps:$4 sm:$0xff]  }
 0x17a   : > { %v17893_v1 = vld [vmem:[%s24906_s4 + $0x164] ss:$16 sps:$4 sm:$0xff]   ;;  %v17891_v5 = vld [vmem:[%s24906_s4 + $0x160] ss:$16 sps:$4 sm:$0xff]   ;;  %v17894_v7 = vld [vmem:[%s24906_s4 + $0x168] ss:$16 sps:$4 sm:$0xff]  }
 0x17e   : > { %2867 = vmatmul.mubr.bf16.vlgmr.msra.gmra.mrb[16].mxu0 %v20135_v12  ;;  %3013 = vmatmul.mubr.bf16.vlgmr.msra.gmra.mrb[16].mxu1 %v20135_v12 }
 0x17f   : > { %3694 = vmatpush1.bf16.msra.mxu0 %v17825_v59  ;;  %3840 = vmatpush1.bf16.msra.mxu1 %v17828_v61  ;;  %v17882_v59 = vld [vmem:[%s24906_s4 + $0x128] ss:$16 sps:$4 sm:$0xff]   ;;  %v17887_v61 = vld [vmem:[%s24906_s4 + $0x144] ss:$16 sps:$4 sm:$0xff]  }
 0x180   : > { %2876 = vmatprep.mubr.bf16.mxu0 %v20279_v50  ;;  %3022 = vmatprep.mubr.bf16.mxu1 %v20279_v50 }
 0x181   : > { %3695 = vmatprep.subr.bf16.mxu0 %v17833_v2  ;;  %3841 = vmatprep.subr.bf16.mxu1 %v17836_v11  ;;  %v17896_v2 = vld [vmem:[%s24906_s4 + $0x16c] ss:$16 sps:$4 sm:$0xff]   ;;  %v17897_v11 = vld [vmem:[%s24906_s4 + $0x180] ss:$16 sps:$4 sm:$0xff]  }
 0x183   : > { %3696 = vmatpush1.bf16.msra.mxu0 %v17831_v14  ;;  %3842 = vmatpush1.bf16.msra.mxu1 %v17834_v8  ;;  %v17899_v14 = vld [vmem:[%s24906_s4 + $0x184] ss:$16 sps:$4 sm:$0xff]   ;;  %v17902_v8 = vld [vmem:[%s24906_s4 + $0x18c] ss:$16 sps:$4 sm:$0xff]  }
 0x184   : > { %3697 = vmatprep.subr.bf16.mxu0 %v17839_v19  ;;  %3843 = vmatprep.subr.bf16.mxu1 %v17842_v20  ;;  %v17900_v19 = vld [vmem:[%s24906_s4 + $0x188] ss:$16 sps:$4 sm:$0xff]   ;;  %v17905_v20 = vld [vmem:[%s24906_s4 + $0x1a4] ss:$16 sps:$4 sm:$0xff]  }
 0x186   : > { %2877 = vmatmul.mubr.bf16.gmra.mrb[20].mxu0 %v20271_v47  ;;  %3023 = vmatmul.mubr.bf16.gmra.mrb[20].mxu1 %v20271_v47 }
 0x187   : > { %3698 = vmatpush1.bf16.msra.mxu0 %v17837_v22  ;;  %3844 = vmatpush1.bf16.msra.mxu1 %v17840_v23  ;;  %v17908_v22 = vld [vmem:[%s24906_s4 + $0x1ac] ss:$16 sps:$4 sm:$0xff]   ;;  %v17903_v23 = vld [vmem:[%s24906_s4 + $0x1a0] ss:$16 sps:$4 sm:$0xff]  }
 0x188   : > { %3699 = vmatprep.subr.bf16.mxu0 %v17845_v63  ;;  %3845 = vmatprep.subr.bf16.mxu1 %v17848_v25  ;;  %v17906_v63 = vld [vmem:[%s24906_s4 + $0x1a8] ss:$16 sps:$4 sm:$0xff]   ;;  %v17911_v25 = vld [vmem:[%s24906_s4 + $0x1c4] ss:$16 sps:$4 sm:$0xff]  }
 0x189   : > { %2886 = vmatprep.mubr.bf16.mxu0 %v20371_v10  ;;  %3032 = vmatprep.mubr.bf16.mxu1 %v20371_v10 }
 0x18b   : > { %3700 = vmatpush1.bf16.msra.mxu0 %v17843_v26  ;;  %3846 = vmatpush1.bf16.msra.mxu1 %v17846_v28  ;;  %v17914_v26 = vld [vmem:[%s24906_s4 + $0x1cc] ss:$16 sps:$4 sm:$0xff]   ;;  %v17909_v28 = vld [vmem:[%s24906_s4 + $0x1c0] ss:$16 sps:$4 sm:$0xff]  }
 0x18c   : > { %3701 = vmatprep.subr.bf16.mxu0 %v17851_v29  ;;  %3847 = vmatprep.subr.bf16.mxu1 %v17854_v17  ;;  %v17912_v29 = vld [vmem:[%s24906_s4 + $0x1c8] ss:$16 sps:$4 sm:$0xff]   ;;  %v17917_v17 = vld [vmem:[%s24906_s4 + $0x1e4] ss:$16 sps:$4 sm:$0xff]  }
 0x18e   : > { %2887 = vmatmul.mubr.bf16.gmra.mrb[24].mxu0 %v20369_v9  ;;  %3033 = vmatmul.mubr.bf16.gmra.mrb[24].mxu1 %v20369_v9 }
 0x18f   : > { %3702 = vmatpush1.bf16.msra.mxu0 %v17849_v30  ;;  %3848 = vmatpush1.bf16.msra.mxu1 %v17852_v31  ;;  %v17920_v30 = vld [vmem:[%s24906_s4 + $0x1ec] ss:$16 sps:$4 sm:$0xff]   ;;  %v17915_v31 = vld [vmem:[%s24906_s4 + $0x1e0] ss:$16 sps:$4 sm:$0xff]  }
 0x190   : > { %3703 = vmatprep.subr.bf16.mxu0 %v17857_v32  ;;  %3849 = vmatprep.subr.bf16.mxu1 %v17860_v33  ;;  %v17918_v32 = vld [vmem:[%s24906_s4 + $0x1e8] ss:$16 sps:$4 sm:$0xff]   ;;  %v17923_v33 = vld [vmem:[%s24906_s4 + $0x204] ss:$16 sps:$4 sm:$0xff]  }
 0x191   : > { %2896 = vmatprep.mubr.bf16.mxu0 %v20427_v21  ;;  %3042 = vmatprep.mubr.bf16.mxu1 %v20427_v21 }
 0x193   : > { %3704 = vmatpush1.bf16.msra.mxu0 %v17855_v34  ;;  %3850 = vmatpush1.bf16.msra.mxu1 %v17858_v36  ;;  %v17926_v34 = vld [vmem:[%s24906_s4 + $0x20c] ss:$16 sps:$4 sm:$0xff]   ;;  %v17921_v36 = vld [vmem:[%s24906_s4 + $0x200] ss:$16 sps:$4 sm:$0xff]  }
 0x194   : > { %3705 = vmatprep.subr.bf16.mxu0 %v17863_v38  ;;  %3851 = vmatprep.subr.bf16.mxu1 %v17866_v24  ;;  %v17924_v38 = vld [vmem:[%s24906_s4 + $0x208] ss:$16 sps:$4 sm:$0xff]   ;;  %v17929_v24 = vld [vmem:[%s24906_s4 + $0x224] ss:$16 sps:$4 sm:$0xff]  }
 0x196   : > { %2897 = vmatmul.mubr.bf16.gmra.mrb[28].mxu0 %v20417_v18  ;;  %3043 = vmatmul.mubr.bf16.gmra.mrb[28].mxu1 %v20417_v18 }
 0x197   : > { %3706 = vmatpush1.bf16.msra.mxu0 %v17861_v45  ;;  %3852 = vmatpush1.bf16.msra.mxu1 %v17864_v46  ;;  %v17932_v45 = vld [vmem:[%s24906_s4 + $0x22c] ss:$16 sps:$4 sm:$0xff]   ;;  %v17927_v46 = vld [vmem:[%s24906_s4 + $0x220] ss:$16 sps:$4 sm:$0xff]  }
 0x198   : > { %3707 = vmatprep.subr.bf16.mxu0 %v17869_v27  ;;  %3853 = vmatprep.subr.bf16.mxu1 %v17872_v48  ;;  %v17930_v27 = vld [vmem:[%s24906_s4 + $0x228] ss:$16 sps:$4 sm:$0xff]   ;;  %v17935_v48 = vld [vmem:[%s24906_s4 + $0x244] ss:$16 sps:$4 sm:$0xff]  }
 0x199   : > { %3725 = vmatprep.mubr.bf16.mxu0 %v24914_v6  ;;  %3871 = vmatprep.mubr.bf16.mxu1 %v24914_v6 }
 0x19b   : > { %3708 = vmatpush1.bf16.msra.mxu0 %v17867_v49  ;;  %3854 = vmatpush1.bf16.msra.mxu1 %v17870_v51  ;;  %v17938_v49 = vld [vmem:[%s24906_s4 + $0x24c] ss:$16 sps:$4 sm:$0xff]   ;;  %v17933_v51 = vld [vmem:[%s24906_s4 + $0x240] ss:$16 sps:$4 sm:$0xff]  }
 0x19c   : > { %3709 = vmatprep.subr.bf16.mxu0 %v17875_v52  ;;  %3855 = vmatprep.subr.bf16.mxu1 %v17878_v53  ;;  %v17936_v52 = vld [vmem:[%s24906_s4 + $0x248] ss:$16 sps:$4 sm:$0xff]   ;;  %v17941_v53 = vld [vmem:[%s24906_s4 + $0x264] ss:$16 sps:$4 sm:$0xff]  }
 0x19f   : > { %3710 = vmatpush1.bf16.msra.mxu0 %v17873_v57  ;;  %3856 = vmatpush1.bf16.msra.mxu1 %v17876_v54  ;;  %v17944_v57 = vld [vmem:[%s24906_s4 + $0x26c] ss:$16 sps:$4 sm:$0xff]   ;;  %v17939_v54 = vld [vmem:[%s24906_s4 + $0x260] ss:$16 sps:$4 sm:$0xff]  }
 0x1a0   : > { %3711 = vmatprep.subr.bf16.mxu0 %v17881_v55  ;;  %3857 = vmatprep.subr.bf16.mxu1 %v17884_v56  ;;  %v17942_v55 = vld [vmem:[%s24906_s4 + $0x268] ss:$16 sps:$4 sm:$0xff]   ;;  %v17947_v56 = vld [vmem:[%s24906_s4 + $0x284] ss:$16 sps:$4 sm:$0xff]  }
 0x1a3   : > { %3712 = vmatpush1.bf16.msra.mxu0 %v17879_v60  ;;  %3858 = vmatpush1.bf16.msra.mxu1 %v17882_v59  ;;  %v17950_v60 = vld [vmem:[%s24906_s4 + $0x28c] ss:$16 sps:$4 sm:$0xff]   ;;  %v17945_v59 = vld [vmem:[%s24906_s4 + $0x280] ss:$16 sps:$4 sm:$0xff]  }
 0x1a4   : > { %3713 = vmatprep.subr.bf16.mxu0 %v17887_v61  ;;  %3859 = vmatprep.subr.bf16.mxu1 %v17890_v62  ;;  %v17948_v61 = vld [vmem:[%s24906_s4 + $0x288] ss:$16 sps:$4 sm:$0xff]   ;;  %v17953_v62 = vld [vmem:[%s24906_s4 + $0x2a4] ss:$16 sps:$4 sm:$0xff]  }
 0x1a7   : > { %3714 = vmatpush1.bf16.msra.mxu0 %v17885_v0  ;;  %3860 = vmatpush1.bf16.msra.mxu1 %v17888_v58  ;;  %v17956_v0 = vld [vmem:[%s24906_s4 + $0x2ac] ss:$16 sps:$4 sm:$0xff]   ;;  %v17951_v58 = vld [vmem:[%s24906_s4 + $0x2a0] ss:$16 sps:$4 sm:$0xff]  }
 0x1a8   : > { %3715 = vmatprep.subr.bf16.mxu0 %v17893_v1  ;;  %3861 = vmatprep.subr.bf16.mxu1 %v17896_v2  ;;  %v17954_v1 = vld [vmem:[%s24906_s4 + $0x2a8] ss:$16 sps:$4 sm:$0xff]   ;;  %v17959_v2 = vld [vmem:[%s24906_s4 + $0x2c4] ss:$16 sps:$4 sm:$0xff]  }
 0x1ab   : > { %3716 = vmatpush1.bf16.msra.mxu0 %v17891_v5  ;;  %3862 = vmatpush1.bf16.msra.mxu1 %v17894_v7  ;;  %v17962_v5 = vld [vmem:[%s24906_s4 + $0x2cc] ss:$16 sps:$4 sm:$0xff]   ;;  %v17957_v7 = vld [vmem:[%s24906_s4 + $0x2c0] ss:$16 sps:$4 sm:$0xff]  }
 0x1ac   : > { %3717 = vmatprep.subr.bf16.mxu0 %v17899_v14  ;;  %3863 = vmatprep.subr.bf16.mxu1 %v17902_v8  ;;  %v17960_v14 = vld [vmem:[%s24906_s4 + $0x2c8] ss:$16 sps:$4 sm:$0xff]   ;;  %v17965_v8 = vld [vmem:[%s24906_s4 + $0x2e4] ss:$16 sps:$4 sm:$0xff]  }
 0x1af   : > { %3718 = vmatpush1.bf16.msra.mxu0 %v17897_v11  ;;  %3864 = vmatpush1.bf16.msra.mxu1 %v17900_v19  ;;  %v17968_v11 = vld [vmem:[%s24906_s4 + $0x2ec] ss:$16 sps:$4 sm:$0xff]   ;;  %v17963_v19 = vld [vmem:[%s24906_s4 + $0x2e0] ss:$16 sps:$4 sm:$0xff]  }
 0x1b0   : > { %3719 = vmatprep.subr.bf16.mxu0 %v17905_v20  ;;  %3865 = vmatprep.subr.bf16.mxu1 %v17908_v22  ;;  %v17966_v20 = vld [vmem:[%s24906_s4 + $0x2e8] ss:$16 sps:$4 sm:$0xff]   ;;  %v17971_v22 = vld [vmem:[%s24906_s4 + $0x304] ss:$16 sps:$4 sm:$0xff]  }
 0x1b3   : > { %3720 = vmatpush1.bf16.msra.mxu0 %v17903_v23  ;;  %3866 = vmatpush1.bf16.msra.mxu1 %v17906_v63  ;;  %v17974_v23 = vld [vmem:[%s24906_s4 + $0x30c] ss:$16 sps:$4 sm:$0xff]   ;;  %v17969_v63 = vld [vmem:[%s24906_s4 + $0x300] ss:$16 sps:$4 sm:$0xff]  }
 0x1b4   : > { %3721 = vmatprep.subr.bf16.mxu0 %v17911_v25  ;;  %3867 = vmatprep.subr.bf16.mxu1 %v17914_v26  ;;  %v17972_v25 = vld [vmem:[%s24906_s4 + $0x308] ss:$16 sps:$4 sm:$0xff]   ;;  %v17977_v26 = vld [vmem:[%s24906_s4 + $0x324] ss:$16 sps:$4 sm:$0xff]  }
 0x1b7   : > { %3722 = vmatpush1.bf16.msra.mxu0 %v17909_v28  ;;  %3868 = vmatpush1.bf16.msra.mxu1 %v17912_v29  ;;  %v17980_v28 = vld [vmem:[%s24906_s4 + $0x32c] ss:$16 sps:$4 sm:$0xff]   ;;  %v17975_v29 = vld [vmem:[%s24906_s4 + $0x320] ss:$16 sps:$4 sm:$0xff]  }
 0x1b8   : > { %3723 = vmatprep.subr.bf16.mxu0 %v17917_v17  ;;  %3869 = vmatprep.subr.bf16.mxu1 %v17920_v30  ;;  %v17978_v17 = vld [vmem:[%s24906_s4 + $0x328] ss:$16 sps:$4 sm:$0xff]   ;;  %v17983_v30 = vld [vmem:[%s24906_s4 + $0x344] ss:$16 sps:$4 sm:$0xff]  }
 0x1bb   : > { %3724 = vmatpush1.bf16.msra.mxu0 %v17915_v31  ;;  %3870 = vmatpush1.bf16.msra.mxu1 %v17918_v32  ;;  %v17986_v31 = vld [vmem:[%s24906_s4 + $0x34c] ss:$16 sps:$4 sm:$0xff]   ;;  %v17981_v32 = vld [vmem:[%s24906_s4 + $0x340] ss:$16 sps:$4 sm:$0xff]  }
 0x1bc   : > { %3766 = vmatprep.subr.bf16.mxu0 %v17923_v33  ;;  %3912 = vmatprep.subr.bf16.mxu1 %v17926_v34  ;;  %v17984_v33 = vld [vmem:[%s24906_s4 + $0x348] ss:$16 sps:$4 sm:$0xff]   ;;  %v17989_v34 = vld [vmem:[%s24906_s4 + $0x364] ss:$16 sps:$4 sm:$0xff]  }
 0x1be   : > { %3726 = vmatmul.mubr.bf16.vlgmr.msra.gmra.mrb[16].mxu0 %v24914_v6  ;;  %3872 = vmatmul.mubr.bf16.vlgmr.msra.gmra.mrb[16].mxu1 %v24914_v6 }
 0x1bf   : > { %3735 = vmatprep.mubr.bf16.mxu0 %v20085_v41  ;;  %3767 = vmatpush1.bf16.msra.mxu0 %v17921_v36  ;;  %v17992_v36 = vld [vmem:[%s24906_s4 + $0x36c] ss:$16 sps:$4 sm:$0xff]  }
 0x1c0   : > { %3881 = vmatprep.mubr.bf16.mxu1 %v20085_v41  ;;  %3913 = vmatpush1.bf16.msra.mxu1 %v17924_v38  ;;  %v17987_v38 = vld [vmem:[%s24906_s4 + $0x360] ss:$16 sps:$4 sm:$0xff]  }
 0x1c1   : > { %3768 = vmatprep.subr.bf16.mxu0 %v17929_v24  ;;  %3914 = vmatprep.subr.bf16.mxu1 %v17932_v45  ;;  %v17990_v24 = vld [vmem:[%s24906_s4 + $0x368] ss:$16 sps:$4 sm:$0xff]   ;;  %v17995_v45 = vld [vmem:[%s24906_s4 + $0x384] ss:$16 sps:$4 sm:$0xff]  }
 0x1c3   : > { %3769 = vmatpush1.bf16.msra.mxu0 %v17927_v46  ;;  %v17998_v46 = vld [vmem:[%s24906_s4 + $0x38c] ss:$16 sps:$4 sm:$0xff]  }
 0x1c4   : > { %3915 = vmatpush1.bf16.msra.mxu1 %v17930_v27  ;;  %3770 = vmatprep.subr.bf16.mxu0 %v17935_v48  ;;  %v17993_v27 = vld [vmem:[%s24906_s4 + $0x380] ss:$16 sps:$4 sm:$0xff]   ;;  %v17996_v48 = vld [vmem:[%s24906_s4 + $0x388] ss:$16 sps:$4 sm:$0xff]  }
 0x1c5   : > { %3916 = vmatprep.subr.bf16.mxu1 %v17938_v49  ;;  %v18001_v49 = vld [vmem:[%s24906_s4 + $0x3a4] ss:$16 sps:$4 sm:$0xff]  }
 0x1c6   : > { %3736 = vmatmul.mubr.bf16.gmra.mrb[20].mxu0 %v20083_v40  ;;  %3882 = vmatmul.mubr.bf16.gmra.mrb[20].mxu1 %v20083_v40 }
 0x1c7   : > { %3745 = vmatprep.mubr.bf16.mxu0 %v20221_v4  ;;  %3771 = vmatpush1.bf16.msra.mxu0 %v17933_v51  ;;  %v18004_v51 = vld [vmem:[%s24906_s4 + $0x3ac] ss:$16 sps:$4 sm:$0xff]  }
 0x1c8   : > { %3891 = vmatprep.mubr.bf16.mxu1 %v20221_v4  ;;  %3917 = vmatpush1.bf16.msra.mxu1 %v17936_v52  ;;  %v17999_v52 = vld [vmem:[%s24906_s4 + $0x3a0] ss:$16 sps:$4 sm:$0xff]  }
 0x1c9   : > { %3772 = vmatprep.subr.bf16.mxu0 %v17941_v53  ;;  %3918 = vmatprep.subr.bf16.mxu1 %v17944_v57  ;;  %v18002_v53 = vld [vmem:[%s24906_s4 + $0x3a8] ss:$16 sps:$4 sm:$0xff]   ;;  %v18007_v57 = vld [vmem:[%s24906_s4 + $0x3c4] ss:$16 sps:$4 sm:$0xff]  }
 0x1cb   : > { %3773 = vmatpush1.bf16.msra.mxu0 %v17939_v54  ;;  %v18010_v54 = vld [vmem:[%s24906_s4 + $0x3cc] ss:$16 sps:$4 sm:$0xff]  }
 0x1cc   : > { %3919 = vmatpush1.bf16.msra.mxu1 %v17942_v55  ;;  %3774 = vmatprep.subr.bf16.mxu0 %v17947_v56  ;;  %v18005_v55 = vld [vmem:[%s24906_s4 + $0x3c0] ss:$16 sps:$4 sm:$0xff]   ;;  %v18008_v56 = vld [vmem:[%s24906_s4 + $0x3c8] ss:$16 sps:$4 sm:$0xff]  }
 0x1cd   : > { %3920 = vmatprep.subr.bf16.mxu1 %v17950_v60  ;;  %v18013_v60 = vld [vmem:[%s24906_s4 + $0x3e4] ss:$16 sps:$4 sm:$0xff]  }
 0x1ce   : > { %3746 = vmatmul.mubr.bf16.gmra.mrb[24].mxu0 %v20219_v3  ;;  %3892 = vmatmul.mubr.bf16.gmra.mrb[24].mxu1 %v20219_v3 }
 0x1cf   : > { %3755 = vmatprep.mubr.bf16.mxu0 %v20355_v43  ;;  %3775 = vmatpush1.bf16.msra.mxu0 %v17945_v59  ;;  %v18016_v59 = vld [vmem:[%s24906_s4 + $0x3ec] ss:$16 sps:$4 sm:$0xff]  }
 0x1d0   : > { %3901 = vmatprep.mubr.bf16.mxu1 %v20355_v43  ;;  %3921 = vmatpush1.bf16.msra.mxu1 %v17948_v61  ;;  %v18011_v61 = vld [vmem:[%s24906_s4 + $0x3e0] ss:$16 sps:$4 sm:$0xff]  }
 0x1d1   : > { %3776 = vmatprep.subr.bf16.mxu0 %v17953_v62  ;;  %3922 = vmatprep.subr.bf16.mxu1 %v17956_v0  ;;  %v18014_v62 = vld [vmem:[%s24906_s4 + $0x3e8] ss:$16 sps:$4 sm:$0xff]   ;;  %v18019_v0 = vld [vmem:[%s24906_s4 + $0xc04] ss:$16 sps:$4 sm:$0xff]  }
 0x1d3   : > { %3777 = vmatpush1.bf16.msra.mxu0 %v17951_v58  ;;  %v18022_v58 = vld [vmem:[%s24906_s4 + $0xc0c] ss:$16 sps:$4 sm:$0xff]  }
 0x1d4   : > { %3923 = vmatpush1.bf16.msra.mxu1 %v17954_v1  ;;  %3778 = vmatprep.subr.bf16.mxu0 %v17959_v2  ;;  %v18017_v1 = vld [vmem:[%s24906_s4 + $0xc00] ss:$16 sps:$4 sm:$0xff]   ;;  %v18020_v2 = vld [vmem:[%s24906_s4 + $0xc08] ss:$16 sps:$4 sm:$0xff]  }
 0x1d5   : > { %3924 = vmatprep.subr.bf16.mxu1 %v17962_v5  ;;  %v18025_v5 = vld [vmem:[%s24906_s4 + $0xc24] ss:$16 sps:$4 sm:$0xff]  }
 0x1d6   : > { %3756 = vmatmul.mubr.bf16.gmra.mrb[28].mxu0 %v20353_v42  ;;  %3902 = vmatmul.mubr.bf16.gmra.mrb[28].mxu1 %v20353_v42 }
 0x1d7   : > { %3779 = vmatpush1.bf16.msra.mxu0 %v17957_v7  ;;  %3798 = vmatprep.mubr.bf16.mxu0 %v24914_v6  ;;  %v18028_v7 = vld [vmem:[%s24906_s4 + $0xc2c] ss:$16 sps:$4 sm:$0xff]  }
 0x1d8   : > { %3925 = vmatpush1.bf16.msra.mxu1 %v17960_v14  ;;  %3780 = vmatprep.subr.bf16.mxu0 %v17965_v8  ;;  %v18023_v14 = vld [vmem:[%s24906_s4 + $0xc20] ss:$16 sps:$4 sm:$0xff]   ;;  %v18026_v8 = vld [vmem:[%s24906_s4 + $0xc28] ss:$16 sps:$4 sm:$0xff]  }
 0x1d9   : > { %3926 = vmatprep.subr.bf16.mxu1 %v17968_v11  ;;  %3944 = vmatprep.mubr.bf16.mxu1 %v24914_v6  ;;  %v18031_v11 = vld [vmem:[%s24906_s4 + $0xc44] ss:$16 sps:$4 sm:$0xff]  }
 0x1db   : > { %3781 = vmatpush1.bf16.msra.mxu0 %v17963_v19  ;;  %v18034_v19 = vld [vmem:[%s24906_s4 + $0xc4c] ss:$16 sps:$4 sm:$0xff]  }
 0x1dc   : > { %3927 = vmatpush1.bf16.msra.mxu1 %v17966_v20  ;;  %3782 = vmatprep.subr.bf16.mxu0 %v17971_v22  ;;  %v18029_v20 = vld [vmem:[%s24906_s4 + $0xc40] ss:$16 sps:$4 sm:$0xff]   ;;  %v18032_v22 = vld [vmem:[%s24906_s4 + $0xc48] ss:$16 sps:$4 sm:$0xff]  }
 0x1dd   : > { %3928 = vmatprep.subr.bf16.mxu1 %v17974_v23  ;;  %v18037_v23 = vld [vmem:[%s24906_s4 + $0xc64] ss:$16 sps:$4 sm:$0xff]  }
 0x1df   : > { %3783 = vmatpush1.bf16.msra.mxu0 %v17969_v63  ;;  %v18040_v63 = vld [vmem:[%s24906_s4 + $0xc6c] ss:$16 sps:$4 sm:$0xff]  }
 0x1e0   : > { %3929 = vmatpush1.bf16.msra.mxu1 %v17972_v25  ;;  %3784 = vmatprep.subr.bf16.mxu0 %v17977_v26  ;;  %v18035_v25 = vld [vmem:[%s24906_s4 + $0xc60] ss:$16 sps:$4 sm:$0xff]   ;;  %v18038_v26 = vld [vmem:[%s24906_s4 + $0xc68] ss:$16 sps:$4 sm:$0xff]  }
 0x1e1   : > { %3930 = vmatprep.subr.bf16.mxu1 %v17980_v28  ;;  %v18043_v28 = vld [vmem:[%s24906_s4 + $0xc84] ss:$16 sps:$4 sm:$0xff]  }
 0x1e3   : > { %3785 = vmatpush1.bf16.msra.mxu0 %v17975_v29  ;;  %v18046_v29 = vld [vmem:[%s24906_s4 + $0xc8c] ss:$16 sps:$4 sm:$0xff]  }
 0x1e4   : > { %3931 = vmatpush1.bf16.msra.mxu1 %v17978_v17  ;;  %3786 = vmatprep.subr.bf16.mxu0 %v17983_v30  ;;  %v18041_v17 = vld [vmem:[%s24906_s4 + $0xc80] ss:$16 sps:$4 sm:$0xff]   ;;  %v18044_v30 = vld [vmem:[%s24906_s4 + $0xc88] ss:$16 sps:$4 sm:$0xff]  }
 0x1e5   : > { %3932 = vmatprep.subr.bf16.mxu1 %v17986_v31  ;;  %v18049_v31 = vld [vmem:[%s24906_s4 + $0xca4] ss:$16 sps:$4 sm:$0xff]  }
 0x1e7   : > { %3787 = vmatpush1.bf16.msra.mxu0 %v17981_v32  ;;  %v18052_v32 = vld [vmem:[%s24906_s4 + $0xcac] ss:$16 sps:$4 sm:$0xff]  }
 0x1e8   : > { %3933 = vmatpush1.bf16.msra.mxu1 %v17984_v33  ;;  %3788 = vmatprep.subr.bf16.mxu0 %v17989_v34  ;;  %v18047_v33 = vld [vmem:[%s24906_s4 + $0xca0] ss:$16 sps:$4 sm:$0xff]   ;;  %v18050_v34 = vld [vmem:[%s24906_s4 + $0xca8] ss:$16 sps:$4 sm:$0xff]  }
 0x1e9   : > { %3934 = vmatprep.subr.bf16.mxu1 %v17992_v36  ;;  %v18055_v36 = vld [vmem:[%s24906_s4 + $0xcc4] ss:$16 sps:$4 sm:$0xff]  }
 0x1eb   : > { %3789 = vmatpush1.bf16.msra.mxu0 %v17987_v38  ;;  %v18058_v38 = vld [vmem:[%s24906_s4 + $0xccc] ss:$16 sps:$4 sm:$0xff]  }
 0x1ec   : > { %3935 = vmatpush1.bf16.msra.mxu1 %v17990_v24  ;;  %3790 = vmatprep.subr.bf16.mxu0 %v17995_v45  ;;  %v18053_v24 = vld [vmem:[%s24906_s4 + $0xcc0] ss:$16 sps:$4 sm:$0xff]   ;;  %v18056_v45 = vld [vmem:[%s24906_s4 + $0xcc8] ss:$16 sps:$4 sm:$0xff]  }
 0x1ed   : > { %3936 = vmatprep.subr.bf16.mxu1 %v17998_v46  ;;  %v18061_v46 = vld [vmem:[%s24906_s4 + $0xce4] ss:$16 sps:$4 sm:$0xff]  }
 0x1ef   : > { %3791 = vmatpush1.bf16.msra.mxu0 %v17993_v27  ;;  %v18064_v27 = vld [vmem:[%s24906_s4 + $0xcec] ss:$16 sps:$4 sm:$0xff]  }
 0x1f0   : > { %3937 = vmatpush1.bf16.msra.mxu1 %v17996_v48  ;;  %3792 = vmatprep.subr.bf16.mxu0 %v18001_v49  ;;  %v18059_v48 = vld [vmem:[%s24906_s4 + $0xce0] ss:$16 sps:$4 sm:$0xff]   ;;  %v18062_v49 = vld [vmem:[%s24906_s4 + $0xce8] ss:$16 sps:$4 sm:$0xff]  }
 0x1f1   : > { %3938 = vmatprep.subr.bf16.mxu1 %v18004_v51  ;;  %v18067_v51 = vld [vmem:[%s24906_s4 + $0xd04] ss:$16 sps:$4 sm:$0xff]  }
 0x1f3   : > { %3793 = vmatpush1.bf16.msra.mxu0 %v17999_v52  ;;  %v18070_v52 = vld [vmem:[%s24906_s4 + $0xd0c] ss:$16 sps:$4 sm:$0xff]  }
 0x1f4   : > { %3939 = vmatpush1.bf16.msra.mxu1 %v18002_v53  ;;  %3794 = vmatprep.subr.bf16.mxu0 %v18007_v57  ;;  %v18065_v53 = vld [vmem:[%s24906_s4 + $0xd00] ss:$16 sps:$4 sm:$0xff]   ;;  %v18068_v57 = vld [vmem:[%s24906_s4 + $0xd08] ss:$16 sps:$4 sm:$0xff]  }
 0x1f5   : > { %3940 = vmatprep.subr.bf16.mxu1 %v18010_v54  ;;  %v18073_v54 = vld [vmem:[%s24906_s4 + $0xd24] ss:$16 sps:$4 sm:$0xff]  }
 0x1f7   : > { %3795 = vmatpush1.bf16.msra.mxu0 %v18005_v55  ;;  %v18076_v55 = vld [vmem:[%s24906_s4 + $0xd2c] ss:$16 sps:$4 sm:$0xff]  }
 0x1f8   : > { %3941 = vmatpush1.bf16.msra.mxu1 %v18008_v56  ;;  %3796 = vmatprep.subr.bf16.mxu0 %v18013_v60  ;;  %v18071_v56 = vld [vmem:[%s24906_s4 + $0xd20] ss:$16 sps:$4 sm:$0xff]   ;;  %v18074_v60 = vld [vmem:[%s24906_s4 + $0xd28] ss:$16 sps:$4 sm:$0xff]  }
 0x1f9   : > { %3942 = vmatprep.subr.bf16.mxu1 %v18016_v59  ;;  %v18079_v59 = vld [vmem:[%s24906_s4 + $0xd44] ss:$16 sps:$4 sm:$0xff]  }
 0x1fb   : > { %3797 = vmatpush1.bf16.msra.mxu0 %v18011_v61  ;;  %v18082_v61 = vld [vmem:[%s24906_s4 + $0xd4c] ss:$16 sps:$4 sm:$0xff]  }
 0x1fc   : > { %3943 = vmatpush1.bf16.msra.mxu1 %v18014_v62  ;;  %5091 = vmatprep.subr.bf16.mxu0 %v18019_v0  ;;  %v18077_v62 = vld [vmem:[%s24906_s4 + $0xd40] ss:$16 sps:$4 sm:$0xff]   ;;  %v18080_v0 = vld [vmem:[%s24906_s4 + $0xd48] ss:$16 sps:$4 sm:$0xff]  }
 0x1fd   : > { %5237 = vmatprep.subr.bf16.mxu1 %v18022_v58  ;;  %v18085_v58 = vld [vmem:[%s24906_s4 + $0xd64] ss:$16 sps:$4 sm:$0xff]  }
 0x1fe   : > { %3799 = vmatmul.mubr.bf16.vlgmr.msra.gmra.mrb[16].mxu0 %v24914_v6 }
 0x1ff   : > { %3945 = vmatmul.mubr.bf16.vlgmr.msra.gmra.mrb[16].mxu1 %v24914_v6  ;;  %3808 = vmatprep.mubr.bf16.mxu0 %v20137_v13 }
 0x200   : > { %3954 = vmatprep.mubr.bf16.mxu1 %v20137_v13  ;;  %5092 = vmatpush1.bf16.msra.mxu0 %v18017_v1  ;;  %v18088_v1 = vld [vmem:[%s24906_s4 + $0xd6c] ss:$16 sps:$4 sm:$0xff]  }
 0x201   : > { %5238 = vmatpush1.bf16.msra.mxu1 %v18020_v2  ;;  %5093 = vmatprep.subr.bf16.mxu0 %v18025_v5  ;;  %v18083_v2 = vld [vmem:[%s24906_s4 + $0xd60] ss:$16 sps:$4 sm:$0xff]   ;;  %v18086_v5 = vld [vmem:[%s24906_s4 + $0xd68] ss:$16 sps:$4 sm:$0xff]  }
 0x202   : > { %5239 = vmatprep.subr.bf16.mxu1 %v18028_v7  ;;  %v18091_v7 = vld [vmem:[%s24906_s4 + $0xd84] ss:$16 sps:$4 sm:$0xff]  }
 0x204   : > { %5094 = vmatpush1.bf16.msra.mxu0 %v18023_v14  ;;  %v18094_v14 = vld [vmem:[%s24906_s4 + $0xd8c] ss:$16 sps:$4 sm:$0xff]  }
 0x205   : > { %5240 = vmatpush1.bf16.msra.mxu1 %v18026_v8  ;;  %5095 = vmatprep.subr.bf16.mxu0 %v18031_v11  ;;  %v18089_v8 = vld [vmem:[%s24906_s4 + $0xd80] ss:$16 sps:$4 sm:$0xff]   ;;  %v18092_v11 = vld [vmem:[%s24906_s4 + $0xd88] ss:$16 sps:$4 sm:$0xff]  }
 0x206   : > { %3809 = vmatmul.mubr.bf16.gmra.mrb[20].mxu0 %v20135_v12  ;;  %5241 = vmatprep.subr.bf16.mxu1 %v18034_v19  ;;  %v18097_v19 = vld [vmem:[%s24906_s4 + $0xda4] ss:$16 sps:$4 sm:$0xff]  }
 0x207   : > { %3955 = vmatmul.mubr.bf16.gmra.mrb[20].mxu1 %v20135_v12  ;;  %3818 = vmatprep.mubr.bf16.mxu0 %v20279_v50 }
 0x208   : > { %3964 = vmatprep.mubr.bf16.mxu1 %v20279_v50  ;;  %5096 = vmatpush1.bf16.msra.mxu0 %v18029_v20  ;;  %v18100_v20 = vld [vmem:[%s24906_s4 + $0xdac] ss:$16 sps:$4 sm:$0xff]  }
 0x209   : > { %5242 = vmatpush1.bf16.msra.mxu1 %v18032_v22  ;;  %5097 = vmatprep.subr.bf16.mxu0 %v18037_v23  ;;  %v18095_v22 = vld [vmem:[%s24906_s4 + $0xda0] ss:$16 sps:$4 sm:$0xff]   ;;  %v18098_v23 = vld [vmem:[%s24906_s4 + $0xda8] ss:$16 sps:$4 sm:$0xff]  }
 0x20a   : > { %5243 = vmatprep.subr.bf16.mxu1 %v18040_v63  ;;  %v18103_v63 = vld [vmem:[%s24906_s4 + $0xdc4] ss:$16 sps:$4 sm:$0xff]  }
 0x20c   : > { %5098 = vmatpush1.bf16.msra.mxu0 %v18035_v25  ;;  %v18106_v25 = vld [vmem:[%s24906_s4 + $0xdcc] ss:$16 sps:$4 sm:$0xff]  }
 0x20d   : > { %5244 = vmatpush1.bf16.msra.mxu1 %v18038_v26  ;;  %5099 = vmatprep.subr.bf16.mxu0 %v18043_v28  ;;  %v18101_v26 = vld [vmem:[%s24906_s4 + $0xdc0] ss:$16 sps:$4 sm:$0xff]   ;;  %v18104_v28 = vld [vmem:[%s24906_s4 + $0xdc8] ss:$16 sps:$4 sm:$0xff]  }
 0x20e   : > { %3819 = vmatmul.mubr.bf16.gmra.mrb[24].mxu0 %v20271_v47  ;;  %5245 = vmatprep.subr.bf16.mxu1 %v18046_v29  ;;  %v18109_v29 = vld [vmem:[%s24906_s4 + $0xde4] ss:$16 sps:$4 sm:$0xff]  }
 0x20f   : > { %3965 = vmatmul.mubr.bf16.gmra.mrb[24].mxu1 %v20271_v47  ;;  %3828 = vmatprep.mubr.bf16.mxu0 %v20371_v10 }
 0x210   : > { %3974 = vmatprep.mubr.bf16.mxu1 %v20371_v10  ;;  %5100 = vmatpush1.bf16.msra.mxu0 %v18041_v17  ;;  %v18112_v17 = vld [vmem:[%s24906_s4 + $0xdec] ss:$16 sps:$4 sm:$0xff]  }
 0x211   : > { %5246 = vmatpush1.bf16.msra.mxu1 %v18044_v30  ;;  %5101 = vmatprep.subr.bf16.mxu0 %v18049_v31  ;;  %v18107_v30 = vld [vmem:[%s24906_s4 + $0xde0] ss:$16 sps:$4 sm:$0xff]   ;;  %v18110_v31 = vld [vmem:[%s24906_s4 + $0xde8] ss:$16 sps:$4 sm:$0xff]  }
 0x212   : > { %5247 = vmatprep.subr.bf16.mxu1 %v18052_v32  ;;  %v18115_v32 = vld [vmem:[%s24906_s4 + $0xe04] ss:$16 sps:$4 sm:$0xff]  }
 0x214   : > { %5102 = vmatpush1.bf16.msra.mxu0 %v18047_v33  ;;  %v18118_v33 = vld [vmem:[%s24906_s4 + $0xe0c] ss:$16 sps:$4 sm:$0xff]  }
 0x215   : > { %5248 = vmatpush1.bf16.msra.mxu1 %v18050_v34  ;;  %5103 = vmatprep.subr.bf16.mxu0 %v18055_v36  ;;  %v18113_v34 = vld [vmem:[%s24906_s4 + $0xe00] ss:$16 sps:$4 sm:$0xff]   ;;  %v18116_v36 = vld [vmem:[%s24906_s4 + $0xe08] ss:$16 sps:$4 sm:$0xff]  }
 0x216   : > { %3829 = vmatmul.mubr.bf16.gmra.mrb[28].mxu0 %v20369_v9  ;;  %5249 = vmatprep.subr.bf16.mxu1 %v18058_v38  ;;  %v18121_v38 = vld [vmem:[%s24906_s4 + $0xe24] ss:$16 sps:$4 sm:$0xff]  }
 0x217   : > { %3975 = vmatmul.mubr.bf16.gmra.mrb[28].mxu1 %v20369_v9  ;;  %5123 = vmatprep.mubr.bf16.mxu0 %v20221_v4 }
 0x218   : > { %5104 = vmatpush1.bf16.msra.mxu0 %v18053_v24  ;;  %5269 = vmatprep.mubr.bf16.mxu1 %v20221_v4  ;;  %v18124_v24 = vld [vmem:[%s24906_s4 + $0xe2c] ss:$16 sps:$4 sm:$0xff]  }
 0x219   : > { %5250 = vmatpush1.bf16.msra.mxu1 %v18056_v45  ;;  %5105 = vmatprep.subr.bf16.mxu0 %v18061_v46  ;;  %v18119_v45 = vld [vmem:[%s24906_s4 + $0xe20] ss:$16 sps:$4 sm:$0xff]   ;;  %v18122_v46 = vld [vmem:[%s24906_s4 + $0xe28] ss:$16 sps:$4 sm:$0xff]  }
 0x21a   : > { %5251 = vmatprep.subr.bf16.mxu1 %v18064_v27  ;;  %v18127_v27 = vld [vmem:[%s24906_s4 + $0xe44] ss:$16 sps:$4 sm:$0xff]  }
 0x21c   : > { %5106 = vmatpush1.bf16.msra.mxu0 %v18059_v48  ;;  %v18130_v48 = vld [vmem:[%s24906_s4 + $0xe4c] ss:$16 sps:$4 sm:$0xff]  }
 0x21d   : > { %5252 = vmatpush1.bf16.msra.mxu1 %v18062_v49  ;;  %5107 = vmatprep.subr.bf16.mxu0 %v18067_v51  ;;  %v18125_v49 = vld [vmem:[%s24906_s4 + $0xe40] ss:$16 sps:$4 sm:$0xff]   ;;  %v18128_v51 = vld [vmem:[%s24906_s4 + $0xe48] ss:$16 sps:$4 sm:$0xff]  }
 0x21e   : > { %5253 = vmatprep.subr.bf16.mxu1 %v18070_v52  ;;  %v18133_v52 = vld [vmem:[%s24906_s4 + $0xe64] ss:$16 sps:$4 sm:$0xff]  }
 0x220   : > { %5108 = vmatpush1.bf16.msra.mxu0 %v18065_v53  ;;  %v18136_v53 = vld [vmem:[%s24906_s4 + $0xe6c] ss:$16 sps:$4 sm:$0xff]  }
 0x221   : > { %5254 = vmatpush1.bf16.msra.mxu1 %v18068_v57  ;;  %5109 = vmatprep.subr.bf16.mxu0 %v18073_v54  ;;  %v18131_v57 = vld [vmem:[%s24906_s4 + $0xe60] ss:$16 sps:$4 sm:$0xff]   ;;  %v18134_v54 = vld [vmem:[%s24906_s4 + $0xe68] ss:$16 sps:$4 sm:$0xff]  }
 0x222   : > { %5255 = vmatprep.subr.bf16.mxu1 %v18076_v55  ;;  %v18139_v55 = vld [vmem:[%s24906_s4 + $0xe84] ss:$16 sps:$4 sm:$0xff]  }
 0x224   : > { %5110 = vmatpush1.bf16.msra.mxu0 %v18071_v56  ;;  %v18142_v56 = vld [vmem:[%s24906_s4 + $0xe8c] ss:$16 sps:$4 sm:$0xff]  }
 0x225   : > { %5256 = vmatpush1.bf16.msra.mxu1 %v18074_v60  ;;  %5111 = vmatprep.subr.bf16.mxu0 %v18079_v59  ;;  %v18137_v60 = vld [vmem:[%s24906_s4 + $0xe80] ss:$16 sps:$4 sm:$0xff]   ;;  %v18140_v59 = vld [vmem:[%s24906_s4 + $0xe88] ss:$16 sps:$4 sm:$0xff]  }
 0x226   : > { %5257 = vmatprep.subr.bf16.mxu1 %v18082_v61  ;;  %v18145_v61 = vld [vmem:[%s24906_s4 + $0xea4] ss:$16 sps:$4 sm:$0xff]  }
 0x228   : > { %5112 = vmatpush1.bf16.msra.mxu0 %v18077_v62  ;;  %v18148_v62 = vld [vmem:[%s24906_s4 + $0xeac] ss:$16 sps:$4 sm:$0xff]  }
 0x229   : > { %5258 = vmatpush1.bf16.msra.mxu1 %v18080_v0  ;;  %5113 = vmatprep.subr.bf16.mxu0 %v18085_v58  ;;  %v18143_v0 = vld [vmem:[%s24906_s4 + $0xea0] ss:$16 sps:$4 sm:$0xff]   ;;  %v18146_v58 = vld [vmem:[%s24906_s4 + $0xea8] ss:$16 sps:$4 sm:$0xff]  }
 0x22a   : > { %5259 = vmatprep.subr.bf16.mxu1 %v18088_v1  ;;  %v18151_v1 = vld [vmem:[%s24906_s4 + $0xec4] ss:$16 sps:$4 sm:$0xff]  }
 0x22c   : > { %5114 = vmatpush1.bf16.msra.mxu0 %v18083_v2  ;;  %v18154_v2 = vld [vmem:[%s24906_s4 + $0xecc] ss:$16 sps:$4 sm:$0xff]  }
 0x22d   : > { %5260 = vmatpush1.bf16.msra.mxu1 %v18086_v5  ;;  %5115 = vmatprep.subr.bf16.mxu0 %v18091_v7  ;;  %v18149_v5 = vld [vmem:[%s24906_s4 + $0xec0] ss:$16 sps:$4 sm:$0xff]   ;;  %v18152_v7 = vld [vmem:[%s24906_s4 + $0xec8] ss:$16 sps:$4 sm:$0xff]  }
 0x22e   : > { %5261 = vmatprep.subr.bf16.mxu1 %v18094_v14  ;;  %v18157_v14 = vld [vmem:[%s24906_s4 + $0xee4] ss:$16 sps:$4 sm:$0xff]  }
 0x230   : > { %5116 = vmatpush1.bf16.msra.mxu0 %v18089_v8  ;;  %v18160_v8 = vld [vmem:[%s24906_s4 + $0xeec] ss:$16 sps:$4 sm:$0xff]  }
 0x231   : > { %5262 = vmatpush1.bf16.msra.mxu1 %v18092_v11  ;;  %5117 = vmatprep.subr.bf16.mxu0 %v18097_v19  ;;  %v18155_v11 = vld [vmem:[%s24906_s4 + $0xee0] ss:$16 sps:$4 sm:$0xff]   ;;  %v18158_v19 = vld [vmem:[%s24906_s4 + $0xee8] ss:$16 sps:$4 sm:$0xff]  }
 0x232   : > { %5263 = vmatprep.subr.bf16.mxu1 %v18100_v20  ;;  %v18163_v20 = vld [vmem:[%s24906_s4 + $0xf04] ss:$16 sps:$4 sm:$0xff]  }
 0x234   : > { %5118 = vmatpush1.bf16.msra.mxu0 %v18095_v22  ;;  %v18166_v22 = vld [vmem:[%s24906_s4 + $0xf0c] ss:$16 sps:$4 sm:$0xff]  }
 0x235   : > { %5264 = vmatpush1.bf16.msra.mxu1 %v18098_v23  ;;  %5119 = vmatprep.subr.bf16.mxu0 %v18103_v63  ;;  %v18161_v23 = vld [vmem:[%s24906_s4 + $0xf00] ss:$16 sps:$4 sm:$0xff]   ;;  %v18164_v63 = vld [vmem:[%s24906_s4 + $0xf08] ss:$16 sps:$4 sm:$0xff]  }
 0x236   : > { %5265 = vmatprep.subr.bf16.mxu1 %v18106_v25  ;;  %v18169_v25 = vld [vmem:[%s24906_s4 + $0xf24] ss:$16 sps:$4 sm:$0xff]  }
 0x238   : > { %5120 = vmatpush1.bf16.msra.mxu0 %v18101_v26  ;;  %v18172_v26 = vld [vmem:[%s24906_s4 + $0xf2c] ss:$16 sps:$4 sm:$0xff]  }
 0x239   : > { %5266 = vmatpush1.bf16.msra.mxu1 %v18104_v28  ;;  %5121 = vmatprep.subr.bf16.mxu0 %v18109_v29  ;;  %v18167_v28 = vld [vmem:[%s24906_s4 + $0xf20] ss:$16 sps:$4 sm:$0xff]   ;;  %v18170_v29 = vld [vmem:[%s24906_s4 + $0xf28] ss:$16 sps:$4 sm:$0xff]  }
 0x23a   : > { %5267 = vmatprep.subr.bf16.mxu1 %v18112_v17  ;;  %v18175_v17 = vld [vmem:[%s24906_s4 + $0xf44] ss:$16 sps:$4 sm:$0xff]  }
 0x23c   : > { %5122 = vmatpush1.bf16.msra.mxu0 %v18107_v30  ;;  %v18178_v30 = vld [vmem:[%s24906_s4 + $0xf4c] ss:$16 sps:$4 sm:$0xff]  }
 0x23d   : > { %5268 = vmatpush1.bf16.msra.mxu1 %v18110_v31  ;;  %5164 = vmatprep.subr.bf16.mxu0 %v18115_v32  ;;  %v18173_v31 = vld [vmem:[%s24906_s4 + $0xf40] ss:$16 sps:$4 sm:$0xff]   ;;  %v18176_v32 = vld [vmem:[%s24906_s4 + $0xf48] ss:$16 sps:$4 sm:$0xff]  }
 0x23e   : > { %5310 = vmatprep.subr.bf16.mxu1 %v18118_v33  ;;  %v18181_v33 = vld [vmem:[%s24906_s4 + $0xf64] ss:$16 sps:$4 sm:$0xff]  }
 0x23f   : > { %5124 = vmatmul.mubr.bf16.vlgmr.msra.gmra.mrb[32].mxu0 %v20219_v3 }
 0x240   : > { %5270 = vmatmul.mubr.bf16.vlgmr.msra.gmra.mrb[32].mxu1 %v20219_v3  ;;  %5133 = vmatprep.mubr.bf16.mxu0 %v20355_v43 }
 0x241   : > { %5165 = vmatpush1.bf16.msra.mxu0 %v18113_v34  ;;  %5279 = vmatprep.mubr.bf16.mxu1 %v20355_v43  ;;  %v18184_v34 = vld [vmem:[%s24906_s4 + $0xf6c] ss:$16 sps:$4 sm:$0xff]  }
 0x242   : > { %5311 = vmatpush1.bf16.msra.mxu1 %v18116_v36  ;;  %5166 = vmatprep.subr.bf16.mxu0 %v18121_v38  ;;  %v18179_v36 = vld [vmem:[%s24906_s4 + $0xf60] ss:$16 sps:$4 sm:$0xff]   ;;  %v18182_v38 = vld [vmem:[%s24906_s4 + $0xf68] ss:$16 sps:$4 sm:$0xff]  }
 0x243   : > { %5312 = vmatprep.subr.bf16.mxu1 %v18124_v24  ;;  %v18187_v24 = vld [vmem:[%s24906_s4 + $0xf84] ss:$16 sps:$4 sm:$0xff]  }
 0x245   : > { %5167 = vmatpush1.bf16.msra.mxu0 %v18119_v45  ;;  %v18190_v45 = vld [vmem:[%s24906_s4 + $0xf8c] ss:$16 sps:$4 sm:$0xff]  }
 0x246   : > { %5313 = vmatpush1.bf16.msra.mxu1 %v18122_v46  ;;  %5168 = vmatprep.subr.bf16.mxu0 %v18127_v27  ;;  %v18185_v46 = vld [vmem:[%s24906_s4 + $0xf80] ss:$16 sps:$4 sm:$0xff]   ;;  %v18188_v27 = vld [vmem:[%s24906_s4 + $0xf88] ss:$16 sps:$4 sm:$0xff]  }
 0x247   : > { %5134 = vmatmul.mubr.bf16.gmra.mrb[36].mxu0 %v20353_v42  ;;  %5314 = vmatprep.subr.bf16.mxu1 %v18130_v48  ;;  %v18193_v48 = vld [vmem:[%s24906_s4 + $0xfa4] ss:$16 sps:$4 sm:$0xff]  }
 0x248   : > { %5280 = vmatmul.mubr.bf16.gmra.mrb[36].mxu1 %v20353_v42  ;;  %5143 = vmatprep.mubr.bf16.mxu0 %v20383_v44 }
 0x249   : > { %5169 = vmatpush1.bf16.msra.mxu0 %v18125_v49  ;;  %5289 = vmatprep.mubr.bf16.mxu1 %v20383_v44  ;;  %v18196_v49 = vld [vmem:[%s24906_s4 + $0xfac] ss:$16 sps:$4 sm:$0xff]  }
 0x24a   : > { %5315 = vmatpush1.bf16.msra.mxu1 %v18128_v51  ;;  %5170 = vmatprep.subr.bf16.mxu0 %v18133_v52  ;;  %v18191_v51 = vld [vmem:[%s24906_s4 + $0xfa0] ss:$16 sps:$4 sm:$0xff]   ;;  %v18194_v52 = vld [vmem:[%s24906_s4 + $0xfa8] ss:$16 sps:$4 sm:$0xff]  }
 0x24b   : > { %5316 = vmatprep.subr.bf16.mxu1 %v18136_v53  ;;  %v18199_v53 = vld [vmem:[%s24906_s4 + $0xfc4] ss:$16 sps:$4 sm:$0xff]  }
 0x24d   : > { %5171 = vmatpush1.bf16.msra.mxu0 %v18131_v57  ;;  %v18202_v57 = vld [vmem:[%s24906_s4 + $0xfcc] ss:$16 sps:$4 sm:$0xff]  }
 0x24e   : > { %5317 = vmatpush1.bf16.msra.mxu1 %v18134_v54  ;;  %5172 = vmatprep.subr.bf16.mxu0 %v18139_v55  ;;  %v18197_v54 = vld [vmem:[%s24906_s4 + $0xfc0] ss:$16 sps:$4 sm:$0xff]   ;;  %v18200_v55 = vld [vmem:[%s24906_s4 + $0xfc8] ss:$16 sps:$4 sm:$0xff]  }
 0x24f   : > { %5144 = vmatmul.mubr.bf16.gmra.mrb[40].mxu0 %v20381_v39  ;;  %5318 = vmatprep.subr.bf16.mxu1 %v18142_v56  ;;  %v18205_v56 = vld [vmem:[%s24906_s4 + $0xfe4] ss:$16 sps:$4 sm:$0xff]  }
 0x250   : > { %5290 = vmatmul.mubr.bf16.gmra.mrb[40].mxu1 %v20381_v39  ;;  %5153 = vmatprep.mubr.bf16.mxu0 %v24914_v6 }
 0x251   : > { %5173 = vmatpush1.bf16.msra.mxu0 %v18137_v60  ;;  %5299 = vmatprep.mubr.bf16.mxu1 %v24914_v6  ;;  %v18208_v60 = vld [vmem:[%s24906_s4 + $0xfec] ss:$16 sps:$4 sm:$0xff]  }
 0x252   : > { %5319 = vmatpush1.bf16.msra.mxu1 %v18140_v59  ;;  %5174 = vmatprep.subr.bf16.mxu0 %v18145_v61  ;;  %v18203_v59 = vld [vmem:[%s24906_s4 + $0xfe0] ss:$16 sps:$4 sm:$0xff]   ;;  %v18206_v61 = vld [vmem:[%s24906_s4 + $0xfe8] ss:$16 sps:$4 sm:$0xff]  }
 0x253   : > { %5320 = vmatprep.subr.bf16.mxu1 %v18148_v62  ;;  %v18211_v62 = vld [vmem:[%s24906_s4 + $0x804] ss:$16 sps:$4 sm:$0xff]  }
 0x255   : > { %5175 = vmatpush1.bf16.msra.mxu0 %v18143_v0  ;;  %v18214_v0 = vld [vmem:[%s24906_s4 + $0x80c] ss:$16 sps:$4 sm:$0xff]  }
 0x256   : > { %5321 = vmatpush1.bf16.msra.mxu1 %v18146_v58  ;;  %5176 = vmatprep.subr.bf16.mxu0 %v18151_v1  ;;  %v18209_v58 = vld [vmem:[%s24906_s4 + $0x800] ss:$16 sps:$4 sm:$0xff]   ;;  %v18212_v1 = vld [vmem:[%s24906_s4 + $0x808] ss:$16 sps:$4 sm:$0xff]  }
 0x257   : > { %5154 = vmatmul.mubr.bf16.gmra.mrb[44].mxu0 %v24914_v6  ;;  %5322 = vmatprep.subr.bf16.mxu1 %v18154_v2  ;;  %v18217_v2 = vld [vmem:[%s24906_s4 + $0x824] ss:$16 sps:$4 sm:$0xff]  }
 0x258   : > { %5300 = vmatmul.mubr.bf16.gmra.mrb[44].mxu1 %v24914_v6  ;;  %5196 = vmatprep.mubr.bf16.mxu0 %v20279_v50 }
 0x259   : > { %5177 = vmatpush1.bf16.msra.mxu0 %v18149_v5  ;;  %5342 = vmatprep.mubr.bf16.mxu1 %v20279_v50  ;;  %v18220_v5 = vld [vmem:[%s24906_s4 + $0x82c] ss:$16 sps:$4 sm:$0xff]  }
 0x25a   : > { %5323 = vmatpush1.bf16.msra.mxu1 %v18152_v7  ;;  %5178 = vmatprep.subr.bf16.mxu0 %v18157_v14  ;;  %v18215_v7 = vld [vmem:[%s24906_s4 + $0x820] ss:$16 sps:$4 sm:$0xff]   ;;  %v18218_v14 = vld [vmem:[%s24906_s4 + $0x828] ss:$16 sps:$4 sm:$0xff]  }
 0x25b   : > { %5324 = vmatprep.subr.bf16.mxu1 %v18160_v8  ;;  %v18223_v8 = vld [vmem:[%s24906_s4 + $0x844] ss:$16 sps:$4 sm:$0xff]  }
 0x25d   : > { %5179 = vmatpush1.bf16.msra.mxu0 %v18155_v11  ;;  %v18226_v11 = vld [vmem:[%s24906_s4 + $0x84c] ss:$16 sps:$4 sm:$0xff]  }
 0x25e   : > { %5325 = vmatpush1.bf16.msra.mxu1 %v18158_v19  ;;  %5180 = vmatprep.subr.bf16.mxu0 %v18163_v20  ;;  %v18221_v19 = vld [vmem:[%s24906_s4 + $0x840] ss:$16 sps:$4 sm:$0xff]   ;;  %v18224_v20 = vld [vmem:[%s24906_s4 + $0x848] ss:$16 sps:$4 sm:$0xff]  }
 0x25f   : > { %5326 = vmatprep.subr.bf16.mxu1 %v18166_v22  ;;  %v18229_v22 = vld [vmem:[%s24906_s4 + $0x864] ss:$16 sps:$4 sm:$0xff]  }
 0x261   : > { %5181 = vmatpush1.bf16.msra.mxu0 %v18161_v23  ;;  %v18232_v23 = vld [vmem:[%s24906_s4 + $0x86c] ss:$16 sps:$4 sm:$0xff]  }
 0x262   : > { %5327 = vmatpush1.bf16.msra.mxu1 %v18164_v63  ;;  %5182 = vmatprep.subr.bf16.mxu0 %v18169_v25  ;;  %v18227_v63 = vld [vmem:[%s24906_s4 + $0x860] ss:$16 sps:$4 sm:$0xff]   ;;  %v18230_v25 = vld [vmem:[%s24906_s4 + $0x868] ss:$16 sps:$4 sm:$0xff]  }
 0x263   : > { %5328 = vmatprep.subr.bf16.mxu1 %v18172_v26  ;;  %v18235_v26 = vld [vmem:[%s24906_s4 + $0x884] ss:$16 sps:$4 sm:$0xff]  }
 0x265   : > { %5183 = vmatpush1.bf16.msra.mxu0 %v18167_v28  ;;  %v18238_v28 = vld [vmem:[%s24906_s4 + $0x88c] ss:$16 sps:$4 sm:$0xff]  }
 0x266   : > { %5329 = vmatpush1.bf16.msra.mxu1 %v18170_v29  ;;  %5184 = vmatprep.subr.bf16.mxu0 %v18175_v17  ;;  %v18233_v29 = vld [vmem:[%s24906_s4 + $0x880] ss:$16 sps:$4 sm:$0xff]   ;;  %v18236_v17 = vld [vmem:[%s24906_s4 + $0x888] ss:$16 sps:$4 sm:$0xff]  }
 0x267   : > { %5330 = vmatprep.subr.bf16.mxu1 %v18178_v30  ;;  %v18241_v30 = vld [vmem:[%s24906_s4 + $0x8a4] ss:$16 sps:$4 sm:$0xff]  }
 0x269   : > { %5185 = vmatpush1.bf16.msra.mxu0 %v18173_v31  ;;  %v18244_v31 = vld [vmem:[%s24906_s4 + $0x8ac] ss:$16 sps:$4 sm:$0xff]  }
 0x26a   : > { %5331 = vmatpush1.bf16.msra.mxu1 %v18176_v32  ;;  %5186 = vmatprep.subr.bf16.mxu0 %v18181_v33  ;;  %v18239_v32 = vld [vmem:[%s24906_s4 + $0x8a0] ss:$16 sps:$4 sm:$0xff]   ;;  %v18242_v33 = vld [vmem:[%s24906_s4 + $0x8a8] ss:$16 sps:$4 sm:$0xff]  }
 0x26b   : > { %5332 = vmatprep.subr.bf16.mxu1 %v18184_v34  ;;  %v18247_v34 = vld [vmem:[%s24906_s4 + $0x8c4] ss:$16 sps:$4 sm:$0xff]  }
 0x26d   : > { %5187 = vmatpush1.bf16.msra.mxu0 %v18179_v36  ;;  %v18250_v36 = vld [vmem:[%s24906_s4 + $0x8cc] ss:$16 sps:$4 sm:$0xff]  }
 0x26e   : > { %5333 = vmatpush1.bf16.msra.mxu1 %v18182_v38  ;;  %5188 = vmatprep.subr.bf16.mxu0 %v18187_v24  ;;  %v18245_v38 = vld [vmem:[%s24906_s4 + $0x8c0] ss:$16 sps:$4 sm:$0xff]   ;;  %v18248_v24 = vld [vmem:[%s24906_s4 + $0x8c8] ss:$16 sps:$4 sm:$0xff]  }
 0x26f   : > { %5334 = vmatprep.subr.bf16.mxu1 %v18190_v45  ;;  %v18253_v45 = vld [vmem:[%s24906_s4 + $0x8e4] ss:$16 sps:$4 sm:$0xff]  }
 0x271   : > { %5189 = vmatpush1.bf16.msra.mxu0 %v18185_v46  ;;  %v18256_v46 = vld [vmem:[%s24906_s4 + $0x8ec] ss:$16 sps:$4 sm:$0xff]  }
 0x272   : > { %5335 = vmatpush1.bf16.msra.mxu1 %v18188_v27  ;;  %5190 = vmatprep.subr.bf16.mxu0 %v18193_v48  ;;  %v18251_v27 = vld [vmem:[%s24906_s4 + $0x8e0] ss:$16 sps:$4 sm:$0xff]   ;;  %v18254_v48 = vld [vmem:[%s24906_s4 + $0x8e8] ss:$16 sps:$4 sm:$0xff]  }
 0x273   : > { %5336 = vmatprep.subr.bf16.mxu1 %v18196_v49  ;;  %v18259_v49 = vld [vmem:[%s24906_s4 + $0x904] ss:$16 sps:$4 sm:$0xff]  }
 0x275   : > { %5191 = vmatpush1.bf16.msra.mxu0 %v18191_v51  ;;  %v18262_v51 = vld [vmem:[%s24906_s4 + $0x90c] ss:$16 sps:$4 sm:$0xff]  }
 0x276   : > { %5337 = vmatpush1.bf16.msra.mxu1 %v18194_v52  ;;  %5192 = vmatprep.subr.bf16.mxu0 %v18199_v53  ;;  %v18260_v52 = vld [vmem:[%s24906_s4 + $0x908] ss:$16 sps:$4 sm:$0xff]   ;;  %v18265_v53 = vld [vmem:[%s24906_s4 + $0x924] ss:$16 sps:$4 sm:$0xff]  }
 0x277   : > { %5338 = vmatprep.subr.bf16.mxu1 %v18202_v57  ;;  %v18268_v57 = vld [vmem:[%s24906_s4 + $0x92c] ss:$16 sps:$4 sm:$0xff]  }
 0x279   : > { %5193 = vmatpush1.bf16.msra.mxu0 %v18197_v54  ;;  %v18263_v54 = vld [vmem:[%s24906_s4 + $0x920] ss:$16 sps:$4 sm:$0xff]  }
 0x27a   : > { %5339 = vmatpush1.bf16.msra.mxu1 %v18200_v55  ;;  %5194 = vmatprep.subr.bf16.mxu0 %v18205_v56  ;;  %v18266_v55 = vld [vmem:[%s24906_s4 + $0x928] ss:$16 sps:$4 sm:$0xff]   ;;  %v18271_v56 = vld [vmem:[%s24906_s4 + $0x944] ss:$16 sps:$4 sm:$0xff]  }
 0x27b   : > { %5340 = vmatprep.subr.bf16.mxu1 %v18208_v60  ;;  %v18274_v60 = vld [vmem:[%s24906_s4 + $0x94c] ss:$16 sps:$4 sm:$0xff]  }
 0x27d   : > { %5195 = vmatpush1.bf16.msra.mxu0 %v18203_v59  ;;  %v18269_v59 = vld [vmem:[%s24906_s4 + $0x940] ss:$16 sps:$4 sm:$0xff]  }
 0x27e   : > { %5341 = vmatpush1.bf16.msra.mxu1 %v18206_v61  ;;  %6023 = vmatprep.subr.bf16.mxu0 %v18211_v62  ;;  %v18272_v61 = vld [vmem:[%s24906_s4 + $0x948] ss:$16 sps:$4 sm:$0xff]   ;;  %v18277_v62 = vld [vmem:[%s24906_s4 + $0x964] ss:$16 sps:$4 sm:$0xff]  }
 0x27f   : > { %6169 = vmatprep.subr.bf16.mxu1 %v18214_v0  ;;  %v18280_v0 = vld [vmem:[%s24906_s4 + $0x96c] ss:$16 sps:$4 sm:$0xff]  }
 0x280   : > { %5197 = vmatmul.mubr.bf16.vlgmr.msra.gmra.mrb[32].mxu0 %v20271_v47 }
 0x281   : > { %5343 = vmatmul.mubr.bf16.vlgmr.msra.gmra.mrb[32].mxu1 %v20271_v47  ;;  %5206 = vmatprep.mubr.bf16.mxu0 %v20371_v10 }
 0x282   : > { %5352 = vmatprep.mubr.bf16.mxu1 %v20371_v10  ;;  %6024 = vmatpush1.bf16.msra.mxu0 %v18209_v58  ;;  %v18275_v58 = vld [vmem:[%s24906_s4 + $0x960] ss:$16 sps:$4 sm:$0xff]  }
 0x283   : > { %6170 = vmatpush1.bf16.msra.mxu1 %v18212_v1  ;;  %6025 = vmatprep.subr.bf16.mxu0 %v18217_v2  ;;  %v18278_v1 = vld [vmem:[%s24906_s4 + $0x968] ss:$16 sps:$4 sm:$0xff]   ;;  %v18283_v2 = vld [vmem:[%s24906_s4 + $0x984] ss:$16 sps:$4 sm:$0xff]  }
 0x284   : > { %6171 = vmatprep.subr.bf16.mxu1 %v18220_v5  ;;  %v18286_v5 = vld [vmem:[%s24906_s4 + $0x98c] ss:$16 sps:$4 sm:$0xff]  }
 0x286   : > { %6026 = vmatpush1.bf16.msra.mxu0 %v18215_v7  ;;  %v18281_v7 = vld [vmem:[%s24906_s4 + $0x980] ss:$16 sps:$4 sm:$0xff]  }
 0x287   : > { %6172 = vmatpush1.bf16.msra.mxu1 %v18218_v14  ;;  %6027 = vmatprep.subr.bf16.mxu0 %v18223_v8  ;;  %v18284_v14 = vld [vmem:[%s24906_s4 + $0x988] ss:$16 sps:$4 sm:$0xff]   ;;  %v18289_v8 = vld [vmem:[%s24906_s4 + $0x9a4] ss:$16 sps:$4 sm:$0xff]  }
 0x288   : > { %5207 = vmatmul.mubr.bf16.gmra.mrb[36].mxu0 %v20369_v9  ;;  %6173 = vmatprep.subr.bf16.mxu1 %v18226_v11  ;;  %v18292_v11 = vld [vmem:[%s24906_s4 + $0x9ac] ss:$16 sps:$4 sm:$0xff]  }
 0x289   : > { %5353 = vmatmul.mubr.bf16.gmra.mrb[36].mxu1 %v20369_v9  ;;  %5216 = vmatprep.mubr.bf16.mxu0 %v20427_v21 }
 0x28a   : > { %5362 = vmatprep.mubr.bf16.mxu1 %v20427_v21  ;;  %6028 = vmatpush1.bf16.msra.mxu0 %v18221_v19  ;;  %v18287_v19 = vld [vmem:[%s24906_s4 + $0x9a0] ss:$16 sps:$4 sm:$0xff]  }
 0x28b   : > { %6174 = vmatpush1.bf16.msra.mxu1 %v18224_v20  ;;  %6029 = vmatprep.subr.bf16.mxu0 %v18229_v22  ;;  %v18290_v20 = vld [vmem:[%s24906_s4 + $0x9a8] ss:$16 sps:$4 sm:$0xff]   ;;  %v18295_v22 = vld [vmem:[%s24906_s4 + $0x9c4] ss:$16 sps:$4 sm:$0xff]  }
 0x28c   : > { %6175 = vmatprep.subr.bf16.mxu1 %v18232_v23  ;;  %v18298_v23 = vld [vmem:[%s24906_s4 + $0x9cc] ss:$16 sps:$4 sm:$0xff]  }
 0x28e   : > { %6030 = vmatpush1.bf16.msra.mxu0 %v18227_v63  ;;  %v18293_v63 = vld [vmem:[%s24906_s4 + $0x9c0] ss:$16 sps:$4 sm:$0xff]  }
 0x28f   : > { %6176 = vmatpush1.bf16.msra.mxu1 %v18230_v25  ;;  %6031 = vmatprep.subr.bf16.mxu0 %v18235_v26  ;;  %v18296_v25 = vld [vmem:[%s24906_s4 + $0x9c8] ss:$16 sps:$4 sm:$0xff]   ;;  %v18301_v26 = vld [vmem:[%s24906_s4 + $0x9e4] ss:$16 sps:$4 sm:$0xff]  }
 0x290   : > { %5217 = vmatmul.mubr.bf16.gmra.mrb[40].mxu0 %v20417_v18  ;;  %6177 = vmatprep.subr.bf16.mxu1 %v18238_v28  ;;  %v18304_v28 = vld [vmem:[%s24906_s4 + $0x9ec] ss:$16 sps:$4 sm:$0xff]  }
 0x291   : > { %5363 = vmatmul.mubr.bf16.gmra.mrb[40].mxu1 %v20417_v18  ;;  %5226 = vmatprep.mubr.bf16.mxu0 %v24914_v6 }
 0x292   : > { %6032 = vmatpush1.bf16.msra.mxu0 %v18233_v29  ;;  %5372 = vmatprep.mubr.bf16.mxu1 %v24914_v6  ;;  %v18299_v29 = vld [vmem:[%s24906_s4 + $0x9e0] ss:$16 sps:$4 sm:$0xff]  }
 0x293   : > { %6178 = vmatpush1.bf16.msra.mxu1 %v18236_v17  ;;  %6033 = vmatprep.subr.bf16.mxu0 %v18241_v30  ;;  %v18302_v17 = vld [vmem:[%s24906_s4 + $0x9e8] ss:$16 sps:$4 sm:$0xff]   ;;  %v18307_v30 = vld [vmem:[%s24906_s4 + $0xa04] ss:$16 sps:$4 sm:$0xff]  }
 0x294   : > { %6179 = vmatprep.subr.bf16.mxu1 %v18244_v31  ;;  %v18310_v31 = vld [vmem:[%s24906_s4 + $0xa0c] ss:$16 sps:$4 sm:$0xff]  }
 0x296   : > { %6034 = vmatpush1.bf16.msra.mxu0 %v18239_v32  ;;  %v18305_v32 = vld [vmem:[%s24906_s4 + $0xa00] ss:$16 sps:$4 sm:$0xff]  }
 0x297   : > { %6180 = vmatpush1.bf16.msra.mxu1 %v18242_v33  ;;  %6035 = vmatprep.subr.bf16.mxu0 %v18247_v34  ;;  %v18308_v33 = vld [vmem:[%s24906_s4 + $0xa08] ss:$16 sps:$4 sm:$0xff]   ;;  %v18313_v34 = vld [vmem:[%s24906_s4 + $0xa24] ss:$16 sps:$4 sm:$0xff]  }
 0x298   : > { %5227 = vmatmul.mubr.bf16.gmra.mrb[44].mxu0 %v24914_v6  ;;  %6181 = vmatprep.subr.bf16.mxu1 %v18250_v36  ;;  %v18316_v36 = vld [vmem:[%s24906_s4 + $0xa2c] ss:$16 sps:$4 sm:$0xff]  }
 0x299   : > { %5373 = vmatmul.mubr.bf16.gmra.mrb[44].mxu1 %v24914_v6  ;;  %6055 = vmatprep.mubr.bf16.mxu0 %v20085_v41 }
 0x29a   : > { %6036 = vmatpush1.bf16.msra.mxu0 %v18245_v38  ;;  %6201 = vmatprep.mubr.bf16.mxu1 %v20085_v41  ;;  %v18257_v41 = vld [vmem:[%s24906_s4 + $0x900] ss:$16 sps:$4 sm:$0xff]  }
 0x29b   : > { %6182 = vmatpush1.bf16.msra.mxu1 %v18248_v24  ;;  %6037 = vmatprep.subr.bf16.mxu0 %v18253_v45  ;;  %v18311_v38 = vld [vmem:[%s24906_s4 + $0xa20] ss:$16 sps:$4 sm:$0xff]   ;;  %v18314_v24 = vld [vmem:[%s24906_s4 + $0xa28] ss:$16 sps:$4 sm:$0xff]   ;;  %v18319_v45 = vld [vmem:[%s24906_s4 + $0xa44] ss:$16 sps:$4 sm:$0xff]  }
 0x29c   : > { %6183 = vmatprep.subr.bf16.mxu1 %v18256_v46  ;;  %v18320_v46 = vld [vmem:[%s24906_s4 + $0xa48] ss:$16 sps:$4 sm:$0xff]  }
 0x29e   : > { %6038 = vmatpush1.bf16.msra.mxu0 %v18251_v27  ;;  %v18325_v27 = vld [vmem:[%s24906_s4 + $0xa64] ss:$16 sps:$4 sm:$0xff]  }
 0x29f   : > { %6184 = vmatpush1.bf16.msra.mxu1 %v18254_v48  ;;  %6039 = vmatprep.subr.bf16.mxu0 %v18259_v49  ;;  %v18328_v48 = vld [vmem:[%s24906_s4 + $0xa6c] ss:$16 sps:$4 sm:$0xff]   ;;  %v18323_v49 = vld [vmem:[%s24906_s4 + $0xa60] ss:$16 sps:$4 sm:$0xff]  }
 0x2a0   : > { %6185 = vmatprep.subr.bf16.mxu1 %v18262_v51  ;;  %v18326_v51 = vld [vmem:[%s24906_s4 + $0xa68] ss:$16 sps:$4 sm:$0xff]  }
 0x2a2   : > { %6040 = vmatpush1.bf16.msra.mxu0 %v18257_v41  ;;  %v18331_v41 = vld [vmem:[%s24906_s4 + $0xa84] ss:$16 sps:$4 sm:$0xff]  }
 0x2a3   : > { %6186 = vmatpush1.bf16.msra.mxu1 %v18260_v52  ;;  %6041 = vmatprep.subr.bf16.mxu0 %v18265_v53  ;;  %v18329_v52 = vld [vmem:[%s24906_s4 + $0xa80] ss:$16 sps:$4 sm:$0xff]  }
 0x2a4   : > { %6187 = vmatprep.subr.bf16.mxu1 %v18268_v57  ;;  %v4071_v53 = vld [vmem:[%s24908_s6] sm:$0xf]  ;;  %v18332_v57 = vld [vmem:[%s24906_s4 + $0xa88] ss:$16 sps:$4 sm:$0xff]  }
 0x2a6   : > { %6042 = vmatpush1.bf16.msra.mxu0 %v18263_v54 }
 0x2a7   : > { %6188 = vmatpush1.bf16.msra.mxu1 %v18266_v55  ;;  %6043 = vmatprep.subr.bf16.mxu0 %v18271_v56  ;;  %v18337_v55 = vld [vmem:[%s24906_s4 + $0xaa4] ss:$16 sps:$4 sm:$0xff]  }
 0x2a8   : > { %6189 = vmatprep.subr.bf16.mxu1 %v18274_v60 }
 0x2aa   : > { %6044 = vmatpush1.bf16.msra.mxu0 %v18269_v59 }
 0x2ab   : > { %6190 = vmatpush1.bf16.msra.mxu1 %v18272_v61  ;;  %6045 = vmatprep.subr.bf16.mxu0 %v18277_v62  ;;  %v18340_v61 = vld [vmem:[%s24906_s4 + $0xaac] ss:$16 sps:$4 sm:$0xff]  }
 0x2ac   : > { %6191 = vmatprep.subr.bf16.mxu1 %v18280_v0  ;;  %v21530_v0 = vrot.slane %v4071_v53, %v20059_v15 }
 0x2ae   : > { %6046 = vmatpush1.bf16.msra.mxu0 %v18275_v58 }
 0x2af   : > { %6192 = vmatpush1.bf16.msra.mxu1 %v18278_v1  ;;  %6047 = vmatprep.subr.bf16.mxu0 %v18283_v2 }
 0x2b0   : > { %6193 = vmatprep.subr.bf16.mxu1 %v18286_v5  ;;  %v18335_v5 = vld [vmem:[%s24906_s4 + $0xaa0] ss:$16 sps:$4 sm:$0xff]  }
 0x2b2   : > { %6048 = vmatpush1.bf16.msra.mxu0 %v18281_v7 }
 0x2b3   : > { %6194 = vmatpush1.bf16.msra.mxu1 %v18284_v14  ;;  %6049 = vmatprep.subr.bf16.mxu0 %v18289_v8  ;;  %v21543_v8 = vrot.slane %v4071_v53, %v20062_v16 }
 0x2b4   : > { %6195 = vmatprep.subr.bf16.mxu1 %v18292_v11 }
 0x2b6   : > { %6050 = vmatpush1.bf16.msra.mxu0 %v18287_v19  ;;  %v18338_v19 = vld [vmem:[%s24906_s4 + $0xaa8] ss:$16 sps:$4 sm:$0xff]  }
 0x2b7   : > { %6196 = vmatpush1.bf16.msra.mxu1 %v18290_v20  ;;  %6051 = vmatprep.subr.bf16.mxu0 %v18295_v22 }
 0x2b8   : > { %6197 = vmatprep.subr.bf16.mxu1 %v18298_v23 }
 0x2ba   : > { %6052 = vmatpush1.bf16.msra.mxu0 %v18293_v63 }
 0x2bb   : > { %6198 = vmatpush1.bf16.msra.mxu1 %v18296_v25  ;;  %6053 = vmatprep.subr.bf16.mxu0 %v18301_v26 }
 0x2bc   : > { %6199 = vmatprep.subr.bf16.mxu1 %v18304_v28  ;;  %v18343_v28 = vld [vmem:[%s24906_s4 + $0xac4] ss:$16 sps:$4 sm:$0xff]  }
 0x2be   : > { %6054 = vmatpush1.bf16.msra.mxu0 %v18299_v29 }
 0x2bf   : > { %6200 = vmatpush1.bf16.msra.mxu1 %v18302_v17  ;;  %6096 = vmatprep.subr.bf16.mxu0 %v18307_v30 }
 0x2c0   : > { %6242 = vmatprep.subr.bf16.mxu1 %v18310_v31 }
 0x2c1   : > { %6056 = vmatmul.mubr.bf16.vlgmr.msra.gmra.mrb[32].mxu0 %v20083_v40 }
 0x2c2   : > { %6202 = vmatmul.mubr.bf16.vlgmr.msra.gmra.mrb[32].mxu1 %v20083_v40  ;;  %6065 = vmatprep.mubr.bf16.mxu0 %v20221_v4  ;;  %v18322_v40 = vld [vmem:[%s24906_s4 + $0xa4c] ss:$16 sps:$4 sm:$0xff]  }
 0x2c3   : > { %6097 = vmatpush1.bf16.msra.mxu0 %v18305_v32  ;;  %6211 = vmatprep.mubr.bf16.mxu1 %v20221_v4  ;;  %v18317_v4 = vld [vmem:[%s24906_s4 + $0xa40] ss:$16 sps:$4 sm:$0xff]  }
 0x2c4   : > { %6243 = vmatpush1.bf16.msra.mxu1 %v18308_v33  ;;  %6098 = vmatprep.subr.bf16.mxu0 %v18313_v34  ;;  %v18346_v33 = vld [vmem:[%s24906_s4 + $0xacc] ss:$16 sps:$4 sm:$0xff]  }
 0x2c5   : > { %6244 = vmatprep.subr.bf16.mxu1 %v18316_v36 }
 0x2c7   : > { %6099 = vmatpush1.bf16.msra.mxu0 %v18311_v38 }
 0x2c8   : > { %6245 = vmatpush1.bf16.msra.mxu1 %v18314_v24  ;;  %6100 = vmatprep.subr.bf16.mxu0 %v18319_v45 }
 0x2c9   : > { %6066 = vmatmul.mubr.bf16.gmra.mrb[36].mxu0 %v20219_v3  ;;  %6246 = vmatprep.subr.bf16.mxu1 %v18322_v40 }
 0x2ca   : > { %6212 = vmatmul.mubr.bf16.gmra.mrb[36].mxu1 %v20219_v3  ;;  %6075 = vmatprep.mubr.bf16.mxu0 %v20355_v43  ;;  %v18334_v3 = vld [vmem:[%s24906_s4 + $0xa8c] ss:$16 sps:$4 sm:$0xff]  }
 0x2cb   : > { %6101 = vmatpush1.bf16.msra.mxu0 %v18317_v4  ;;  %6221 = vmatprep.mubr.bf16.mxu1 %v20355_v43  ;;  %v4017_v43 = vld [vmem:[%s24907_s5] sm:$0xf] }
 0x2cc   : > { %6247 = vmatpush1.bf16.msra.mxu1 %v18320_v46  ;;  %6102 = vmatprep.subr.bf16.mxu0 %v18325_v27  ;;  %v21512_v54 = vrot.slane %v4017_v43, %v20059_v15  ;;  %v21519_v60 = vrot.slane %v4017_v43, %v20078_v35  ;;  %v21522_v59 = vrot.slane %v4017_v43, %v20062_v16  ;;  %v18341_v46 = vld [vmem:[%s24906_s4 + $0xac0] ss:$16 sps:$4 sm:$0xff]  }
 0x2cd   : > { %6248 = vmatprep.subr.bf16.mxu1 %v18328_v48  ;;  %v21533_v2 = vrot.slane %v4017_v43, %v20081_v37 }
 0x2cf   : > { %6103 = vmatpush1.bf16.msra.mxu0 %v18323_v49 }
 0x2d0   : > { %6249 = vmatpush1.bf16.msra.mxu1 %v18326_v51  ;;  %6104 = vmatprep.subr.bf16.mxu0 %v18331_v41  ;;  %v18344_v51 = vld [vmem:[%s24906_s4 + $0xac8] ss:$16 sps:$4 sm:$0xff]   ;;  %v18349_v41 = vld [vmem:[%s24906_s4 + $0xae4] ss:$16 sps:$4 sm:$0xff]  }
 0x2d1   : > { %6076 = vmatmul.mubr.bf16.gmra.mrb[40].mxu0 %v20353_v42  ;;  %6250 = vmatprep.subr.bf16.mxu1 %v18334_v3  ;;  %v3800_v56 = vpop.f32.mrb[16].mxu0 }
 0x2d2   : > { %6222 = vmatmul.mubr.bf16.gmra.mrb[40].mxu1 %v20353_v42  ;;  %6085 = vmatprep.mubr.bf16.mxu0 %v20383_v44  ;;  %v3985_v62 = vmax.f32 %v3800_v56, 0.0  ;;  %v3946_v58 = vpop.f32.mrb[16].mxu1  ;;  %v3802_v1 = vpop.f32.mrb[17].mxu0  ;;  %v21540_v42 = vrot.slane %v4071_v53, %v20078_v35 }
 0x2d3   : > { %6105 = vmatpush1.bf16.msra.mxu0 %v18329_v52  ;;  %6231 = vmatprep.mubr.bf16.mxu1 %v20383_v44  ;;  %v3987_v7 = vmax.f32 %v3946_v58, 0.0  ;;  %v3986_v14 = vmax.f32 %v3802_v1, 0.0  ;;  %v3948_v11 = vpop.f32.mrb[17].mxu1  ;;  %v3804_v20 = vpop.f32.mrb[18].mxu0  ;;  %v21550_v44 = vrot.slane %v4071_v53, %v20081_v37  ;;  %v18347_v1 = vld [vmem:[%s24906_s4 + $0xae0] ss:$16 sps:$4 sm:$0xff]  }
 0x2d4   : > { %6251 = vmatpush1.bf16.msra.mxu1 %v18332_v57  ;;  %v4039_v22 = vmul.f32 %v21512_v54, %v3985_v62  ;;  %v3988_v23 = vmax.f32 %v3948_v11, 0.0  ;;  %6106 = vmatprep.subr.bf16.mxu0 %v18337_v55  ;;  %v3989_v63 = vmax.f32 %v3804_v20, 0.0  ;;  %v3950_v25 = vpop.f32.mrb[18].mxu1  ;;  %v3806_v26 = vpop.f32.mrb[19].mxu0  ;;  %v18352_v57 = vld [vmem:[%s24906_s4 + $0xaec] ss:$16 sps:$4 sm:$0xff]  }
 0x2d5   : > { %v4041_v29 = vmul.f32 %v21519_v60, %v3987_v7  ;;  %v4040_v17 = vmul.f32 %v21522_v59, %v3986_v14  ;;  %6252 = vmatprep.subr.bf16.mxu1 %v18340_v61  ;;  %v3991_v30 = vmax.f32 %v3950_v25, 0.0  ;;  %v3990_v31 = vmax.f32 %v3806_v26, 0.0  ;;  %v3952_v32 = vpop.f32.mrb[19].mxu1 }
 0x2d6   : > { %v4042_v34 = vmul.f32 %v21533_v2, %v3988_v23  ;;  %v4043_v36 = vmul.f32 %v21512_v54, %v3989_v63  ;;  %v3992_v38 = vmax.f32 %v3952_v32, 0.0  ;;  %v4093_v24 = vadd.f32 %v21530_v0, %v4039_v22 }
 0x2d7   : > { %v4095_v45 = vadd.f32 %v21540_v42, %v4041_v29  ;;  %v4045_v40 = vmul.f32 %v21519_v60, %v3991_v30  ;;  %6107 = vmatpush1.bf16.msra.mxu0 %v18335_v5  ;;  %v4044_v4 = vmul.f32 %v21522_v59, %v3990_v31  ;;  %v4094_v3 = vadd.f32 %v21543_v8, %v4040_v17 }
 0x2d8   : > { %v4096_v27 = vadd.f32 %v21550_v44, %v4042_v34  ;;  %v4097_v48 = vadd.f32 %v21530_v0, %v4043_v36  ;;  %6253 = vmatpush1.bf16.msra.mxu1 %v18338_v19  ;;  %v4046_v49 = vmul.f32 %v21533_v2, %v3992_v38  ;;  %6108 = vmatprep.subr.bf16.mxu0 %v18343_v28 }
 0x2d9   : > { %v4099_v43 = vadd.f32 %v21540_v42, %v4045_v40  ;;  %v4098_v52 = vadd.f32 %v21543_v8, %v4044_v4  ;;  %6086 = vmatmul.mubr.bf16.gmra.mrb[44].mxu0 %v20381_v39  ;;  %6254 = vmatprep.subr.bf16.mxu1 %v18346_v33  ;;  %v3810_v53 = vpop.f32.mrb[20].mxu0  ;;  %v18358_v33 = vld [vmem:[%s24906_s4 + $0xb0c] ss:$16 sps:$4 sm:$0xff]  }
 0x2da   : > { %v21585_v55 = vpack.c.bf16 %v4097_v48, %v4093_v24  ;;  %v4100_v56 = vadd.f32 %v21550_v44, %v4046_v49  ;;  %6232 = vmatmul.mubr.bf16.gmra.mrb[44].mxu1 %v20381_v39  ;;  %6128 = vmatprep.mubr.bf16.mxu0 %v20137_v13  ;;  %v3993_v61 = vmax.f32 %v3810_v53, 0.0  ;;  %v3956_v62 = vpop.f32.mrb[20].mxu1  ;;  %v3812_v58 = vpop.f32.mrb[21].mxu0  ;;  %v18350_v39 = vld [vmem:[%s24906_s4 + $0xae8] ss:$16 sps:$4 sm:$0xff]  }
 0x2db   : > { %v21593_v5 = vpack.c.bf16 %v4099_v43, %v4095_v45  ;;  %v21595_v7 = vpack.c.bf16 %v4098_v52, %v4094_v3  ;;  %6109 = vmatpush1.bf16.msra.mxu0 %v18341_v46  ;;  %6274 = vmatprep.mubr.bf16.mxu1 %v20137_v13  ;;  %v3995_v14 = vmax.f32 %v3956_v62, 0.0  ;;  %v3994_v11 = vmax.f32 %v3812_v58, 0.0  ;;  %v3958_v19 = vpop.f32.mrb[21].mxu1  ;;  %v3814_v20 = vpop.f32.mrb[22].mxu0  ;;  %v18355_v13 = vld [vmem:[%s24906_s4 + $0xb04] ss:$16 sps:$4 sm:$0xff]  }
 0x2dc   : > { %v21601_v22 = vpack.c.bf16 %v4100_v56, %v4096_v27  ;;  %6255 = vmatpush1.bf16.msra.mxu1 %v18344_v51  ;;  %v4047_v23 = vmul.f32 %v21512_v54, %v3993_v61  ;;  %v3996_v63 = vmax.f32 %v3958_v19, 0.0  ;;  %6110 = vmatprep.subr.bf16.mxu0 %v18349_v41  ;;  %v3997_v25 = vmax.f32 %v3814_v20, 0.0  ;;  %v3960_v26 = vpop.f32.mrb[22].mxu1  ;;  %v3816_v28 = vpop.f32.mrb[23].mxu0  ;;  %v18353_v27 = vld [vmem:[%s24906_s4 + $0xb00] ss:$16 sps:$4 sm:$0xff]  }
 0x2dd   : > { %v4049_v29 = vmul.f32 %v21519_v60, %v3995_v14  ;;  %v4048_v17 = vmul.f32 %v21522_v59, %v3994_v11  ;;  %6256 = vmatprep.subr.bf16.mxu1 %v18352_v57  ;;  %v3999_v30 = vmax.f32 %v3960_v26, 0.0  ;;  %v3998_v31 = vmax.f32 %v3816_v28, 0.0  ;;  %v3962_v32 = vpop.f32.mrb[23].mxu1  ;;  %v18356_v41 = vld [vmem:[%s24906_s4 + $0xb08] ss:$16 sps:$4 sm:$0xff]  }
 0x2de   : > { %v4101_v34 = vadd.f32 %v21530_v0, %v4047_v23  ;;  %v4050_v36 = vmul.f32 %v21533_v2, %v3996_v63  ;;  %v4051_v38 = vmul.f32 %v21512_v54, %v3997_v25  ;;  %v4000_v24 = vmax.f32 %v3962_v32, 0.0  ;;  %v18361_v3 = vld [vmem:[%s24906_s4 + $0xb24] ss:$16 sps:$4 sm:$0xff]   ;;  %v18364_v57 = vld [vmem:[%s24906_s4 + $0xb2c] ss:$16 sps:$4 sm:$0xff]  }
 0x2df   : > { %v4103_v45 = vadd.f32 %v21540_v42, %v4049_v29  ;;  %v4102_v40 = vadd.f32 %v21543_v8, %v4048_v17  ;;  %v4053_v4 = vmul.f32 %v21519_v60, %v3999_v30  ;;  %6111 = vmatpush1.bf16.msra.mxu0 %v18347_v1  ;;  %v4052_v46 = vmul.f32 %v21522_v59, %v3998_v31  ;;  %v18359_v14 = vld [vmem:[%s24906_s4 + $0xb20] ss:$16 sps:$4 sm:$0xff]   ;;  %v18362_v63 = vld [vmem:[%s24906_s4 + $0xb28] ss:$16 sps:$4 sm:$0xff]   ;;  %v18367_v31 = vld [vmem:[%s24906_s4 + $0xb44] ss:$16 sps:$4 sm:$0xff]  }
 0x2e0   : > { %v4104_v48 = vadd.f32 %v21550_v44, %v4050_v36  ;;  %v4105_v49 = vadd.f32 %v21530_v0, %v4051_v38  ;;  %6257 = vmatpush1.bf16.msra.mxu1 %v18350_v39  ;;  %v4054_v51 = vmul.f32 %v21533_v2, %v4000_v24  ;;  %6112 = vmatprep.subr.bf16.mxu0 %v18355_v13  ;;  %v18370_v24 = vld [vmem:[%s24906_s4 + $0xb4c] ss:$16 sps:$4 sm:$0xff]  }
 0x2e1   : > { %v4107_v43 = vadd.f32 %v21540_v42, %v4053_v4  ;;  %v4106_v52 = vadd.f32 %v21543_v8, %v4052_v46  ;;  %6258 = vmatprep.subr.bf16.mxu1 %v18358_v33  ;;  %v3820_v53 = vpop.f32.mrb[24].mxu0 }
 0x2e2   : > { %v21636_v56 = vpack.c.bf16 %v4105_v49, %v4101_v34  ;;  %v4108_v61 = vadd.f32 %v21550_v44, %v4054_v51  ;;  %v4001_v62 = vmax.f32 %v3820_v53, 0.0  ;;  %v3966_v58 = vpop.f32.mrb[24].mxu1  ;;  %v3822_v1 = vpop.f32.mrb[25].mxu0  ;;  %v18368_v53 = vld [vmem:[%s24906_s4 + $0xb48] ss:$16 sps:$4 sm:$0xff]  }
 0x2e3   : > { %v21642_v11 = vpack.c.bf16 %v4107_v43, %v4103_v45  ;;  %v21644_v19 = vpack.c.bf16 %v4106_v52, %v4102_v40  ;;  %6113 = vmatpush1.bf16.msra.mxu0 %v18353_v27  ;;  %v4003_v39 = vmax.f32 %v3966_v58, 0.0  ;;  %v4002_v20 = vmax.f32 %v3822_v1, 0.0  ;;  %v3968_v23 = vpop.f32.mrb[25].mxu1  ;;  %v3824_v25 = vpop.f32.mrb[26].mxu0  ;;  %v18376_v1 = vld [vmem:[%s24906_s4 + $0xb6c] ss:$16 sps:$4 sm:$0xff]  }
 0x2e4   : > { %v21649_v26 = vpack.c.bf16 %v4108_v61, %v4104_v48  ;;  %6259 = vmatpush1.bf16.msra.mxu1 %v18356_v41  ;;  %v4055_v28 = vmul.f32 %v21512_v54, %v4001_v62  ;;  %v4004_v13 = vmax.f32 %v3968_v23, 0.0  ;;  %6114 = vmatprep.subr.bf16.mxu0 %v18361_v3  ;;  %v4005_v29 = vmax.f32 %v3824_v25, 0.0  ;;  %v3970_v17 = vpop.f32.mrb[26].mxu1  ;;  %v3826_v30 = vpop.f32.mrb[27].mxu0  ;;  %v18365_v41 = vld [vmem:[%s24906_s4 + $0xb40] ss:$16 sps:$4 sm:$0xff]  }
 0x2e5   : > { %v4057_v32 = vmul.f32 %v21519_v60, %v4003_v39  ;;  %v4056_v33 = vmul.f32 %v21522_v59, %v4002_v20  ;;  %6260 = vmatprep.subr.bf16.mxu1 %v18364_v57  ;;  %v4007_v34 = vmax.f32 %v3970_v17, 0.0  ;;  %v4006_v36 = vmax.f32 %v3826_v30, 0.0  ;;  %v3972_v38 = vpop.f32.mrb[27].mxu1  ;;  %v18373_v57 = vld [vmem:[%s24906_s4 + $0xb64] ss:$16 sps:$4 sm:$0xff]  }
 0x2e6   : > { %v4109_v45 = vadd.f32 %v21530_v0, %v4055_v28  ;;  %v4058_v40 = vmul.f32 %v21533_v2, %v4004_v13  ;;  %v4059_v4 = vmul.f32 %v21512_v54, %v4005_v29  ;;  %v4008_v46 = vmax.f32 %v3972_v38, 0.0  ;;  %v18371_v25 = vld [vmem:[%s24906_s4 + $0xb60] ss:$16 sps:$4 sm:$0xff]  }
 0x2e7   : > { %v4111_v27 = vadd.f32 %v21540_v42, %v4057_v32  ;;  %v4110_v48 = vadd.f32 %v21543_v8, %v4056_v33  ;;  %v4061_v49 = vmul.f32 %v21519_v60, %v4007_v34  ;;  %6115 = vmatpush1.bf16.msra.mxu0 %v18359_v14  ;;  %v4060_v51 = vmul.f32 %v21522_v59, %v4006_v36 }
 0x2e8   : > { %v4112_v3 = vadd.f32 %v21550_v44, %v4058_v40  ;;  %v4113_v43 = vadd.f32 %v21530_v0, %v4059_v4  ;;  %6261 = vmatpush1.bf16.msra.mxu1 %v18362_v63  ;;  %v4062_v52 = vmul.f32 %v21533_v2, %v4008_v46  ;;  %6116 = vmatprep.subr.bf16.mxu0 %v18367_v31  ;;  %v18374_v31 = vld [vmem:[%s24906_s4 + $0xb68] ss:$16 sps:$4 sm:$0xff]   ;;  %v18379_v40 = vld [vmem:[%s24906_s4 + $0xb84] ss:$16 sps:$4 sm:$0xff]  }
 0x2e9   : > { %v4115_v61 = vadd.f32 %v21540_v42, %v4061_v49  ;;  %v4114_v62 = vadd.f32 %v21543_v8, %v4060_v51  ;;  %6262 = vmatprep.subr.bf16.mxu1 %v18370_v24  ;;  %v3830_v58 = vpop.f32.mrb[28].mxu0  ;;  %v18382_v51 = vld [vmem:[%s24906_s4 + $0xb8c] ss:$16 sps:$4 sm:$0xff]  }
 0x2ea   : > { %v21684_v14 = vpack.c.bf16 %v4113_v43, %v4109_v45  ;;  %v4116_v39 = vadd.f32 %v21550_v44, %v4062_v52  ;;  %v4009_v20 = vmax.f32 %v3830_v58, 0.0  ;;  %v3976_v23 = vpop.f32.mrb[28].mxu1  ;;  %v3832_v63 = vpop.f32.mrb[29].mxu0  ;;  %v18377_v58 = vld [vmem:[%s24906_s4 + $0xb80] ss:$16 sps:$4 sm:$0xff]  }
 0x2eb   : > { %v21690_v28 = vpack.c.bf16 %v4115_v61, %v4111_v27  ;;  %v21692_v13 = vpack.c.bf16 %v4114_v62, %v4110_v48  ;;  %6117 = vmatpush1.bf16.msra.mxu0 %v18365_v41  ;;  %v4011_v29 = vmax.f32 %v3976_v23, 0.0  ;;  %v4010_v17 = vmax.f32 %v3832_v63, 0.0  ;;  %v3978_v30 = vpop.f32.mrb[29].mxu1  ;;  %v3834_v32 = vpop.f32.mrb[30].mxu0 }
 0x2ec   : > { %v21697_v33 = vpack.c.bf16 %v4116_v39, %v4112_v3  ;;  %6263 = vmatpush1.bf16.msra.mxu1 %v18368_v53  ;;  %v4063_v34 = vmul.f32 %v21512_v54, %v4009_v20  ;;  %v4012_v36 = vmax.f32 %v3978_v30, 0.0  ;;  %6118 = vmatprep.subr.bf16.mxu0 %v18373_v57  ;;  %v4013_v38 = vmax.f32 %v3834_v32, 0.0  ;;  %v3980_v24 = vpop.f32.mrb[30].mxu1  ;;  %v3836_v45 = vpop.f32.mrb[31].mxu0  ;;  %v18380_v20 = vld [vmem:[%s24906_s4 + $0xb88] ss:$16 sps:$4 sm:$0xff]  }
 0x2ed   : > { %v4065_v4 = vmul.f32 %v21519_v60, %v4011_v29  ;;  %v4064_v46 = vmul.f32 %v21522_v59, %v4010_v17  ;;  %6264 = vmatprep.subr.bf16.mxu1 %v18376_v1  ;;  %v4015_v27 = vmax.f32 %v3980_v24, 0.0  ;;  %v4014_v48 = vmax.f32 %v3836_v45, 0.0  ;;  %v3982_v49 = vpop.f32.mrb[31].mxu1  ;;  %v18394_v30 = vld [vmem:[%s24906_s4 + $0xbcc] ss:$16 sps:$4 sm:$0xff]  }
 0x2ee   : > { %v4117_v41 = vadd.f32 %v21530_v0, %v4063_v34  ;;  %v4066_v3 = vmul.f32 %v21533_v2, %v4012_v36  ;;  %v4067_v43 = vmul.f32 %v21512_v54, %v4013_v38  ;;  %v4016_v52 = vmax.f32 %v3982_v49, 0.0  ;;  %v18392_v32 = vld [vmem:[%s24906_s4 + $0xbc8] ss:$16 sps:$4 sm:$0xff]   ;;  %v18397_v34 = vld [vmem:[%s24906_s4 + $0xbe4] ss:$16 sps:$4 sm:$0xff]  }
 0x2ef   : > { %v4119_v53 = vadd.f32 %v21540_v42, %v4065_v4  ;;  %v4118_v57 = vadd.f32 %v21543_v8, %v4064_v46  ;;  %v4069_v61 = vmul.f32 %v21519_v60, %v4015_v27  ;;  %6119 = vmatpush1.bf16.msra.mxu0 %v18371_v25  ;;  %v4068_v62 = vmul.f32 %v21522_v59, %v4014_v48  ;;  %v18385_v60 = vld [vmem:[%s24906_s4 + $0xba4] ss:$16 sps:$4 sm:$0xff]   ;;  %v18400_v36 = vld [vmem:[%s24906_s4 + $0xbec] ss:$16 sps:$4 sm:$0xff]   ;;  %v18395_v38 = vld [vmem:[%s24906_s4 + $0xbe0] ss:$16 sps:$4 sm:$0xff]  }
 0x2f0   : > { %v4120_v1 = vadd.f32 %v21550_v44, %v4066_v3  ;;  %v4121_v39 = vadd.f32 %v21530_v0, %v4067_v43  ;;  %6265 = vmatpush1.bf16.msra.mxu1 %v18374_v31  ;;  %v4070_v54 = vmul.f32 %v21533_v2, %v4016_v52  ;;  %6120 = vmatprep.subr.bf16.mxu0 %v18379_v40  ;;  %v18388_v0 = vld [vmem:[%s24906_s4 + $0xbac] ss:$16 sps:$4 sm:$0xff]   ;;  %v18389_v31 = vld [vmem:[%s24906_s4 + $0xbc0] ss:$16 sps:$4 sm:$0xff]   ;;  %v18398_v24 = vld [vmem:[%s24906_s4 + $0xbe8] ss:$16 sps:$4 sm:$0xff]  }
 0x2f1   : > { %v4123_v59 = vadd.f32 %v21540_v42, %v4069_v61  ;;  %v4122_v23 = vadd.f32 %v21543_v8, %v4068_v62  ;;  %6266 = vmatprep.subr.bf16.mxu1 %v18382_v51  ;;  %v18383_v42 = vld [vmem:[%s24906_s4 + $0xba0] ss:$16 sps:$4 sm:$0xff]   ;;  %v18386_v8 = vld [vmem:[%s24906_s4 + $0xba8] ss:$16 sps:$4 sm:$0xff]   ;;  %v18403_v45 = vld [vmem:[%s24909_s7 + $0x404] ss:$16 sps:$4 sm:$0xff]  }
 0x2f2   : > { %v21732_v63 = vpack.c.bf16 %v4121_v39, %v4117_v41  ;;  %v4124_v2 = vadd.f32 %v21550_v44, %v4070_v54  ;;  %v18391_v44 = vld [vmem:[%s24906_s4 + $0xbc4] ss:$16 sps:$4 sm:$0xff]   ;;  %v18406_v40 = vld [vmem:[%s24909_s7 + $0x40c] ss:$16 sps:$4 sm:$0xff]   ;;  %v18401_v4 = vld [vmem:[%s24909_s7 + $0x400] ss:$16 sps:$4 sm:$0xff]  }
 0x2f3   : > { %v21735_v25 = vpack.c.bf16 %v4123_v59, %v4119_v53  ;;  %v21737_v29 = vpack.c.bf16 %v4122_v23, %v4118_v57  ;;  %6121 = vmatpush1.bf16.msra.mxu0 %v18377_v58  ;;  %v18404_v46 = vld [vmem:[%s24909_s7 + $0x408] ss:$16 sps:$4 sm:$0xff]   ;;  %v18409_v27 = vld [vmem:[%s24909_s7 + $0x424] ss:$16 sps:$4 sm:$0xff]   ;;  %v18412_v48 = vld [vmem:[%s24909_s7 + $0x42c] ss:$16 sps:$4 sm:$0xff]  }
 0x2f4   : > { %v21742_v17 = vpack.c.bf16 %v4124_v2, %v4120_v1  ;;  %6267 = vmatpush1.bf16.msra.mxu1 %v18380_v20  ;;  %6122 = vmatprep.subr.bf16.mxu0 %v18385_v60  ;;  %v18407_v49 = vld [vmem:[%s24909_s7 + $0x420] ss:$16 sps:$4 sm:$0xff]   ;;  %v18410_v51 = vld [vmem:[%s24909_s7 + $0x428] ss:$16 sps:$4 sm:$0xff]   ;;  %v18415_v41 = vld [vmem:[%s24909_s7 + $0x444] ss:$16 sps:$4 sm:$0xff]  }
 0x2f5   : > { %6268 = vmatprep.subr.bf16.mxu1 %v18388_v0  ;;  %v18416_v3 = vld [vmem:[%s24909_s7 + $0x448] ss:$16 sps:$4 sm:$0xff]   ;;  %v18421_v43 = vld [vmem:[%s24909_s7 + $0x464] ss:$16 sps:$4 sm:$0xff]   ;;  %v18424_v52 = vld [vmem:[%s24909_s7 + $0x46c] ss:$16 sps:$4 sm:$0xff]  }
 0x2f6   : > { %v18419_v53 = vld [vmem:[%s24909_s7 + $0x460] ss:$16 sps:$4 sm:$0xff]   ;;  %v18422_v57 = vld [vmem:[%s24909_s7 + $0x468] ss:$16 sps:$4 sm:$0xff]   ;;  %v18427_v61 = vld [vmem:[%s24909_s7 + $0x484] ss:$16 sps:$4 sm:$0xff]  }
 0x2f7   : > { %6123 = vmatpush1.bf16.msra.mxu0 %v18383_v42  ;;  %v18428_v62 = vld [vmem:[%s24909_s7 + $0x488] ss:$16 sps:$4 sm:$0xff]   ;;  %v18433_v58 = vld [vmem:[%s24909_s7 + $0x4a4] ss:$16 sps:$4 sm:$0xff]   ;;  %v18436_v1 = vld [vmem:[%s24909_s7 + $0x4ac] ss:$16 sps:$4 sm:$0xff]  }
 0x2f8   : > { %6269 = vmatpush1.bf16.msra.mxu1 %v18386_v8  ;;  %6124 = vmatprep.subr.bf16.mxu0 %v18391_v44  ;;  %v18431_v39 = vld [vmem:[%s24909_s7 + $0x4a0] ss:$16 sps:$4 sm:$0xff]   ;;  %v18434_v54 = vld [vmem:[%s24909_s7 + $0x4a8] ss:$16 sps:$4 sm:$0xff]   ;;  %v18439_v20 = vld [vmem:[%s24909_s7 + $0x4c4] ss:$16 sps:$4 sm:$0xff]  }
 0x2f9   : > { %6270 = vmatprep.subr.bf16.mxu1 %v18394_v30  ;;  %v18440_v60 = vld [vmem:[%s24909_s7 + $0x4c8] ss:$16 sps:$4 sm:$0xff]   ;;  %v18445_v59 = vld [vmem:[%s24909_s7 + $0x4e4] ss:$16 sps:$4 sm:$0xff]   ;;  %v18448_v23 = vld [vmem:[%s24909_s7 + $0x4ec] ss:$16 sps:$4 sm:$0xff]  }
 0x2fa   : > { %v18443_v0 = vld [vmem:[%s24909_s7 + $0x4e0] ss:$16 sps:$4 sm:$0xff]   ;;  %v18446_v2 = vld [vmem:[%s24909_s7 + $0x4e8] ss:$16 sps:$4 sm:$0xff]   ;;  %v18451_v42 = vld [vmem:[%s24909_s7 + $0x504] ss:$16 sps:$4 sm:$0xff]  }
 0x2fb   : > { %6125 = vmatpush1.bf16.msra.mxu0 %v18389_v31  ;;  %v18449_v8 = vld [vmem:[%s24909_s7 + $0x500] ss:$16 sps:$4 sm:$0xff]   ;;  %v18452_v44 = vld [vmem:[%s24909_s7 + $0x508] ss:$16 sps:$4 sm:$0xff]   ;;  %v18457_v30 = vld [vmem:[%s24909_s7 + $0x524] ss:$16 sps:$4 sm:$0xff]  }
 0x2fc   : > { %6271 = vmatpush1.bf16.msra.mxu1 %v18392_v32  ;;  %6126 = vmatprep.subr.bf16.mxu0 %v18397_v34  ;;  %v18460_v31 = vld [vmem:[%s24909_s7 + $0x52c] ss:$16 sps:$4 sm:$0xff]   ;;  %v18455_v32 = vld [vmem:[%s24909_s7 + $0x520] ss:$16 sps:$4 sm:$0xff]   ;;  %v18458_v34 = vld [vmem:[%s24909_s7 + $0x528] ss:$16 sps:$4 sm:$0xff]  }
 0x2fd   : > { %6272 = vmatprep.subr.bf16.mxu1 %v18400_v36  ;;  %v18463_v36 = vld [vmem:[%s24909_s7 + $0x544] ss:$16 sps:$4 sm:$0xff]  }
 0x2ff   : > { %6127 = vmatpush1.bf16.msra.mxu0 %v18395_v38  ;;  %v18466_v38 = vld [vmem:[%s24909_s7 + $0x54c] ss:$16 sps:$4 sm:$0xff]  }
 0x300   : > { %6273 = vmatpush1.bf16.msra.mxu1 %v18398_v24  ;;  %7452 = vmatprep.subr.bf16.mxu0 %v18403_v45  ;;  %v18461_v24 = vld [vmem:[%s24909_s7 + $0x540] ss:$16 sps:$4 sm:$0xff]   ;;  %v18464_v45 = vld [vmem:[%s24909_s7 + $0x548] ss:$16 sps:$4 sm:$0xff]  }
 0x301   : > { %7678 = vmatprep.subr.bf16.mxu1 %v18406_v40  ;;  %v18469_v40 = vld [vmem:[%s24909_s7 + $0x564] ss:$16 sps:$4 sm:$0xff]  }
 0x302   : > { %6129 = vmatmul.mubr.bf16.vlgmr.msra.gmra.mrb[32].mxu0 %v20135_v12 }
 0x303   : > { %6275 = vmatmul.mubr.bf16.vlgmr.msra.gmra.mrb[32].mxu1 %v20135_v12  ;;  %6138 = vmatprep.mubr.bf16.mxu0 %v20279_v50  ;;  %v18418_v12 = vld [vmem:[%s24909_s7 + $0x44c] ss:$16 sps:$4 sm:$0xff]  }
 0x304   : > { %6284 = vmatprep.mubr.bf16.mxu1 %v20279_v50  ;;  %7453 = vmatpush1.bf16.msra.mxu0 %v18401_v4  ;;  %v18413_v50 = vld [vmem:[%s24909_s7 + $0x440] ss:$16 sps:$4 sm:$0xff]   ;;  %v18472_v4 = vld [vmem:[%s24909_s7 + $0x56c] ss:$16 sps:$4 sm:$0xff]  }
 0x305   : > { %7679 = vmatpush1.bf16.msra.mxu1 %v18404_v46  ;;  %7454 = vmatprep.subr.bf16.mxu0 %v18409_v27  ;;  %v18467_v46 = vld [vmem:[%s24909_s7 + $0x560] ss:$16 sps:$4 sm:$0xff]   ;;  %v18470_v27 = vld [vmem:[%s24909_s7 + $0x568] ss:$16 sps:$4 sm:$0xff]  }
 0x306   : > { %7680 = vmatprep.subr.bf16.mxu1 %v18412_v48  ;;  %v18475_v48 = vld [vmem:[%s24909_s7 + $0x584] ss:$16 sps:$4 sm:$0xff]  }
 0x308   : > { %7455 = vmatpush1.bf16.msra.mxu0 %v18407_v49  ;;  %v18478_v49 = vld [vmem:[%s24909_s7 + $0x58c] ss:$16 sps:$4 sm:$0xff]  }
 0x309   : > { %7681 = vmatpush1.bf16.msra.mxu1 %v18410_v51  ;;  %7456 = vmatprep.subr.bf16.mxu0 %v18415_v41  ;;  %v18473_v51 = vld [vmem:[%s24909_s7 + $0x580] ss:$16 sps:$4 sm:$0xff]   ;;  %v18476_v41 = vld [vmem:[%s24909_s7 + $0x588] ss:$16 sps:$4 sm:$0xff]  }
 0x30a   : > { %6139 = vmatmul.mubr.bf16.gmra.mrb[36].mxu0 %v20271_v47  ;;  %7682 = vmatprep.subr.bf16.mxu1 %v18418_v12  ;;  %v18481_v12 = vld [vmem:[%s24909_s7 + $0x5a4] ss:$16 sps:$4 sm:$0xff]  }
 0x30b   : > { %6285 = vmatmul.mubr.bf16.gmra.mrb[36].mxu1 %v20271_v47  ;;  %6148 = vmatprep.mubr.bf16.mxu0 %v20371_v10  ;;  %v18430_v47 = vld [vmem:[%s24909_s7 + $0x48c] ss:$16 sps:$4 sm:$0xff]  }
 0x30c   : > { %6294 = vmatprep.mubr.bf16.mxu1 %v20371_v10  ;;  %7457 = vmatpush1.bf16.msra.mxu0 %v18413_v50  ;;  %v18425_v10 = vld [vmem:[%s24909_s7 + $0x480] ss:$16 sps:$4 sm:$0xff]   ;;  %v18484_v50 = vld [vmem:[%s24909_s7 + $0x5ac] ss:$16 sps:$4 sm:$0xff]  }
 0x30d   : > { %7683 = vmatpush1.bf16.msra.mxu1 %v18416_v3  ;;  %7458 = vmatprep.subr.bf16.mxu0 %v18421_v43  ;;  %v18479_v3 = vld [vmem:[%s24909_s7 + $0x5a0] ss:$16 sps:$4 sm:$0xff]   ;;  %v18482_v43 = vld [vmem:[%s24909_s7 + $0x5a8] ss:$16 sps:$4 sm:$0xff]  }
 0x30e   : > { %7684 = vmatprep.subr.bf16.mxu1 %v18424_v52  ;;  %v18487_v52 = vld [vmem:[%s24909_s7 + $0x5c4] ss:$16 sps:$4 sm:$0xff]  }
 0x310   : > { %7459 = vmatpush1.bf16.msra.mxu0 %v18419_v53  ;;  %v18490_v53 = vld [vmem:[%s24909_s7 + $0x5cc] ss:$16 sps:$4 sm:$0xff]  }
 0x311   : > { %7685 = vmatpush1.bf16.msra.mxu1 %v18422_v57  ;;  %7460 = vmatprep.subr.bf16.mxu0 %v18427_v61  ;;  %v18485_v57 = vld [vmem:[%s24909_s7 + $0x5c0] ss:$16 sps:$4 sm:$0xff]   ;;  %v18488_v61 = vld [vmem:[%s24909_s7 + $0x5c8] ss:$16 sps:$4 sm:$0xff]  }
 0x312   : > { %6149 = vmatmul.mubr.bf16.gmra.mrb[40].mxu0 %v20369_v9  ;;  %7686 = vmatprep.subr.bf16.mxu1 %v18430_v47  ;;  %v18493_v47 = vld [vmem:[%s24909_s7 + $0x5e4] ss:$16 sps:$4 sm:$0xff]  }
 0x313   : > { %6295 = vmatmul.mubr.bf16.gmra.mrb[40].mxu1 %v20369_v9  ;;  %6158 = vmatprep.mubr.bf16.mxu0 %v20427_v21  ;;  %v18442_v9 = vld [vmem:[%s24909_s7 + $0x4cc] ss:$16 sps:$4 sm:$0xff]  }
 0x314   : > { %6304 = vmatprep.mubr.bf16.mxu1 %v20427_v21  ;;  %7461 = vmatpush1.bf16.msra.mxu0 %v18425_v10  ;;  %v18437_v21 = vld [vmem:[%s24909_s7 + $0x4c0] ss:$16 sps:$4 sm:$0xff]   ;;  %v18496_v10 = vld [vmem:[%s24909_s7 + $0x5ec] ss:$16 sps:$4 sm:$0xff]  }
 0x315   : > { %7687 = vmatpush1.bf16.msra.mxu1 %v18428_v62  ;;  %7462 = vmatprep.subr.bf16.mxu0 %v18433_v58  ;;  %v18491_v62 = vld [vmem:[%s24909_s7 + $0x5e0] ss:$16 sps:$4 sm:$0xff]   ;;  %v18494_v58 = vld [vmem:[%s24909_s7 + $0x5e8] ss:$16 sps:$4 sm:$0xff]  }
 0x316   : > { %7688 = vmatprep.subr.bf16.mxu1 %v18436_v1  ;;  %v18499_v1 = vld [vmem:[%s24909_s7 + $0x604] ss:$16 sps:$4 sm:$0xff]  }
 0x318   : > { %7463 = vmatpush1.bf16.msra.mxu0 %v18431_v39  ;;  %v18502_v39 = vld [vmem:[%s24909_s7 + $0x60c] ss:$16 sps:$4 sm:$0xff]  }
 0x319   : > { %7689 = vmatpush1.bf16.msra.mxu1 %v18434_v54  ;;  %7464 = vmatprep.subr.bf16.mxu0 %v18439_v20  ;;  %v18497_v54 = vld [vmem:[%s24909_s7 + $0x600] ss:$16 sps:$4 sm:$0xff]   ;;  %v18500_v20 = vld [vmem:[%s24909_s7 + $0x608] ss:$16 sps:$4 sm:$0xff]  }
 0x31a   : > { %6159 = vmatmul.mubr.bf16.gmra.mrb[44].mxu0 %v20417_v18  ;;  %7690 = vmatprep.subr.bf16.mxu1 %v18442_v9  ;;  %v18505_v9 = vld [vmem:[%s24909_s7 + $0x624] ss:$16 sps:$4 sm:$0xff]  }
 0x31b   : > { %6305 = vmatmul.mubr.bf16.gmra.mrb[44].mxu1 %v20417_v18  ;;  %7484 = vmatprep.mubr.bf16.mxu0 %v21595_v7  ;;  %v18454_v18 = vld [vmem:[%s24909_s7 + $0x50c] ss:$16 sps:$4 sm:$0xff]  }
 0x31c   : > { %7465 = vmatpush1.bf16.msra.mxu0 %v18437_v21  ;;  %7710 = vmatprep.mubr.bf16.mxu1 %v21595_v7  ;;  %v18508_v21 = vld [vmem:[%s24909_s7 + $0x62c] ss:$16 sps:$4 sm:$0xff]  }
 0x31d   : > { %7691 = vmatpush1.bf16.msra.mxu1 %v18440_v60  ;;  %7466 = vmatprep.subr.bf16.mxu0 %v18445_v59  ;;  %v18503_v60 = vld [vmem:[%s24909_s7 + $0x620] ss:$16 sps:$4 sm:$0xff]   ;;  %v18506_v59 = vld [vmem:[%s24909_s7 + $0x628] ss:$16 sps:$4 sm:$0xff]  }
 0x31e   : > { %7692 = vmatprep.subr.bf16.mxu1 %v18448_v23  ;;  %v18511_v23 = vld [vmem:[%s24909_s7 + $0x644] ss:$16 sps:$4 sm:$0xff]  }
 0x320   : > { %7467 = vmatpush1.bf16.msra.mxu0 %v18443_v0  ;;  %v18514_v0 = vld [vmem:[%s24909_s7 + $0x64c] ss:$16 sps:$4 sm:$0xff]  }
 0x321   : > { %7693 = vmatpush1.bf16.msra.mxu1 %v18446_v2  ;;  %7468 = vmatprep.subr.bf16.mxu0 %v18451_v42  ;;  %v18509_v2 = vld [vmem:[%s24909_s7 + $0x640] ss:$16 sps:$4 sm:$0xff]   ;;  %v18512_v42 = vld [vmem:[%s24909_s7 + $0x648] ss:$16 sps:$4 sm:$0xff]  }
 0x322   : > { %7694 = vmatprep.subr.bf16.mxu1 %v18454_v18  ;;  %v18517_v18 = vld [vmem:[%s24909_s7 + $0x664] ss:$16 sps:$4 sm:$0xff]  }
 0x324   : > { %7469 = vmatpush1.bf16.msra.mxu0 %v18449_v8  ;;  %v18520_v8 = vld [vmem:[%s24909_s7 + $0x66c] ss:$16 sps:$4 sm:$0xff]  }
 0x325   : > { %7695 = vmatpush1.bf16.msra.mxu1 %v18452_v44  ;;  %7470 = vmatprep.subr.bf16.mxu0 %v18457_v30  ;;  %v18515_v44 = vld [vmem:[%s24909_s7 + $0x660] ss:$16 sps:$4 sm:$0xff]   ;;  %v18518_v30 = vld [vmem:[%s24909_s7 + $0x668] ss:$16 sps:$4 sm:$0xff]  }
 0x326   : > { %7696 = vmatprep.subr.bf16.mxu1 %v18460_v31  ;;  %v18523_v31 = vld [vmem:[%s24909_s7 + $0x684] ss:$16 sps:$4 sm:$0xff]  }
 0x328   : > { %7471 = vmatpush1.bf16.msra.mxu0 %v18455_v32  ;;  %v18526_v32 = vld [vmem:[%s24909_s7 + $0x68c] ss:$16 sps:$4 sm:$0xff]  }
 0x329   : > { %7697 = vmatpush1.bf16.msra.mxu1 %v18458_v34  ;;  %7472 = vmatprep.subr.bf16.mxu0 %v18463_v36  ;;  %v18521_v34 = vld [vmem:[%s24909_s7 + $0x680] ss:$16 sps:$4 sm:$0xff]   ;;  %v18524_v36 = vld [vmem:[%s24909_s7 + $0x688] ss:$16 sps:$4 sm:$0xff]  }
 0x32a   : > { %7698 = vmatprep.subr.bf16.mxu1 %v18466_v38  ;;  %v18529_v38 = vld [vmem:[%s24909_s7 + $0x6a4] ss:$16 sps:$4 sm:$0xff]  }
 0x32c   : > { %7473 = vmatpush1.bf16.msra.mxu0 %v18461_v24  ;;  %v18532_v24 = vld [vmem:[%s24909_s7 + $0x6ac] ss:$16 sps:$4 sm:$0xff]  }
 0x32d   : > { %7699 = vmatpush1.bf16.msra.mxu1 %v18464_v45  ;;  %7474 = vmatprep.subr.bf16.mxu0 %v18469_v40  ;;  %v18527_v45 = vld [vmem:[%s24909_s7 + $0x6a0] ss:$16 sps:$4 sm:$0xff]   ;;  %v18530_v40 = vld [vmem:[%s24909_s7 + $0x6a8] ss:$16 sps:$4 sm:$0xff]  }
 0x32e   : > { %7700 = vmatprep.subr.bf16.mxu1 %v18472_v4  ;;  %v18535_v4 = vld [vmem:[%s24909_s7 + $0x6c4] ss:$16 sps:$4 sm:$0xff]  }
 0x330   : > { %7475 = vmatpush1.bf16.msra.mxu0 %v18467_v46  ;;  %v18538_v46 = vld [vmem:[%s24909_s7 + $0x6cc] ss:$16 sps:$4 sm:$0xff]  }
 0x331   : > { %7701 = vmatpush1.bf16.msra.mxu1 %v18470_v27  ;;  %7476 = vmatprep.subr.bf16.mxu0 %v18475_v48  ;;  %v18533_v27 = vld [vmem:[%s24909_s7 + $0x6c0] ss:$16 sps:$4 sm:$0xff]   ;;  %v18536_v48 = vld [vmem:[%s24909_s7 + $0x6c8] ss:$16 sps:$4 sm:$0xff]  }
 0x332   : > { %7702 = vmatprep.subr.bf16.mxu1 %v18478_v49  ;;  %v18541_v49 = vld [vmem:[%s24909_s7 + $0x6e4] ss:$16 sps:$4 sm:$0xff]  }
 0x334   : > { %7477 = vmatpush1.bf16.msra.mxu0 %v18473_v51  ;;  %v18544_v51 = vld [vmem:[%s24909_s7 + $0x6ec] ss:$16 sps:$4 sm:$0xff]  }
 0x335   : > { %7703 = vmatpush1.bf16.msra.mxu1 %v18476_v41  ;;  %7478 = vmatprep.subr.bf16.mxu0 %v18481_v12  ;;  %v18539_v41 = vld [vmem:[%s24909_s7 + $0x6e0] ss:$16 sps:$4 sm:$0xff]   ;;  %v18542_v12 = vld [vmem:[%s24909_s7 + $0x6e8] ss:$16 sps:$4 sm:$0xff]  }
 0x336   : > { %7704 = vmatprep.subr.bf16.mxu1 %v18484_v50  ;;  %v18547_v50 = vld [vmem:[%s24909_s7 + $0x704] ss:$16 sps:$4 sm:$0xff]  }
 0x338   : > { %7479 = vmatpush1.bf16.msra.mxu0 %v18479_v3  ;;  %v18545_v3 = vld [vmem:[%s24909_s7 + $0x700] ss:$16 sps:$4 sm:$0xff]  }
 0x339   : > { %7705 = vmatpush1.bf16.msra.mxu1 %v18482_v43  ;;  %7480 = vmatprep.subr.bf16.mxu0 %v18487_v52  ;;  %v18548_v43 = vld [vmem:[%s24909_s7 + $0x708] ss:$16 sps:$4 sm:$0xff]   ;;  %v18550_v52 = vld [vmem:[%s24909_s7 + $0x70c] ss:$16 sps:$4 sm:$0xff]  }
 0x33a   : > { %7706 = vmatprep.subr.bf16.mxu1 %v18490_v53  ;;  %v18553_v53 = vld [vmem:[%s24909_s7 + $0x724] ss:$16 sps:$4 sm:$0xff]  }
 0x33c   : > { %7481 = vmatpush1.bf16.msra.mxu0 %v18485_v57  ;;  %v18556_v57 = vld [vmem:[%s24909_s7 + $0x72c] ss:$16 sps:$4 sm:$0xff]  }
 0x33d   : > { %7707 = vmatpush1.bf16.msra.mxu1 %v18488_v61  ;;  %7482 = vmatprep.subr.bf16.mxu0 %v18493_v47  ;;  %v18551_v61 = vld [vmem:[%s24909_s7 + $0x720] ss:$16 sps:$4 sm:$0xff]   ;;  %v18554_v47 = vld [vmem:[%s24909_s7 + $0x728] ss:$16 sps:$4 sm:$0xff]  }
 0x33e   : > { %7708 = vmatprep.subr.bf16.mxu1 %v18496_v10  ;;  %v18559_v10 = vld [vmem:[%s24909_s7 + $0x744] ss:$16 sps:$4 sm:$0xff]  }
 0x340   : > { %7483 = vmatpush1.bf16.msra.mxu0 %v18491_v62  ;;  %v18562_v62 = vld [vmem:[%s24909_s7 + $0x74c] ss:$16 sps:$4 sm:$0xff]  }
 0x341   : > { %7709 = vmatpush1.bf16.msra.mxu1 %v18494_v58  ;;  %7565 = vmatprep.subr.bf16.mxu0 %v18499_v1  ;;  %v18557_v58 = vld [vmem:[%s24909_s7 + $0x740] ss:$16 sps:$4 sm:$0xff]   ;;  %v18560_v1 = vld [vmem:[%s24909_s7 + $0x748] ss:$16 sps:$4 sm:$0xff]  }
 0x342   : > { %7791 = vmatprep.subr.bf16.mxu1 %v18502_v39  ;;  %v18565_v39 = vld [vmem:[%s24909_s7 + $0x764] ss:$16 sps:$4 sm:$0xff]  }
 0x343   : > { %7485 = vmatmul.mubr.bf16.vlgmr.msra.gmra.mrb[48].mxu0 %v21585_v55 }
 0x344   : > { %7711 = vmatmul.mubr.bf16.vlgmr.msra.gmra.mrb[48].mxu1 %v21585_v55  ;;  %7566 = vmatpush1.bf16.msra.mxu0 %v18497_v54  ;;  %v18568_v54 = vld [vmem:[%s24909_s7 + $0x76c] ss:$16 sps:$4 sm:$0xff]  }
 0x345   : > { %7792 = vmatpush1.bf16.msra.mxu1 %v18500_v20  ;;  %7567 = vmatprep.subr.bf16.mxu0 %v18505_v9  ;;  %v18563_v20 = vld [vmem:[%s24909_s7 + $0x760] ss:$16 sps:$4 sm:$0xff]   ;;  %v18566_v9 = vld [vmem:[%s24909_s7 + $0x768] ss:$16 sps:$4 sm:$0xff]  }
 0x346   : > { %7793 = vmatprep.subr.bf16.mxu1 %v18508_v21  ;;  %v18571_v21 = vld [vmem:[%s24909_s7 + $0x784] ss:$16 sps:$4 sm:$0xff]  }
 0x348   : > { %7568 = vmatpush1.bf16.msra.mxu0 %v18503_v60  ;;  %v18574_v60 = vld [vmem:[%s24909_s7 + $0x78c] ss:$16 sps:$4 sm:$0xff]  }
 0x349   : > { %7794 = vmatpush1.bf16.msra.mxu1 %v18506_v59  ;;  %7569 = vmatprep.subr.bf16.mxu0 %v18511_v23  ;;  %v18569_v59 = vld [vmem:[%s24909_s7 + $0x780] ss:$16 sps:$4 sm:$0xff]   ;;  %v18572_v23 = vld [vmem:[%s24909_s7 + $0x788] ss:$16 sps:$4 sm:$0xff]  }
 0x34a   : > { %7795 = vmatprep.subr.bf16.mxu1 %v18514_v0  ;;  %v18577_v0 = vld [vmem:[%s24909_s7 + $0x7a4] ss:$16 sps:$4 sm:$0xff]  }
 0x34c   : > { %7570 = vmatpush1.bf16.msra.mxu0 %v18509_v2  ;;  %v18580_v2 = vld [vmem:[%s24909_s7 + $0x7ac] ss:$16 sps:$4 sm:$0xff]  }
 0x34d   : > { %7796 = vmatpush1.bf16.msra.mxu1 %v18512_v42  ;;  %7571 = vmatprep.subr.bf16.mxu0 %v18517_v18  ;;  %v18575_v42 = vld [vmem:[%s24909_s7 + $0x7a0] ss:$16 sps:$4 sm:$0xff]   ;;  %v18578_v18 = vld [vmem:[%s24909_s7 + $0x7a8] ss:$16 sps:$4 sm:$0xff]  }
 0x34e   : > { %7797 = vmatprep.subr.bf16.mxu1 %v18520_v8  ;;  %v18583_v8 = vld [vmem:[%s24909_s7 + $0x7c4] ss:$16 sps:$4 sm:$0xff]  }
 0x350   : > { %7572 = vmatpush1.bf16.msra.mxu0 %v18515_v44  ;;  %v18586_v44 = vld [vmem:[%s24909_s7 + $0x7cc] ss:$16 sps:$4 sm:$0xff]  }
 0x351   : > { %7798 = vmatpush1.bf16.msra.mxu1 %v18518_v30  ;;  %7573 = vmatprep.subr.bf16.mxu0 %v18523_v31  ;;  %v18581_v30 = vld [vmem:[%s24909_s7 + $0x7c0] ss:$16 sps:$4 sm:$0xff]   ;;  %v18584_v31 = vld [vmem:[%s24909_s7 + $0x7c8] ss:$16 sps:$4 sm:$0xff]  }
 0x352   : > { %7799 = vmatprep.subr.bf16.mxu1 %v18526_v32  ;;  %v18589_v32 = vld [vmem:[%s24909_s7 + $0x7e4] ss:$16 sps:$4 sm:$0xff]  }
 0x354   : > { %7574 = vmatpush1.bf16.msra.mxu0 %v18521_v34  ;;  %v18592_v34 = vld [vmem:[%s24909_s7 + $0x7ec] ss:$16 sps:$4 sm:$0xff]  }
 0x355   : > { %7800 = vmatpush1.bf16.msra.mxu1 %v18524_v36  ;;  %7575 = vmatprep.subr.bf16.mxu0 %v18529_v38  ;;  %v18587_v36 = vld [vmem:[%s24909_s7 + $0x7e0] ss:$16 sps:$4 sm:$0xff]   ;;  %v18590_v38 = vld [vmem:[%s24909_s7 + $0x7e8] ss:$16 sps:$4 sm:$0xff]  }
 0x356   : > { %7801 = vmatprep.subr.bf16.mxu1 %v18532_v24  ;;  %v18595_v24 = vld [vmem:[%s24909_s7 + $0x4] ss:$16 sps:$4 sm:$0xff]  }
 0x358   : > { %7576 = vmatpush1.bf16.msra.mxu0 %v18527_v45  ;;  %v18598_v45 = vld [vmem:[%s24909_s7 + $0xc] ss:$16 sps:$4 sm:$0xff]  }
 0x359   : > { %7802 = vmatpush1.bf16.msra.mxu1 %v18530_v40  ;;  %7577 = vmatprep.subr.bf16.mxu0 %v18535_v4  ;;  %v6347_v40 = vld [vmem:[%s24907_s5] sm:$0xf] }
 0x35a   : > { %7803 = vmatprep.subr.bf16.mxu1 %v18538_v46  ;;  %v22183_v4 = vrot.slane %v6347_v40, %v20059_v15  ;;  %v6401_v46 = vld [vmem:[%s24908_s6] sm:$0xf] }
 0x35c   : > { %7578 = vmatpush1.bf16.msra.mxu0 %v18533_v27 }
 0x35d   : > { %7804 = vmatpush1.bf16.msra.mxu1 %v18536_v48  ;;  %7579 = vmatprep.subr.bf16.mxu0 %v18541_v49  ;;  %v22189_v48 = vrot.slane %v6347_v40, %v20078_v35  ;;  %v22192_v49 = vrot.slane %v6347_v40, %v20062_v16 }
 0x35e   : > { %7805 = vmatprep.subr.bf16.mxu1 %v18544_v51 }
 0x360   : > { %7580 = vmatpush1.bf16.msra.mxu0 %v18539_v41 }
 0x361   : > { %7806 = vmatpush1.bf16.msra.mxu1 %v18542_v12  ;;  %7581 = vmatprep.subr.bf16.mxu0 %v18547_v50  ;;  %v22195_v50 = vrot.slane %v6347_v40, %v20081_v37 }
 0x362   : > { %7807 = vmatprep.subr.bf16.mxu1 %v18550_v52  ;;  %v22201_v52 = vrot.slane %v6401_v46, %v20078_v35 }
 0x364   : > { %7582 = vmatpush1.bf16.msra.mxu0 %v18545_v3  ;;  %v22198_v3 = vrot.slane %v6401_v46, %v20059_v15 }
 0x365   : > { %7808 = vmatpush1.bf16.msra.mxu1 %v18548_v43  ;;  %7583 = vmatprep.subr.bf16.mxu0 %v18553_v53 }
 0x366   : > { %7809 = vmatprep.subr.bf16.mxu1 %v18556_v57 }
 0x368   : > { %7584 = vmatpush1.bf16.msra.mxu0 %v18551_v61 }
 0x369   : > { %7810 = vmatpush1.bf16.msra.mxu1 %v18554_v47  ;;  %7585 = vmatprep.subr.bf16.mxu0 %v18559_v10  ;;  %v22205_v10 = vrot.slane %v6401_v46, %v20062_v16 }
 0x36a   : > { %7811 = vmatprep.subr.bf16.mxu1 %v18562_v62 }
 0x36c   : > { %7586 = vmatpush1.bf16.msra.mxu0 %v18557_v58 }
 0x36d   : > { %7812 = vmatpush1.bf16.msra.mxu1 %v18560_v1  ;;  %7587 = vmatprep.subr.bf16.mxu0 %v18565_v39 }
 0x36e   : > { %7813 = vmatprep.subr.bf16.mxu1 %v18568_v54 }
 0x370   : > { %7588 = vmatpush1.bf16.msra.mxu0 %v18563_v20 }
 0x371   : > { %7814 = vmatpush1.bf16.msra.mxu1 %v18566_v9  ;;  %7589 = vmatprep.subr.bf16.mxu0 %v18571_v21 }
 0x372   : > { %7815 = vmatprep.subr.bf16.mxu1 %v18574_v60 }
 0x374   : > { %7590 = vmatpush1.bf16.msra.mxu0 %v18569_v59 }
 0x375   : > { %7816 = vmatpush1.bf16.msra.mxu1 %v18572_v23  ;;  %7591 = vmatprep.subr.bf16.mxu0 %v18577_v0  ;;  %v22211_v23 = vrot.slane %v6401_v46, %v20081_v37 }
 0x376   : > { %7817 = vmatprep.subr.bf16.mxu1 %v18580_v2 }
 0x378   : > { %7592 = vmatpush1.bf16.msra.mxu0 %v18575_v42 }
 0x379   : > { %7818 = vmatpush1.bf16.msra.mxu1 %v18578_v18  ;;  %7593 = vmatprep.subr.bf16.mxu0 %v18583_v8 }
 0x37a   : > { %7819 = vmatprep.subr.bf16.mxu1 %v18586_v44 }
 0x37c   : > { %7594 = vmatpush1.bf16.msra.mxu0 %v18581_v30 }
 0x37d   : > { %7820 = vmatpush1.bf16.msra.mxu1 %v18584_v31  ;;  %7595 = vmatprep.subr.bf16.mxu0 %v18589_v32 }
 0x37e   : > { %7821 = vmatprep.subr.bf16.mxu1 %v18592_v34 }
 0x380   : > { %7596 = vmatpush1.bf16.msra.mxu0 %v18587_v36 }
 0x381   : > { %7822 = vmatpush1.bf16.msra.mxu1 %v18590_v38  ;;  %8544 = vmatprep.subr.bf16.mxu0 %v18595_v24 }
 0x382   : > { %8770 = vmatprep.subr.bf16.mxu1 %v18598_v45 }
 0x3d5   : > { %v6130_v27 = vpop.f32.mrb[32].mxu0 }
 0x3d6   : > { %v6315_v51 = vmax.f32 %v6130_v27, 0.0  ;;  %v6276_v41 = vpop.f32.mrb[32].mxu1  ;;  %v6132_v12 = vpop.f32.mrb[33].mxu0 }
 0x3d7   : > { %v6317_v43 = vmax.f32 %v6276_v41, 0.0  ;;  %v6316_v53 = vmax.f32 %v6132_v12, 0.0  ;;  %v6278_v57 = vpop.f32.mrb[33].mxu1  ;;  %v6134_v61 = vpop.f32.mrb[34].mxu0 }
 0x3d8   : > { %v6369_v47 = vmul.f32 %v22183_v4, %v6315_v51  ;;  %v6318_v62 = vmax.f32 %v6278_v57, 0.0  ;;  %v6319_v58 = vmax.f32 %v6134_v61, 0.0  ;;  %v6280_v1 = vpop.f32.mrb[34].mxu1  ;;  %v6136_v39 = vpop.f32.mrb[35].mxu0 }
 0x3d9   : > { %v6371_v54 = vmul.f32 %v22189_v48, %v6317_v43  ;;  %v6370_v20 = vmul.f32 %v22192_v49, %v6316_v53  ;;  %v6321_v9 = vmax.f32 %v6280_v1, 0.0  ;;  %v6320_v21 = vmax.f32 %v6136_v39, 0.0  ;;  %v6282_v60 = vpop.f32.mrb[35].mxu1 }
 0x3da   : > { %v6372_v59 = vmul.f32 %v22195_v50, %v6318_v62  ;;  %v6373_v0 = vmul.f32 %v22183_v4, %v6319_v58  ;;  %v6322_v2 = vmax.f32 %v6282_v60, 0.0  ;;  %v6423_v44 = vadd.f32 %v22198_v3, %v6369_v47 }
 0x3db   : > { %v6425_v42 = vadd.f32 %v22201_v52, %v6371_v54  ;;  %v6375_v18 = vmul.f32 %v22189_v48, %v6321_v9  ;;  %v6374_v8 = vmul.f32 %v22192_v49, %v6320_v21  ;;  %v6424_v32 = vadd.f32 %v22205_v10, %v6370_v20 }
 0x3dc   : > { %v6427_v30 = vadd.f32 %v22198_v3, %v6373_v0  ;;  %v6376_v31 = vmul.f32 %v22195_v50, %v6322_v2  ;;  %v6426_v24 = vadd.f32 %v22211_v23, %v6372_v59 }
 0x3dd   : > { %v6429_v34 = vadd.f32 %v22201_v52, %v6375_v18  ;;  %v6428_v36 = vadd.f32 %v22205_v10, %v6374_v8  ;;  %v6140_v38 = vpop.f32.mrb[36].mxu0 }
 0x3de   : > { %v22224_v45 = vpack.c.bf16 %v6427_v30, %v6423_v44  ;;  %v6430_v40 = vadd.f32 %v22211_v23, %v6376_v31  ;;  %v6323_v46 = vmax.f32 %v6140_v38, 0.0  ;;  %v6286_v27 = vpop.f32.mrb[36].mxu1  ;;  %v6142_v51 = vpop.f32.mrb[37].mxu0 }
 0x3df   : > { %v22227_v41 = vpack.c.bf16 %v6429_v34, %v6425_v42  ;;  %v22229_v12 = vpack.c.bf16 %v6428_v36, %v6424_v32  ;;  %v6325_v43 = vmax.f32 %v6286_v27, 0.0  ;;  %v6324_v53 = vmax.f32 %v6142_v51, 0.0  ;;  %v6288_v57 = vpop.f32.mrb[37].mxu1  ;;  %v6144_v61 = vpop.f32.mrb[38].mxu0 }
 0x3e0   : > { %v22231_v47 = vpack.c.bf16 %v6430_v40, %v6426_v24  ;;  %v6377_v62 = vmul.f32 %v22183_v4, %v6323_v46  ;;  %v6326_v58 = vmax.f32 %v6288_v57, 0.0  ;;  %v6327_v1 = vmax.f32 %v6144_v61, 0.0  ;;  %v6290_v39 = vpop.f32.mrb[38].mxu1  ;;  %v6146_v54 = vpop.f32.mrb[39].mxu0 }
 0x3e1   : > { %v6379_v20 = vmul.f32 %v22189_v48, %v6325_v43  ;;  %v6378_v9 = vmul.f32 %v22192_v49, %v6324_v53  ;;  %v6329_v21 = vmax.f32 %v6290_v39, 0.0  ;;  %v6328_v60 = vmax.f32 %v6146_v54, 0.0  ;;  %v6292_v59 = vpop.f32.mrb[39].mxu1  ;;  %7494 = vmatprep.mubr.bf16.mxu0 %v22229_v12  ;;  %7720 = vmatprep.mubr.bf16.mxu1 %v22229_v12 }
 0x3e2   : > { %v6380_v0 = vmul.f32 %v22195_v50, %v6326_v58  ;;  %v6381_v2 = vmul.f32 %v22183_v4, %v6327_v1  ;;  %v6330_v42 = vmax.f32 %v6292_v59, 0.0  ;;  %7495 = vmatmul.mubr.bf16.gmra.mrb[52].mxu0 %v22224_v45  ;;  %7721 = vmatmul.mubr.bf16.gmra.mrb[52].mxu1 %v22224_v45  ;;  %v6431_v30 = vadd.f32 %v22198_v3, %v6377_v62 }
 0x3e3   : > { %v6433_v18 = vadd.f32 %v22201_v52, %v6379_v20  ;;  %v6383_v8 = vmul.f32 %v22189_v48, %v6329_v21  ;;  %v6382_v44 = vmul.f32 %v22192_v49, %v6328_v60  ;;  %7504 = vmatprep.mubr.bf16.mxu0 %v21644_v19  ;;  %7730 = vmatprep.mubr.bf16.mxu1 %v21644_v19 }
 0x3e4   : > { %v6435_v31 = vadd.f32 %v22198_v3, %v6381_v2  ;;  %v6384_v32 = vmul.f32 %v22195_v50, %v6330_v42  ;;  %v6432_v34 = vadd.f32 %v22205_v10, %v6378_v9  ;;  %v6434_v40 = vadd.f32 %v22211_v23, %v6380_v0 }
 0x3e5   : > { %v6437_v36 = vadd.f32 %v22201_v52, %v6383_v8  ;;  %v6436_v38 = vadd.f32 %v22205_v10, %v6382_v44  ;;  %v6150_v24 = vpop.f32.mrb[40].mxu0 }
 0x3e6   : > { %v22254_v46 = vpack.c.bf16 %v6435_v31, %v6431_v30  ;;  %v6438_v27 = vadd.f32 %v22211_v23, %v6384_v32  ;;  %v6331_v51 = vmax.f32 %v6150_v24, 0.0  ;;  %v6296_v43 = vpop.f32.mrb[40].mxu1  ;;  %v6152_v53 = vpop.f32.mrb[41].mxu0 }
 0x3e7   : > { %v22257_v57 = vpack.c.bf16 %v6437_v36, %v6433_v18  ;;  %v22259_v61 = vpack.c.bf16 %v6436_v38, %v6432_v34  ;;  %v6333_v62 = vmax.f32 %v6296_v43, 0.0  ;;  %v6332_v58 = vmax.f32 %v6152_v53, 0.0  ;;  %v6298_v1 = vpop.f32.mrb[41].mxu1  ;;  %v6154_v39 = vpop.f32.mrb[42].mxu0 }
 0x3e8   : > { %v22261_v54 = vpack.c.bf16 %v6438_v27, %v6434_v40  ;;  %v6385_v20 = vmul.f32 %v22183_v4, %v6331_v51  ;;  %v6334_v9 = vmax.f32 %v6298_v1, 0.0  ;;  %v6335_v21 = vmax.f32 %v6154_v39, 0.0  ;;  %v6300_v60 = vpop.f32.mrb[42].mxu1  ;;  %v6156_v59 = vpop.f32.mrb[43].mxu0 }
 0x3e9   : > { %v6387_v0 = vmul.f32 %v22189_v48, %v6333_v62  ;;  %v6386_v2 = vmul.f32 %v22192_v49, %v6332_v58  ;;  %v6337_v42 = vmax.f32 %v6300_v60, 0.0  ;;  %v6336_v18 = vmax.f32 %v6156_v59, 0.0  ;;  %v6302_v8 = vpop.f32.mrb[43].mxu1 }
 0x3ea   : > { %v6388_v44 = vmul.f32 %v22195_v50, %v6334_v9  ;;  %v6389_v30 = vmul.f32 %v22183_v4, %v6335_v21  ;;  %v6338_v31 = vmax.f32 %v6302_v8, 0.0  ;;  %7505 = vmatmul.mubr.bf16.gmra.mrb[56].mxu0 %v21636_v56  ;;  %7731 = vmatmul.mubr.bf16.gmra.mrb[56].mxu1 %v21636_v56  ;;  %v6439_v38 = vadd.f32 %v22198_v3, %v6385_v20 }
 0x3eb   : > { %v6441_v32 = vadd.f32 %v22201_v52, %v6387_v0  ;;  %v6391_v34 = vmul.f32 %v22189_v48, %v6337_v42  ;;  %v6390_v36 = vmul.f32 %v22192_v49, %v6336_v18  ;;  %7514 = vmatprep.mubr.bf16.mxu0 %v22259_v61  ;;  %7740 = vmatprep.mubr.bf16.mxu1 %v22259_v61 }
 0x3ec   : > { %v6443_v24 = vadd.f32 %v22198_v3, %v6389_v30  ;;  %v6392_v40 = vmul.f32 %v22195_v50, %v6338_v31  ;;  %v6440_v27 = vadd.f32 %v22205_v10, %v6386_v2  ;;  %v6442_v62 = vadd.f32 %v22211_v23, %v6388_v44 }
 0x3ed   : > { %v6445_v51 = vadd.f32 %v22201_v52, %v6391_v34  ;;  %v6444_v43 = vadd.f32 %v22205_v10, %v6390_v36  ;;  %v6160_v53 = vpop.f32.mrb[44].mxu0 }
 0x3ee   : > { %v22282_v58 = vpack.c.bf16 %v6443_v24, %v6439_v38  ;;  %v6446_v1 = vadd.f32 %v22211_v23, %v6392_v40  ;;  %v6339_v39 = vmax.f32 %v6160_v53, 0.0  ;;  %v6306_v20 = vpop.f32.mrb[44].mxu1  ;;  %v6162_v9 = vpop.f32.mrb[45].mxu0 }
 0x3ef   : > { %v22285_v21 = vpack.c.bf16 %v6445_v51, %v6441_v32  ;;  %v22287_v60 = vpack.c.bf16 %v6444_v43, %v6440_v27  ;;  %v6341_v59 = vmax.f32 %v6306_v20, 0.0  ;;  %v6340_v0 = vmax.f32 %v6162_v9, 0.0  ;;  %v6308_v2 = vpop.f32.mrb[45].mxu1  ;;  %v6164_v42 = vpop.f32.mrb[46].mxu0 }
 0x3f0   : > { %v22289_v18 = vpack.c.bf16 %v6446_v1, %v6442_v62  ;;  %v6393_v8 = vmul.f32 %v22183_v4, %v6339_v39  ;;  %v6342_v44 = vmax.f32 %v6308_v2, 0.0  ;;  %v6343_v30 = vmax.f32 %v6164_v42, 0.0  ;;  %v6310_v31 = vpop.f32.mrb[46].mxu1  ;;  %v6166_v34 = vpop.f32.mrb[47].mxu0 }
 0x3f1   : > { %v6395_v36 = vmul.f32 %v22189_v48, %v6341_v59  ;;  %v6394_v38 = vmul.f32 %v22192_v49, %v6340_v0  ;;  %v6345_v32 = vmax.f32 %v6310_v31, 0.0  ;;  %v6344_v24 = vmax.f32 %v6166_v34, 0.0  ;;  %v6312_v40 = vpop.f32.mrb[47].mxu1  ;;  %v18607_v31 = vld [vmem:[%s24909_s7 + $0x44] ss:$16 sps:$4 sm:$0xff]  }
 0x3f2   : > { %v6396_v27 = vmul.f32 %v22195_v50, %v6342_v44  ;;  %v6397_v51 = vmul.f32 %v22183_v4, %v6343_v30  ;;  %v6346_v43 = vmax.f32 %v6312_v40, 0.0  ;;  %7515 = vmatmul.mubr.bf16.gmra.mrb[60].mxu0 %v22254_v46  ;;  %7741 = vmatmul.mubr.bf16.gmra.mrb[60].mxu1 %v22254_v46  ;;  %v6447_v39 = vadd.f32 %v22198_v3, %v6393_v8  ;;  %v18599_v44 = vld [vmem:[%s24909_s7 + $0x20] ss:$16 sps:$4 sm:$0xff]   ;;  %v18602_v30 = vld [vmem:[%s24909_s7 + $0x28] ss:$16 sps:$4 sm:$0xff]  }
 0x3f3   : > { %v6449_v53 = vadd.f32 %v22201_v52, %v6395_v36  ;;  %v6399_v62 = vmul.f32 %v22189_v48, %v6345_v32  ;;  %v6398_v1 = vmul.f32 %v22192_v49, %v6344_v24  ;;  %7524 = vmatprep.mubr.bf16.mxu0 %v21692_v13  ;;  %7750 = vmatprep.mubr.bf16.mxu1 %v21692_v13  ;;  %v18610_v34 = vld [vmem:[%s24909_s7 + $0x4c] ss:$16 sps:$4 sm:$0xff]   ;;  %v18605_v36 = vld [vmem:[%s24909_s7 + $0x40] ss:$16 sps:$4 sm:$0xff]   ;;  %v18613_v32 = vld [vmem:[%s24909_s7 + $0x64] ss:$16 sps:$4 sm:$0xff]  }
 0x3f4   : > { %v6451_v20 = vadd.f32 %v22198_v3, %v6397_v51  ;;  %v6400_v9 = vmul.f32 %v22195_v50, %v6346_v43  ;;  %v6448_v4 = vadd.f32 %v22205_v10, %v6394_v38  ;;  %v6450_v48 = vadd.f32 %v22211_v23, %v6396_v27  ;;  %v18593_v50 = vld [vmem:[%s24909_s7] ss:$16 sps:$4 sm:$0xff]   ;;  %v18608_v38 = vld [vmem:[%s24909_s7 + $0x48] ss:$16 sps:$4 sm:$0xff]   ;;  %v18616_v24 = vld [vmem:[%s24909_s7 + $0x6c] ss:$16 sps:$4 sm:$0xff]  }
 0x3f5   : > { %v6453_v59 = vadd.f32 %v22201_v52, %v6399_v62  ;;  %v6452_v0 = vadd.f32 %v22205_v10, %v6398_v1  ;;  %v18596_v52 = vld [vmem:[%s24909_s7 + $0x8] ss:$16 sps:$4 sm:$0xff]   ;;  %v18601_v10 = vld [vmem:[%s24909_s7 + $0x24] ss:$16 sps:$4 sm:$0xff]   ;;  %v18611_v40 = vld [vmem:[%s24909_s7 + $0x60] ss:$16 sps:$4 sm:$0xff]  }
 0x3f6   : > { %v22310_v2 = vpack.c.bf16 %v6451_v20, %v6447_v39  ;;  %v6454_v49 = vadd.f32 %v22211_v23, %v6400_v9  ;;  %v18604_v23 = vld [vmem:[%s24909_s7 + $0x2c] ss:$16 sps:$4 sm:$0xff]   ;;  %v18614_v27 = vld [vmem:[%s24909_s7 + $0x68] ss:$16 sps:$4 sm:$0xff]   ;;  %v18619_v51 = vld [vmem:[%s24909_s7 + $0x84] ss:$16 sps:$4 sm:$0xff]  }
 0x3f7   : > { %v22313_v42 = vpack.c.bf16 %v6453_v59, %v6449_v53  ;;  %v22315_v8 = vpack.c.bf16 %v6452_v0, %v6448_v4  ;;  %v18622_v43 = vld [vmem:[%s24909_s7 + $0x8c] ss:$16 sps:$4 sm:$0xff]   ;;  %v18617_v53 = vld [vmem:[%s24909_s7 + $0x80] ss:$16 sps:$4 sm:$0xff]   ;;  %v18620_v62 = vld [vmem:[%s24909_s7 + $0x88] ss:$16 sps:$4 sm:$0xff]  }
 0x3f8   : > { %v22317_v3 = vpack.c.bf16 %v6454_v49, %v6450_v48  ;;  %v18625_v1 = vld [vmem:[%s24909_s7 + $0xa4] ss:$16 sps:$4 sm:$0xff]   ;;  %v18628_v39 = vld [vmem:[%s24909_s7 + $0xac] ss:$16 sps:$4 sm:$0xff]   ;;  %v18623_v20 = vld [vmem:[%s24909_s7 + $0xa0] ss:$16 sps:$4 sm:$0xff]  }
 0x3f9   : > { %v18626_v9 = vld [vmem:[%s24909_s7 + $0xa8] ss:$16 sps:$4 sm:$0xff]   ;;  %v18631_v4 = vld [vmem:[%s24909_s7 + $0xc4] ss:$16 sps:$4 sm:$0xff]   ;;  %v18634_v59 = vld [vmem:[%s24909_s7 + $0xcc] ss:$16 sps:$4 sm:$0xff]  }
 0x3fa   : > { %7525 = vmatmul.mubr.bf16.gmra.mrb[64].mxu0 %v21684_v14  ;;  %7751 = vmatmul.mubr.bf16.gmra.mrb[64].mxu1 %v21684_v14  ;;  %v18629_v0 = vld [vmem:[%s24909_s7 + $0xc0] ss:$16 sps:$4 sm:$0xff]   ;;  %v18632_v48 = vld [vmem:[%s24909_s7 + $0xc8] ss:$16 sps:$4 sm:$0xff]   ;;  %v18637_v49 = vld [vmem:[%s24909_s7 + $0xe4] ss:$16 sps:$4 sm:$0xff]  }
 0x3fb   : > { %7534 = vmatprep.mubr.bf16.mxu0 %v22287_v60  ;;  %7760 = vmatprep.mubr.bf16.mxu1 %v22287_v60 }
 0x402   : > { %7535 = vmatmul.mubr.bf16.gmra.mrb[68].mxu0 %v22282_v58  ;;  %7761 = vmatmul.mubr.bf16.gmra.mrb[68].mxu1 %v22282_v58 }
 0x403   : > { %7544 = vmatprep.mubr.bf16.mxu0 %v21737_v29  ;;  %7770 = vmatprep.mubr.bf16.mxu1 %v21737_v29 }
 0x40a   : > { %7545 = vmatmul.mubr.bf16.gmra.mrb[72].mxu0 %v21732_v63  ;;  %7771 = vmatmul.mubr.bf16.gmra.mrb[72].mxu1 %v21732_v63 }
 0x40b   : > { %7554 = vmatprep.mubr.bf16.mxu0 %v22315_v8  ;;  %7780 = vmatprep.mubr.bf16.mxu1 %v22315_v8 }
 0x412   : > { %7555 = vmatmul.mubr.bf16.gmra.mrb[76].mxu0 %v22310_v2  ;;  %7781 = vmatmul.mubr.bf16.gmra.mrb[76].mxu1 %v22310_v2 }
 0x413   : > { %7597 = vmatprep.mubr.bf16.mxu0 %v21601_v22  ;;  %7823 = vmatprep.mubr.bf16.mxu1 %v21601_v22 }
 0x41a   : > { %7598 = vmatmul.mubr.bf16.vlgmr.msra.gmra.mrb[48].mxu0 %v21593_v5  ;;  %7824 = vmatmul.mubr.bf16.vlgmr.msra.gmra.mrb[48].mxu1 %v21593_v5 }
 0x41b   : > { %8545 = vmatpush1.bf16.msra.mxu0 %v18593_v50  ;;  %8771 = vmatpush1.bf16.msra.mxu1 %v18596_v52  ;;  %v18640_v50 = vld [vmem:[%s24909_s7 + $0xec] ss:$16 sps:$4 sm:$0xff]   ;;  %v18635_v52 = vld [vmem:[%s24909_s7 + $0xe0] ss:$16 sps:$4 sm:$0xff]  }
 0x41c   : > { %7607 = vmatprep.mubr.bf16.mxu0 %v22231_v47  ;;  %7833 = vmatprep.mubr.bf16.mxu1 %v22231_v47 }
 0x41d   : > { %8546 = vmatprep.subr.bf16.mxu0 %v18601_v10  ;;  %8772 = vmatprep.subr.bf16.mxu1 %v18604_v23  ;;  %v18638_v10 = vld [vmem:[%s24909_s7 + $0xe8] ss:$16 sps:$4 sm:$0xff]   ;;  %v18643_v23 = vld [vmem:[%s24909_s7 + $0x104] ss:$16 sps:$4 sm:$0xff]  }
 0x41f   : > { %8547 = vmatpush1.bf16.msra.mxu0 %v18599_v44  ;;  %8773 = vmatpush1.bf16.msra.mxu1 %v18602_v30  ;;  %v18646_v44 = vld [vmem:[%s24909_s7 + $0x10c] ss:$16 sps:$4 sm:$0xff]   ;;  %v18641_v30 = vld [vmem:[%s24909_s7 + $0x100] ss:$16 sps:$4 sm:$0xff]  }
 0x420   : > { %8548 = vmatprep.subr.bf16.mxu0 %v18607_v31  ;;  %8774 = vmatprep.subr.bf16.mxu1 %v18610_v34  ;;  %v18644_v31 = vld [vmem:[%s24909_s7 + $0x108] ss:$16 sps:$4 sm:$0xff]   ;;  %v18649_v34 = vld [vmem:[%s24909_s7 + $0x124] ss:$16 sps:$4 sm:$0xff]  }
 0x422   : > { %7608 = vmatmul.mubr.bf16.gmra.mrb[52].mxu0 %v22227_v41  ;;  %7834 = vmatmul.mubr.bf16.gmra.mrb[52].mxu1 %v22227_v41 }
 0x423   : > { %8549 = vmatpush1.bf16.msra.mxu0 %v18605_v36  ;;  %8775 = vmatpush1.bf16.msra.mxu1 %v18608_v38  ;;  %v18652_v36 = vld [vmem:[%s24909_s7 + $0x12c] ss:$16 sps:$4 sm:$0xff]   ;;  %v18647_v38 = vld [vmem:[%s24909_s7 + $0x120] ss:$16 sps:$4 sm:$0xff]  }
 0x424   : > { %7617 = vmatprep.mubr.bf16.mxu0 %v21649_v26  ;;  %7843 = vmatprep.mubr.bf16.mxu1 %v21649_v26 }
 0x425   : > { %8550 = vmatprep.subr.bf16.mxu0 %v18613_v32  ;;  %8776 = vmatprep.subr.bf16.mxu1 %v18616_v24  ;;  %v18650_v32 = vld [vmem:[%s24909_s7 + $0x128] ss:$16 sps:$4 sm:$0xff]   ;;  %v18655_v24 = vld [vmem:[%s24909_s7 + $0x144] ss:$16 sps:$4 sm:$0xff]  }
 0x427   : > { %8551 = vmatpush1.bf16.msra.mxu0 %v18611_v40  ;;  %8777 = vmatpush1.bf16.msra.mxu1 %v18614_v27  ;;  %v18658_v40 = vld [vmem:[%s24909_s7 + $0x14c] ss:$16 sps:$4 sm:$0xff]   ;;  %v18653_v27 = vld [vmem:[%s24909_s7 + $0x140] ss:$16 sps:$4 sm:$0xff]  }
 0x428   : > { %8552 = vmatprep.subr.bf16.mxu0 %v18619_v51  ;;  %8778 = vmatprep.subr.bf16.mxu1 %v18622_v43  ;;  %v18656_v51 = vld [vmem:[%s24909_s7 + $0x148] ss:$16 sps:$4 sm:$0xff]   ;;  %v18661_v43 = vld [vmem:[%s24909_s7 + $0x164] ss:$16 sps:$4 sm:$0xff]  }
 0x42a   : > { %7618 = vmatmul.mubr.bf16.gmra.mrb[56].mxu0 %v21642_v11  ;;  %7844 = vmatmul.mubr.bf16.gmra.mrb[56].mxu1 %v21642_v11 }
 0x42b   : > { %8553 = vmatpush1.bf16.msra.mxu0 %v18617_v53  ;;  %8779 = vmatpush1.bf16.msra.mxu1 %v18620_v62  ;;  %v18664_v53 = vld [vmem:[%s24909_s7 + $0x16c] ss:$16 sps:$4 sm:$0xff]   ;;  %v18659_v62 = vld [vmem:[%s24909_s7 + $0x160] ss:$16 sps:$4 sm:$0xff]  }
 0x42c   : > { %7627 = vmatprep.mubr.bf16.mxu0 %v22261_v54  ;;  %7853 = vmatprep.mubr.bf16.mxu1 %v22261_v54 }
 0x42d   : > { %8554 = vmatprep.subr.bf16.mxu0 %v18625_v1  ;;  %8780 = vmatprep.subr.bf16.mxu1 %v18628_v39  ;;  %v18662_v1 = vld [vmem:[%s24909_s7 + $0x168] ss:$16 sps:$4 sm:$0xff]   ;;  %v18667_v39 = vld [vmem:[%s24909_s7 + $0x184] ss:$16 sps:$4 sm:$0xff]  }
 0x42f   : > { %8555 = vmatpush1.bf16.msra.mxu0 %v18623_v20  ;;  %8781 = vmatpush1.bf16.msra.mxu1 %v18626_v9  ;;  %v18670_v20 = vld [vmem:[%s24909_s7 + $0x18c] ss:$16 sps:$4 sm:$0xff]   ;;  %v18665_v9 = vld [vmem:[%s24909_s7 + $0x180] ss:$16 sps:$4 sm:$0xff]  }
 0x430   : > { %8556 = vmatprep.subr.bf16.mxu0 %v18631_v4  ;;  %8782 = vmatprep.subr.bf16.mxu1 %v18634_v59  ;;  %v18668_v4 = vld [vmem:[%s24909_s7 + $0x188] ss:$16 sps:$4 sm:$0xff]   ;;  %v18673_v59 = vld [vmem:[%s24909_s7 + $0x1a4] ss:$16 sps:$4 sm:$0xff]  }
 0x432   : > { %7628 = vmatmul.mubr.bf16.gmra.mrb[60].mxu0 %v22257_v57  ;;  %7854 = vmatmul.mubr.bf16.gmra.mrb[60].mxu1 %v22257_v57 }
 0x433   : > { %8557 = vmatpush1.bf16.msra.mxu0 %v18629_v0  ;;  %8783 = vmatpush1.bf16.msra.mxu1 %v18632_v48  ;;  %v18676_v0 = vld [vmem:[%s24909_s7 + $0x1ac] ss:$16 sps:$4 sm:$0xff]   ;;  %v18671_v48 = vld [vmem:[%s24909_s7 + $0x1a0] ss:$16 sps:$4 sm:$0xff]  }
 0x434   : > { %7637 = vmatprep.mubr.bf16.mxu0 %v21697_v33  ;;  %7863 = vmatprep.mubr.bf16.mxu1 %v21697_v33 }
 0x435   : > { %8558 = vmatprep.subr.bf16.mxu0 %v18637_v49  ;;  %8784 = vmatprep.subr.bf16.mxu1 %v18640_v50  ;;  %v18674_v49 = vld [vmem:[%s24909_s7 + $0x1a8] ss:$16 sps:$4 sm:$0xff]   ;;  %v18679_v50 = vld [vmem:[%s24909_s7 + $0x1c4] ss:$16 sps:$4 sm:$0xff]  }
 0x437   : > { %8559 = vmatpush1.bf16.msra.mxu0 %v18635_v52  ;;  %8785 = vmatpush1.bf16.msra.mxu1 %v18638_v10  ;;  %v18682_v52 = vld [vmem:[%s24909_s7 + $0x1cc] ss:$16 sps:$4 sm:$0xff]   ;;  %v18677_v10 = vld [vmem:[%s24909_s7 + $0x1c0] ss:$16 sps:$4 sm:$0xff]  }
 0x438   : > { %8560 = vmatprep.subr.bf16.mxu0 %v18643_v23  ;;  %8786 = vmatprep.subr.bf16.mxu1 %v18646_v44  ;;  %v18680_v23 = vld [vmem:[%s24909_s7 + $0x1c8] ss:$16 sps:$4 sm:$0xff]   ;;  %v18685_v44 = vld [vmem:[%s24909_s7 + $0x1e4] ss:$16 sps:$4 sm:$0xff]  }
 0x43a   : > { %7638 = vmatmul.mubr.bf16.gmra.mrb[64].mxu0 %v21690_v28  ;;  %7864 = vmatmul.mubr.bf16.gmra.mrb[64].mxu1 %v21690_v28 }
 0x43b   : > { %8561 = vmatpush1.bf16.msra.mxu0 %v18641_v30  ;;  %8787 = vmatpush1.bf16.msra.mxu1 %v18644_v31  ;;  %v18688_v30 = vld [vmem:[%s24909_s7 + $0x1ec] ss:$16 sps:$4 sm:$0xff]   ;;  %v18683_v31 = vld [vmem:[%s24909_s7 + $0x1e0] ss:$16 sps:$4 sm:$0xff]  }
 0x43c   : > { %7647 = vmatprep.mubr.bf16.mxu0 %v22289_v18  ;;  %7873 = vmatprep.mubr.bf16.mxu1 %v22289_v18 }
 0x43d   : > { %8562 = vmatprep.subr.bf16.mxu0 %v18649_v34  ;;  %8788 = vmatprep.subr.bf16.mxu1 %v18652_v36  ;;  %v18686_v34 = vld [vmem:[%s24909_s7 + $0x1e8] ss:$16 sps:$4 sm:$0xff]   ;;  %v18691_v36 = vld [vmem:[%s24909_s7 + $0x204] ss:$16 sps:$4 sm:$0xff]  }
 0x43f   : > { %8563 = vmatpush1.bf16.msra.mxu0 %v18647_v38  ;;  %8789 = vmatpush1.bf16.msra.mxu1 %v18650_v32  ;;  %v18694_v38 = vld [vmem:[%s24909_s7 + $0x20c] ss:$16 sps:$4 sm:$0xff]   ;;  %v18689_v32 = vld [vmem:[%s24909_s7 + $0x200] ss:$16 sps:$4 sm:$0xff]  }
 0x440   : > { %8564 = vmatprep.subr.bf16.mxu0 %v18655_v24  ;;  %8790 = vmatprep.subr.bf16.mxu1 %v18658_v40  ;;  %v18692_v24 = vld [vmem:[%s24909_s7 + $0x208] ss:$16 sps:$4 sm:$0xff]   ;;  %v18697_v40 = vld [vmem:[%s24909_s7 + $0x224] ss:$16 sps:$4 sm:$0xff]  }
 0x442   : > { %7648 = vmatmul.mubr.bf16.gmra.mrb[68].mxu0 %v22285_v21  ;;  %7874 = vmatmul.mubr.bf16.gmra.mrb[68].mxu1 %v22285_v21 }
 0x443   : > { %8565 = vmatpush1.bf16.msra.mxu0 %v18653_v27  ;;  %8791 = vmatpush1.bf16.msra.mxu1 %v18656_v51  ;;  %v18700_v27 = vld [vmem:[%s24909_s7 + $0x22c] ss:$16 sps:$4 sm:$0xff]   ;;  %v18695_v51 = vld [vmem:[%s24909_s7 + $0x220] ss:$16 sps:$4 sm:$0xff]  }
 0x444   : > { %7657 = vmatprep.mubr.bf16.mxu0 %v21742_v17  ;;  %7883 = vmatprep.mubr.bf16.mxu1 %v21742_v17 }
 0x445   : > { %8566 = vmatprep.subr.bf16.mxu0 %v18661_v43  ;;  %8792 = vmatprep.subr.bf16.mxu1 %v18664_v53  ;;  %v18698_v43 = vld [vmem:[%s24909_s7 + $0x228] ss:$16 sps:$4 sm:$0xff]   ;;  %v18703_v53 = vld [vmem:[%s24909_s7 + $0x244] ss:$16 sps:$4 sm:$0xff]  }
 0x447   : > { %8567 = vmatpush1.bf16.msra.mxu0 %v18659_v62  ;;  %8793 = vmatpush1.bf16.msra.mxu1 %v18662_v1  ;;  %v18706_v62 = vld [vmem:[%s24909_s7 + $0x24c] ss:$16 sps:$4 sm:$0xff]   ;;  %v18701_v1 = vld [vmem:[%s24909_s7 + $0x240] ss:$16 sps:$4 sm:$0xff]  }
 0x448   : > { %8568 = vmatprep.subr.bf16.mxu0 %v18667_v39  ;;  %8794 = vmatprep.subr.bf16.mxu1 %v18670_v20  ;;  %v18704_v39 = vld [vmem:[%s24909_s7 + $0x248] ss:$16 sps:$4 sm:$0xff]   ;;  %v18709_v20 = vld [vmem:[%s24909_s7 + $0x264] ss:$16 sps:$4 sm:$0xff]  }
 0x44a   : > { %7658 = vmatmul.mubr.bf16.gmra.mrb[72].mxu0 %v21735_v25  ;;  %7884 = vmatmul.mubr.bf16.gmra.mrb[72].mxu1 %v21735_v25 }
 0x44b   : > { %8569 = vmatpush1.bf16.msra.mxu0 %v18665_v9  ;;  %8795 = vmatpush1.bf16.msra.mxu1 %v18668_v4  ;;  %v18712_v9 = vld [vmem:[%s24909_s7 + $0x26c] ss:$16 sps:$4 sm:$0xff]   ;;  %v18707_v4 = vld [vmem:[%s24909_s7 + $0x260] ss:$16 sps:$4 sm:$0xff]  }
 0x44c   : > { %7667 = vmatprep.mubr.bf16.mxu0 %v22317_v3  ;;  %7893 = vmatprep.mubr.bf16.mxu1 %v22317_v3 }
 0x44d   : > { %8570 = vmatprep.subr.bf16.mxu0 %v18673_v59  ;;  %8796 = vmatprep.subr.bf16.mxu1 %v18676_v0  ;;  %v18710_v59 = vld [vmem:[%s24909_s7 + $0x268] ss:$16 sps:$4 sm:$0xff]   ;;  %v18715_v0 = vld [vmem:[%s24909_s7 + $0x284] ss:$16 sps:$4 sm:$0xff]  }
 0x44f   : > { %8571 = vmatpush1.bf16.msra.mxu0 %v18671_v48  ;;  %8797 = vmatpush1.bf16.msra.mxu1 %v18674_v49  ;;  %v18718_v48 = vld [vmem:[%s24909_s7 + $0x28c] ss:$16 sps:$4 sm:$0xff]   ;;  %v18713_v49 = vld [vmem:[%s24909_s7 + $0x280] ss:$16 sps:$4 sm:$0xff]  }
 0x450   : > { %8572 = vmatprep.subr.bf16.mxu0 %v18679_v50  ;;  %8798 = vmatprep.subr.bf16.mxu1 %v18682_v52  ;;  %v18716_v50 = vld [vmem:[%s24909_s7 + $0x288] ss:$16 sps:$4 sm:$0xff]   ;;  %v18721_v52 = vld [vmem:[%s24909_s7 + $0x2a4] ss:$16 sps:$4 sm:$0xff]  }
 0x452   : > { %7668 = vmatmul.mubr.bf16.gmra.mrb[76].mxu0 %v22313_v42  ;;  %7894 = vmatmul.mubr.bf16.gmra.mrb[76].mxu1 %v22313_v42 }
 0x453   : > { %8573 = vmatpush1.bf16.msra.mxu0 %v18677_v10  ;;  %8799 = vmatpush1.bf16.msra.mxu1 %v18680_v23  ;;  %v18724_v10 = vld [vmem:[%s24909_s7 + $0x2ac] ss:$16 sps:$4 sm:$0xff]   ;;  %v18719_v23 = vld [vmem:[%s24909_s7 + $0x2a0] ss:$16 sps:$4 sm:$0xff]  }
 0x454   : > { %8574 = vmatprep.subr.bf16.mxu0 %v18685_v44  ;;  %8800 = vmatprep.subr.bf16.mxu1 %v18688_v30  ;;  %v18722_v44 = vld [vmem:[%s24909_s7 + $0x2a8] ss:$16 sps:$4 sm:$0xff]   ;;  %v18727_v30 = vld [vmem:[%s24909_s7 + $0x2c4] ss:$16 sps:$4 sm:$0xff]  }
 0x455   : > { %8576 = vmatprep.mubr.bf16.mxu0 %v24914_v6  ;;  %8802 = vmatprep.mubr.bf16.mxu1 %v24914_v6 }
 0x457   : > { %8575 = vmatpush1.bf16.msra.mxu0 %v18683_v31  ;;  %8801 = vmatpush1.bf16.msra.mxu1 %v18686_v34  ;;  %v18730_v31 = vld [vmem:[%s24909_s7 + $0x2cc] ss:$16 sps:$4 sm:$0xff]   ;;  %v18725_v34 = vld [vmem:[%s24909_s7 + $0x2c0] ss:$16 sps:$4 sm:$0xff]  }
 0x458   : > { %8657 = vmatprep.subr.bf16.mxu0 %v18691_v36  ;;  %8883 = vmatprep.subr.bf16.mxu1 %v18694_v38  ;;  %v18728_v36 = vld [vmem:[%s24909_s7 + $0x2c8] ss:$16 sps:$4 sm:$0xff]   ;;  %v18733_v38 = vld [vmem:[%s24909_s7 + $0x2e4] ss:$16 sps:$4 sm:$0xff]  }
 0x45a   : > { %8577 = vmatmul.mubr.bf16.vlgmr.msra.gmra.mrb[48].mxu0 %v24914_v6  ;;  %8803 = vmatmul.mubr.bf16.vlgmr.msra.gmra.mrb[48].mxu1 %v24914_v6 }
 0x45b   : > { %8658 = vmatpush1.bf16.msra.mxu0 %v18689_v32  ;;  %8884 = vmatpush1.bf16.msra.mxu1 %v18692_v24  ;;  %v18736_v32 = vld [vmem:[%s24909_s7 + $0x2ec] ss:$16 sps:$4 sm:$0xff]   ;;  %v18731_v24 = vld [vmem:[%s24909_s7 + $0x2e0] ss:$16 sps:$4 sm:$0xff]  }
 0x45c   : > { %8586 = vmatprep.mubr.bf16.mxu0 %v21595_v7  ;;  %8812 = vmatprep.mubr.bf16.mxu1 %v21595_v7 }
 0x45d   : > { %8659 = vmatprep.subr.bf16.mxu0 %v18697_v40  ;;  %8885 = vmatprep.subr.bf16.mxu1 %v18700_v27  ;;  %v18734_v40 = vld [vmem:[%s24909_s7 + $0x2e8] ss:$16 sps:$4 sm:$0xff]   ;;  %v18739_v27 = vld [vmem:[%s24909_s7 + $0x304] ss:$16 sps:$4 sm:$0xff]  }
 0x45f   : > { %8660 = vmatpush1.bf16.msra.mxu0 %v18695_v51  ;;  %8886 = vmatpush1.bf16.msra.mxu1 %v18698_v43  ;;  %v18742_v51 = vld [vmem:[%s24909_s7 + $0x30c] ss:$16 sps:$4 sm:$0xff]   ;;  %v18737_v43 = vld [vmem:[%s24909_s7 + $0x300] ss:$16 sps:$4 sm:$0xff]  }
 0x460   : > { %8661 = vmatprep.subr.bf16.mxu0 %v18703_v53  ;;  %8887 = vmatprep.subr.bf16.mxu1 %v18706_v62  ;;  %v18740_v53 = vld [vmem:[%s24909_s7 + $0x308] ss:$16 sps:$4 sm:$0xff]   ;;  %v18745_v62 = vld [vmem:[%s24909_s7 + $0x324] ss:$16 sps:$4 sm:$0xff]  }
 0x462   : > { %8587 = vmatmul.mubr.bf16.gmra.mrb[52].mxu0 %v21585_v55  ;;  %8813 = vmatmul.mubr.bf16.gmra.mrb[52].mxu1 %v21585_v55 }
 0x463   : > { %8662 = vmatpush1.bf16.msra.mxu0 %v18701_v1  ;;  %8888 = vmatpush1.bf16.msra.mxu1 %v18704_v39  ;;  %v18748_v1 = vld [vmem:[%s24909_s7 + $0x32c] ss:$16 sps:$4 sm:$0xff]   ;;  %v18743_v39 = vld [vmem:[%s24909_s7 + $0x320] ss:$16 sps:$4 sm:$0xff]  }
 0x464   : > { %8596 = vmatprep.mubr.bf16.mxu0 %v22229_v12  ;;  %8822 = vmatprep.mubr.bf16.mxu1 %v22229_v12 }
 0x465   : > { %8663 = vmatprep.subr.bf16.mxu0 %v18709_v20  ;;  %8889 = vmatprep.subr.bf16.mxu1 %v18712_v9  ;;  %v18746_v20 = vld [vmem:[%s24909_s7 + $0x328] ss:$16 sps:$4 sm:$0xff]   ;;  %v18751_v9 = vld [vmem:[%s24909_s7 + $0x344] ss:$16 sps:$4 sm:$0xff]  }
 0x467   : > { %8664 = vmatpush1.bf16.msra.mxu0 %v18707_v4  ;;  %8890 = vmatpush1.bf16.msra.mxu1 %v18710_v59  ;;  %v18754_v4 = vld [vmem:[%s24909_s7 + $0x34c] ss:$16 sps:$4 sm:$0xff]   ;;  %v18749_v59 = vld [vmem:[%s24909_s7 + $0x340] ss:$16 sps:$4 sm:$0xff]  }
 0x468   : > { %8665 = vmatprep.subr.bf16.mxu0 %v18715_v0  ;;  %8891 = vmatprep.subr.bf16.mxu1 %v18718_v48  ;;  %v18752_v0 = vld [vmem:[%s24909_s7 + $0x348] ss:$16 sps:$4 sm:$0xff]   ;;  %v18757_v48 = vld [vmem:[%s24909_s7 + $0x364] ss:$16 sps:$4 sm:$0xff]  }
 0x46a   : > { %8597 = vmatmul.mubr.bf16.gmra.mrb[56].mxu0 %v22224_v45  ;;  %8823 = vmatmul.mubr.bf16.gmra.mrb[56].mxu1 %v22224_v45 }
 0x46b   : > { %8666 = vmatpush1.bf16.msra.mxu0 %v18713_v49  ;;  %8892 = vmatpush1.bf16.msra.mxu1 %v18716_v50  ;;  %v18760_v49 = vld [vmem:[%s24909_s7 + $0x36c] ss:$16 sps:$4 sm:$0xff]   ;;  %v18755_v50 = vld [vmem:[%s24909_s7 + $0x360] ss:$16 sps:$4 sm:$0xff]  }
 0x46c   : > { %8606 = vmatprep.mubr.bf16.mxu0 %v21644_v19  ;;  %8832 = vmatprep.mubr.bf16.mxu1 %v21644_v19 }
 0x46d   : > { %8667 = vmatprep.subr.bf16.mxu0 %v18721_v52  ;;  %8893 = vmatprep.subr.bf16.mxu1 %v18724_v10  ;;  %v18758_v52 = vld [vmem:[%s24909_s7 + $0x368] ss:$16 sps:$4 sm:$0xff]   ;;  %v18763_v10 = vld [vmem:[%s24909_s7 + $0x384] ss:$16 sps:$4 sm:$0xff]  }
 0x46f   : > { %8668 = vmatpush1.bf16.msra.mxu0 %v18719_v23  ;;  %8894 = vmatpush1.bf16.msra.mxu1 %v18722_v44  ;;  %v18766_v23 = vld [vmem:[%s24909_s7 + $0x38c] ss:$16 sps:$4 sm:$0xff]   ;;  %v18761_v44 = vld [vmem:[%s24909_s7 + $0x380] ss:$16 sps:$4 sm:$0xff]  }
 0x470   : > { %8669 = vmatprep.subr.bf16.mxu0 %v18727_v30  ;;  %8895 = vmatprep.subr.bf16.mxu1 %v18730_v31  ;;  %v18764_v30 = vld [vmem:[%s24909_s7 + $0x388] ss:$16 sps:$4 sm:$0xff]   ;;  %v18769_v31 = vld [vmem:[%s24909_s7 + $0x3a4] ss:$16 sps:$4 sm:$0xff]  }
 0x472   : > { %8607 = vmatmul.mubr.bf16.gmra.mrb[60].mxu0 %v21636_v56  ;;  %8833 = vmatmul.mubr.bf16.gmra.mrb[60].mxu1 %v21636_v56 }
 0x473   : > { %8670 = vmatpush1.bf16.msra.mxu0 %v18725_v34  ;;  %8896 = vmatpush1.bf16.msra.mxu1 %v18728_v36  ;;  %v18772_v34 = vld [vmem:[%s24909_s7 + $0x3ac] ss:$16 sps:$4 sm:$0xff]   ;;  %v18767_v36 = vld [vmem:[%s24909_s7 + $0x3a0] ss:$16 sps:$4 sm:$0xff]  }
 0x474   : > { %8616 = vmatprep.mubr.bf16.mxu0 %v22259_v61  ;;  %8842 = vmatprep.mubr.bf16.mxu1 %v22259_v61 }
 0x475   : > { %8671 = vmatprep.subr.bf16.mxu0 %v18733_v38  ;;  %8897 = vmatprep.subr.bf16.mxu1 %v18736_v32  ;;  %v18770_v38 = vld [vmem:[%s24909_s7 + $0x3a8] ss:$16 sps:$4 sm:$0xff]   ;;  %v18775_v32 = vld [vmem:[%s24909_s7 + $0x3c4] ss:$16 sps:$4 sm:$0xff]  }
 0x477   : > { %8672 = vmatpush1.bf16.msra.mxu0 %v18731_v24  ;;  %8898 = vmatpush1.bf16.msra.mxu1 %v18734_v40  ;;  %v18778_v24 = vld [vmem:[%s24909_s7 + $0x3cc] ss:$16 sps:$4 sm:$0xff]   ;;  %v18773_v40 = vld [vmem:[%s24909_s7 + $0x3c0] ss:$16 sps:$4 sm:$0xff]  }
 0x478   : > { %8673 = vmatprep.subr.bf16.mxu0 %v18739_v27  ;;  %8899 = vmatprep.subr.bf16.mxu1 %v18742_v51  ;;  %v18776_v27 = vld [vmem:[%s24909_s7 + $0x3c8] ss:$16 sps:$4 sm:$0xff]   ;;  %v18781_v51 = vld [vmem:[%s24909_s7 + $0x3e4] ss:$16 sps:$4 sm:$0xff]  }
 0x47a   : > { %8617 = vmatmul.mubr.bf16.gmra.mrb[64].mxu0 %v22254_v46  ;;  %8843 = vmatmul.mubr.bf16.gmra.mrb[64].mxu1 %v22254_v46 }
 0x47b   : > { %8674 = vmatpush1.bf16.msra.mxu0 %v18737_v43  ;;  %8900 = vmatpush1.bf16.msra.mxu1 %v18740_v53  ;;  %v18784_v43 = vld [vmem:[%s24909_s7 + $0x3ec] ss:$16 sps:$4 sm:$0xff]   ;;  %v18779_v53 = vld [vmem:[%s24909_s7 + $0x3e0] ss:$16 sps:$4 sm:$0xff]  }
 0x47c   : > { %8626 = vmatprep.mubr.bf16.mxu0 %v21692_v13  ;;  %8852 = vmatprep.mubr.bf16.mxu1 %v21692_v13 }
 0x47d   : > { %8675 = vmatprep.subr.bf16.mxu0 %v18745_v62  ;;  %8901 = vmatprep.subr.bf16.mxu1 %v18748_v1  ;;  %v18782_v62 = vld [vmem:[%s24909_s7 + $0x3e8] ss:$16 sps:$4 sm:$0xff]   ;;  %v18787_v1 = vld [vmem:[%s24909_s7 + $0xc04] ss:$16 sps:$4 sm:$0xff]  }
 0x47f   : > { %8676 = vmatpush1.bf16.msra.mxu0 %v18743_v39  ;;  %8902 = vmatpush1.bf16.msra.mxu1 %v18746_v20  ;;  %v18790_v39 = vld [vmem:[%s24909_s7 + $0xc0c] ss:$16 sps:$4 sm:$0xff]   ;;  %v18785_v20 = vld [vmem:[%s24909_s7 + $0xc00] ss:$16 sps:$4 sm:$0xff]  }
 0x480   : > { %8677 = vmatprep.subr.bf16.mxu0 %v18751_v9  ;;  %8903 = vmatprep.subr.bf16.mxu1 %v18754_v4  ;;  %v18788_v9 = vld [vmem:[%s24909_s7 + $0xc08] ss:$16 sps:$4 sm:$0xff]   ;;  %v18793_v4 = vld [vmem:[%s24909_s7 + $0xc24] ss:$16 sps:$4 sm:$0xff]  }
 0x482   : > { %8627 = vmatmul.mubr.bf16.gmra.mrb[68].mxu0 %v21684_v14  ;;  %8853 = vmatmul.mubr.bf16.gmra.mrb[68].mxu1 %v21684_v14 }
 0x483   : > { %8678 = vmatpush1.bf16.msra.mxu0 %v18749_v59  ;;  %8904 = vmatpush1.bf16.msra.mxu1 %v18752_v0  ;;  %v18796_v59 = vld [vmem:[%s24909_s7 + $0xc2c] ss:$16 sps:$4 sm:$0xff]   ;;  %v18791_v0 = vld [vmem:[%s24909_s7 + $0xc20] ss:$16 sps:$4 sm:$0xff]  }
 0x484   : > { %8636 = vmatprep.mubr.bf16.mxu0 %v22287_v60  ;;  %8862 = vmatprep.mubr.bf16.mxu1 %v22287_v60 }
 0x485   : > { %8679 = vmatprep.subr.bf16.mxu0 %v18757_v48  ;;  %8905 = vmatprep.subr.bf16.mxu1 %v18760_v49  ;;  %v18794_v48 = vld [vmem:[%s24909_s7 + $0xc28] ss:$16 sps:$4 sm:$0xff]   ;;  %v18799_v49 = vld [vmem:[%s24909_s7 + $0xc44] ss:$16 sps:$4 sm:$0xff]  }
 0x487   : > { %8680 = vmatpush1.bf16.msra.mxu0 %v18755_v50  ;;  %8906 = vmatpush1.bf16.msra.mxu1 %v18758_v52  ;;  %v18802_v50 = vld [vmem:[%s24909_s7 + $0xc4c] ss:$16 sps:$4 sm:$0xff]   ;;  %v18797_v52 = vld [vmem:[%s24909_s7 + $0xc40] ss:$16 sps:$4 sm:$0xff]  }
 0x488   : > { %8681 = vmatprep.subr.bf16.mxu0 %v18763_v10  ;;  %8907 = vmatprep.subr.bf16.mxu1 %v18766_v23  ;;  %v18800_v10 = vld [vmem:[%s24909_s7 + $0xc48] ss:$16 sps:$4 sm:$0xff]   ;;  %v18805_v23 = vld [vmem:[%s24909_s7 + $0xc64] ss:$16 sps:$4 sm:$0xff]  }
 0x48a   : > { %8637 = vmatmul.mubr.bf16.gmra.mrb[72].mxu0 %v22282_v58  ;;  %8863 = vmatmul.mubr.bf16.gmra.mrb[72].mxu1 %v22282_v58 }
 0x48b   : > { %8682 = vmatpush1.bf16.msra.mxu0 %v18761_v44  ;;  %8908 = vmatpush1.bf16.msra.mxu1 %v18764_v30  ;;  %v18808_v44 = vld [vmem:[%s24909_s7 + $0xc6c] ss:$16 sps:$4 sm:$0xff]   ;;  %v18803_v30 = vld [vmem:[%s24909_s7 + $0xc60] ss:$16 sps:$4 sm:$0xff]  }
 0x48c   : > { %8646 = vmatprep.mubr.bf16.mxu0 %v21737_v29  ;;  %8872 = vmatprep.mubr.bf16.mxu1 %v21737_v29 }
 0x48d   : > { %8683 = vmatprep.subr.bf16.mxu0 %v18769_v31  ;;  %8909 = vmatprep.subr.bf16.mxu1 %v18772_v34  ;;  %v18806_v31 = vld [vmem:[%s24909_s7 + $0xc68] ss:$16 sps:$4 sm:$0xff]   ;;  %v18811_v34 = vld [vmem:[%s24909_s7 + $0xc84] ss:$16 sps:$4 sm:$0xff]  }
 0x48f   : > { %8684 = vmatpush1.bf16.msra.mxu0 %v18767_v36  ;;  %8910 = vmatpush1.bf16.msra.mxu1 %v18770_v38  ;;  %v18814_v36 = vld [vmem:[%s24909_s7 + $0xc8c] ss:$16 sps:$4 sm:$0xff]   ;;  %v18809_v38 = vld [vmem:[%s24909_s7 + $0xc80] ss:$16 sps:$4 sm:$0xff]  }
 0x490   : > { %8685 = vmatprep.subr.bf16.mxu0 %v18775_v32  ;;  %8911 = vmatprep.subr.bf16.mxu1 %v18778_v24  ;;  %v18812_v32 = vld [vmem:[%s24909_s7 + $0xc88] ss:$16 sps:$4 sm:$0xff]   ;;  %v18817_v24 = vld [vmem:[%s24909_s7 + $0xca4] ss:$16 sps:$4 sm:$0xff]  }
 0x492   : > { %8647 = vmatmul.mubr.bf16.gmra.mrb[76].mxu0 %v21732_v63  ;;  %8873 = vmatmul.mubr.bf16.gmra.mrb[76].mxu1 %v21732_v63 }
 0x493   : > { %8686 = vmatpush1.bf16.msra.mxu0 %v18773_v40  ;;  %8912 = vmatpush1.bf16.msra.mxu1 %v18776_v27  ;;  %v18820_v40 = vld [vmem:[%s24909_s7 + $0xcac] ss:$16 sps:$4 sm:$0xff]   ;;  %v18815_v27 = vld [vmem:[%s24909_s7 + $0xca0] ss:$16 sps:$4 sm:$0xff]  }
 0x494   : > { %8687 = vmatprep.subr.bf16.mxu0 %v18781_v51  ;;  %8913 = vmatprep.subr.bf16.mxu1 %v18784_v43  ;;  %v18818_v51 = vld [vmem:[%s24909_s7 + $0xca8] ss:$16 sps:$4 sm:$0xff]   ;;  %v18823_v43 = vld [vmem:[%s24909_s7 + $0xcc4] ss:$16 sps:$4 sm:$0xff]  }
 0x495   : > { %8689 = vmatprep.mubr.bf16.mxu0 %v24914_v6  ;;  %8915 = vmatprep.mubr.bf16.mxu1 %v24914_v6 }
 0x497   : > { %8688 = vmatpush1.bf16.msra.mxu0 %v18779_v53  ;;  %8914 = vmatpush1.bf16.msra.mxu1 %v18782_v62  ;;  %v18826_v53 = vld [vmem:[%s24909_s7 + $0xccc] ss:$16 sps:$4 sm:$0xff]   ;;  %v18821_v62 = vld [vmem:[%s24909_s7 + $0xcc0] ss:$16 sps:$4 sm:$0xff]  }
 0x498   : > { %10265 = vmatprep.subr.bf16.mxu0 %v18787_v1  ;;  %10491 = vmatprep.subr.bf16.mxu1 %v18790_v39  ;;  %v18824_v1 = vld [vmem:[%s24909_s7 + $0xcc8] ss:$16 sps:$4 sm:$0xff]   ;;  %v18829_v39 = vld [vmem:[%s24909_s7 + $0xce4] ss:$16 sps:$4 sm:$0xff]  }
 0x49a   : > { %8690 = vmatmul.mubr.bf16.vlgmr.msra.gmra.mrb[48].mxu0 %v24914_v6  ;;  %8916 = vmatmul.mubr.bf16.vlgmr.msra.gmra.mrb[48].mxu1 %v24914_v6 }
 0x49b   : > { %10266 = vmatpush1.bf16.msra.mxu0 %v18785_v20  ;;  %10492 = vmatpush1.bf16.msra.mxu1 %v18788_v9  ;;  %v18832_v20 = vld [vmem:[%s24909_s7 + $0xcec] ss:$16 sps:$4 sm:$0xff]   ;;  %v18827_v9 = vld [vmem:[%s24909_s7 + $0xce0] ss:$16 sps:$4 sm:$0xff]  }
 0x49c   : > { %8699 = vmatprep.mubr.bf16.mxu0 %v21601_v22  ;;  %8925 = vmatprep.mubr.bf16.mxu1 %v21601_v22 }
 0x49d   : > { %10267 = vmatprep.subr.bf16.mxu0 %v18793_v4  ;;  %10493 = vmatprep.subr.bf16.mxu1 %v18796_v59  ;;  %v18830_v4 = vld [vmem:[%s24909_s7 + $0xce8] ss:$16 sps:$4 sm:$0xff]   ;;  %v18835_v59 = vld [vmem:[%s24909_s7 + $0xd04] ss:$16 sps:$4 sm:$0xff]  }
 0x49f   : > { %10268 = vmatpush1.bf16.msra.mxu0 %v18791_v0  ;;  %10494 = vmatpush1.bf16.msra.mxu1 %v18794_v48  ;;  %v18838_v0 = vld [vmem:[%s24909_s7 + $0xd0c] ss:$16 sps:$4 sm:$0xff]   ;;  %v18833_v48 = vld [vmem:[%s24909_s7 + $0xd00] ss:$16 sps:$4 sm:$0xff]  }
 0x4a0   : > { %10269 = vmatprep.subr.bf16.mxu0 %v18799_v49  ;;  %10495 = vmatprep.subr.bf16.mxu1 %v18802_v50  ;;  %v18836_v49 = vld [vmem:[%s24909_s7 + $0xd08] ss:$16 sps:$4 sm:$0xff]   ;;  %v18841_v50 = vld [vmem:[%s24909_s7 + $0xd24] ss:$16 sps:$4 sm:$0xff]  }
 0x4a2   : > { %8700 = vmatmul.mubr.bf16.gmra.mrb[52].mxu0 %v21593_v5  ;;  %8926 = vmatmul.mubr.bf16.gmra.mrb[52].mxu1 %v21593_v5 }
 0x4a3   : > { %10270 = vmatpush1.bf16.msra.mxu0 %v18797_v52  ;;  %10496 = vmatpush1.bf16.msra.mxu1 %v18800_v10  ;;  %v18844_v52 = vld [vmem:[%s24909_s7 + $0xd2c] ss:$16 sps:$4 sm:$0xff]   ;;  %v18839_v10 = vld [vmem:[%s24909_s7 + $0xd20] ss:$16 sps:$4 sm:$0xff]  }
 0x4a4   : > { %8709 = vmatprep.mubr.bf16.mxu0 %v22231_v47  ;;  %8935 = vmatprep.mubr.bf16.mxu1 %v22231_v47 }
 0x4a5   : > { %10271 = vmatprep.subr.bf16.mxu0 %v18805_v23  ;;  %10497 = vmatprep.subr.bf16.mxu1 %v18808_v44  ;;  %v18842_v23 = vld [vmem:[%s24909_s7 + $0xd28] ss:$16 sps:$4 sm:$0xff]   ;;  %v18847_v44 = vld [vmem:[%s24909_s7 + $0xd44] ss:$16 sps:$4 sm:$0xff]  }
 0x4a7   : > { %10272 = vmatpush1.bf16.msra.mxu0 %v18803_v30  ;;  %10498 = vmatpush1.bf16.msra.mxu1 %v18806_v31  ;;  %v18850_v30 = vld [vmem:[%s24909_s7 + $0xd4c] ss:$16 sps:$4 sm:$0xff]   ;;  %v18845_v31 = vld [vmem:[%s24909_s7 + $0xd40] ss:$16 sps:$4 sm:$0xff]  }
 0x4a8   : > { %10273 = vmatprep.subr.bf16.mxu0 %v18811_v34  ;;  %10499 = vmatprep.subr.bf16.mxu1 %v18814_v36  ;;  %v18848_v34 = vld [vmem:[%s24909_s7 + $0xd48] ss:$16 sps:$4 sm:$0xff]   ;;  %v18853_v36 = vld [vmem:[%s24909_s7 + $0xd64] ss:$16 sps:$4 sm:$0xff]  }
 0x4aa   : > { %8710 = vmatmul.mubr.bf16.gmra.mrb[56].mxu0 %v22227_v41  ;;  %8936 = vmatmul.mubr.bf16.gmra.mrb[56].mxu1 %v22227_v41 }
 0x4ab   : > { %10274 = vmatpush1.bf16.msra.mxu0 %v18809_v38  ;;  %10500 = vmatpush1.bf16.msra.mxu1 %v18812_v32  ;;  %v18856_v38 = vld [vmem:[%s24909_s7 + $0xd6c] ss:$16 sps:$4 sm:$0xff]   ;;  %v18851_v32 = vld [vmem:[%s24909_s7 + $0xd60] ss:$16 sps:$4 sm:$0xff]  }
 0x4ac   : > { %8719 = vmatprep.mubr.bf16.mxu0 %v21649_v26  ;;  %8945 = vmatprep.mubr.bf16.mxu1 %v21649_v26 }
 0x4ad   : > { %10275 = vmatprep.subr.bf16.mxu0 %v18817_v24  ;;  %10501 = vmatprep.subr.bf16.mxu1 %v18820_v40  ;;  %v18854_v24 = vld [vmem:[%s24909_s7 + $0xd68] ss:$16 sps:$4 sm:$0xff]   ;;  %v18859_v40 = vld [vmem:[%s24909_s7 + $0xd84] ss:$16 sps:$4 sm:$0xff]  }
 0x4af   : > { %10276 = vmatpush1.bf16.msra.mxu0 %v18815_v27  ;;  %10502 = vmatpush1.bf16.msra.mxu1 %v18818_v51  ;;  %v18862_v27 = vld [vmem:[%s24909_s7 + $0xd8c] ss:$16 sps:$4 sm:$0xff]   ;;  %v18857_v51 = vld [vmem:[%s24909_s7 + $0xd80] ss:$16 sps:$4 sm:$0xff]  }
 0x4b0   : > { %10277 = vmatprep.subr.bf16.mxu0 %v18823_v43  ;;  %10503 = vmatprep.subr.bf16.mxu1 %v18826_v53  ;;  %v18860_v43 = vld [vmem:[%s24909_s7 + $0xd88] ss:$16 sps:$4 sm:$0xff]   ;;  %v18865_v53 = vld [vmem:[%s24909_s7 + $0xda4] ss:$16 sps:$4 sm:$0xff]  }
 0x4b2   : > { %8720 = vmatmul.mubr.bf16.gmra.mrb[60].mxu0 %v21642_v11  ;;  %8946 = vmatmul.mubr.bf16.gmra.mrb[60].mxu1 %v21642_v11 }
 0x4b3   : > { %10278 = vmatpush1.bf16.msra.mxu0 %v18821_v62  ;;  %10504 = vmatpush1.bf16.msra.mxu1 %v18824_v1  ;;  %v18868_v62 = vld [vmem:[%s24909_s7 + $0xdac] ss:$16 sps:$4 sm:$0xff]   ;;  %v18863_v1 = vld [vmem:[%s24909_s7 + $0xda0] ss:$16 sps:$4 sm:$0xff]  }
 0x4b4   : > { %8729 = vmatprep.mubr.bf16.mxu0 %v22261_v54  ;;  %8955 = vmatprep.mubr.bf16.mxu1 %v22261_v54 }
 0x4b5   : > { %10279 = vmatprep.subr.bf16.mxu0 %v18829_v39  ;;  %10505 = vmatprep.subr.bf16.mxu1 %v18832_v20  ;;  %v18866_v39 = vld [vmem:[%s24909_s7 + $0xda8] ss:$16 sps:$4 sm:$0xff]   ;;  %v18871_v20 = vld [vmem:[%s24909_s7 + $0xdc4] ss:$16 sps:$4 sm:$0xff]  }
 0x4b7   : > { %10280 = vmatpush1.bf16.msra.mxu0 %v18827_v9  ;;  %10506 = vmatpush1.bf16.msra.mxu1 %v18830_v4  ;;  %v18874_v9 = vld [vmem:[%s24909_s7 + $0xdcc] ss:$16 sps:$4 sm:$0xff]   ;;  %v18869_v4 = vld [vmem:[%s24909_s7 + $0xdc0] ss:$16 sps:$4 sm:$0xff]  }
 0x4b8   : > { %10281 = vmatprep.subr.bf16.mxu0 %v18835_v59  ;;  %10507 = vmatprep.subr.bf16.mxu1 %v18838_v0  ;;  %v18872_v59 = vld [vmem:[%s24909_s7 + $0xdc8] ss:$16 sps:$4 sm:$0xff]   ;;  %v18877_v0 = vld [vmem:[%s24909_s7 + $0xde4] ss:$16 sps:$4 sm:$0xff]  }
 0x4ba   : > { %8730 = vmatmul.mubr.bf16.gmra.mrb[64].mxu0 %v22257_v57  ;;  %8956 = vmatmul.mubr.bf16.gmra.mrb[64].mxu1 %v22257_v57 }
 0x4bb   : > { %10282 = vmatpush1.bf16.msra.mxu0 %v18833_v48  ;;  %10508 = vmatpush1.bf16.msra.mxu1 %v18836_v49  ;;  %v18880_v48 = vld [vmem:[%s24909_s7 + $0xdec] ss:$16 sps:$4 sm:$0xff]   ;;  %v18875_v49 = vld [vmem:[%s24909_s7 + $0xde0] ss:$16 sps:$4 sm:$0xff]  }
 0x4bc   : > { %8739 = vmatprep.mubr.bf16.mxu0 %v21697_v33  ;;  %8965 = vmatprep.mubr.bf16.mxu1 %v21697_v33 }
 0x4bd   : > { %10283 = vmatprep.subr.bf16.mxu0 %v18841_v50  ;;  %10509 = vmatprep.subr.bf16.mxu1 %v18844_v52  ;;  %v18878_v50 = vld [vmem:[%s24909_s7 + $0xde8] ss:$16 sps:$4 sm:$0xff]   ;;  %v18883_v52 = vld [vmem:[%s24909_s7 + $0xe04] ss:$16 sps:$4 sm:$0xff]  }
 0x4bf   : > { %10284 = vmatpush1.bf16.msra.mxu0 %v18839_v10  ;;  %10510 = vmatpush1.bf16.msra.mxu1 %v18842_v23  ;;  %v18886_v10 = vld [vmem:[%s24909_s7 + $0xe0c] ss:$16 sps:$4 sm:$0xff]   ;;  %v18881_v23 = vld [vmem:[%s24909_s7 + $0xe00] ss:$16 sps:$4 sm:$0xff]  }
 0x4c0   : > { %10285 = vmatprep.subr.bf16.mxu0 %v18847_v44  ;;  %10511 = vmatprep.subr.bf16.mxu1 %v18850_v30  ;;  %v18884_v44 = vld [vmem:[%s24909_s7 + $0xe08] ss:$16 sps:$4 sm:$0xff]   ;;  %v18889_v30 = vld [vmem:[%s24909_s7 + $0xe24] ss:$16 sps:$4 sm:$0xff]  }
 0x4c2   : > { %8740 = vmatmul.mubr.bf16.gmra.mrb[68].mxu0 %v21690_v28  ;;  %8966 = vmatmul.mubr.bf16.gmra.mrb[68].mxu1 %v21690_v28 }
 0x4c3   : > { %10286 = vmatpush1.bf16.msra.mxu0 %v18845_v31  ;;  %10512 = vmatpush1.bf16.msra.mxu1 %v18848_v34  ;;  %v18892_v31 = vld [vmem:[%s24909_s7 + $0xe2c] ss:$16 sps:$4 sm:$0xff]   ;;  %v18887_v34 = vld [vmem:[%s24909_s7 + $0xe20] ss:$16 sps:$4 sm:$0xff]  }
 0x4c4   : > { %8749 = vmatprep.mubr.bf16.mxu0 %v22289_v18  ;;  %8975 = vmatprep.mubr.bf16.mxu1 %v22289_v18 }
 0x4c5   : > { %10287 = vmatprep.subr.bf16.mxu0 %v18853_v36  ;;  %10513 = vmatprep.subr.bf16.mxu1 %v18856_v38  ;;  %v18890_v36 = vld [vmem:[%s24909_s7 + $0xe28] ss:$16 sps:$4 sm:$0xff]   ;;  %v18895_v38 = vld [vmem:[%s24909_s7 + $0xe44] ss:$16 sps:$4 sm:$0xff]  }
 0x4c7   : > { %10288 = vmatpush1.bf16.msra.mxu0 %v18851_v32  ;;  %10514 = vmatpush1.bf16.msra.mxu1 %v18854_v24  ;;  %v18898_v32 = vld [vmem:[%s24909_s7 + $0xe4c] ss:$16 sps:$4 sm:$0xff]   ;;  %v18893_v24 = vld [vmem:[%s24909_s7 + $0xe40] ss:$16 sps:$4 sm:$0xff]  }
 0x4c8   : > { %10289 = vmatprep.subr.bf16.mxu0 %v18859_v40  ;;  %10515 = vmatprep.subr.bf16.mxu1 %v18862_v27  ;;  %v18896_v40 = vld [vmem:[%s24909_s7 + $0xe48] ss:$16 sps:$4 sm:$0xff]   ;;  %v18901_v27 = vld [vmem:[%s24909_s7 + $0xe64] ss:$16 sps:$4 sm:$0xff]  }
 0x4ca   : > { %8750 = vmatmul.mubr.bf16.gmra.mrb[72].mxu0 %v22285_v21  ;;  %8976 = vmatmul.mubr.bf16.gmra.mrb[72].mxu1 %v22285_v21 }
 0x4cb   : > { %10290 = vmatpush1.bf16.msra.mxu0 %v18857_v51  ;;  %10516 = vmatpush1.bf16.msra.mxu1 %v18860_v43  ;;  %v18904_v51 = vld [vmem:[%s24909_s7 + $0xe6c] ss:$16 sps:$4 sm:$0xff]   ;;  %v18899_v43 = vld [vmem:[%s24909_s7 + $0xe60] ss:$16 sps:$4 sm:$0xff]  }
 0x4cc   : > { %8759 = vmatprep.mubr.bf16.mxu0 %v21742_v17  ;;  %8985 = vmatprep.mubr.bf16.mxu1 %v21742_v17 }
 0x4cd   : > { %10291 = vmatprep.subr.bf16.mxu0 %v18865_v53  ;;  %10517 = vmatprep.subr.bf16.mxu1 %v18868_v62  ;;  %v18902_v53 = vld [vmem:[%s24909_s7 + $0xe68] ss:$16 sps:$4 sm:$0xff]   ;;  %v18907_v62 = vld [vmem:[%s24909_s7 + $0xe84] ss:$16 sps:$4 sm:$0xff]  }
 0x4cf   : > { %10292 = vmatpush1.bf16.msra.mxu0 %v18863_v1  ;;  %10518 = vmatpush1.bf16.msra.mxu1 %v18866_v39  ;;  %v18910_v1 = vld [vmem:[%s24909_s7 + $0xe8c] ss:$16 sps:$4 sm:$0xff]   ;;  %v18905_v39 = vld [vmem:[%s24909_s7 + $0xe80] ss:$16 sps:$4 sm:$0xff]  }
 0x4d0   : > { %10293 = vmatprep.subr.bf16.mxu0 %v18871_v20  ;;  %10519 = vmatprep.subr.bf16.mxu1 %v18874_v9  ;;  %v18908_v20 = vld [vmem:[%s24909_s7 + $0xe88] ss:$16 sps:$4 sm:$0xff]   ;;  %v18913_v9 = vld [vmem:[%s24909_s7 + $0xea4] ss:$16 sps:$4 sm:$0xff]  }
 0x4d2   : > { %8760 = vmatmul.mubr.bf16.gmra.mrb[76].mxu0 %v21735_v25  ;;  %8986 = vmatmul.mubr.bf16.gmra.mrb[76].mxu1 %v21735_v25 }
 0x4d3   : > { %10294 = vmatpush1.bf16.msra.mxu0 %v18869_v4  ;;  %10520 = vmatpush1.bf16.msra.mxu1 %v18872_v59  ;;  %v18916_v4 = vld [vmem:[%s24909_s7 + $0xeac] ss:$16 sps:$4 sm:$0xff]   ;;  %v18911_v59 = vld [vmem:[%s24909_s7 + $0xea0] ss:$16 sps:$4 sm:$0xff]  }
 0x4d4   : > { %10297 = vmatprep.mubr.bf16.mxu0 %v22229_v12  ;;  %10523 = vmatprep.mubr.bf16.mxu1 %v22229_v12 }
 0x4d5   : > { %10295 = vmatprep.subr.bf16.mxu0 %v18877_v0  ;;  %10521 = vmatprep.subr.bf16.mxu1 %v18880_v48  ;;  %v18914_v0 = vld [vmem:[%s24909_s7 + $0xea8] ss:$16 sps:$4 sm:$0xff]   ;;  %v18919_v48 = vld [vmem:[%s24909_s7 + $0xec4] ss:$16 sps:$4 sm:$0xff]  }
 0x4d7   : > { %10296 = vmatpush1.bf16.msra.mxu0 %v18875_v49  ;;  %10522 = vmatpush1.bf16.msra.mxu1 %v18878_v50  ;;  %v18922_v49 = vld [vmem:[%s24909_s7 + $0xecc] ss:$16 sps:$4 sm:$0xff]   ;;  %v18917_v50 = vld [vmem:[%s24909_s7 + $0xec0] ss:$16 sps:$4 sm:$0xff]  }
 0x4d8   : > { %10378 = vmatprep.subr.bf16.mxu0 %v18883_v52  ;;  %10604 = vmatprep.subr.bf16.mxu1 %v18886_v10  ;;  %v18920_v52 = vld [vmem:[%s24909_s7 + $0xec8] ss:$16 sps:$4 sm:$0xff]   ;;  %v18925_v10 = vld [vmem:[%s24909_s7 + $0xee4] ss:$16 sps:$4 sm:$0xff]  }
 0x4da   : > { %10298 = vmatmul.mubr.bf16.vlgmr.msra.gmra.mrb[80].mxu0 %v22224_v45  ;;  %10524 = vmatmul.mubr.bf16.vlgmr.msra.gmra.mrb[80].mxu1 %v22224_v45 }
 0x4db   : > { %10379 = vmatpush1.bf16.msra.mxu0 %v18881_v23  ;;  %10605 = vmatpush1.bf16.msra.mxu1 %v18884_v44  ;;  %v18928_v23 = vld [vmem:[%s24909_s7 + $0xeec] ss:$16 sps:$4 sm:$0xff]   ;;  %v18923_v44 = vld [vmem:[%s24909_s7 + $0xee0] ss:$16 sps:$4 sm:$0xff]  }
 0x4dc   : > { %10307 = vmatprep.mubr.bf16.mxu0 %v21644_v19  ;;  %10533 = vmatprep.mubr.bf16.mxu1 %v21644_v19 }
 0x4dd   : > { %10380 = vmatprep.subr.bf16.mxu0 %v18889_v30  ;;  %10606 = vmatprep.subr.bf16.mxu1 %v18892_v31  ;;  %v18926_v30 = vld [vmem:[%s24909_s7 + $0xee8] ss:$16 sps:$4 sm:$0xff]   ;;  %v18931_v31 = vld [vmem:[%s24909_s7 + $0xf04] ss:$16 sps:$4 sm:$0xff]  }
 0x4df   : > { %10381 = vmatpush1.bf16.msra.mxu0 %v18887_v34  ;;  %10607 = vmatpush1.bf16.msra.mxu1 %v18890_v36  ;;  %v18934_v34 = vld [vmem:[%s24909_s7 + $0xf0c] ss:$16 sps:$4 sm:$0xff]   ;;  %v18929_v36 = vld [vmem:[%s24909_s7 + $0xf00] ss:$16 sps:$4 sm:$0xff]  }
 0x4e0   : > { %10382 = vmatprep.subr.bf16.mxu0 %v18895_v38  ;;  %10608 = vmatprep.subr.bf16.mxu1 %v18898_v32  ;;  %v18932_v38 = vld [vmem:[%s24909_s7 + $0xf08] ss:$16 sps:$4 sm:$0xff]   ;;  %v18937_v32 = vld [vmem:[%s24909_s7 + $0xf24] ss:$16 sps:$4 sm:$0xff]  }
 0x4e2   : > { %10308 = vmatmul.mubr.bf16.gmra.mrb[84].mxu0 %v21636_v56  ;;  %10534 = vmatmul.mubr.bf16.gmra.mrb[84].mxu1 %v21636_v56 }
 0x4e3   : > { %10383 = vmatpush1.bf16.msra.mxu0 %v18893_v24  ;;  %10609 = vmatpush1.bf16.msra.mxu1 %v18896_v40  ;;  %v18940_v24 = vld [vmem:[%s24909_s7 + $0xf2c] ss:$16 sps:$4 sm:$0xff]   ;;  %v18935_v40 = vld [vmem:[%s24909_s7 + $0xf20] ss:$16 sps:$4 sm:$0xff]  }
 0x4e4   : > { %10317 = vmatprep.mubr.bf16.mxu0 %v22259_v61  ;;  %10543 = vmatprep.mubr.bf16.mxu1 %v22259_v61 }
 0x4e5   : > { %10384 = vmatprep.subr.bf16.mxu0 %v18901_v27  ;;  %10610 = vmatprep.subr.bf16.mxu1 %v18904_v51  ;;  %v18938_v27 = vld [vmem:[%s24909_s7 + $0xf28] ss:$16 sps:$4 sm:$0xff]   ;;  %v18943_v51 = vld [vmem:[%s24909_s7 + $0xf44] ss:$16 sps:$4 sm:$0xff]  }
 0x4e7   : > { %10385 = vmatpush1.bf16.msra.mxu0 %v18899_v43  ;;  %10611 = vmatpush1.bf16.msra.mxu1 %v18902_v53  ;;  %v18946_v43 = vld [vmem:[%s24909_s7 + $0xf4c] ss:$16 sps:$4 sm:$0xff]   ;;  %v18941_v53 = vld [vmem:[%s24909_s7 + $0xf40] ss:$16 sps:$4 sm:$0xff]  }
 0x4e8   : > { %10386 = vmatprep.subr.bf16.mxu0 %v18907_v62  ;;  %10612 = vmatprep.subr.bf16.mxu1 %v18910_v1  ;;  %v18944_v62 = vld [vmem:[%s24909_s7 + $0xf48] ss:$16 sps:$4 sm:$0xff]   ;;  %v18949_v1 = vld [vmem:[%s24909_s7 + $0xf64] ss:$16 sps:$4 sm:$0xff]  }
 0x4ea   : > { %10318 = vmatmul.mubr.bf16.gmra.mrb[88].mxu0 %v22254_v46  ;;  %10544 = vmatmul.mubr.bf16.gmra.mrb[88].mxu1 %v22254_v46 }
 0x4eb   : > { %10387 = vmatpush1.bf16.msra.mxu0 %v18905_v39  ;;  %10613 = vmatpush1.bf16.msra.mxu1 %v18908_v20  ;;  %v18952_v39 = vld [vmem:[%s24909_s7 + $0xf6c] ss:$16 sps:$4 sm:$0xff]   ;;  %v18947_v20 = vld [vmem:[%s24909_s7 + $0xf60] ss:$16 sps:$4 sm:$0xff]  }
 0x4ec   : > { %10327 = vmatprep.mubr.bf16.mxu0 %v21692_v13  ;;  %10553 = vmatprep.mubr.bf16.mxu1 %v21692_v13 }
 0x4ed   : > { %10388 = vmatprep.subr.bf16.mxu0 %v18913_v9  ;;  %10614 = vmatprep.subr.bf16.mxu1 %v18916_v4  ;;  %v18950_v9 = vld [vmem:[%s24909_s7 + $0xf68] ss:$16 sps:$4 sm:$0xff]   ;;  %v18955_v4 = vld [vmem:[%s24909_s7 + $0xf84] ss:$16 sps:$4 sm:$0xff]  }
 0x4ef   : > { %10389 = vmatpush1.bf16.msra.mxu0 %v18911_v59  ;;  %10615 = vmatpush1.bf16.msra.mxu1 %v18914_v0  ;;  %v18958_v59 = vld [vmem:[%s24909_s7 + $0xf8c] ss:$16 sps:$4 sm:$0xff]   ;;  %v18953_v0 = vld [vmem:[%s24909_s7 + $0xf80] ss:$16 sps:$4 sm:$0xff]  }
 0x4f0   : > { %10390 = vmatprep.subr.bf16.mxu0 %v18919_v48  ;;  %10616 = vmatprep.subr.bf16.mxu1 %v18922_v49  ;;  %v18956_v48 = vld [vmem:[%s24909_s7 + $0xf88] ss:$16 sps:$4 sm:$0xff]   ;;  %v18961_v49 = vld [vmem:[%s24909_s7 + $0xfa4] ss:$16 sps:$4 sm:$0xff]  }
 0x4f2   : > { %10328 = vmatmul.mubr.bf16.gmra.mrb[92].mxu0 %v21684_v14  ;;  %10554 = vmatmul.mubr.bf16.gmra.mrb[92].mxu1 %v21684_v14 }
 0x4f3   : > { %10391 = vmatpush1.bf16.msra.mxu0 %v18917_v50  ;;  %10617 = vmatpush1.bf16.msra.mxu1 %v18920_v52  ;;  %v18964_v50 = vld [vmem:[%s24909_s7 + $0xfac] ss:$16 sps:$4 sm:$0xff]   ;;  %v18959_v52 = vld [vmem:[%s24909_s7 + $0xfa0] ss:$16 sps:$4 sm:$0xff]  }
 0x4f4   : > { %10337 = vmatprep.mubr.bf16.mxu0 %v22287_v60  ;;  %10563 = vmatprep.mubr.bf16.mxu1 %v22287_v60 }
 0x4f5   : > { %10392 = vmatprep.subr.bf16.mxu0 %v18925_v10  ;;  %10618 = vmatprep.subr.bf16.mxu1 %v18928_v23  ;;  %v18962_v10 = vld [vmem:[%s24909_s7 + $0xfa8] ss:$16 sps:$4 sm:$0xff]   ;;  %v18967_v23 = vld [vmem:[%s24909_s7 + $0xfc4] ss:$16 sps:$4 sm:$0xff]  }
 0x4f7   : > { %10393 = vmatpush1.bf16.msra.mxu0 %v18923_v44  ;;  %10619 = vmatpush1.bf16.msra.mxu1 %v18926_v30  ;;  %v18970_v44 = vld [vmem:[%s24909_s7 + $0xfcc] ss:$16 sps:$4 sm:$0xff]   ;;  %v18965_v30 = vld [vmem:[%s24909_s7 + $0xfc0] ss:$16 sps:$4 sm:$0xff]  }
 0x4f8   : > { %10394 = vmatprep.subr.bf16.mxu0 %v18931_v31  ;;  %10620 = vmatprep.subr.bf16.mxu1 %v18934_v34  ;;  %v18968_v31 = vld [vmem:[%s24909_s7 + $0xfc8] ss:$16 sps:$4 sm:$0xff]   ;;  %v18973_v34 = vld [vmem:[%s24909_s7 + $0xfe4] ss:$16 sps:$4 sm:$0xff]  }
 0x4fa   : > { %10338 = vmatmul.mubr.bf16.gmra.mrb[96].mxu0 %v22282_v58  ;;  %10564 = vmatmul.mubr.bf16.gmra.mrb[96].mxu1 %v22282_v58 }
 0x4fb   : > { %10395 = vmatpush1.bf16.msra.mxu0 %v18929_v36  ;;  %10621 = vmatpush1.bf16.msra.mxu1 %v18932_v38  ;;  %v18976_v36 = vld [vmem:[%s24909_s7 + $0xfec] ss:$16 sps:$4 sm:$0xff]   ;;  %v18971_v38 = vld [vmem:[%s24909_s7 + $0xfe0] ss:$16 sps:$4 sm:$0xff]  }
 0x4fc   : > { %10347 = vmatprep.mubr.bf16.mxu0 %v21737_v29  ;;  %10573 = vmatprep.mubr.bf16.mxu1 %v21737_v29 }
 0x4fd   : > { %10396 = vmatprep.subr.bf16.mxu0 %v18937_v32  ;;  %10622 = vmatprep.subr.bf16.mxu1 %v18940_v24  ;;  %v18974_v32 = vld [vmem:[%s24909_s7 + $0xfe8] ss:$16 sps:$4 sm:$0xff]   ;;  %v18979_v24 = vld [vmem:[%s24909_s7 + $0x804] ss:$16 sps:$4 sm:$0xff]  }
 0x4ff   : > { %10397 = vmatpush1.bf16.msra.mxu0 %v18935_v40  ;;  %10623 = vmatpush1.bf16.msra.mxu1 %v18938_v27  ;;  %v18982_v40 = vld [vmem:[%s24909_s7 + $0x80c] ss:$16 sps:$4 sm:$0xff]   ;;  %v18977_v27 = vld [vmem:[%s24909_s7 + $0x800] ss:$16 sps:$4 sm:$0xff]  }
 0x500   : > { %10398 = vmatprep.subr.bf16.mxu0 %v18943_v51  ;;  %10624 = vmatprep.subr.bf16.mxu1 %v18946_v43  ;;  %v18980_v51 = vld [vmem:[%s24909_s7 + $0x808] ss:$16 sps:$4 sm:$0xff]   ;;  %v18985_v43 = vld [vmem:[%s24909_s7 + $0x824] ss:$16 sps:$4 sm:$0xff]  }
 0x502   : > { %10348 = vmatmul.mubr.bf16.gmra.mrb[100].mxu0 %v21732_v63  ;;  %10574 = vmatmul.mubr.bf16.gmra.mrb[100].mxu1 %v21732_v63 }
 0x503   : > { %10399 = vmatpush1.bf16.msra.mxu0 %v18941_v53  ;;  %10625 = vmatpush1.bf16.msra.mxu1 %v18944_v62  ;;  %v18988_v53 = vld [vmem:[%s24909_s7 + $0x82c] ss:$16 sps:$4 sm:$0xff]   ;;  %v18983_v62 = vld [vmem:[%s24909_s7 + $0x820] ss:$16 sps:$4 sm:$0xff]  }
 0x504   : > { %10357 = vmatprep.mubr.bf16.mxu0 %v22315_v8  ;;  %10583 = vmatprep.mubr.bf16.mxu1 %v22315_v8 }
 0x505   : > { %10400 = vmatprep.subr.bf16.mxu0 %v18949_v1  ;;  %10626 = vmatprep.subr.bf16.mxu1 %v18952_v39  ;;  %v18986_v1 = vld [vmem:[%s24909_s7 + $0x828] ss:$16 sps:$4 sm:$0xff]   ;;  %v18991_v39 = vld [vmem:[%s24909_s7 + $0x844] ss:$16 sps:$4 sm:$0xff]  }
 0x507   : > { %10401 = vmatpush1.bf16.msra.mxu0 %v18947_v20  ;;  %10627 = vmatpush1.bf16.msra.mxu1 %v18950_v9  ;;  %v18994_v20 = vld [vmem:[%s24909_s7 + $0x84c] ss:$16 sps:$4 sm:$0xff]   ;;  %v18989_v9 = vld [vmem:[%s24909_s7 + $0x840] ss:$16 sps:$4 sm:$0xff]  }
 0x508   : > { %10402 = vmatprep.subr.bf16.mxu0 %v18955_v4  ;;  %10628 = vmatprep.subr.bf16.mxu1 %v18958_v59  ;;  %v18992_v4 = vld [vmem:[%s24909_s7 + $0x848] ss:$16 sps:$4 sm:$0xff]   ;;  %v18997_v59 = vld [vmem:[%s24909_s7 + $0x864] ss:$16 sps:$4 sm:$0xff]  }
 0x50a   : > { %10358 = vmatmul.mubr.bf16.gmra.mrb[104].mxu0 %v22310_v2  ;;  %10584 = vmatmul.mubr.bf16.gmra.mrb[104].mxu1 %v22310_v2 }
 0x50b   : > { %10403 = vmatpush1.bf16.msra.mxu0 %v18953_v0  ;;  %10629 = vmatpush1.bf16.msra.mxu1 %v18956_v48  ;;  %v19000_v0 = vld [vmem:[%s24909_s7 + $0x86c] ss:$16 sps:$4 sm:$0xff]   ;;  %v18995_v48 = vld [vmem:[%s24909_s7 + $0x860] ss:$16 sps:$4 sm:$0xff]  }
 0x50c   : > { %10404 = vmatprep.subr.bf16.mxu0 %v18961_v49  ;;  %10630 = vmatprep.subr.bf16.mxu1 %v18964_v50  ;;  %v18998_v49 = vld [vmem:[%s24909_s7 + $0x868] ss:$16 sps:$4 sm:$0xff]   ;;  %v19003_v50 = vld [vmem:[%s24909_s7 + $0x884] ss:$16 sps:$4 sm:$0xff]  }
 0x50d   : > { %10367 = vmatprep.mubr.bf16.mxu0 %v24914_v6  ;;  %10593 = vmatprep.mubr.bf16.mxu1 %v24914_v6 }
 0x50f   : > { %10405 = vmatpush1.bf16.msra.mxu0 %v18959_v52  ;;  %10631 = vmatpush1.bf16.msra.mxu1 %v18962_v10  ;;  %v19006_v52 = vld [vmem:[%s24909_s7 + $0x88c] ss:$16 sps:$4 sm:$0xff]   ;;  %v19001_v10 = vld [vmem:[%s24909_s7 + $0x880] ss:$16 sps:$4 sm:$0xff]  }
 0x510   : > { %10406 = vmatprep.subr.bf16.mxu0 %v18967_v23  ;;  %10632 = vmatprep.subr.bf16.mxu1 %v18970_v44  ;;  %v19004_v23 = vld [vmem:[%s24909_s7 + $0x888] ss:$16 sps:$4 sm:$0xff]   ;;  %v19009_v44 = vld [vmem:[%s24909_s7 + $0x8a4] ss:$16 sps:$4 sm:$0xff]  }
 0x512   : > { %10368 = vmatmul.mubr.bf16.gmra.mrb[108].mxu0 %v24914_v6  ;;  %10594 = vmatmul.mubr.bf16.gmra.mrb[108].mxu1 %v24914_v6 }
 0x513   : > { %10407 = vmatpush1.bf16.msra.mxu0 %v18965_v30  ;;  %10633 = vmatpush1.bf16.msra.mxu1 %v18968_v31  ;;  %v19012_v30 = vld [vmem:[%s24909_s7 + $0x8ac] ss:$16 sps:$4 sm:$0xff]   ;;  %v19007_v31 = vld [vmem:[%s24909_s7 + $0x8a0] ss:$16 sps:$4 sm:$0xff]  }
 0x514   : > { %10410 = vmatprep.mubr.bf16.mxu0 %v22231_v47  ;;  %10636 = vmatprep.mubr.bf16.mxu1 %v22231_v47 }
 0x515   : > { %10408 = vmatprep.subr.bf16.mxu0 %v18973_v34  ;;  %10634 = vmatprep.subr.bf16.mxu1 %v18976_v36  ;;  %v19010_v34 = vld [vmem:[%s24909_s7 + $0x8a8] ss:$16 sps:$4 sm:$0xff]   ;;  %v19015_v36 = vld [vmem:[%s24909_s7 + $0x8c4] ss:$16 sps:$4 sm:$0xff]  }
 0x517   : > { %10409 = vmatpush1.bf16.msra.mxu0 %v18971_v38  ;;  %10635 = vmatpush1.bf16.msra.mxu1 %v18974_v32  ;;  %v19018_v38 = vld [vmem:[%s24909_s7 + $0x8cc] ss:$16 sps:$4 sm:$0xff]   ;;  %v19013_v32 = vld [vmem:[%s24909_s7 + $0x8c0] ss:$16 sps:$4 sm:$0xff]  }
 0x518   : > { %11357 = vmatprep.subr.bf16.mxu0 %v18979_v24  ;;  %11583 = vmatprep.subr.bf16.mxu1 %v18982_v40  ;;  %v19016_v24 = vld [vmem:[%s24909_s7 + $0x8c8] ss:$16 sps:$4 sm:$0xff]   ;;  %v19021_v40 = vld [vmem:[%s24909_s7 + $0x8e4] ss:$16 sps:$4 sm:$0xff]  }
 0x51a   : > { %10411 = vmatmul.mubr.bf16.vlgmr.msra.gmra.mrb[80].mxu0 %v22227_v41  ;;  %10637 = vmatmul.mubr.bf16.vlgmr.msra.gmra.mrb[80].mxu1 %v22227_v41 }
 0x51b   : > { %11358 = vmatpush1.bf16.msra.mxu0 %v18977_v27  ;;  %11584 = vmatpush1.bf16.msra.mxu1 %v18980_v51  ;;  %v19024_v27 = vld [vmem:[%s24909_s7 + $0x8ec] ss:$16 sps:$4 sm:$0xff]   ;;  %v19019_v51 = vld [vmem:[%s24909_s7 + $0x8e0] ss:$16 sps:$4 sm:$0xff]  }
 0x51c   : > { %10420 = vmatprep.mubr.bf16.mxu0 %v21649_v26  ;;  %10646 = vmatprep.mubr.bf16.mxu1 %v21649_v26 }
 0x51d   : > { %11359 = vmatprep.subr.bf16.mxu0 %v18985_v43  ;;  %11585 = vmatprep.subr.bf16.mxu1 %v18988_v53  ;;  %v19022_v43 = vld [vmem:[%s24909_s7 + $0x8e8] ss:$16 sps:$4 sm:$0xff]   ;;  %v19027_v53 = vld [vmem:[%s24909_s7 + $0x904] ss:$16 sps:$4 sm:$0xff]  }
 0x51f   : > { %11360 = vmatpush1.bf16.msra.mxu0 %v18983_v62  ;;  %11586 = vmatpush1.bf16.msra.mxu1 %v18986_v1  ;;  %v19030_v62 = vld [vmem:[%s24909_s7 + $0x90c] ss:$16 sps:$4 sm:$0xff]   ;;  %v19025_v1 = vld [vmem:[%s24909_s7 + $0x900] ss:$16 sps:$4 sm:$0xff]  }
 0x520   : > { %11361 = vmatprep.subr.bf16.mxu0 %v18991_v39  ;;  %11587 = vmatprep.subr.bf16.mxu1 %v18994_v20  ;;  %v19028_v39 = vld [vmem:[%s24909_s7 + $0x908] ss:$16 sps:$4 sm:$0xff]   ;;  %v19033_v20 = vld [vmem:[%s24909_s7 + $0x924] ss:$16 sps:$4 sm:$0xff]  }
 0x522   : > { %10421 = vmatmul.mubr.bf16.gmra.mrb[84].mxu0 %v21642_v11  ;;  %10647 = vmatmul.mubr.bf16.gmra.mrb[84].mxu1 %v21642_v11 }
 0x523   : > { %11362 = vmatpush1.bf16.msra.mxu0 %v18989_v9  ;;  %11588 = vmatpush1.bf16.msra.mxu1 %v18992_v4  ;;  %v19036_v9 = vld [vmem:[%s24909_s7 + $0x92c] ss:$16 sps:$4 sm:$0xff]   ;;  %v19031_v4 = vld [vmem:[%s24909_s7 + $0x920] ss:$16 sps:$4 sm:$0xff]  }
 0x524   : > { %10430 = vmatprep.mubr.bf16.mxu0 %v22261_v54  ;;  %10656 = vmatprep.mubr.bf16.mxu1 %v22261_v54 }
 0x525   : > { %11363 = vmatprep.subr.bf16.mxu0 %v18997_v59  ;;  %11589 = vmatprep.subr.bf16.mxu1 %v19000_v0  ;;  %v19034_v59 = vld [vmem:[%s24909_s7 + $0x928] ss:$16 sps:$4 sm:$0xff]   ;;  %v19039_v0 = vld [vmem:[%s24909_s7 + $0x944] ss:$16 sps:$4 sm:$0xff]  }
 0x527   : > { %11364 = vmatpush1.bf16.msra.mxu0 %v18995_v48  ;;  %11590 = vmatpush1.bf16.msra.mxu1 %v18998_v49  ;;  %v19042_v48 = vld [vmem:[%s24909_s7 + $0x94c] ss:$16 sps:$4 sm:$0xff]   ;;  %v19037_v49 = vld [vmem:[%s24909_s7 + $0x940] ss:$16 sps:$4 sm:$0xff]  }
 0x528   : > { %11365 = vmatprep.subr.bf16.mxu0 %v19003_v50  ;;  %11591 = vmatprep.subr.bf16.mxu1 %v19006_v52  ;;  %v19040_v50 = vld [vmem:[%s24909_s7 + $0x948] ss:$16 sps:$4 sm:$0xff]   ;;  %v19045_v52 = vld [vmem:[%s24909_s7 + $0x964] ss:$16 sps:$4 sm:$0xff]  }
 0x52a   : > { %10431 = vmatmul.mubr.bf16.gmra.mrb[88].mxu0 %v22257_v57  ;;  %10657 = vmatmul.mubr.bf16.gmra.mrb[88].mxu1 %v22257_v57 }
 0x52b   : > { %11366 = vmatpush1.bf16.msra.mxu0 %v19001_v10  ;;  %11592 = vmatpush1.bf16.msra.mxu1 %v19004_v23  ;;  %v19048_v10 = vld [vmem:[%s24909_s7 + $0x96c] ss:$16 sps:$4 sm:$0xff]   ;;  %v19043_v23 = vld [vmem:[%s24909_s7 + $0x960] ss:$16 sps:$4 sm:$0xff]  }
 0x52c   : > { %10440 = vmatprep.mubr.bf16.mxu0 %v21697_v33  ;;  %10666 = vmatprep.mubr.bf16.mxu1 %v21697_v33 }
 0x52d   : > { %11367 = vmatprep.subr.bf16.mxu0 %v19009_v44  ;;  %11593 = vmatprep.subr.bf16.mxu1 %v19012_v30  ;;  %v19046_v44 = vld [vmem:[%s24909_s7 + $0x968] ss:$16 sps:$4 sm:$0xff]   ;;  %v19051_v30 = vld [vmem:[%s24909_s7 + $0x984] ss:$16 sps:$4 sm:$0xff]  }
 0x52f   : > { %11368 = vmatpush1.bf16.msra.mxu0 %v19007_v31  ;;  %11594 = vmatpush1.bf16.msra.mxu1 %v19010_v34  ;;  %v19054_v31 = vld [vmem:[%s24909_s7 + $0x98c] ss:$16 sps:$4 sm:$0xff]   ;;  %v19049_v34 = vld [vmem:[%s24909_s7 + $0x980] ss:$16 sps:$4 sm:$0xff]  }
 0x530   : > { %11369 = vmatprep.subr.bf16.mxu0 %v19015_v36  ;;  %11595 = vmatprep.subr.bf16.mxu1 %v19018_v38  ;;  %v19052_v36 = vld [vmem:[%s24909_s7 + $0x988] ss:$16 sps:$4 sm:$0xff]   ;;  %v19057_v38 = vld [vmem:[%s24909_s7 + $0x9a4] ss:$16 sps:$4 sm:$0xff]  }
 0x532   : > { %10441 = vmatmul.mubr.bf16.gmra.mrb[92].mxu0 %v21690_v28  ;;  %10667 = vmatmul.mubr.bf16.gmra.mrb[92].mxu1 %v21690_v28 }
 0x533   : > { %11370 = vmatpush1.bf16.msra.mxu0 %v19013_v32  ;;  %11596 = vmatpush1.bf16.msra.mxu1 %v19016_v24  ;;  %v19060_v32 = vld [vmem:[%s24909_s7 + $0x9ac] ss:$16 sps:$4 sm:$0xff]   ;;  %v19055_v24 = vld [vmem:[%s24909_s7 + $0x9a0] ss:$16 sps:$4 sm:$0xff]  }
 0x534   : > { %10450 = vmatprep.mubr.bf16.mxu0 %v22289_v18  ;;  %10676 = vmatprep.mubr.bf16.mxu1 %v22289_v18 }
 0x535   : > { %11371 = vmatprep.subr.bf16.mxu0 %v19021_v40  ;;  %11597 = vmatprep.subr.bf16.mxu1 %v19024_v27  ;;  %v19058_v40 = vld [vmem:[%s24909_s7 + $0x9a8] ss:$16 sps:$4 sm:$0xff]   ;;  %v19063_v27 = vld [vmem:[%s24909_s7 + $0x9c4] ss:$16 sps:$4 sm:$0xff]  }
 0x537   : > { %11372 = vmatpush1.bf16.msra.mxu0 %v19019_v51  ;;  %11598 = vmatpush1.bf16.msra.mxu1 %v19022_v43  ;;  %v19066_v51 = vld [vmem:[%s24909_s7 + $0x9cc] ss:$16 sps:$4 sm:$0xff]   ;;  %v19061_v43 = vld [vmem:[%s24909_s7 + $0x9c0] ss:$16 sps:$4 sm:$0xff]  }
 0x538   : > { %11373 = vmatprep.subr.bf16.mxu0 %v19027_v53  ;;  %11599 = vmatprep.subr.bf16.mxu1 %v19030_v62  ;;  %v19064_v53 = vld [vmem:[%s24909_s7 + $0x9c8] ss:$16 sps:$4 sm:$0xff]   ;;  %v19069_v62 = vld [vmem:[%s24909_s7 + $0x9e4] ss:$16 sps:$4 sm:$0xff]  }
 0x53a   : > { %10451 = vmatmul.mubr.bf16.gmra.mrb[96].mxu0 %v22285_v21  ;;  %10677 = vmatmul.mubr.bf16.gmra.mrb[96].mxu1 %v22285_v21 }
 0x53b   : > { %11374 = vmatpush1.bf16.msra.mxu0 %v19025_v1  ;;  %11600 = vmatpush1.bf16.msra.mxu1 %v19028_v39  ;;  %v19072_v1 = vld [vmem:[%s24909_s7 + $0x9ec] ss:$16 sps:$4 sm:$0xff]   ;;  %v19067_v39 = vld [vmem:[%s24909_s7 + $0x9e0] ss:$16 sps:$4 sm:$0xff]  }
 0x53c   : > { %10460 = vmatprep.mubr.bf16.mxu0 %v21742_v17  ;;  %10686 = vmatprep.mubr.bf16.mxu1 %v21742_v17 }
 0x53d   : > { %11375 = vmatprep.subr.bf16.mxu0 %v19033_v20  ;;  %11601 = vmatprep.subr.bf16.mxu1 %v19036_v9  ;;  %v19070_v20 = vld [vmem:[%s24909_s7 + $0x9e8] ss:$16 sps:$4 sm:$0xff]   ;;  %v19075_v9 = vld [vmem:[%s24909_s7 + $0xa04] ss:$16 sps:$4 sm:$0xff]  }
 0x53f   : > { %11376 = vmatpush1.bf16.msra.mxu0 %v19031_v4  ;;  %11602 = vmatpush1.bf16.msra.mxu1 %v19034_v59  ;;  %v19078_v4 = vld [vmem:[%s24909_s7 + $0xa0c] ss:$16 sps:$4 sm:$0xff]   ;;  %v19073_v59 = vld [vmem:[%s24909_s7 + $0xa00] ss:$16 sps:$4 sm:$0xff]  }
 0x540   : > { %11377 = vmatprep.subr.bf16.mxu0 %v19039_v0  ;;  %11603 = vmatprep.subr.bf16.mxu1 %v19042_v48  ;;  %v19081_v0 = vld [vmem:[%s24909_s7 + $0xa24] ss:$16 sps:$4 sm:$0xff]   ;;  %v19084_v48 = vld [vmem:[%s24909_s7 + $0xa2c] ss:$16 sps:$4 sm:$0xff]  }
 0x542   : > { %10461 = vmatmul.mubr.bf16.gmra.mrb[100].mxu0 %v21735_v25  ;;  %10687 = vmatmul.mubr.bf16.gmra.mrb[100].mxu1 %v21735_v25 }
 0x543   : > { %11378 = vmatpush1.bf16.msra.mxu0 %v19037_v49  ;;  %11604 = vmatpush1.bf16.msra.mxu1 %v19040_v50  ;;  %v19079_v49 = vld [vmem:[%s24909_s7 + $0xa20] ss:$16 sps:$4 sm:$0xff]   ;;  %v19082_v50 = vld [vmem:[%s24909_s7 + $0xa28] ss:$16 sps:$4 sm:$0xff]  }
 0x544   : > { %10470 = vmatprep.mubr.bf16.mxu0 %v22317_v3  ;;  %10696 = vmatprep.mubr.bf16.mxu1 %v22317_v3 }
 0x545   : > { %11379 = vmatprep.subr.bf16.mxu0 %v19045_v52  ;;  %11605 = vmatprep.subr.bf16.mxu1 %v19048_v10  ;;  %v19087_v52 = vld [vmem:[%s24909_s7 + $0xa44] ss:$16 sps:$4 sm:$0xff]   ;;  %v19085_v10 = vld [vmem:[%s24909_s7 + $0xa40] ss:$16 sps:$4 sm:$0xff]  }
 0x547   : > { %11380 = vmatpush1.bf16.msra.mxu0 %v19043_v23  ;;  %11606 = vmatpush1.bf16.msra.mxu1 %v19046_v44  ;;  %v19093_v23 = vld [vmem:[%s24909_s7 + $0xa64] ss:$16 sps:$4 sm:$0xff]   ;;  %v19096_v44 = vld [vmem:[%s24909_s7 + $0xa6c] ss:$16 sps:$4 sm:$0xff]  }
 0x548   : > { %11381 = vmatprep.subr.bf16.mxu0 %v19051_v30  ;;  %11607 = vmatprep.subr.bf16.mxu1 %v19054_v31  ;;  %v19091_v30 = vld [vmem:[%s24909_s7 + $0xa60] ss:$16 sps:$4 sm:$0xff]   ;;  %v19094_v31 = vld [vmem:[%s24909_s7 + $0xa68] ss:$16 sps:$4 sm:$0xff]  }
 0x54a   : > { %10471 = vmatmul.mubr.bf16.gmra.mrb[104].mxu0 %v22313_v42  ;;  %10697 = vmatmul.mubr.bf16.gmra.mrb[104].mxu1 %v22313_v42 }
 0x54b   : > { %11382 = vmatpush1.bf16.msra.mxu0 %v19049_v34  ;;  %11608 = vmatpush1.bf16.msra.mxu1 %v19052_v36  ;;  %v19099_v34 = vld [vmem:[%s24909_s7 + $0xa84] ss:$16 sps:$4 sm:$0xff]   ;;  %v19097_v36 = vld [vmem:[%s24909_s7 + $0xa80] ss:$16 sps:$4 sm:$0xff]  }
 0x54c   : > { %11383 = vmatprep.subr.bf16.mxu0 %v19057_v38  ;;  %11609 = vmatprep.subr.bf16.mxu1 %v19060_v32  ;;  %v9060_v38 = vld [vmem:[%s24910_s8] sm:$0xf]  ;;  %v19105_v32 = vld [vmem:[%s24909_s7 + $0xaa4] ss:$16 sps:$4 sm:$0xff]  }
 0x54d   : > { %10480 = vmatprep.mubr.bf16.mxu0 %v24914_v6  ;;  %10706 = vmatprep.mubr.bf16.mxu1 %v24914_v6 }
 0x54f   : > { %11384 = vmatpush1.bf16.msra.mxu0 %v19055_v24  ;;  %11610 = vmatpush1.bf16.msra.mxu1 %v19058_v40  ;;  %v19108_v24 = vld [vmem:[%s24909_s7 + $0xaac] ss:$16 sps:$4 sm:$0xff]   ;;  %v9146_v40 = vld [vmem:[%s24911_s9] sm:$0xf] }
 0x550   : > { %11385 = vmatprep.subr.bf16.mxu0 %v19063_v27  ;;  %11611 = vmatprep.subr.bf16.mxu1 %v19066_v51  ;;  %v19103_v27 = vld [vmem:[%s24909_s7 + $0xaa0] ss:$16 sps:$4 sm:$0xff]   ;;  %v19106_v51 = vld [vmem:[%s24909_s7 + $0xaa8] ss:$16 sps:$4 sm:$0xff]  }
 0x552   : > { %10481 = vmatmul.mubr.bf16.gmra.mrb[108].mxu0 %v24914_v6  ;;  %10707 = vmatmul.mubr.bf16.gmra.mrb[108].mxu1 %v24914_v6 }
 0x553   : > { %11386 = vmatpush1.bf16.msra.mxu0 %v19061_v43  ;;  %11612 = vmatpush1.bf16.msra.mxu1 %v19064_v53  ;;  %v23543_v43 = vrot.slane %v9060_v38, %v20078_v35  ;;  %v19111_v53 = vld [vmem:[%s24909_s7 + $0xac4] ss:$16 sps:$4 sm:$0xff]  }
 0x554   : > { %11389 = vmatprep.mubr.bf16.mxu0 %v21595_v7  ;;  %11615 = vmatprep.mubr.bf16.mxu1 %v21595_v7  ;;  %v19076_v7 = vld [vmem:[%s24909_s7 + $0xa08] ss:$16 sps:$4 sm:$0xff]  }
 0x555   : > { %11387 = vmatprep.subr.bf16.mxu0 %v19069_v62  ;;  %11613 = vmatprep.subr.bf16.mxu1 %v19072_v1  ;;  %v19114_v62 = vld [vmem:[%s24909_s7 + $0xacc] ss:$16 sps:$4 sm:$0xff]  }
 0x557   : > { %11388 = vmatpush1.bf16.msra.mxu0 %v19067_v39  ;;  %11614 = vmatpush1.bf16.msra.mxu1 %v19070_v20  ;;  %v23555_v20 = vrot.slane %v9060_v38, %v20081_v37 }
 0x558   : > { %11470 = vmatprep.subr.bf16.mxu0 %v19075_v9  ;;  %11696 = vmatprep.subr.bf16.mxu1 %v19078_v4  ;;  %v23558_v4 = vrot.slane %v9146_v40, %v20059_v15 }
 0x55a   : > { %11390 = vmatmul.mubr.bf16.vlgmr.msra.gmra.mrb[80].mxu0 %v21585_v55  ;;  %11616 = vmatmul.mubr.bf16.vlgmr.msra.gmra.mrb[80].mxu1 %v21585_v55  ;;  %v19090_v55 = vld [vmem:[%s24909_s7 + $0xa4c] ss:$16 sps:$4 sm:$0xff]  }
 0x55b   : > { %11471 = vmatpush1.bf16.msra.mxu0 %v19073_v59  ;;  %11697 = vmatpush1.bf16.msra.mxu1 %v19076_v7  ;;  %v23561_v7 = vrot.slane %v9146_v40, %v20078_v35 }
 0x55c   : > { %11399 = vmatprep.mubr.bf16.mxu0 %v22229_v12  ;;  %11625 = vmatprep.mubr.bf16.mxu1 %v22229_v12  ;;  %v19088_v12 = vld [vmem:[%s24909_s7 + $0xa48] ss:$16 sps:$4 sm:$0xff]  }
 0x55d   : > { %11472 = vmatprep.subr.bf16.mxu0 %v19081_v0  ;;  %11698 = vmatprep.subr.bf16.mxu1 %v19084_v48 }
 0x55f   : > { %11473 = vmatpush1.bf16.msra.mxu0 %v19079_v49  ;;  %11699 = vmatpush1.bf16.msra.mxu1 %v19082_v50  ;;  %v23564_v50 = vrot.slane %v9146_v40, %v20062_v16 }
 0x560   : > { %11474 = vmatprep.subr.bf16.mxu0 %v19087_v52  ;;  %11700 = vmatprep.subr.bf16.mxu1 %v19090_v55  ;;  %v23567_v55 = vrot.slane %v9146_v40, %v20081_v37  ;;  %v19112_v40 = vld [vmem:[%s24909_s7 + $0xac8] ss:$16 sps:$4 sm:$0xff]  }
 0x562   : > { %11400 = vmatmul.mubr.bf16.gmra.mrb[84].mxu0 %v22224_v45  ;;  %11626 = vmatmul.mubr.bf16.gmra.mrb[84].mxu1 %v22224_v45  ;;  %v19102_v45 = vld [vmem:[%s24909_s7 + $0xa8c] ss:$16 sps:$4 sm:$0xff]  }
 0x563   : > { %11475 = vmatpush1.bf16.msra.mxu0 %v19085_v10  ;;  %11701 = vmatpush1.bf16.msra.mxu1 %v19088_v12 }
 0x564   : > { %11409 = vmatprep.mubr.bf16.mxu0 %v21644_v19  ;;  %11635 = vmatprep.mubr.bf16.mxu1 %v21644_v19  ;;  %v19100_v19 = vld [vmem:[%s24909_s7 + $0xa88] ss:$16 sps:$4 sm:$0xff]  }
 0x565   : > { %11476 = vmatprep.subr.bf16.mxu0 %v19093_v23  ;;  %11702 = vmatprep.subr.bf16.mxu1 %v19096_v44  ;;  %v19109_v23 = vld [vmem:[%s24909_s7 + $0xac0] ss:$16 sps:$4 sm:$0xff]  }
 0x567   : > { %11477 = vmatpush1.bf16.msra.mxu0 %v19091_v30  ;;  %11703 = vmatpush1.bf16.msra.mxu1 %v19094_v31 }
 0x568   : > { %11478 = vmatprep.subr.bf16.mxu0 %v19099_v34  ;;  %11704 = vmatprep.subr.bf16.mxu1 %v19102_v45 }
 0x56a   : > { %11410 = vmatmul.mubr.bf16.gmra.mrb[88].mxu0 %v21636_v56  ;;  %11636 = vmatmul.mubr.bf16.gmra.mrb[88].mxu1 %v21636_v56  ;;  %v23540_v56 = vrot.slane %v9060_v38, %v20059_v15 }
 0x56b   : > { %11479 = vmatpush1.bf16.msra.mxu0 %v19097_v36  ;;  %11705 = vmatpush1.bf16.msra.mxu1 %v19100_v19 }
 0x56c   : > { %11419 = vmatprep.mubr.bf16.mxu0 %v22259_v61  ;;  %11645 = vmatprep.mubr.bf16.mxu1 %v22259_v61  ;;  %v23552_v61 = vrot.slane %v9060_v38, %v20062_v16 }
 0x56d   : > { %v8691_v1 = vpop.f32.mrb[48].mxu0  ;;  %v8917_v39 = vpop.f32.mrb[48].mxu1  ;;  %11480 = vmatprep.subr.bf16.mxu0 %v19105_v32  ;;  %11706 = vmatprep.subr.bf16.mxu1 %v19108_v24 }
 0x56e   : > { %v8996_v9 = vmax.f32 %v8691_v1, 0.0  ;;  %v8998_v59 = vmax.f32 %v8917_v39, 0.0  ;;  %v8693_v0 = vpop.f32.mrb[49].mxu0  ;;  %v8919_v48 = vpop.f32.mrb[49].mxu1 }
 0x56f   : > { %v8997_v49 = vmax.f32 %v8693_v0, 0.0  ;;  %v8999_v52 = vmax.f32 %v8919_v48, 0.0  ;;  %11481 = vmatpush1.bf16.msra.mxu0 %v19103_v27  ;;  %11707 = vmatpush1.bf16.msra.mxu1 %v19106_v51  ;;  %v8695_v10 = vpop.f32.mrb[50].mxu0  ;;  %v8921_v12 = vpop.f32.mrb[50].mxu1  ;;  %v19115_v0 = vld [vmem:[%s24909_s7 + $0xae0] ss:$16 sps:$4 sm:$0xff]  }
 0x570   : > { %v9082_v44 = vmul.f32 %v23540_v56, %v8996_v9  ;;  %v9084_v30 = vmul.f32 %v23543_v43, %v8998_v59  ;;  %v9000_v31 = vmax.f32 %v8695_v10, 0.0  ;;  %v9002_v34 = vmax.f32 %v8921_v12, 0.0  ;;  %v8697_v45 = vpop.f32.mrb[51].mxu0  ;;  %v8923_v36 = vpop.f32.mrb[51].mxu1  ;;  %11482 = vmatprep.subr.bf16.mxu0 %v19111_v53  ;;  %11708 = vmatprep.subr.bf16.mxu1 %v19114_v62  ;;  %v19117_v53 = vld [vmem:[%s24909_s7 + $0xae4] ss:$16 sps:$4 sm:$0xff]  }
 0x571   : > { %v9083_v19 = vmul.f32 %v23552_v61, %v8997_v49  ;;  %v9085_v38 = vmul.f32 %v23555_v20, %v8999_v52  ;;  %v9001_v32 = vmax.f32 %v8697_v45, 0.0  ;;  %v9003_v24 = vmax.f32 %v8923_v36, 0.0  ;;  %v19120_v62 = vld [vmem:[%s24909_s7 + $0xaec] ss:$16 sps:$4 sm:$0xff]   ;;  %v19123_v10 = vld [vmem:[%s24909_s7 + $0xb04] ss:$16 sps:$4 sm:$0xff]  }
 0x572   : > { %v9086_v27 = vmul.f32 %v23540_v56, %v9000_v31  ;;  %v9088_v51 = vmul.f32 %v23543_v43, %v9002_v34  ;;  %11420 = vmatmul.mubr.bf16.gmra.mrb[92].mxu0 %v22254_v46  ;;  %v23589_v1 = vadd.f32 %v23558_v4, %v9082_v44  ;;  %v23592_v39 = vadd.f32 %v23561_v7, %v9084_v30  ;;  %v19118_v31 = vld [vmem:[%s24909_s7 + $0xae8] ss:$16 sps:$4 sm:$0xff]  }
 0x573   : > { %v9087_v9 = vmul.f32 %v23552_v61, %v9001_v32  ;;  %v9089_v59 = vmul.f32 %v23555_v20, %v9003_v24  ;;  %11483 = vmatpush1.bf16.msra.mxu0 %v19109_v23  ;;  %v23600_v48 = vadd.f32 %v23564_v50, %v9083_v19  ;;  %11646 = vmatmul.mubr.bf16.gmra.mrb[92].mxu1 %v22254_v46 }
 0x574   : > { %24956 = vst [vmem:[#allocation11_spill] sm:$0xff] %v23592_v39  ;;  %v23603_v49 = vadd.f32 %v23558_v4, %v9086_v27  ;;  %v23606_v52 = vadd.f32 %v23561_v7, %v9088_v51  ;;  %11429 = vmatprep.mubr.bf16.mxu0 %v21692_v13  ;;  %v23614_v12 = vadd.f32 %v23567_v55, %v9085_v38 }
 0x575   : > { %v23617_v23 = vadd.f32 %v23564_v50, %v9087_v9  ;;  %v23620_v44 = vadd.f32 %v23567_v55, %v9089_v59  ;;  %11709 = vmatpush1.bf16.msra.mxu1 %v19112_v40  ;;  %11655 = vmatprep.mubr.bf16.mxu1 %v21692_v13  ;;  %v8701_v30 = vpop.f32.mrb[52].mxu0  ;;  %v8927_v46 = vpop.f32.mrb[52].mxu1  ;;  %v19126_v13 = vld [vmem:[%s24909_s7 + $0xb0c] ss:$16 sps:$4 sm:$0xff]  }
 0x576   : > { %24957 = vst [vmem:[#allocation12_spill] sm:$0xff] %v23606_v52  ;;  %v9004_v36 = vmax.f32 %v8701_v30, 0.0  ;;  %v9006_v19 = vmax.f32 %v8927_v46, 0.0  ;;  %11484 = vmatprep.subr.bf16.mxu0 %v19117_v53  ;;  %11710 = vmatprep.subr.bf16.mxu1 %v19120_v62  ;;  %v8703_v38 = vpop.f32.mrb[53].mxu0  ;;  %v8929_v32 = vpop.f32.mrb[53].mxu1 }
 0x577   : > { %v9005_v24 = vmax.f32 %v8703_v38, 0.0  ;;  %v9007_v40 = vmax.f32 %v8929_v32, 0.0  ;;  %11485 = vmatpush1.bf16.msra.mxu0 %v19115_v0  ;;  %v8705_v27 = vpop.f32.mrb[54].mxu0  ;;  %v8931_v51 = vpop.f32.mrb[54].mxu1  ;;  %v19121_v0 = vld [vmem:[%s24909_s7 + $0xb00] ss:$16 sps:$4 sm:$0xff]  }
 0x578   : > { %v9090_v53 = vmul.f32 %v23540_v56, %v9004_v36  ;;  %v9092_v62 = vmul.f32 %v23543_v43, %v9006_v19  ;;  %v9008_v30 = vmax.f32 %v8705_v27, 0.0  ;;  %v9010_v46 = vmax.f32 %v8931_v51, 0.0  ;;  %v8707_v6 = vpop.f32.mrb[55].mxu0  ;;  %v8933_v45 = vpop.f32.mrb[55].mxu1  ;;  %11486 = vmatprep.subr.bf16.mxu0 %v19123_v10  ;;  %v19124_v36 = vld [vmem:[%s24909_s7 + $0xb08] ss:$16 sps:$4 sm:$0xff]  }
 0x579   : > { %v9091_v38 = vmul.f32 %v23552_v61, %v9005_v24  ;;  %v9093_v32 = vmul.f32 %v23555_v20, %v9007_v40  ;;  %11711 = vmatpush1.bf16.msra.mxu1 %v19118_v31  ;;  %v9009_v34 = vmax.f32 %v8707_v6, 0.0  ;;  %v9011_v59 = vmax.f32 %v8933_v45, 0.0  ;;  %v19129_v10 = vld [vmem:[%s24909_s7 + $0xb24] ss:$16 sps:$4 sm:$0xff]   ;;  %v19132_v45 = vld [vmem:[%s24909_s7 + $0xb2c] ss:$16 sps:$4 sm:$0xff]  }
 0x57a   : > { %v9094_v19 = vmul.f32 %v23540_v56, %v9008_v30  ;;  %v9096_v27 = vmul.f32 %v23543_v43, %v9010_v46  ;;  %11712 = vmatprep.subr.bf16.mxu1 %v19126_v13  ;;  %v9176_v24 = vadd.f32 %v23558_v4, %v9090_v53  ;;  %v9178_v40 = vadd.f32 %v23561_v7, %v9092_v62 }
 0x57b   : > { %v9095_v6 = vmul.f32 %v23552_v61, %v9009_v34  ;;  %v9097_v31 = vmul.f32 %v23555_v20, %v9011_v59  ;;  %11430 = vmatmul.mubr.bf16.gmra.mrb[96].mxu0 %v21684_v14  ;;  %v9177_v13 = vadd.f32 %v23564_v50, %v9091_v38  ;;  %11656 = vmatmul.mubr.bf16.gmra.mrb[96].mxu1 %v21684_v14  ;;  %v19127_v34 = vld [vmem:[%s24909_s7 + $0xb20] ss:$16 sps:$4 sm:$0xff]   ;;  %v19135_v14 = vld [vmem:[%s24909_s7 + $0xb44] ss:$16 sps:$4 sm:$0xff]  }
 0x57c   : > { %v9180_v51 = vadd.f32 %v23558_v4, %v9094_v19  ;;  %v9182_v30 = vadd.f32 %v23561_v7, %v9096_v27  ;;  %11487 = vmatpush1.bf16.msra.mxu0 %v19121_v0  ;;  %v9179_v59 = vadd.f32 %v23567_v55, %v9093_v32  ;;  %11439 = vmatprep.mubr.bf16.mxu0 %v22287_v60  ;;  %v19130_v0 = vld [vmem:[%s24909_s7 + $0xb28] ss:$16 sps:$4 sm:$0xff]  }
 0x57d   : > { %v9181_v53 = vadd.f32 %v23564_v50, %v9095_v6  ;;  %v9183_v62 = vadd.f32 %v23567_v55, %v9097_v31  ;;  %11713 = vmatpush1.bf16.msra.mxu1 %v19124_v36  ;;  %v8711_v46 = vpop.f32.mrb[56].mxu0  ;;  %v8937_v38 = vpop.f32.mrb[56].mxu1  ;;  %11665 = vmatprep.mubr.bf16.mxu1 %v22287_v60  ;;  %v19138_v36 = vld [vmem:[%s24909_s7 + $0xb4c] ss:$16 sps:$4 sm:$0xff]  }
 0x57e   : > { %v9012_v32 = vmax.f32 %v8711_v46, 0.0  ;;  %v9014_v19 = vmax.f32 %v8937_v38, 0.0  ;;  %11488 = vmatprep.subr.bf16.mxu0 %v19129_v10  ;;  %v8713_v27 = vpop.f32.mrb[57].mxu0  ;;  %v8939_v6 = vpop.f32.mrb[57].mxu1  ;;  %v23681_v31 = vpack.c.bf16 %v9180_v51, %v9176_v24  ;;  %v23683_v9 = vpack.c.bf16 %v9182_v30, %v9178_v40  ;;  %11714 = vmatprep.subr.bf16.mxu1 %v19132_v45  ;;  %v19133_v40 = vld [vmem:[%s24909_s7 + $0xb40] ss:$16 sps:$4 sm:$0xff]  }
 0x57f   : > { %v9013_v37 = vmax.f32 %v8713_v27, 0.0  ;;  %v9015_v16 = vmax.f32 %v8939_v6, 0.0  ;;  %v8715_v35 = vpop.f32.mrb[58].mxu0  ;;  %v8941_v15 = vpop.f32.mrb[58].mxu1  ;;  %v23685_v39 = vpack.c.bf16 %v9181_v53, %v9177_v13  ;;  %v23687_v60 = vpack.c.bf16 %v9183_v62, %v9179_v59  ;;  %v19141_v53 = vld [vmem:[%s24909_s7 + $0xb64] ss:$16 sps:$4 sm:$0xff]  }
 0x580   : > { %24958 = vst [vmem:[#allocation13_spill] sm:$0xff] %v23681_v31  ;;  %24959 = vst [vmem:[#allocation14_spill] sm:$0xff] %v23683_v9  ;;  %v9098_v10 = vmul.f32 %v23540_v56, %v9012_v32  ;;  %v9100_v46 = vmul.f32 %v23543_v43, %v9014_v19  ;;  %11489 = vmatpush1.bf16.msra.mxu0 %v19127_v34  ;;  %v9016_v38 = vmax.f32 %v8715_v35, 0.0  ;;  %v9018_v52 = vmax.f32 %v8941_v15, 0.0  ;;  %v8717_v24 = vpop.f32.mrb[59].mxu0  ;;  %v8943_v51 = vpop.f32.mrb[59].mxu1 }
 0x581   : > { %v9099_v45 = vmul.f32 %v23552_v61, %v9013_v37  ;;  %v9101_v13 = vmul.f32 %v23555_v20, %v9015_v16  ;;  %11715 = vmatpush1.bf16.msra.mxu1 %v19130_v0  ;;  %v9017_v30 = vmax.f32 %v8717_v24, 0.0  ;;  %v9019_v59 = vmax.f32 %v8943_v51, 0.0  ;;  %11490 = vmatprep.subr.bf16.mxu0 %v19135_v14  ;;  %v19136_v34 = vld [vmem:[%s24909_s7 + $0xb48] ss:$16 sps:$4 sm:$0xff]   ;;  %v19144_v14 = vld [vmem:[%s24909_s7 + $0xb6c] ss:$16 sps:$4 sm:$0xff]  }
 0x582   : > { %v9102_v15 = vmul.f32 %v23540_v56, %v9016_v38  ;;  %v9104_v35 = vmul.f32 %v23543_v43, %v9018_v52  ;;  %11716 = vmatprep.subr.bf16.mxu1 %v19138_v36  ;;  %v9184_v37 = vadd.f32 %v23558_v4, %v9098_v10  ;;  %v9186_v16 = vadd.f32 %v23561_v7, %v9100_v46  ;;  %v19139_v27 = vld [vmem:[%s24909_s7 + $0xb60] ss:$16 sps:$4 sm:$0xff]   ;;  %v19142_v24 = vld [vmem:[%s24909_s7 + $0xb68] ss:$16 sps:$4 sm:$0xff]  }
 0x583   : > { %v9103_v62 = vmul.f32 %v23552_v61, %v9017_v30  ;;  %v9105_v0 = vmul.f32 %v23555_v20, %v9019_v59  ;;  %11440 = vmatmul.mubr.bf16.gmra.mrb[100].mxu0 %v22282_v58  ;;  %v9185_v52 = vadd.f32 %v23564_v50, %v9099_v45  ;;  %11666 = vmatmul.mubr.bf16.gmra.mrb[100].mxu1 %v22282_v58  ;;  %v19147_v58 = vld [vmem:[%s24909_s7 + $0xb84] ss:$16 sps:$4 sm:$0xff]   ;;  %v19150_v30 = vld [vmem:[%s24909_s7 + $0xb8c] ss:$16 sps:$4 sm:$0xff]  }
 0x584   : > { %v9188_v32 = vadd.f32 %v23558_v4, %v9102_v15  ;;  %v9190_v19 = vadd.f32 %v23561_v7, %v9104_v35  ;;  %11491 = vmatpush1.bf16.msra.mxu0 %v19133_v40  ;;  %v9187_v6 = vadd.f32 %v23567_v55, %v9101_v13  ;;  %11449 = vmatprep.mubr.bf16.mxu0 %v21737_v29 }
 0x585   : > { %v9189_v36 = vadd.f32 %v23564_v50, %v9103_v62  ;;  %v9191_v10 = vadd.f32 %v23567_v55, %v9105_v0  ;;  %11717 = vmatpush1.bf16.msra.mxu1 %v19136_v34  ;;  %v8721_v46 = vpop.f32.mrb[60].mxu0  ;;  %v8947_v38 = vpop.f32.mrb[60].mxu1  ;;  %11675 = vmatprep.mubr.bf16.mxu1 %v21737_v29 }
 0x586   : > { %v9020_v51 = vmax.f32 %v8721_v46, 0.0  ;;  %v9022_v40 = vmax.f32 %v8947_v38, 0.0  ;;  %11492 = vmatprep.subr.bf16.mxu0 %v19141_v53  ;;  %v8723_v45 = vpop.f32.mrb[61].mxu0  ;;  %v8949_v13 = vpop.f32.mrb[61].mxu1  ;;  %v23733_v59 = vpack.c.bf16 %v9188_v32, %v9184_v37  ;;  %v23735_v34 = vpack.c.bf16 %v9190_v19, %v9186_v16  ;;  %11718 = vmatprep.subr.bf16.mxu1 %v19144_v14  ;;  %v19145_v16 = vld [vmem:[%s24909_s7 + $0xb80] ss:$16 sps:$4 sm:$0xff]  }
 0x587   : > { %v9021_v15 = vmax.f32 %v8723_v45, 0.0  ;;  %v9023_v35 = vmax.f32 %v8949_v13, 0.0  ;;  %v8725_v62 = vpop.f32.mrb[62].mxu0  ;;  %v8951_v0 = vpop.f32.mrb[62].mxu1  ;;  %v23737_v9 = vpack.c.bf16 %v9189_v36, %v9185_v52  ;;  %v23739_v29 = vpack.c.bf16 %v9191_v10, %v9187_v6  ;;  %v19156_v13 = vld [vmem:[%s24909_s7 + $0xbac] ss:$16 sps:$4 sm:$0xff]  }
 0x588   : > { %24960 = vst [vmem:[#allocation15_spill] sm:$0xff] %v23733_v59  ;;  %24961 = vst [vmem:[#allocation16_spill] sm:$0xff] %v23735_v34  ;;  %v9106_v53 = vmul.f32 %v23540_v56, %v9020_v51  ;;  %v9108_v46 = vmul.f32 %v23543_v43, %v9022_v40  ;;  %11493 = vmatpush1.bf16.msra.mxu0 %v19139_v27  ;;  %v9024_v38 = vmax.f32 %v8725_v62, 0.0  ;;  %v9026_v31 = vmax.f32 %v8951_v0, 0.0  ;;  %v8727_v37 = vpop.f32.mrb[63].mxu0  ;;  %v8953_v32 = vpop.f32.mrb[63].mxu1 }
 0x589   : > { %v9107_v14 = vmul.f32 %v23552_v61, %v9021_v15  ;;  %v9109_v52 = vmul.f32 %v23555_v20, %v9023_v35  ;;  %11719 = vmatpush1.bf16.msra.mxu1 %v19142_v24  ;;  %v9025_v19 = vmax.f32 %v8727_v37, 0.0  ;;  %v9027_v6 = vmax.f32 %v8953_v32, 0.0  ;;  %11494 = vmatprep.subr.bf16.mxu0 %v19147_v58  ;;  %v19148_v27 = vld [vmem:[%s24909_s7 + $0xb88] ss:$16 sps:$4 sm:$0xff]   ;;  %v19153_v51 = vld [vmem:[%s24909_s7 + $0xba4] ss:$16 sps:$4 sm:$0xff]  }
 0x58a   : > { %v9110_v36 = vmul.f32 %v23540_v56, %v9024_v38  ;;  %v9112_v10 = vmul.f32 %v23543_v43, %v9026_v31  ;;  %11720 = vmatprep.subr.bf16.mxu1 %v19150_v30  ;;  %v9192_v40 = vadd.f32 %v23558_v4, %v9106_v53  ;;  %v9194_v24 = vadd.f32 %v23561_v7, %v9108_v46  ;;  %v19151_v35 = vld [vmem:[%s24909_s7 + $0xba0] ss:$16 sps:$4 sm:$0xff]   ;;  %v19154_v37 = vld [vmem:[%s24909_s7 + $0xba8] ss:$16 sps:$4 sm:$0xff]  }
 0x58b   : > { %v9111_v45 = vmul.f32 %v23552_v61, %v9025_v19  ;;  %v9113_v58 = vmul.f32 %v23555_v20, %v9027_v6  ;;  %11450 = vmatmul.mubr.bf16.gmra.mrb[104].mxu0 %v21732_v63  ;;  %v9193_v31 = vadd.f32 %v23564_v50, %v9107_v14  ;;  %11676 = vmatmul.mubr.bf16.gmra.mrb[104].mxu1 %v21732_v63  ;;  %v19159_v63 = vld [vmem:[%s24909_s7 + $0xbc4] ss:$16 sps:$4 sm:$0xff]   ;;  %v19162_v19 = vld [vmem:[%s24909_s7 + $0xbcc] ss:$16 sps:$4 sm:$0xff]  }
 0x58c   : > { %v9196_v30 = vadd.f32 %v23558_v4, %v9110_v36  ;;  %v9198_v15 = vadd.f32 %v23561_v7, %v9112_v10  ;;  %11495 = vmatpush1.bf16.msra.mxu0 %v19145_v16  ;;  %v9195_v62 = vadd.f32 %v23567_v55, %v9109_v52  ;;  %11459 = vmatprep.mubr.bf16.mxu0 %v22315_v8 }
 0x58d   : > { %v9197_v0 = vadd.f32 %v23564_v50, %v9111_v45  ;;  %v9199_v53 = vadd.f32 %v23567_v55, %v9113_v58  ;;  %11721 = vmatpush1.bf16.msra.mxu1 %v19148_v27  ;;  %v8731_v46 = vpop.f32.mrb[64].mxu0  ;;  %v8957_v38 = vpop.f32.mrb[64].mxu1  ;;  %11685 = vmatprep.mubr.bf16.mxu1 %v22315_v8 }
 0x58e   : > { %v9028_v32 = vmax.f32 %v8731_v46, 0.0  ;;  %v9030_v16 = vmax.f32 %v8957_v38, 0.0  ;;  %11496 = vmatprep.subr.bf16.mxu0 %v19153_v51  ;;  %v8733_v14 = vpop.f32.mrb[65].mxu0  ;;  %v8959_v52 = vpop.f32.mrb[65].mxu1  ;;  %v23785_v6 = vpack.c.bf16 %v9196_v30, %v9192_v40  ;;  %v23787_v27 = vpack.c.bf16 %v9198_v15, %v9194_v24  ;;  %11722 = vmatprep.subr.bf16.mxu1 %v19156_v13  ;;  %v19157_v24 = vld [vmem:[%s24909_s7 + $0xbc0] ss:$16 sps:$4 sm:$0xff]  }
 0x58f   : > { %v9029_v36 = vmax.f32 %v8733_v14, 0.0  ;;  %v9031_v10 = vmax.f32 %v8959_v52, 0.0  ;;  %v8735_v45 = vpop.f32.mrb[66].mxu0  ;;  %v8961_v58 = vpop.f32.mrb[66].mxu1  ;;  %v23789_v34 = vpack.c.bf16 %v9197_v0, %v9193_v31  ;;  %v23791_v8 = vpack.c.bf16 %v9199_v53, %v9195_v62  ;;  %v19168_v52 = vld [vmem:[%s24909_s7 + $0xbec] ss:$16 sps:$4 sm:$0xff]  }
 0x590   : > { %24962 = vst [vmem:[#allocation17_spill] sm:$0xff] %v23785_v6  ;;  %24963 = vst [vmem:[#allocation18_spill] sm:$0xff] %v23787_v27  ;;  %v9114_v51 = vmul.f32 %v23540_v56, %v9028_v32  ;;  %v9116_v46 = vmul.f32 %v23543_v43, %v9030_v16  ;;  %11497 = vmatpush1.bf16.msra.mxu0 %v19151_v35  ;;  %v9032_v38 = vmax.f32 %v8735_v45, 0.0  ;;  %v9034_v59 = vmax.f32 %v8961_v58, 0.0  ;;  %v8737_v40 = vpop.f32.mrb[67].mxu0  ;;  %v8963_v30 = vpop.f32.mrb[67].mxu1 }
 0x591   : > { %24964 = vst [vmem:[#allocation19_spill] sm:$0xff] %v23789_v34  ;;  %24965 = vst [vmem:[#allocation20_spill] sm:$0xff] %v23791_v8  ;;  %v9115_v13 = vmul.f32 %v23552_v61, %v9029_v36  ;;  %v9117_v31 = vmul.f32 %v23555_v20, %v9031_v10  ;;  %11723 = vmatpush1.bf16.msra.mxu1 %v19154_v37  ;;  %v9033_v15 = vmax.f32 %v8737_v40, 0.0  ;;  %v9035_v62 = vmax.f32 %v8963_v30, 0.0  ;;  %v19160_v35 = vld [vmem:[%s24909_s7 + $0xbc8] ss:$16 sps:$4 sm:$0xff]  }
 0x592   : > { %11498 = vmatprep.subr.bf16.mxu0 %v19159_v63  ;;  %v9118_v0 = vmul.f32 %v23540_v56, %v9032_v38  ;;  %v9120_v53 = vmul.f32 %v23543_v43, %v9034_v59  ;;  %11724 = vmatprep.subr.bf16.mxu1 %v19162_v19  ;;  %v19165_v32 = vld [vmem:[%s24909_s7 + $0xbe4] ss:$16 sps:$4 sm:$0xff]   ;;  %v9200_v16 = vadd.f32 %v23558_v4, %v9114_v51  ;;  %v19163_v10 = vld [vmem:[%s24909_s7 + $0xbe0] ss:$16 sps:$4 sm:$0xff]   ;;  %v19166_v40 = vld [vmem:[%s24909_s7 + $0xbe8] ss:$16 sps:$4 sm:$0xff]  }
 0x593   : > { %v9202_v37 = vadd.f32 %v23561_v7, %v9116_v46  ;;  %v9119_v14 = vmul.f32 %v23552_v61, %v9033_v15  ;;  %v9121_v63 = vmul.f32 %v23555_v20, %v9035_v62  ;;  %11460 = vmatmul.mubr.bf16.gmra.mrb[108].mxu0 %v22310_v2  ;;  %v9201_v59 = vadd.f32 %v23564_v50, %v9115_v13  ;;  %v19170_v15 = vld [vmem:[%s24912_s10 + $0x1c0] sm:$0xff]  }
 0x594   : > { %v9204_v19 = vadd.f32 %v23558_v4, %v9118_v0  ;;  %v9206_v36 = vadd.f32 %v23561_v7, %v9120_v53  ;;  %11499 = vmatpush1.bf16.msra.mxu0 %v19157_v24  ;;  %11686 = vmatmul.mubr.bf16.gmra.mrb[108].mxu1 %v22310_v2  ;;  %v9203_v45 = vadd.f32 %v23567_v55, %v9117_v31  ;;  %v19169_v2 = vld [vmem:[%s24912_s10 + $0x140] sm:$0xff]  }
 0x595   : > { %v9205_v58 = vadd.f32 %v23564_v50, %v9119_v14  ;;  %v9207_v51 = vadd.f32 %v23567_v55, %v9121_v63  ;;  %11725 = vmatpush1.bf16.msra.mxu1 %v19160_v35  ;;  %11502 = vmatprep.mubr.bf16.mxu0 %v21601_v22  ;;  %v8741_v46 = vpop.f32.mrb[68].mxu0  ;;  %v8967_v38 = vpop.f32.mrb[68].mxu1 }
 0x596   : > { %11728 = vmatprep.mubr.bf16.mxu1 %v21601_v22  ;;  %v9036_v30 = vmax.f32 %v8741_v46, 0.0  ;;  %v9038_v24 = vmax.f32 %v8967_v38, 0.0  ;;  %11500 = vmatprep.subr.bf16.mxu0 %v19165_v32  ;;  %v8743_v13 = vpop.f32.mrb[69].mxu0  ;;  %v8969_v31 = vpop.f32.mrb[69].mxu1  ;;  %v23837_v62 = vpack.c.bf16 %v9204_v19, %v9200_v16  ;;  %v23839_v35 = vpack.c.bf16 %v9206_v36, %v9202_v37 }
 0x597   : > { %11726 = vmatprep.subr.bf16.mxu1 %v19168_v52  ;;  %v9037_v0 = vmax.f32 %v8743_v13, 0.0  ;;  %v9039_v53 = vmax.f32 %v8969_v31, 0.0  ;;  %v8745_v14 = vpop.f32.mrb[70].mxu0  ;;  %v8971_v63 = vpop.f32.mrb[70].mxu1  ;;  %v23841_v27 = vpack.c.bf16 %v9205_v58, %v9201_v59  ;;  %v23843_v22 = vpack.c.bf16 %v9207_v51, %v9203_v45  ;;  %v19171_v59 = vld [vmem:[%s24912_s10 + $0x100] sm:$0xff]   ;;  %v19173_v51 = vld [vmem:[%s24912_s10 + $0x148] sm:$0xff]  }
 0x598   : > { %24966 = vst [vmem:[#allocation21_spill] sm:$0xff] %v23837_v62  ;;  %24967 = vst [vmem:[#allocation22_spill] sm:$0xff] %v23839_v35  ;;  %v9122_v32 = vmul.f32 %v23540_v56, %v9036_v30  ;;  %v9124_v46 = vmul.f32 %v23543_v43, %v9038_v24  ;;  %11501 = vmatpush1.bf16.msra.mxu0 %v19163_v10  ;;  %v9040_v38 = vmax.f32 %v8745_v14, 0.0  ;;  %v9042_v6 = vmax.f32 %v8971_v63, 0.0  ;;  %v8747_v16 = vpop.f32.mrb[71].mxu0  ;;  %v8973_v19 = vpop.f32.mrb[71].mxu1 }
 0x599   : > { %24968 = vst [vmem:[#allocation23_spill] sm:$0xff] %v23841_v27  ;;  %24969 = vst [vmem:[#allocation24_spill] sm:$0xff] %v23843_v22  ;;  %v9123_v37 = vmul.f32 %v23552_v61, %v9037_v0  ;;  %v9125_v52 = vmul.f32 %v23555_v20, %v9039_v53  ;;  %11727 = vmatpush1.bf16.msra.mxu1 %v19166_v40  ;;  %v9041_v36 = vmax.f32 %v8747_v16, 0.0  ;;  %v9043_v13 = vmax.f32 %v8973_v19, 0.0  ;;  %v19172_v58 = vld [vmem:[%s24912_s10 + $0x180] sm:$0xff]  }
 0x59a   : > { %16519 = vmatprep.subr.bf16.mxu0 %v19169_v2  ;;  %v9126_v45 = vmul.f32 %v23540_v56, %v9040_v38  ;;  %v9128_v10 = vmul.f32 %v23543_v43, %v9042_v6  ;;  %16583 = vmatprep.subr.bf16.mxu1 %v19170_v15  ;;  %v9208_v40 = vadd.f32 %v23558_v4, %v9122_v32  ;;  %v19174_v6 = vld [vmem:[%s24912_s10 + $0x1c8] sm:$0xff]  }
 0x59b   : > { %v9210_v2 = vadd.f32 %v23561_v7, %v9124_v46  ;;  %v9127_v30 = vmul.f32 %v23552_v61, %v9041_v36  ;;  %v9129_v24 = vmul.f32 %v23555_v20, %v9043_v13  ;;  %11503 = vmatmul.mubr.bf16.vlgmr.msra.gmra.mrb[80].mxu0 %v21593_v5  ;;  %v9209_v31 = vadd.f32 %v23564_v50, %v9123_v37  ;;  %v19175_v38 = vld [vmem:[%s24912_s10 + $0x108] sm:$0xff]  }
 0x59c   : > { %v9212_v15 = vadd.f32 %v23558_v4, %v9126_v45  ;;  %v9214_v0 = vadd.f32 %v23561_v7, %v9128_v10  ;;  %11729 = vmatmul.mubr.bf16.vlgmr.msra.gmra.mrb[80].mxu1 %v21593_v5  ;;  %11512 = vmatprep.mubr.bf16.mxu0 %v22231_v47  ;;  %v9211_v53 = vadd.f32 %v23567_v55, %v9125_v52  ;;  %v19176_v52 = vld [vmem:[%s24912_s10 + $0x188] sm:$0xff]  }
 0x59d   : > { %v9213_v14 = vadd.f32 %v23564_v50, %v9127_v30  ;;  %v9215_v63 = vadd.f32 %v23567_v55, %v9129_v24  ;;  %11738 = vmatprep.mubr.bf16.mxu1 %v22231_v47  ;;  %v8751_v32 = vpop.f32.mrb[72].mxu0  ;;  %v8977_v46 = vpop.f32.mrb[72].mxu1  ;;  %16520 = vmatpush3.bf16.msra.mxu0 %v19171_v59 }
 0x59e   : > { %v9044_v16 = vmax.f32 %v8751_v32, 0.0  ;;  %v9046_v19 = vmax.f32 %v8977_v46, 0.0  ;;  %v8753_v5 = vpop.f32.mrb[73].mxu0  ;;  %v8979_v37 = vpop.f32.mrb[73].mxu1  ;;  %16584 = vmatpush3.bf16.msra.mxu1 %v19172_v58  ;;  %16521 = vmatprep.subr.bf16.mxu0 %v19173_v51  ;;  %v23883_v36 = vpack.c.bf16 %v9212_v15, %v9208_v40  ;;  %v23885_v47 = vpack.c.bf16 %v9214_v0, %v9210_v2 }
 0x59f   : > { %v9045_v13 = vmax.f32 %v8753_v5, 0.0  ;;  %v9047_v59 = vmax.f32 %v8979_v37, 0.0  ;;  %v8755_v45 = vpop.f32.mrb[74].mxu0  ;;  %v8981_v10 = vpop.f32.mrb[74].mxu1  ;;  %16585 = vmatprep.subr.bf16.mxu1 %v19174_v6  ;;  %v23887_v30 = vpack.c.bf16 %v9213_v14, %v9209_v31  ;;  %v23889_v24 = vpack.c.bf16 %v9215_v63, %v9211_v53  ;;  %v19177_v6 = vld [vmem:[%s24912_s10 + $0x150] sm:$0xff]  }
 0x5a0   : > { %24970 = vst [vmem:[#allocation25_spill] sm:$0xff] %v23883_v36  ;;  %24971 = vst [vmem:[#allocation26_spill] sm:$0xff] %v23885_v47  ;;  %v9130_v58 = vmul.f32 %v23540_v56, %v9044_v16  ;;  %v9132_v51 = vmul.f32 %v23543_v43, %v9046_v19  ;;  %v9048_v32 = vmax.f32 %v8755_v45, 0.0  ;;  %v9050_v46 = vmax.f32 %v8981_v10, 0.0  ;;  %v8757_v35 = vpop.f32.mrb[75].mxu0  ;;  %v8983_v40 = vpop.f32.mrb[75].mxu1 }
 0x5a1   : > { %24972 = vst [vmem:[#allocation27_spill] sm:$0xff] %v23887_v30  ;;  %24973 = vst [vmem:[#allocation28_spill] sm:$0xff] %v23889_v24  ;;  %v9131_v2 = vmul.f32 %v23552_v61, %v9045_v13  ;;  %v9133_v15 = vmul.f32 %v23555_v20, %v9047_v59  ;;  %v9049_v0 = vmax.f32 %v8757_v35, 0.0  ;;  %v9051_v5 = vmax.f32 %v8983_v40, 0.0  ;;  %16522 = vmatpush3.bf16.msra.mxu0 %v19175_v38  ;;  %v19178_v14 = vld [vmem:[%s24912_s10 + $0x1d0] sm:$0xff]   ;;  %v19182_v10 = vld [vmem:[%s24912_s10 + $0x1d8] sm:$0xff]  }
 0x5a2   : > { %v9134_v31 = vmul.f32 %v23540_v56, %v9048_v32  ;;  %v9136_v53 = vmul.f32 %v23543_v43, %v9050_v46  ;;  %16586 = vmatpush3.bf16.msra.mxu1 %v19176_v52  ;;  %v19179_v63 = vld [vmem:[%s24912_s10 + $0x110] sm:$0xff]   ;;  %v9216_v35 = vadd.f32 %v23558_v4, %v9130_v58  ;;  %v9218_v38 = vadd.f32 %v23561_v7, %v9132_v51  ;;  %v19181_v52 = vld [vmem:[%s24912_s10 + $0x158] sm:$0xff]  }
 0x5a3   : > { %v9135_v16 = vmul.f32 %v23552_v61, %v9049_v0  ;;  %v9137_v19 = vmul.f32 %v23555_v20, %v9051_v5  ;;  %11513 = vmatmul.mubr.bf16.gmra.mrb[84].mxu0 %v22227_v41  ;;  %v19180_v37 = vld [vmem:[%s24912_s10 + $0x190] sm:$0xff]   ;;  %v9217_v13 = vadd.f32 %v23564_v50, %v9131_v2  ;;  %v9219_v58 = vadd.f32 %v23567_v55, %v9133_v15 }
 0x5a4   : > { %v9220_v59 = vadd.f32 %v23558_v4, %v9134_v31  ;;  %v9222_v45 = vadd.f32 %v23561_v7, %v9136_v53  ;;  %11739 = vmatmul.mubr.bf16.gmra.mrb[84].mxu1 %v22227_v41  ;;  %11522 = vmatprep.mubr.bf16.mxu0 %v21649_v26  ;;  %v19183_v31 = vld [vmem:[%s24912_s10 + $0x118] sm:$0xff]  }
 0x5a5   : > { %v9221_v51 = vadd.f32 %v23564_v50, %v9135_v16  ;;  %v9223_v32 = vadd.f32 %v23567_v55, %v9137_v19  ;;  %11748 = vmatprep.mubr.bf16.mxu1 %v21649_v26  ;;  %v8761_v46 = vpop.f32.mrb[76].mxu0  ;;  %v8987_v40 = vpop.f32.mrb[76].mxu1  ;;  %16523 = vmatprep.subr.bf16.mxu0 %v19177_v6 }
 0x5a6   : > { %v9052_v2 = vmax.f32 %v8761_v46, 0.0  ;;  %v9054_v0 = vmax.f32 %v8987_v40, 0.0  ;;  %v8763_v41 = vpop.f32.mrb[77].mxu0  ;;  %v8989_v5 = vpop.f32.mrb[77].mxu1  ;;  %16587 = vmatprep.subr.bf16.mxu1 %v19178_v14  ;;  %16524 = vmatpush3.bf16.msra.mxu0 %v19179_v63  ;;  %v23932_v15 = vpack.c.bf16 %v9220_v59, %v9216_v35  ;;  %v23934_v53 = vpack.c.bf16 %v9222_v45, %v9218_v38 }
 0x5a7   : > { %v9053_v16 = vmax.f32 %v8763_v41, 0.0  ;;  %v9055_v19 = vmax.f32 %v8989_v5, 0.0  ;;  %v8765_v26 = vpop.f32.mrb[78].mxu0  ;;  %v8991_v47 = vpop.f32.mrb[78].mxu1  ;;  %16588 = vmatpush3.bf16.msra.mxu1 %v19180_v37  ;;  %16525 = vmatprep.subr.bf16.mxu0 %v19181_v52  ;;  %v23936_v6 = vpack.c.bf16 %v9221_v51, %v9217_v13  ;;  %v23938_v46 = vpack.c.bf16 %v9223_v32, %v9219_v58  ;;  %v19184_v52 = vld [vmem:[%s24912_s10 + $0x198] sm:$0xff]  }
 0x5a8   : > { %24974 = vst [vmem:[#allocation29_spill] sm:$0xff] %v23932_v15  ;;  %24975 = vst [vmem:[#allocation30_spill] sm:$0xff] %v23934_v53  ;;  %v9138_v14 = vmul.f32 %v23540_v56, %v9052_v2  ;;  %v9140_v63 = vmul.f32 %v23543_v43, %v9054_v0  ;;  %v9056_v40 = vmax.f32 %v8765_v26, 0.0  ;;  %v9058_v36 = vmax.f32 %v8991_v47, 0.0  ;;  %v8767_v35 = vpop.f32.mrb[79].mxu0  ;;  %v8993_v59 = vpop.f32.mrb[79].mxu1  ;;  %16589 = vmatprep.subr.bf16.mxu1 %v19182_v10 }
 0x5a9   : > { %24976 = vst [vmem:[#allocation31_spill] sm:$0xff] %v23936_v6  ;;  %24977 = vst [vmem:[#allocation32_spill] sm:$0xff] %v23938_v46  ;;  %v9139_v38 = vmul.f32 %v23552_v61, %v9053_v16  ;;  %v9141_v45 = vmul.f32 %v23555_v20, %v9055_v19  ;;  %v9057_v41 = vmax.f32 %v8767_v35, 0.0  ;;  %v9059_v37 = vmax.f32 %v8993_v59, 0.0  ;;  %v19185_v47 = vld [vmem:[%s24912_s10 + $0x160] sm:$0xff]   ;;  %v19192_v26 = vld [vmem:[%s24912_s10 + $0x1a8] sm:$0xff]  }
 0x5aa   : > { %v9142_v13 = vmul.f32 %v23540_v56, %v9056_v40  ;;  %v9144_v58 = vmul.f32 %v23543_v43, %v9058_v36  ;;  %16526 = vmatpush3.bf16.msra.mxu0 %v19183_v31  ;;  %v19186_v10 = vld [vmem:[%s24912_s10 + $0x1e0] sm:$0xff]   ;;  %v9224_v51 = vadd.f32 %v23558_v4, %v9138_v14  ;;  %v9226_v32 = vadd.f32 %v23561_v7, %v9140_v63  ;;  %v19193_v14 = vld [vmem:[%s24912_s10 + $0x170] sm:$0xff]   ;;  %v19197_v59 = vld [vmem:[%s24912_s10 + $0x178] sm:$0xff]  }
 0x5ab   : > { %v9143_v2 = vmul.f32 %v23552_v61, %v9057_v41  ;;  %v9145_v0 = vmul.f32 %v23555_v20, %v9059_v37  ;;  %11523 = vmatmul.mubr.bf16.gmra.mrb[88].mxu0 %v21642_v11  ;;  %v19187_v56 = vld [vmem:[%s24912_s10 + $0x120] sm:$0xff]   ;;  %v9225_v43 = vadd.f32 %v23564_v50, %v9139_v38  ;;  %v19189_v61 = vld [vmem:[%s24912_s10 + $0x168] sm:$0xff]   ;;  %v9227_v20 = vadd.f32 %v23567_v55, %v9141_v45  ;;  %v19194_v63 = vld [vmem:[%s24912_s10 + $0x1f0] sm:$0xff]  }
 0x5ac   : > { %v9228_v36 = vadd.f32 %v23558_v4, %v9142_v13  ;;  %v9230_v5 = vadd.f32 %v23561_v7, %v9144_v58  ;;  %11749 = vmatmul.mubr.bf16.gmra.mrb[88].mxu1 %v21642_v11  ;;  %11532 = vmatprep.mubr.bf16.mxu0 %v22261_v54  ;;  %v19188_v4 = vld [vmem:[%s24912_s10 + $0x1a0] sm:$0xff]   ;;  %v19190_v11 = vld [vmem:[%s24912_s10 + $0x1e8] sm:$0xff]   ;;  %v19195_v40 = vld [vmem:[%s24912_s10 + $0x130] sm:$0xff]  }
 0x5ad   : > { %v9229_v31 = vadd.f32 %v23564_v50, %v9143_v2  ;;  %v9231_v16 = vadd.f32 %v23567_v55, %v9145_v0  ;;  %11758 = vmatprep.mubr.bf16.mxu1 %v22261_v54  ;;  %16590 = vmatpush3.bf16.msra.mxu1 %v19184_v52  ;;  %v19191_v54 = vld [vmem:[%s24912_s10 + $0x128] sm:$0xff]   ;;  %v19196_v35 = vld [vmem:[%s24912_s10 + $0x1b0] sm:$0xff]   ;;  %v19200_v38 = vld [vmem:[%s24912_s10 + $0x1b8] sm:$0xff]  }
 0x5ae   : > { %16527 = vmatprep.subr.bf16.mxu0 %v19185_v47  ;;  %16591 = vmatprep.subr.bf16.mxu1 %v19186_v10  ;;  %v23981_v7 = vpack.c.bf16 %v9228_v36, %v9224_v51  ;;  %v23983_v19 = vpack.c.bf16 %v9230_v5, %v9226_v32  ;;  %v19201_v45 = vld [vmem:[%s24912_s10 + $0x40] sm:$0xff]   ;;  %v19211_v37 = vld [vmem:[%s24912_s10 + $0xd0] sm:$0xff]   ;;  %v19213_v58 = vld [vmem:[%s24912_s10 + $0x58] sm:$0xff]  }
 0x5af   : > { %16528 = vmatpush3.bf16.msra.mxu0 %v19187_v56  ;;  %v23985_v50 = vpack.c.bf16 %v9229_v31, %v9225_v43  ;;  %v23987_v55 = vpack.c.bf16 %v9231_v16, %v9227_v20  ;;  %v19203_v41 = vld [vmem:[%s24912_s10 + $0xc0] sm:$0xff]   ;;  %v19210_v52 = vld [vmem:[%s24912_s10 + $0x10] sm:$0xff]   ;;  %v19215_v10 = vld [vmem:[%s24912_s10 + $0xd8] sm:$0xff]  }
 0x5b0   : > { %24978 = vst [vmem:[#allocation33_spill] sm:$0xff] %v23981_v7  ;;  %24979 = vst [vmem:[#allocation34_spill] sm:$0xff] %v23983_v19  ;;  %16529 = vmatprep.subr.bf16.mxu0 %v19189_v61  ;;  %v19212_v13 = vld [vmem:[%s24912_s10 + $0x90] sm:$0xff]   ;;  %v24989_v51 = vld [vmem:[#allocation14_spill] sm:$0xff] }
 0x5b1   : > { %24980 = vst [vmem:[#allocation35_spill] sm:$0xff] %v23985_v50  ;;  %24981 = vst [vmem:[#allocation36_spill] sm:$0xff] %v23987_v55  ;;  %16592 = vmatpush3.bf16.msra.mxu1 %v19188_v4  ;;  %v24988_v47 = vld [vmem:[#allocation13_spill] sm:$0xff]  ;;  %v19214_v32 = vld [vmem:[%s24912_s10 + $0x18] sm:$0xff]  }
 0x5b2   : > { %16593 = vmatprep.subr.bf16.mxu1 %v19190_v11  ;;  %v19216_v2 = vld [vmem:[%s24912_s10 + $0x98] sm:$0xff]   ;;  %v19217_v0 = vld [vmem:[%s24912_s10 + $0x60] sm:$0xff]   ;;  %v19221_v5 = vld [vmem:[%s24912_s10 + $0x68] sm:$0xff]  }
 0x5b3   : > { %11533 = vmatmul.mubr.bf16.gmra.mrb[92].mxu0 %v22257_v57  ;;  %v19219_v56 = vld [vmem:[%s24912_s10 + $0xe0] sm:$0xff]   ;;  %v19223_v20 = vld [vmem:[%s24912_s10 + $0xe8] sm:$0xff]   ;;  %v19225_v11 = vld [vmem:[%s24912_s10 + $0x70] sm:$0xff]  }
 0x5b4   : > { %11759 = vmatmul.mubr.bf16.gmra.mrb[92].mxu1 %v22257_v57  ;;  %11542 = vmatprep.mubr.bf16.mxu0 %v21697_v33  ;;  %v19199_v57 = vld [vmem:[%s24912_s10 + $0x138] sm:$0xff]   ;;  %v19218_v43 = vld [vmem:[%s24912_s10 + $0x20] sm:$0xff]   ;;  %v24991_v31 = vld [vmem:[#allocation16_spill] sm:$0xff] }
 0x5b5   : > { %11768 = vmatprep.mubr.bf16.mxu1 %v21697_v33  ;;  %16530 = vmatpush3.bf16.msra.mxu0 %v19191_v54  ;;  %v19198_v33 = vld [vmem:[%s24912_s10 + $0x1f8] sm:$0xff]   ;;  %v19220_v36 = vld [vmem:[%s24912_s10 + $0xa0] sm:$0xff]   ;;  %v19222_v16 = vld [vmem:[%s24912_s10 + $0x28] sm:$0xff]  }
 0x5b6   : > { %16594 = vmatpush3.bf16.msra.mxu1 %v19192_v26  ;;  %16531 = vmatprep.subr.bf16.mxu0 %v19193_v14  ;;  %v24990_v61 = vld [vmem:[#allocation15_spill] sm:$0xff]  ;;  %v19224_v4 = vld [vmem:[%s24912_s10 + $0xa8] sm:$0xff]   ;;  %v19227_v54 = vld [vmem:[%s24912_s10 + $0xf0] sm:$0xff]  }
 0x5b7   : > { %16595 = vmatprep.subr.bf16.mxu1 %v19194_v63  ;;  %v19226_v26 = vld [vmem:[%s24912_s10 + $0x30] sm:$0xff]   ;;  %v19229_v63 = vld [vmem:[%s24912_s10 + $0x78] sm:$0xff]  }
 0x5b8   : > { %v19228_v14 = vld [vmem:[%s24912_s10 + $0xb0] sm:$0xff]  }
 0x5b9   : > { %16532 = vmatpush3.bf16.msra.mxu0 %v19195_v40  ;;  %v24992_v40 = vld [vmem:[#allocation17_spill] sm:$0xff] }
 0x5ba   : > { %16596 = vmatpush3.bf16.msra.mxu1 %v19196_v35  ;;  %16533 = vmatprep.subr.bf16.mxu0 %v19197_v59  ;;  %v19231_v35 = vld [vmem:[%s24912_s10 + $0xf8] sm:$0xff]  }
 0x5bb   : > { %11543 = vmatmul.mubr.bf16.gmra.mrb[96].mxu0 %v21690_v28  ;;  %16597 = vmatprep.subr.bf16.mxu1 %v19198_v33  ;;  %v24993_v59 = vld [vmem:[#allocation18_spill] sm:$0xff] }
 0x5bc   : > { %11769 = vmatmul.mubr.bf16.gmra.mrb[96].mxu1 %v21690_v28  ;;  %11552 = vmatprep.mubr.bf16.mxu0 %v22289_v18  ;;  %v24982_v28 = vpack.c.bf16 %v23617_v23, %v23600_v48  ;;  %v24985_v48 = vld [vmem:[#allocation12_spill] sm:$0xff]  ;;  %v19230_v33 = vld [vmem:[%s24912_s10 + $0x38] sm:$0xff]  }
 0x5bd   : > { %11778 = vmatprep.mubr.bf16.mxu1 %v22289_v18  ;;  %16534 = vmatpush3.bf16.msra.mxu0 %v19199_v57  ;;  %v19205_v18 = vld [vmem:[%s24912_s10 + $0x48] sm:$0xff]   ;;  %v19232_v57 = vld [vmem:[%s24912_s10 + $0xb8] sm:$0xff]  }
 0x5be   : > { %16598 = vmatpush3.bf16.msra.mxu1 %v19200_v38  ;;  %16647 = vmatprep.subr.bf16.mxu0 %v19201_v45  ;;  %v19233_v38 = vld [vmem:[%s24912_s10 + $0x240] sm:$0xff]  }
 0x5bf   : > { %16711 = vmatprep.subr.bf16.mxu1 %v19203_v41  ;;  %v19234_v45 = vld [vmem:[%s24912_s10 + $0x2c0] sm:$0xff]   ;;  %v24994_v41 = vld [vmem:[#allocation22_spill] sm:$0xff] }
 0x5c3   : > { %11553 = vmatmul.mubr.bf16.gmra.mrb[100].mxu0 %v22285_v21 }
 0x5c4   : > { %11779 = vmatmul.mubr.bf16.gmra.mrb[100].mxu1 %v22285_v21  ;;  %11562 = vmatprep.mubr.bf16.mxu0 %v21742_v17  ;;  %v24983_v21 = vpack.c.bf16 %v23620_v44, %v23614_v12  ;;  %v24986_v12 = vld [vmem:[#allocation11_spill] sm:$0xff]  ;;  %v19206_v44 = vld [vmem:[%s24912_s10 + $0x8] sm:$0xff]  }
 0x5c5   : > { %11788 = vmatprep.mubr.bf16.mxu1 %v21742_v17  ;;  %v19204_v17 = vld [vmem:[%s24912_s10 + $0x80] sm:$0xff]   ;;  %v24987_v23 = vpack.c.bf16 %v24985_v48, %v24986_v12  ;;  %v19239_v48 = vld [vmem:[%s24912_s10 + $0x208] sm:$0xff]  }
 0x5c6   : > { %v19240_v12 = vld [vmem:[%s24912_s10 + $0x288] sm:$0xff]  }
 0x5cb   : > { %11563 = vmatmul.mubr.bf16.gmra.mrb[104].mxu0 %v21735_v25 }
 0x5cc   : > { %11789 = vmatmul.mubr.bf16.gmra.mrb[104].mxu1 %v21735_v25  ;;  %11572 = vmatprep.mubr.bf16.mxu0 %v22317_v3  ;;  %v19202_v25 = vld [vmem:[%s24912_s10] sm:$0xff]  }
 0x5cd   : > { %11798 = vmatprep.mubr.bf16.mxu1 %v22317_v3  ;;  %v19207_v3 = vld [vmem:[%s24912_s10 + $0xc8] sm:$0xff]  }
 0x5d3   : > { %11573 = vmatmul.mubr.bf16.gmra.mrb[108].mxu0 %v22313_v42 }
 0x5d4   : > { %11799 = vmatmul.mubr.bf16.gmra.mrb[108].mxu1 %v22313_v42  ;;  %12534 = vmatprep.mubr.bf16.mxu0 %v24982_v28  ;;  %v24984_v42 = vpack.c.bf16 %v23603_v49, %v23589_v1  ;;  %v19208_v1 = vld [vmem:[%s24912_s10 + $0x88] sm:$0xff]   ;;  %v19209_v49 = vld [vmem:[%s24912_s10 + $0x50] sm:$0xff]  }
 0x5d5   : > { %12631 = vmatprep.mubr.bf16.mxu1 %v24983_v21  ;;  %v24995_v28 = vld [vmem:[#allocation25_spill] sm:$0xff]  ;;  %v24996_v21 = vld [vmem:[#allocation26_spill] sm:$0xff] }
 0x5db   : > { %12535 = vmatmul.mubr.bf16.vlgmr.msra.gmra.mrb[112].mxu0 %v24984_v42  ;;  %v19237_v42 = vld [vmem:[%s24912_s10 + $0x248] sm:$0xff]  }
 0x5dc   : > { %12632 = vmatmul.mubr.bf16.vlgmr.msra.gmra.mrb[112].mxu1 %v24987_v23  ;;  %12542 = vmatprep.mubr.bf16.mxu0 %v23685_v39  ;;  %v19241_v23 = vld [vmem:[%s24912_s10 + $0x250] sm:$0xff]  }
 0x5dd   : > { %12639 = vmatprep.mubr.bf16.mxu1 %v23687_v60  ;;  %16648 = vmatpush3.bf16.msra.mxu0 %v19202_v25  ;;  %v24997_v25 = vmov 0  }
 0x5de   : > { %16712 = vmatpush3.bf16.msra.mxu1 %v19204_v17  ;;  %16649 = vmatprep.subr.bf16.mxu0 %v19205_v18  ;;  %v19235_v17 = vld [vmem:[%s24912_s10 + $0x200] sm:$0xff]  }
 0x5df   : > { %16713 = vmatprep.subr.bf16.mxu1 %v19207_v3  ;;  %v19236_v18 = vld [vmem:[%s24912_s10 + $0x280] sm:$0xff]   ;;  %v19238_v3 = vld [vmem:[%s24912_s10 + $0x2c8] sm:$0xff]  }
 0x5e1   : > { %16650 = vmatpush3.bf16.msra.mxu0 %v19206_v44  ;;  %v19242_v44 = vld [vmem:[%s24912_s10 + $0x2d0] sm:$0xff]  }
 0x5e2   : > { %16714 = vmatpush3.bf16.msra.mxu1 %v19208_v1  ;;  %16651 = vmatprep.subr.bf16.mxu0 %v19209_v49  ;;  %v19243_v1 = vld [vmem:[%s24912_s10 + $0x210] sm:$0xff]  }
 0x5e3   : > { %12543 = vmatmul.mubr.bf16.gmra.mrb[116].mxu0 %v24988_v47  ;;  %16715 = vmatprep.subr.bf16.mxu1 %v19211_v37  ;;  %v19244_v49 = vld [vmem:[%s24912_s10 + $0x290] sm:$0xff]   ;;  %v19245_v37 = vld [vmem:[%s24912_s10 + $0x258] sm:$0xff]  }
 0x5e4   : > { %12640 = vmatmul.mubr.bf16.gmra.mrb[116].mxu1 %v24989_v51  ;;  %12550 = vmatprep.mubr.bf16.mxu0 %v23737_v9 }
 0x5e5   : > { %12647 = vmatprep.mubr.bf16.mxu1 %v23739_v29  ;;  %16652 = vmatpush3.bf16.msra.mxu0 %v19210_v52  ;;  %v19246_v52 = vld [vmem:[%s24912_s10 + $0x2d8] sm:$0xff]  }
 0x5e6   : > { %16716 = vmatpush3.bf16.msra.mxu1 %v19212_v13  ;;  %16653 = vmatprep.subr.bf16.mxu0 %v19213_v58  ;;  %v19247_v13 = vld [vmem:[%s24912_s10 + $0x218] sm:$0xff]  }
 0x5e7   : > { %16717 = vmatprep.subr.bf16.mxu1 %v19215_v10  ;;  %v19248_v58 = vld [vmem:[%s24912_s10 + $0x298] sm:$0xff]   ;;  %v19249_v10 = vld [vmem:[%s24912_s10 + $0x260] sm:$0xff]  }
 0x5e9   : > { %16654 = vmatpush3.bf16.msra.mxu0 %v19214_v32  ;;  %v19250_v32 = vld [vmem:[%s24912_s10 + $0x2e0] sm:$0xff]  }
 0x5ea   : > { %16718 = vmatpush3.bf16.msra.mxu1 %v19216_v2  ;;  %16655 = vmatprep.subr.bf16.mxu0 %v19217_v0  ;;  %v19251_v2 = vld [vmem:[%s24912_s10 + $0x220] sm:$0xff]  }
 0x5eb   : > { %12551 = vmatmul.mubr.bf16.gmra.mrb[120].mxu0 %v24990_v61  ;;  %16719 = vmatprep.subr.bf16.mxu1 %v19219_v56  ;;  %v19252_v0 = vld [vmem:[%s24912_s10 + $0x2a0] sm:$0xff]   ;;  %v19253_v56 = vld [vmem:[%s24912_s10 + $0x268] sm:$0xff]  }
 0x5ec   : > { %12648 = vmatmul.mubr.bf16.gmra.mrb[120].mxu1 %v24991_v31  ;;  %12558 = vmatprep.mubr.bf16.mxu0 %v23789_v34 }
 0x5ed   : > { %12655 = vmatprep.mubr.bf16.mxu1 %v23791_v8  ;;  %16656 = vmatpush3.bf16.msra.mxu0 %v19218_v43  ;;  %v19254_v43 = vld [vmem:[%s24912_s10 + $0x2e8] sm:$0xff]  }
 0x5ee   : > { %16720 = vmatpush3.bf16.msra.mxu1 %v19220_v36  ;;  %16657 = vmatprep.subr.bf16.mxu0 %v19221_v5  ;;  %v19255_v36 = vld [vmem:[%s24912_s10 + $0x228] sm:$0xff]  }
 0x5ef   : > { %16721 = vmatprep.subr.bf16.mxu1 %v19223_v20  ;;  %v19256_v5 = vld [vmem:[%s24912_s10 + $0x2a8] sm:$0xff]   ;;  %v19257_v20 = vld [vmem:[%s24912_s10 + $0x270] sm:$0xff]  }
 0x5f1   : > { %16658 = vmatpush3.bf16.msra.mxu0 %v19222_v16  ;;  %v19258_v16 = vld [vmem:[%s24912_s10 + $0x2f0] sm:$0xff]  }
 0x5f2   : > { %16722 = vmatpush3.bf16.msra.mxu1 %v19224_v4  ;;  %16659 = vmatprep.subr.bf16.mxu0 %v19225_v11  ;;  %v19259_v4 = vld [vmem:[%s24912_s10 + $0x230] sm:$0xff]  }
 0x5f3   : > { %12559 = vmatmul.mubr.bf16.gmra.mrb[124].mxu0 %v24992_v40  ;;  %16723 = vmatprep.subr.bf16.mxu1 %v19227_v54  ;;  %v19260_v11 = vld [vmem:[%s24912_s10 + $0x2b0] sm:$0xff]   ;;  %v19261_v54 = vld [vmem:[%s24912_s10 + $0x278] sm:$0xff]  }
 0x5f4   : > { %12656 = vmatmul.mubr.bf16.gmra.mrb[124].mxu1 %v24993_v59  ;;  %12566 = vmatprep.mubr.bf16.mxu0 %v23841_v27 }
 0x5f5   : > { %12663 = vmatprep.mubr.bf16.mxu1 %v23843_v22  ;;  %16660 = vmatpush3.bf16.msra.mxu0 %v19226_v26  ;;  %v19262_v26 = vld [vmem:[%s24912_s10 + $0x2f8] sm:$0xff]  }
 0x5f6   : > { %16724 = vmatpush3.bf16.msra.mxu1 %v19228_v14  ;;  %16661 = vmatprep.subr.bf16.mxu0 %v19229_v63  ;;  %v19263_v14 = vld [vmem:[%s24912_s10 + $0x238] sm:$0xff]  }
 0x5f7   : > { %16725 = vmatprep.subr.bf16.mxu1 %v19231_v35  ;;  %v19264_v63 = vld [vmem:[%s24912_s10 + $0x2b8] sm:$0xff]   ;;  %v19265_v35 = vld [vmem:[%s24912_s10 + $0x340] sm:$0xff]  }
 0x5f9   : > { %16662 = vmatpush3.bf16.msra.mxu0 %v19230_v33  ;;  %v19266_v33 = vld [vmem:[%s24912_s10 + $0x3c0] sm:$0xff]  }
 0x5fa   : > { %16726 = vmatpush3.bf16.msra.mxu1 %v19232_v57  ;;  %16775 = vmatprep.subr.bf16.mxu0 %v19233_v38  ;;  %v11873_v57 = vld [vmem:[%s24910_s8] sm:$0xf] }
 0x5fb   : > { %12567 = vmatmul.mubr.bf16.gmra.mrb[128].mxu0 %v23837_v62  ;;  %16839 = vmatprep.subr.bf16.mxu1 %v19234_v45  ;;  %v24998_v38 = vld [vmem:[#allocation7_spill] sm:$0xff] }
 0x5fc   : > { %12664 = vmatmul.mubr.bf16.gmra.mrb[128].mxu1 %v24994_v41  ;;  %12574 = vmatprep.mubr.bf16.mxu0 %v23887_v30  ;;  %v24283_v45 = vrot.slane %v11873_v57, %v24998_v38 }
 0x5fd   : > { %12671 = vmatprep.mubr.bf16.mxu1 %v23889_v24 }
 0x603   : > { %12575 = vmatmul.mubr.bf16.gmra.mrb[132].mxu0 %v24995_v28 }
 0x604   : > { %12672 = vmatmul.mubr.bf16.gmra.mrb[132].mxu1 %v24996_v21  ;;  %12582 = vmatprep.mubr.bf16.mxu0 %v23936_v6 }
 0x605   : > { %12679 = vmatprep.mubr.bf16.mxu1 %v23938_v46 }
 0x60b   : > { %12583 = vmatmul.mubr.bf16.gmra.mrb[136].mxu0 %v23932_v15 }
 0x60c   : > { %12680 = vmatmul.mubr.bf16.gmra.mrb[136].mxu1 %v23934_v53  ;;  %12590 = vmatprep.mubr.bf16.mxu0 %v23985_v50 }
 0x60d   : > { %12687 = vmatprep.mubr.bf16.mxu1 %v23987_v55 }
 0x613   : > { %12591 = vmatmul.mubr.bf16.gmra.mrb[140].mxu0 %v23981_v7 }
 0x614   : > { %12688 = vmatmul.mubr.bf16.gmra.mrb[140].mxu1 %v23983_v19  ;;  %12920 = vmatprep.mubr.bf16.mxu0 %v24997_v25 }
 0x615   : > { %13017 = vmatprep.mubr.bf16.mxu1 %v24997_v25 }
 0x61b   : > { %12921 = vmatmul.mubr.bf16.vlgmr.msra.gmra.mrb[144].mxu0 %v24997_v25 }
 0x61c   : > { %13018 = vmatmul.mubr.bf16.vlgmr.msra.gmra.mrb[144].mxu1 %v24997_v25  ;;  %16776 = vmatpush3.bf16.msra.mxu0 %v19235_v17  ;;  %v11959_v17 = vld [vmem:[%s24911_s9] sm:$0xf] }
 0x61d   : > { %16840 = vmatpush3.bf16.msra.mxu1 %v19236_v18  ;;  %16777 = vmatprep.subr.bf16.mxu0 %v19237_v42  ;;  %v24999_v42 = vld [vmem:[#allocation9_spill] sm:$0xff] }
 0x61e   : > { %16841 = vmatprep.subr.bf16.mxu1 %v19238_v3  ;;  %v24289_v3 = vrot.slane %v11873_v57, %v24999_v42 }
 0x620   : > { %16778 = vmatpush3.bf16.msra.mxu0 %v19239_v48  ;;  %v25000_v48 = vld [vmem:[#allocation8_spill] sm:$0xff] }
 0x621   : > { %16842 = vmatpush3.bf16.msra.mxu1 %v19240_v12  ;;  %16779 = vmatprep.subr.bf16.mxu0 %v19241_v23  ;;  %v24292_v12 = vrot.slane %v11873_v57, %v25000_v48 }
 0x622   : > { %16843 = vmatprep.subr.bf16.mxu1 %v19242_v44 }
 0x624   : > { %16780 = vmatpush3.bf16.msra.mxu0 %v19243_v1 }
 0x625   : > { %16844 = vmatpush3.bf16.msra.mxu1 %v19244_v49  ;;  %16781 = vmatprep.subr.bf16.mxu0 %v19245_v37  ;;  %v25001_v49 = vld [vmem:[#allocation10_spill] sm:$0xff] }
 0x626   : > { %16845 = vmatprep.subr.bf16.mxu1 %v19246_v52  ;;  %v24295_v37 = vrot.slane %v11873_v57, %v25001_v49  ;;  %v24298_v52 = vrot.slane %v11959_v17, %v24998_v38 }
 0x628   : > { %16782 = vmatpush3.bf16.msra.mxu0 %v19247_v13 }
 0x629   : > { %16846 = vmatpush3.bf16.msra.mxu1 %v19248_v58  ;;  %16783 = vmatprep.subr.bf16.mxu0 %v19249_v10  ;;  %v24301_v58 = vrot.slane %v11959_v17, %v24999_v42 }
 0x62a   : > { %16847 = vmatprep.subr.bf16.mxu1 %v19250_v32 }
 0x62c   : > { %16784 = vmatpush3.bf16.msra.mxu0 %v19251_v2 }
 0x62d   : > { %16848 = vmatpush3.bf16.msra.mxu1 %v19252_v0  ;;  %16785 = vmatprep.subr.bf16.mxu0 %v19253_v56  ;;  %v24305_v56 = vrot.slane %v11959_v17, %v25000_v48 }
 0x62e   : > { %16849 = vmatprep.subr.bf16.mxu1 %v19254_v43 }
 0x630   : > { %16786 = vmatpush3.bf16.msra.mxu0 %v19255_v36 }
 0x631   : > { %16850 = vmatpush3.bf16.msra.mxu1 %v19256_v5  ;;  %16787 = vmatprep.subr.bf16.mxu0 %v19257_v20 }
 0x632   : > { %16851 = vmatprep.subr.bf16.mxu1 %v19258_v16 }
 0x634   : > { %16788 = vmatpush3.bf16.msra.mxu0 %v19259_v4 }
 0x635   : > { %16852 = vmatpush3.bf16.msra.mxu1 %v19260_v11  ;;  %16789 = vmatprep.subr.bf16.mxu0 %v19261_v54 }
 0x636   : > { %16853 = vmatprep.subr.bf16.mxu1 %v19262_v26 }
 0x638   : > { %16790 = vmatpush3.bf16.msra.mxu0 %v19263_v14 }
 0x639   : > { %16854 = vmatpush3.bf16.msra.mxu1 %v19264_v63  ;;  %16903 = vmatprep.subr.bf16.mxu0 %v19265_v35  ;;  %v24311_v63 = vrot.slane %v11959_v17, %v25001_v49 }
 0x63a   : > { %16967 = vmatprep.subr.bf16.mxu1 %v19266_v33 }
 0x66e   : > { %v11504_v18 = vpop.f32.mrb[80].mxu0 }
 0x66f   : > { %v11809_v23 = vmax.f32 %v11504_v18, 0.0  ;;  %v11730_v44 = vpop.f32.mrb[80].mxu1  ;;  %v11506_v1 = vpop.f32.mrb[81].mxu0 }
 0x670   : > { %v11811_v13 = vmax.f32 %v11730_v44, 0.0  ;;  %v11810_v10 = vmax.f32 %v11506_v1, 0.0  ;;  %v11732_v32 = vpop.f32.mrb[81].mxu1  ;;  %v11508_v2 = vpop.f32.mrb[82].mxu0 }
 0x671   : > { %v11895_v0 = vmul.f32 %v24283_v45, %v11809_v23  ;;  %v11812_v43 = vmax.f32 %v11732_v32, 0.0  ;;  %v11813_v36 = vmax.f32 %v11508_v2, 0.0  ;;  %v11734_v5 = vpop.f32.mrb[82].mxu1  ;;  %v11510_v20 = vpop.f32.mrb[83].mxu0 }
 0x672   : > { %v11897_v16 = vmul.f32 %v24289_v3, %v11811_v13  ;;  %v11896_v4 = vmul.f32 %v24292_v12, %v11810_v10  ;;  %v11815_v11 = vmax.f32 %v11734_v5, 0.0  ;;  %v11814_v54 = vmax.f32 %v11510_v20, 0.0  ;;  %v11736_v26 = vpop.f32.mrb[83].mxu1 }
 0x673   : > { %v11898_v14 = vmul.f32 %v24295_v37, %v11812_v43  ;;  %v11899_v35 = vmul.f32 %v24283_v45, %v11813_v36  ;;  %v11816_v33 = vmax.f32 %v11736_v26, 0.0  ;;  %v11981_v18 = vadd.f32 %v24298_v52, %v11895_v0 }
 0x674   : > { %v11901_v57 = vmul.f32 %v24289_v3, %v11815_v11  ;;  %v11900_v38 = vmul.f32 %v24292_v12, %v11814_v54  ;;  %v11983_v23 = vadd.f32 %v24301_v58, %v11897_v16  ;;  %v11982_v44 = vadd.f32 %v24305_v56, %v11896_v4 }
 0x675   : > { %v11985_v42 = vadd.f32 %v24298_v52, %v11899_v35  ;;  %v11902_v48 = vmul.f32 %v24295_v37, %v11816_v33  ;;  %v11984_v13 = vadd.f32 %v24311_v63, %v11898_v14 }
 0x676   : > { %v11987_v17 = vadd.f32 %v24301_v58, %v11901_v57  ;;  %v11986_v1 = vadd.f32 %v24305_v56, %v11900_v38  ;;  %v11514_v49 = vpop.f32.mrb[84].mxu0 }
 0x677   : > { %v11988_v10 = vadd.f32 %v24311_v63, %v11902_v48  ;;  %v11817_v32 = vmax.f32 %v11514_v49, 0.0  ;;  %v11740_v2 = vpop.f32.mrb[84].mxu1  ;;  %v11516_v0 = vpop.f32.mrb[85].mxu0  ;;  %v24325_v43 = vpack.c.bf16 %v11985_v42, %v11981_v18 }
 0x678   : > { %v11819_v36 = vmax.f32 %v11740_v2, 0.0  ;;  %v11818_v5 = vmax.f32 %v11516_v0, 0.0  ;;  %v11742_v20 = vpop.f32.mrb[85].mxu1  ;;  %v11518_v16 = vpop.f32.mrb[86].mxu0  ;;  %v24327_v11 = vpack.c.bf16 %v11986_v1, %v11982_v44  ;;  %v24329_v4 = vpack.c.bf16 %v11987_v17, %v11983_v23 }
 0x679   : > { %v11903_v54 = vmul.f32 %v24283_v45, %v11817_v32  ;;  %v11820_v26 = vmax.f32 %v11742_v20, 0.0  ;;  %v11821_v35 = vmax.f32 %v11518_v16, 0.0  ;;  %v11744_v14 = vpop.f32.mrb[86].mxu1  ;;  %v11520_v33 = vpop.f32.mrb[87].mxu0  ;;  %v24332_v57 = vpack.c.bf16 %v11988_v10, %v11984_v13 }
 0x67a   : > { %v11905_v38 = vmul.f32 %v24289_v3, %v11819_v36  ;;  %v11904_v18 = vmul.f32 %v24292_v12, %v11818_v5  ;;  %v11823_v42 = vmax.f32 %v11744_v14, 0.0  ;;  %v11822_v48 = vmax.f32 %v11520_v33, 0.0  ;;  %v11746_v49 = vpop.f32.mrb[87].mxu1  ;;  %12928 = vmatprep.mubr.bf16.mxu0 %v24327_v11 }
 0x67b   : > { %v11906_v23 = vmul.f32 %v24295_v37, %v11820_v26  ;;  %v11907_v44 = vmul.f32 %v24283_v45, %v11821_v35  ;;  %v11824_v17 = vmax.f32 %v11746_v49, 0.0  ;;  %13025 = vmatprep.mubr.bf16.mxu1 %v24332_v57  ;;  %12929 = vmatmul.mubr.bf16.gmra.mrb[148].mxu0 %v24325_v43  ;;  %v11989_v10 = vadd.f32 %v24298_v52, %v11903_v54 }
 0x67c   : > { %v11909_v1 = vmul.f32 %v24289_v3, %v11823_v42  ;;  %v11908_v13 = vmul.f32 %v24292_v12, %v11822_v48  ;;  %13026 = vmatmul.mubr.bf16.gmra.mrb[148].mxu1 %v24329_v4  ;;  %v11991_v0 = vadd.f32 %v24301_v58, %v11905_v38  ;;  %v11990_v36 = vadd.f32 %v24305_v56, %v11904_v18 }
 0x67d   : > { %v11993_v32 = vadd.f32 %v24298_v52, %v11907_v44  ;;  %v11910_v2 = vmul.f32 %v24295_v37, %v11824_v17  ;;  %v11992_v26 = vadd.f32 %v24311_v63, %v11906_v23 }
 0x67e   : > { %v11995_v5 = vadd.f32 %v24301_v58, %v11909_v1  ;;  %v11994_v20 = vadd.f32 %v24305_v56, %v11908_v13  ;;  %v11524_v16 = vpop.f32.mrb[88].mxu0 }
 0x67f   : > { %v11996_v35 = vadd.f32 %v24311_v63, %v11910_v2  ;;  %v11825_v14 = vmax.f32 %v11524_v16, 0.0  ;;  %v11750_v33 = vpop.f32.mrb[88].mxu1  ;;  %v11526_v54 = vpop.f32.mrb[89].mxu0  ;;  %v24353_v42 = vpack.c.bf16 %v11993_v32, %v11989_v10 }
 0x680   : > { %v11827_v48 = vmax.f32 %v11750_v33, 0.0  ;;  %v11826_v49 = vmax.f32 %v11526_v54, 0.0  ;;  %v11752_v44 = vpop.f32.mrb[89].mxu1  ;;  %v11528_v38 = vpop.f32.mrb[90].mxu0  ;;  %v24355_v17 = vpack.c.bf16 %v11994_v20, %v11990_v36  ;;  %v24357_v18 = vpack.c.bf16 %v11995_v5, %v11991_v0 }
 0x681   : > { %v11911_v1 = vmul.f32 %v24283_v45, %v11825_v14  ;;  %v11828_v13 = vmax.f32 %v11752_v44, 0.0  ;;  %v11829_v25 = vmax.f32 %v11528_v38, 0.0  ;;  %v11754_v23 = vpop.f32.mrb[90].mxu1  ;;  %v11530_v19 = vpop.f32.mrb[91].mxu0  ;;  %v24360_v2 = vpack.c.bf16 %v11996_v35, %v11992_v26 }
 0x682   : > { %v11913_v16 = vmul.f32 %v24289_v3, %v11827_v48  ;;  %v11912_v10 = vmul.f32 %v24292_v12, %v11826_v49  ;;  %v11831_v32 = vmax.f32 %v11754_v23, 0.0  ;;  %v11830_v33 = vmax.f32 %v11530_v19, 0.0  ;;  %v11756_v54 = vpop.f32.mrb[91].mxu1  ;;  %12936 = vmatprep.mubr.bf16.mxu0 %v24355_v17 }
 0x683   : > { %v11914_v0 = vmul.f32 %v24295_v37, %v11828_v13  ;;  %v11915_v36 = vmul.f32 %v24283_v45, %v11829_v25  ;;  %v11832_v5 = vmax.f32 %v11756_v54, 0.0  ;;  %13033 = vmatprep.mubr.bf16.mxu1 %v24360_v2  ;;  %12937 = vmatmul.mubr.bf16.gmra.mrb[152].mxu0 %v24353_v42  ;;  %v11997_v19 = vadd.f32 %v24298_v52, %v11911_v1 }
 0x684   : > { %v11917_v20 = vmul.f32 %v24289_v3, %v11831_v32  ;;  %v11916_v26 = vmul.f32 %v24292_v12, %v11830_v33  ;;  %13034 = vmatmul.mubr.bf16.gmra.mrb[152].mxu1 %v24357_v18  ;;  %v11999_v48 = vadd.f32 %v24301_v58, %v11913_v16  ;;  %v11998_v25 = vadd.f32 %v24305_v56, %v11912_v10 }
 0x685   : > { %v12001_v35 = vadd.f32 %v24298_v52, %v11915_v36  ;;  %v11918_v14 = vmul.f32 %v24295_v37, %v11832_v5  ;;  %v12000_v13 = vadd.f32 %v24311_v63, %v11914_v0 }
 0x686   : > { %v12003_v49 = vadd.f32 %v24301_v58, %v11917_v20  ;;  %v12002_v44 = vadd.f32 %v24305_v56, %v11916_v26  ;;  %v11534_v38 = vpop.f32.mrb[92].mxu0 }
 0x687   : > { %v12004_v23 = vadd.f32 %v24311_v63, %v11918_v14  ;;  %v11833_v32 = vmax.f32 %v11534_v38, 0.0  ;;  %v11760_v33 = vpop.f32.mrb[92].mxu1  ;;  %v11536_v1 = vpop.f32.mrb[93].mxu0  ;;  %v24381_v54 = vpack.c.bf16 %v12001_v35, %v11997_v19 }
 0x688   : > { %v11835_v36 = vmax.f32 %v11760_v33, 0.0  ;;  %v11834_v5 = vmax.f32 %v11536_v1, 0.0  ;;  %v11762_v7 = vpop.f32.mrb[93].mxu1  ;;  %v11538_v16 = vpop.f32.mrb[94].mxu0  ;;  %v24383_v55 = vpack.c.bf16 %v12002_v44, %v11998_v25  ;;  %v24385_v10 = vpack.c.bf16 %v12003_v49, %v11999_v48 }
 0x689   : > { %v11919_v20 = vmul.f32 %v24283_v45, %v11833_v32  ;;  %v11836_v26 = vmax.f32 %v11762_v7, 0.0  ;;  %v11837_v50 = vmax.f32 %v11538_v16, 0.0  ;;  %v11764_v0 = vpop.f32.mrb[94].mxu1  ;;  %v11540_v53 = vpop.f32.mrb[95].mxu0  ;;  %v24388_v14 = vpack.c.bf16 %v12004_v23, %v12000_v13 }
 0x68a   : > { %v11921_v38 = vmul.f32 %v24289_v3, %v11835_v36  ;;  %v11920_v19 = vmul.f32 %v24292_v12, %v11834_v5  ;;  %v11839_v35 = vmax.f32 %v11764_v0, 0.0  ;;  %v11838_v33 = vmax.f32 %v11540_v53, 0.0  ;;  %v11766_v1 = vpop.f32.mrb[95].mxu1  ;;  %12944 = vmatprep.mubr.bf16.mxu0 %v24383_v55 }
 0x68b   : > { %v11922_v48 = vmul.f32 %v24295_v37, %v11836_v26  ;;  %v11923_v25 = vmul.f32 %v24283_v45, %v11837_v50  ;;  %v11840_v49 = vmax.f32 %v11766_v1, 0.0  ;;  %13041 = vmatprep.mubr.bf16.mxu1 %v24388_v14  ;;  %12945 = vmatmul.mubr.bf16.gmra.mrb[156].mxu0 %v24381_v54  ;;  %v12005_v53 = vadd.f32 %v24298_v52, %v11919_v20 }
 0x68c   : > { %v11925_v7 = vmul.f32 %v24289_v3, %v11839_v35  ;;  %v11924_v44 = vmul.f32 %v24292_v12, %v11838_v33  ;;  %13042 = vmatmul.mubr.bf16.gmra.mrb[156].mxu1 %v24385_v10  ;;  %v12007_v32 = vadd.f32 %v24301_v58, %v11921_v38  ;;  %v12006_v50 = vadd.f32 %v24305_v56, %v11920_v19 }
 0x68d   : > { %v12009_v13 = vadd.f32 %v24298_v52, %v11923_v25  ;;  %v11926_v23 = vmul.f32 %v24295_v37, %v11840_v49  ;;  %v12008_v26 = vadd.f32 %v24311_v63, %v11922_v48 }
 0x68e   : > { %v12011_v36 = vadd.f32 %v24301_v58, %v11925_v7  ;;  %v12010_v5 = vadd.f32 %v24305_v56, %v11924_v44  ;;  %v11544_v16 = vpop.f32.mrb[96].mxu0 }
 0x68f   : > { %v12012_v0 = vadd.f32 %v24311_v63, %v11926_v23  ;;  %v11841_v35 = vmax.f32 %v11544_v16, 0.0  ;;  %v11770_v33 = vpop.f32.mrb[96].mxu1  ;;  %v11546_v20 = vpop.f32.mrb[97].mxu0  ;;  %v24409_v1 = vpack.c.bf16 %v12009_v13, %v12005_v53 }
 0x690   : > { %v11843_v25 = vmax.f32 %v11770_v33, 0.0  ;;  %v11842_v49 = vmax.f32 %v11546_v20, 0.0  ;;  %v11772_v15 = vpop.f32.mrb[97].mxu1  ;;  %v11548_v38 = vpop.f32.mrb[98].mxu0  ;;  %v24411_v46 = vpack.c.bf16 %v12010_v5, %v12006_v50  ;;  %v24413_v19 = vpack.c.bf16 %v12011_v36, %v12007_v32 }
 0x691   : > { %v11927_v7 = vmul.f32 %v24283_v45, %v11841_v35  ;;  %v11844_v44 = vmax.f32 %v11772_v15, 0.0  ;;  %v11845_v6 = vmax.f32 %v11548_v38, 0.0  ;;  %v11774_v48 = vpop.f32.mrb[98].mxu1  ;;  %v11550_v21 = vpop.f32.mrb[99].mxu0  ;;  %v24416_v23 = vpack.c.bf16 %v12012_v0, %v12008_v26 }
 0x692   : > { %v11929_v16 = vmul.f32 %v24289_v3, %v11843_v25  ;;  %v11928_v53 = vmul.f32 %v24292_v12, %v11842_v49  ;;  %v11847_v13 = vmax.f32 %v11774_v48, 0.0  ;;  %v11846_v33 = vmax.f32 %v11550_v21, 0.0  ;;  %v11776_v20 = vpop.f32.mrb[99].mxu1  ;;  %12952 = vmatprep.mubr.bf16.mxu0 %v24411_v46 }
 0x693   : > { %v11930_v32 = vmul.f32 %v24295_v37, %v11844_v44  ;;  %v11931_v50 = vmul.f32 %v24283_v45, %v11845_v6  ;;  %v11848_v36 = vmax.f32 %v11776_v20, 0.0  ;;  %13049 = vmatprep.mubr.bf16.mxu1 %v24416_v23  ;;  %12953 = vmatmul.mubr.bf16.gmra.mrb[160].mxu0 %v24409_v1  ;;  %v12013_v21 = vadd.f32 %v24298_v52, %v11927_v7 }
 0x694   : > { %v11933_v15 = vmul.f32 %v24289_v3, %v11847_v13  ;;  %v11932_v5 = vmul.f32 %v24292_v12, %v11846_v33  ;;  %13050 = vmatmul.mubr.bf16.gmra.mrb[160].mxu1 %v24413_v19  ;;  %v12015_v35 = vadd.f32 %v24301_v58, %v11929_v16  ;;  %v12014_v6 = vadd.f32 %v24305_v56, %v11928_v53 }
 0x695   : > { %v12017_v26 = vadd.f32 %v24298_v52, %v11931_v50  ;;  %v11934_v0 = vmul.f32 %v24295_v37, %v11848_v36  ;;  %v12016_v44 = vadd.f32 %v24311_v63, %v11930_v32 }
 0x696   : > { %v12019_v25 = vadd.f32 %v24301_v58, %v11933_v15  ;;  %v12018_v49 = vadd.f32 %v24305_v56, %v11932_v5  ;;  %v11554_v38 = vpop.f32.mrb[100].mxu0 }
 0x697   : > { %v12020_v48 = vadd.f32 %v24311_v63, %v11934_v0  ;;  %v11849_v13 = vmax.f32 %v11554_v38, 0.0  ;;  %v11780_v33 = vpop.f32.mrb[100].mxu1  ;;  %v11556_v7 = vpop.f32.mrb[101].mxu0  ;;  %v24437_v20 = vpack.c.bf16 %v12017_v26, %v12013_v21 }
 0x698   : > { %v11851_v50 = vmax.f32 %v11780_v33, 0.0  ;;  %v11850_v36 = vmax.f32 %v11556_v7, 0.0  ;;  %v11782_v28 = vpop.f32.mrb[101].mxu1  ;;  %v11558_v16 = vpop.f32.mrb[102].mxu0  ;;  %v24439_v24 = vpack.c.bf16 %v12018_v49, %v12014_v6  ;;  %v24441_v53 = vpack.c.bf16 %v12019_v25, %v12015_v35 }
 0x699   : > { %v11935_v15 = vmul.f32 %v24283_v45, %v11849_v13  ;;  %v11852_v5 = vmax.f32 %v11782_v28, 0.0  ;;  %v11853_v30 = vmax.f32 %v11558_v16, 0.0  ;;  %v11784_v32 = vpop.f32.mrb[102].mxu1  ;;  %v11560_v41 = vpop.f32.mrb[103].mxu0  ;;  %v24444_v0 = vpack.c.bf16 %v12020_v48, %v12016_v44 }
 0x69a   : > { %v11937_v38 = vmul.f32 %v24289_v3, %v11851_v50  ;;  %v11936_v21 = vmul.f32 %v24292_v12, %v11850_v36  ;;  %v11855_v26 = vmax.f32 %v11784_v32, 0.0  ;;  %v11854_v33 = vmax.f32 %v11560_v41, 0.0  ;;  %v11786_v7 = vpop.f32.mrb[103].mxu1  ;;  %12960 = vmatprep.mubr.bf16.mxu0 %v24439_v24 }
 0x69b   : > { %v11938_v35 = vmul.f32 %v24295_v37, %v11852_v5  ;;  %v11939_v6 = vmul.f32 %v24283_v45, %v11853_v30  ;;  %v11856_v25 = vmax.f32 %v11786_v7, 0.0  ;;  %13057 = vmatprep.mubr.bf16.mxu1 %v24444_v0  ;;  %12961 = vmatmul.mubr.bf16.gmra.mrb[164].mxu0 %v24437_v20  ;;  %v12021_v41 = vadd.f32 %v24298_v52, %v11935_v15 }
 0x69c   : > { %v11941_v28 = vmul.f32 %v24289_v3, %v11855_v26  ;;  %v11940_v49 = vmul.f32 %v24292_v12, %v11854_v33  ;;  %13058 = vmatmul.mubr.bf16.gmra.mrb[164].mxu1 %v24441_v53  ;;  %v12023_v13 = vadd.f32 %v24301_v58, %v11937_v38  ;;  %v12022_v30 = vadd.f32 %v24305_v56, %v11936_v21 }
 0x69d   : > { %v12025_v44 = vadd.f32 %v24298_v52, %v11939_v6  ;;  %v11942_v48 = vmul.f32 %v24295_v37, %v11856_v25  ;;  %v12024_v5 = vadd.f32 %v24311_v63, %v11938_v35 }
 0x69e   : > { %v12027_v50 = vadd.f32 %v24301_v58, %v11941_v28  ;;  %v12026_v36 = vadd.f32 %v24305_v56, %v11940_v49  ;;  %v11564_v16 = vpop.f32.mrb[104].mxu0 }
 0x69f   : > { %v12028_v32 = vadd.f32 %v24311_v63, %v11942_v48  ;;  %v11857_v26 = vmax.f32 %v11564_v16, 0.0  ;;  %v11790_v33 = vpop.f32.mrb[104].mxu1  ;;  %v11566_v15 = vpop.f32.mrb[105].mxu0  ;;  %v24465_v7 = vpack.c.bf16 %v12025_v44, %v12021_v41 }
 0x6a0   : > { %v11859_v6 = vmax.f32 %v11790_v33, 0.0  ;;  %v11858_v25 = vmax.f32 %v11566_v15, 0.0  ;;  %v11792_v62 = vpop.f32.mrb[105].mxu1  ;;  %v11568_v38 = vpop.f32.mrb[106].mxu0  ;;  %v24467_v22 = vpack.c.bf16 %v12026_v36, %v12022_v30  ;;  %v24469_v21 = vpack.c.bf16 %v12027_v50, %v12023_v13 }
 0x6a1   : > { %v11943_v28 = vmul.f32 %v24283_v45, %v11857_v26  ;;  %v11860_v49 = vmax.f32 %v11792_v62, 0.0  ;;  %v11861_v27 = vmax.f32 %v11568_v38, 0.0  ;;  %v11794_v35 = vpop.f32.mrb[106].mxu1  ;;  %v11570_v59 = vpop.f32.mrb[107].mxu0  ;;  %v24472_v48 = vpack.c.bf16 %v12028_v32, %v12024_v5 }
 0x6a2   : > { %v11945_v16 = vmul.f32 %v24289_v3, %v11859_v6  ;;  %v11944_v41 = vmul.f32 %v24292_v12, %v11858_v25  ;;  %v11863_v44 = vmax.f32 %v11794_v35, 0.0  ;;  %v11862_v33 = vmax.f32 %v11570_v59, 0.0  ;;  %v11796_v15 = vpop.f32.mrb[107].mxu1  ;;  %12968 = vmatprep.mubr.bf16.mxu0 %v24467_v22 }
 0x6a3   : > { %v11946_v13 = vmul.f32 %v24295_v37, %v11860_v49  ;;  %v11947_v30 = vmul.f32 %v24283_v45, %v11861_v27  ;;  %v11864_v50 = vmax.f32 %v11796_v15, 0.0  ;;  %13065 = vmatprep.mubr.bf16.mxu1 %v24472_v48  ;;  %12969 = vmatmul.mubr.bf16.gmra.mrb[168].mxu0 %v24465_v7  ;;  %v12029_v59 = vadd.f32 %v24298_v52, %v11943_v28 }
 0x6a4   : > { %v11949_v62 = vmul.f32 %v24289_v3, %v11863_v44  ;;  %v11948_v36 = vmul.f32 %v24292_v12, %v11862_v33  ;;  %13066 = vmatmul.mubr.bf16.gmra.mrb[168].mxu1 %v24469_v21  ;;  %v12031_v26 = vadd.f32 %v24301_v58, %v11945_v16  ;;  %v12030_v27 = vadd.f32 %v24305_v56, %v11944_v41 }
 0x6a5   : > { %v12033_v5 = vadd.f32 %v24298_v52, %v11947_v30  ;;  %v11950_v32 = vmul.f32 %v24295_v37, %v11864_v50  ;;  %v12032_v49 = vadd.f32 %v24311_v63, %v11946_v13 }
 0x6a6   : > { %v12035_v6 = vadd.f32 %v24301_v58, %v11949_v62  ;;  %v12034_v25 = vadd.f32 %v24305_v56, %v11948_v36  ;;  %v11574_v38 = vpop.f32.mrb[108].mxu0 }
 0x6a7   : > { %v12036_v35 = vadd.f32 %v24311_v63, %v11950_v32  ;;  %v11865_v44 = vmax.f32 %v11574_v38, 0.0  ;;  %v11800_v33 = vpop.f32.mrb[108].mxu1  ;;  %v11576_v28 = vpop.f32.mrb[109].mxu0  ;;  %v24493_v15 = vpack.c.bf16 %v12033_v5, %v12029_v59 }
 0x6a8   : > { %v11867_v30 = vmax.f32 %v11800_v33, 0.0  ;;  %v11866_v50 = vmax.f32 %v11576_v28, 0.0  ;;  %v11802_v40 = vpop.f32.mrb[109].mxu1  ;;  %v11578_v16 = vpop.f32.mrb[110].mxu0  ;;  %v24495_v8 = vpack.c.bf16 %v12034_v25, %v12030_v27  ;;  %v24497_v41 = vpack.c.bf16 %v12035_v6, %v12031_v26 }
 0x6a9   : > { %v11951_v62 = vmul.f32 %v24283_v45, %v11865_v44  ;;  %v11868_v36 = vmax.f32 %v11802_v40, 0.0  ;;  %v11869_v34 = vmax.f32 %v11578_v16, 0.0  ;;  %v11804_v13 = vpop.f32.mrb[110].mxu1  ;;  %v11580_v31 = vpop.f32.mrb[111].mxu0  ;;  %v24500_v32 = vpack.c.bf16 %v12036_v35, %v12032_v49 }
 0x6aa   : > { %v11953_v38 = vmul.f32 %v24289_v3, %v11867_v30  ;;  %v11952_v59 = vmul.f32 %v24292_v12, %v11866_v50  ;;  %v11871_v5 = vmax.f32 %v11804_v13, 0.0  ;;  %v11870_v33 = vmax.f32 %v11580_v31, 0.0  ;;  %v11806_v28 = vpop.f32.mrb[111].mxu1  ;;  %12976 = vmatprep.mubr.bf16.mxu0 %v24495_v8 }
 0x6ab   : > { %v24506_v26 = vadd.f32 %v24298_v52, %v11951_v62  ;;  %v11954_v27 = vmul.f32 %v24295_v37, %v11868_v36  ;;  %v11955_v40 = vmul.f32 %v24283_v45, %v11869_v34  ;;  %v11872_v6 = vmax.f32 %v11806_v28, 0.0  ;;  %13073 = vmatprep.mubr.bf16.mxu1 %v24500_v32  ;;  %12977 = vmatmul.mubr.bf16.gmra.mrb[172].mxu0 %v24493_v15 }
 0x6ac   : > { %v24513_v25 = vadd.f32 %v24301_v58, %v11953_v38  ;;  %v24516_v31 = vadd.f32 %v24305_v56, %v11952_v59  ;;  %v11957_v49 = vmul.f32 %v24289_v3, %v11871_v5  ;;  %v11956_v35 = vmul.f32 %v24292_v12, %v11870_v33  ;;  %13074 = vmatmul.mubr.bf16.gmra.mrb[172].mxu1 %v24497_v41  ;;  %v19268_v59 = vld [vmem:[%s24912_s10 + $0x380] sm:$0xff]  }
 0x6ad   : > { %v24522_v44 = vadd.f32 %v24311_v63, %v11954_v27  ;;  %v24525_v34 = vadd.f32 %v24298_v52, %v11955_v40  ;;  %v11958_v45 = vmul.f32 %v24295_v37, %v11872_v6  ;;  %13403 = vmatprep.mubr.bf16.mxu0 %v24327_v11  ;;  %13500 = vmatprep.mubr.bf16.mxu1 %v24332_v57  ;;  %v19269_v27 = vld [vmem:[%s24912_s10 + $0x348] sm:$0xff]  }
 0x6ae   : > { %v24531_v30 = vadd.f32 %v24301_v58, %v11957_v49  ;;  %v24534_v3 = vadd.f32 %v24305_v56, %v11956_v35  ;;  %v16535_v12 = vpop.f32.mrb[112].mxu0  ;;  %v19267_v58 = vld [vmem:[%s24912_s10 + $0x300] sm:$0xff]   ;;  %v19270_v49 = vld [vmem:[%s24912_s10 + $0x3c8] sm:$0xff]  }
 0x6af   : > { %v24537_v50 = vadd.f32 %v24311_v63, %v11958_v45  ;;  %v16599_v16 = vpop.f32.mrb[112].mxu1  ;;  %v16536_v62 = vpop.f32.mrb[113].mxu0  ;;  %v12073_v52 = vpack.c.bf16 %v24525_v34, %v24506_v26  ;;  %v19271_v35 = vld [vmem:[%s24912_s10 + $0x308] sm:$0xff]  }
 0x6b0   : > { %v16537_v37 = vadd.f32 %v16536_v62, %v16535_v12  ;;  %v16600_v36 = vpop.f32.mrb[113].mxu1  ;;  %v16538_v11 = vpop.f32.mrb[114].mxu0  ;;  %v12074_v56 = vpack.c.bf16 %v24534_v3, %v24516_v31  ;;  %v12075_v57 = vpack.c.bf16 %v24531_v30, %v24513_v25  ;;  %v19273_v12 = vld [vmem:[%s24912_s10 + $0x350] sm:$0xff]  }
 0x6b1   : > { %v16601_v63 = vadd.f32 %v16600_v36, %v16599_v16  ;;  %v16602_v13 = vpop.f32.mrb[114].mxu1  ;;  %v16539_v38 = vpop.f32.mrb[115].mxu0  ;;  %v12076_v5 = vpack.c.bf16 %v24537_v50, %v24522_v44  ;;  %v19274_v16 = vld [vmem:[%s24912_s10 + $0x3d0] sm:$0xff]  }
 0x6b2   : > { %v16540_v33 = vadd.f32 %v16539_v38, %v16538_v11  ;;  %v16603_v28 = vpop.f32.mrb[115].mxu1 }
 0x6b3   : > { %v24556_v40 = vadd.f32 %v16601_v63, %v16537_v37  ;;  %v16604_v6 = vadd.f32 %v16603_v28, %v16602_v13  ;;  %13404 = vmatmul.mubr.bf16.vlgmr.msra.gmra.mrb[176].mxu0 %v24325_v43  ;;  %v19272_v43 = vld [vmem:[%s24912_s10 + $0x388] sm:$0xff]   ;;  %v19277_v28 = vld [vmem:[%s24912_s10 + $0x358] sm:$0xff]  }
 0x6b4   : > { %13501 = vmatmul.mubr.bf16.vlgmr.msra.gmra.mrb[176].mxu1 %v24329_v4  ;;  %16904 = vmatpush3.bf16.msra.mxu0 %v19267_v58 }
 0x6b5   : > { %v24566_v45 = vadd.f32 %v16604_v6, %v16540_v33  ;;  %16968 = vmatpush3.bf16.msra.mxu1 %v19268_v59  ;;  %13411 = vmatprep.mubr.bf16.mxu0 %v24355_v17  ;;  %v19276_v33 = vld [vmem:[%s24912_s10 + $0x390] sm:$0xff]  }
 0x6b6   : > { %13508 = vmatprep.mubr.bf16.mxu1 %v24360_v2  ;;  %v16541_v4 = vpop.f32.mrb[116].mxu0  ;;  %16905 = vmatprep.subr.bf16.mxu0 %v19269_v27  ;;  %v19275_v2 = vld [vmem:[%s24912_s10 + $0x310] sm:$0xff]  }
 0x6b7   : > { %v16605_v62 = vpop.f32.mrb[116].mxu1  ;;  %v16542_v37 = vpop.f32.mrb[117].mxu0  ;;  %16969 = vmatprep.subr.bf16.mxu1 %v19270_v49  ;;  %v19278_v49 = vld [vmem:[%s24912_s10 + $0x3d8] sm:$0xff]  }
 0x6b8   : > { %v16543_v17 = vadd.f32 %v16542_v37, %v16541_v4  ;;  %v16606_v36 = vpop.f32.mrb[117].mxu1  ;;  %v16544_v11 = vpop.f32.mrb[118].mxu0  ;;  %16906 = vmatpush3.bf16.msra.mxu0 %v19271_v35 }
 0x6b9   : > { %v16607_v58 = vadd.f32 %v16606_v36, %v16605_v62  ;;  %v16608_v63 = vpop.f32.mrb[118].mxu1  ;;  %v16545_v13 = vpop.f32.mrb[119].mxu0  ;;  %16970 = vmatpush3.bf16.msra.mxu1 %v19272_v43  ;;  %16907 = vmatprep.subr.bf16.mxu0 %v19273_v12  ;;  %v19279_v43 = vld [vmem:[%s24912_s10 + $0x318] sm:$0xff]  }
 0x6ba   : > { %v16546_v38 = vadd.f32 %v16545_v13, %v16544_v11  ;;  %v16609_v59 = vpop.f32.mrb[119].mxu1  ;;  %16971 = vmatprep.subr.bf16.mxu1 %v19274_v16 }
 0x6bb   : > { %v24588_v27 = vadd.f32 %v16607_v58, %v16543_v17  ;;  %v16610_v6 = vadd.f32 %v16609_v59, %v16608_v63  ;;  %13412 = vmatmul.mubr.bf16.gmra.mrb[180].mxu0 %v24353_v42  ;;  %v19280_v42 = vld [vmem:[%s24912_s10 + $0x398] sm:$0xff]   ;;  %v19283_v58 = vld [vmem:[%s24912_s10 + $0x320] sm:$0xff]  }
 0x6bc   : > { %13509 = vmatmul.mubr.bf16.gmra.mrb[180].mxu1 %v24357_v18  ;;  %13419 = vmatprep.mubr.bf16.mxu0 %v24383_v55  ;;  %v19281_v55 = vld [vmem:[%s24912_s10 + $0x360] sm:$0xff]  }
 0x6bd   : > { %v24596_v35 = vadd.f32 %v16610_v6, %v16546_v38  ;;  %13516 = vmatprep.mubr.bf16.mxu1 %v24388_v14  ;;  %16908 = vmatpush3.bf16.msra.mxu0 %v19275_v2  ;;  %v19282_v14 = vld [vmem:[%s24912_s10 + $0x3e0] sm:$0xff]   ;;  %v19285_v38 = vld [vmem:[%s24912_s10 + $0x368] sm:$0xff]  }
 0x6be   : > { %v16547_v12 = vpop.f32.mrb[120].mxu0  ;;  %16972 = vmatpush3.bf16.msra.mxu1 %v19276_v33  ;;  %16909 = vmatprep.subr.bf16.mxu0 %v19277_v28  ;;  %v19284_v2 = vld [vmem:[%s24912_s10 + $0x3a0] sm:$0xff]   ;;  %v19286_v28 = vld [vmem:[%s24912_s10 + $0x3e8] sm:$0xff]  }
 0x6bf   : > { %v16611_v18 = vpop.f32.mrb[120].mxu1  ;;  %v16548_v4 = vpop.f32.mrb[121].mxu0  ;;  %16973 = vmatprep.subr.bf16.mxu1 %v19278_v49  ;;  %v19287_v49 = vld [vmem:[%s24912_s10 + $0x328] sm:$0xff]  }
 0x6c0   : > { %v16549_v16 = vadd.f32 %v16548_v4, %v16547_v12  ;;  %v16612_v62 = vpop.f32.mrb[121].mxu1  ;;  %v16550_v37 = vpop.f32.mrb[122].mxu0 }
 0x6c1   : > { %v16613_v17 = vadd.f32 %v16612_v62, %v16611_v18  ;;  %v16614_v36 = vpop.f32.mrb[122].mxu1  ;;  %v16551_v11 = vpop.f32.mrb[123].mxu0  ;;  %16910 = vmatpush3.bf16.msra.mxu0 %v19279_v43  ;;  %v19291_v62 = vld [vmem:[%s24912_s10 + $0x330] sm:$0xff]  }
 0x6c2   : > { %v16552_v63 = vadd.f32 %v16551_v11, %v16550_v37  ;;  %v16615_v13 = vpop.f32.mrb[123].mxu1  ;;  %16974 = vmatpush3.bf16.msra.mxu1 %v19280_v42  ;;  %16911 = vmatprep.subr.bf16.mxu0 %v19281_v55  ;;  %v19293_v11 = vld [vmem:[%s24912_s10 + $0x378] sm:$0xff]  }
 0x6c3   : > { %v24620_v59 = vadd.f32 %v16613_v17, %v16549_v16  ;;  %v16616_v33 = vadd.f32 %v16615_v13, %v16614_v36  ;;  %13420 = vmatmul.mubr.bf16.gmra.mrb[184].mxu0 %v24381_v54  ;;  %16975 = vmatprep.subr.bf16.mxu1 %v19282_v14  ;;  %v19288_v54 = vld [vmem:[%s24912_s10 + $0x3a8] sm:$0xff]   ;;  %v19292_v36 = vld [vmem:[%s24912_s10 + $0x3b0] sm:$0xff]   ;;  %v19294_v13 = vld [vmem:[%s24912_s10 + $0x3f8] sm:$0xff]  }
 0x6c4   : > { %13517 = vmatmul.mubr.bf16.gmra.mrb[184].mxu1 %v24385_v10  ;;  %13427 = vmatprep.mubr.bf16.mxu0 %v24411_v46  ;;  %v19289_v46 = vld [vmem:[%s24912_s10 + $0x370] sm:$0xff]  }
 0x6c5   : > { %v24628_v6 = vadd.f32 %v16616_v33, %v16552_v63  ;;  %13524 = vmatprep.mubr.bf16.mxu1 %v24416_v23  ;;  %16912 = vmatpush3.bf16.msra.mxu0 %v19283_v58  ;;  %v19290_v23 = vld [vmem:[%s24912_s10 + $0x3f0] sm:$0xff]  }
 0x6c6   : > { %v16553_v43 = vpop.f32.mrb[124].mxu0  ;;  %16976 = vmatpush3.bf16.msra.mxu1 %v19284_v2  ;;  %16913 = vmatprep.subr.bf16.mxu0 %v19285_v38  ;;  %v19295_v38 = vld [vmem:[%s24912_s10 + $0x338] sm:$0xff]  }
 0x6c7   : > { %v16617_v10 = vpop.f32.mrb[124].mxu1  ;;  %v16554_v12 = vpop.f32.mrb[125].mxu0  ;;  %16977 = vmatprep.subr.bf16.mxu1 %v19286_v28 }
 0x6c8   : > { %v16555_v42 = vadd.f32 %v16554_v12, %v16553_v43  ;;  %v16618_v55 = vpop.f32.mrb[125].mxu1  ;;  %v16556_v18 = vpop.f32.mrb[126].mxu0 }
 0x6c9   : > { %v16619_v4 = vadd.f32 %v16618_v55, %v16617_v10  ;;  %v16620_v14 = vpop.f32.mrb[126].mxu1  ;;  %v16557_v16 = vpop.f32.mrb[127].mxu0  ;;  %16914 = vmatpush3.bf16.msra.mxu0 %v19287_v49 }
 0x6ca   : > { %v16558_v37 = vadd.f32 %v16557_v16, %v16556_v18  ;;  %v16621_v17 = vpop.f32.mrb[127].mxu1  ;;  %16978 = vmatpush3.bf16.msra.mxu1 %v19288_v54  ;;  %16915 = vmatprep.subr.bf16.mxu0 %v19289_v46 }
 0x6cb   : > { %v24652_v58 = vadd.f32 %v16619_v4, %v16555_v42  ;;  %v16622_v63 = vadd.f32 %v16621_v17, %v16620_v14  ;;  %13428 = vmatmul.mubr.bf16.gmra.mrb[188].mxu0 %v24409_v1  ;;  %16979 = vmatprep.subr.bf16.mxu1 %v19290_v23  ;;  %v19296_v1 = vld [vmem:[%s24912_s10 + $0x3b8] sm:$0xff]  }
 0x6cc   : > { %13525 = vmatmul.mubr.bf16.gmra.mrb[188].mxu1 %v24413_v19  ;;  %13435 = vmatprep.mubr.bf16.mxu0 %v24439_v24 }
 0x6cd   : > { %v24660_v2 = vadd.f32 %v16622_v63, %v16558_v37  ;;  %13532 = vmatprep.mubr.bf16.mxu1 %v24444_v0  ;;  %16916 = vmatpush3.bf16.msra.mxu0 %v19291_v62 }
 0x6ce   : > { %v16559_v33 = vpop.f32.mrb[128].mxu0  ;;  %16980 = vmatpush3.bf16.msra.mxu1 %v19292_v36  ;;  %16917 = vmatprep.subr.bf16.mxu0 %v19293_v11 }
 0x6cf   : > { %v16623_v28 = vpop.f32.mrb[128].mxu1  ;;  %v16560_v19 = vpop.f32.mrb[129].mxu0  ;;  %16981 = vmatprep.subr.bf16.mxu1 %v19294_v13 }
 0x6d0   : > { %v16561_v24 = vadd.f32 %v16560_v19, %v16559_v33  ;;  %v16624_v49 = vpop.f32.mrb[129].mxu1  ;;  %v16562_v43 = vpop.f32.mrb[130].mxu0 }
 0x6d1   : > { %v16625_v54 = vadd.f32 %v16624_v49, %v16623_v28  ;;  %v16626_v0 = vpop.f32.mrb[130].mxu1  ;;  %v16563_v46 = vpop.f32.mrb[131].mxu0  ;;  %16918 = vmatpush3.bf16.msra.mxu0 %v19295_v38 }
 0x6d2   : > { %v16564_v10 = vadd.f32 %v16563_v46, %v16562_v43  ;;  %v16627_v12 = vpop.f32.mrb[131].mxu1  ;;  %16982 = vmatpush3.bf16.msra.mxu1 %v19296_v1 }
 0x6d3   : > { %v24669_v23 = vadd.f32 %v16625_v54, %v16561_v24  ;;  %v16628_v42 = vadd.f32 %v16627_v12, %v16626_v0  ;;  %13436 = vmatmul.mubr.bf16.gmra.mrb[192].mxu0 %v24437_v20 }
 0x6d4   : > { %13533 = vmatmul.mubr.bf16.gmra.mrb[192].mxu1 %v24441_v53  ;;  %13443 = vmatprep.mubr.bf16.mxu0 %v24467_v22 }
 0x6d5   : > { %v24674_v55 = vadd.f32 %v16628_v42, %v16564_v10  ;;  %13540 = vmatprep.mubr.bf16.mxu1 %v24472_v48 }
 0x6d6   : > { %v16565_v18 = vpop.f32.mrb[132].mxu0 }
 0x6d7   : > { %v16629_v4 = vpop.f32.mrb[132].mxu1  ;;  %v16566_v14 = vpop.f32.mrb[133].mxu0 }
 0x6d8   : > { %v16567_v16 = vadd.f32 %v16566_v14, %v16565_v18  ;;  %v16630_v62 = vpop.f32.mrb[133].mxu1  ;;  %v16568_v37 = vpop.f32.mrb[134].mxu0 }
 0x6d9   : > { %v16631_v17 = vadd.f32 %v16630_v62, %v16629_v4  ;;  %v16632_v36 = vpop.f32.mrb[134].mxu1  ;;  %v16569_v11 = vpop.f32.mrb[135].mxu0 }
 0x6da   : > { %v16570_v63 = vadd.f32 %v16569_v11, %v16568_v37  ;;  %v16633_v13 = vpop.f32.mrb[135].mxu1 }
 0x6db   : > { %v24677_v20 = vadd.f32 %v16631_v17, %v16567_v16  ;;  %v16634_v53 = vadd.f32 %v16633_v13, %v16632_v36  ;;  %13444 = vmatmul.mubr.bf16.gmra.mrb[196].mxu0 %v24465_v7  ;;  %v25004_v13 = vld [vmem:[#allocation20_spill] sm:$0xff] }
 0x6dc   : > { %13541 = vmatmul.mubr.bf16.gmra.mrb[196].mxu1 %v24469_v21  ;;  %13451 = vmatprep.mubr.bf16.mxu0 %v24495_v8 }
 0x6dd   : > { %v24682_v22 = vadd.f32 %v16634_v53, %v16570_v63  ;;  %13548 = vmatprep.mubr.bf16.mxu1 %v24500_v32  ;;  %v25003_v63 = vld [vmem:[#allocation19_spill] sm:$0xff] }
 0x6de   : > { %v16571_v48 = vpop.f32.mrb[136].mxu0  ;;  %v25007_v53 = vld [vmem:[#allocation23_spill] sm:$0xff] }
 0x6df   : > { %v16635_v38 = vpop.f32.mrb[136].mxu1  ;;  %v16572_v33 = vpop.f32.mrb[137].mxu0 }
 0x6e0   : > { %v16573_v1 = vadd.f32 %v16572_v33, %v16571_v48  ;;  %v16636_v28 = vpop.f32.mrb[137].mxu1  ;;  %v16574_v19 = vpop.f32.mrb[138].mxu0  ;;  %v25011_v48 = vld [vmem:[#allocation27_spill] sm:$0xff]  ;;  %v25014_v33 = vld [vmem:[#allocation26_spill] sm:$0xff] }
 0x6e1   : > { %v16637_v24 = vadd.f32 %v16636_v28, %v16635_v38  ;;  %v16638_v49 = vpop.f32.mrb[138].mxu1  ;;  %v16575_v43 = vpop.f32.mrb[139].mxu0  ;;  %v25013_v38 = vld [vmem:[#allocation25_spill] sm:$0xff]  ;;  %v25016_v28 = vld [vmem:[#allocation32_spill] sm:$0xff] }
 0x6e2   : > { %v16576_v54 = vadd.f32 %v16575_v43, %v16574_v19  ;;  %v16639_v0 = vpop.f32.mrb[139].mxu1  ;;  %v25017_v19 = vld [vmem:[#allocation29_spill] sm:$0xff]  ;;  %v25020_v43 = vld [vmem:[#allocation36_spill] sm:$0xff] }
 0x6e3   : > { %v24685_v7 = vadd.f32 %v16637_v24, %v16573_v1  ;;  %v16640_v21 = vadd.f32 %v16639_v0, %v16638_v49  ;;  %13452 = vmatmul.mubr.bf16.gmra.mrb[200].mxu0 %v24493_v15  ;;  %v25015_v1 = vld [vmem:[#allocation31_spill] sm:$0xff]  ;;  %v25018_v24 = vld [vmem:[#allocation30_spill] sm:$0xff] }
 0x6e4   : > { %13549 = vmatmul.mubr.bf16.gmra.mrb[200].mxu1 %v24497_v41  ;;  %13459 = vmatprep.mubr.bf16.mxu0 %v12074_v56  ;;  %v25019_v49 = vld [vmem:[#allocation35_spill] sm:$0xff]  ;;  %v25022_v0 = vld [vmem:[#allocation34_spill] sm:$0xff] }
 0x6e5   : > { %v24692_v8 = vadd.f32 %v16640_v21, %v16576_v54  ;;  %13556 = vmatprep.mubr.bf16.mxu1 %v12076_v5  ;;  %v25021_v54 = vld [vmem:[#allocation33_spill] sm:$0xff]  ;;  %v25023_v21 = vmov 0  }
 0x6e6   : > { %v16577_v32 = vpop.f32.mrb[140].mxu0 }
 0x6e7   : > { %v16641_v46 = vpop.f32.mrb[140].mxu1  ;;  %v16578_v10 = vpop.f32.mrb[141].mxu0 }
 0x6e8   : > { %v16579_v12 = vadd.f32 %v16578_v10, %v16577_v32  ;;  %v16642_v42 = vpop.f32.mrb[141].mxu1  ;;  %v16580_v18 = vpop.f32.mrb[142].mxu0 }
 0x6e9   : > { %v16643_v4 = vadd.f32 %v16642_v42, %v16641_v46  ;;  %v16644_v15 = vpop.f32.mrb[142].mxu1  ;;  %v16581_v14 = vpop.f32.mrb[143].mxu0 }
 0x6ea   : > { %v16582_v41 = vadd.f32 %v16581_v14, %v16580_v18  ;;  %v16645_v16 = vpop.f32.mrb[143].mxu1 }
 0x6eb   : > { %v24697_v62 = vadd.f32 %v16643_v4, %v16579_v12  ;;  %v16646_v31 = vadd.f32 %v16645_v16, %v16644_v15  ;;  %13460 = vmatmul.mubr.bf16.gmra.mrb[204].mxu0 %v12073_v52 }
 0x6ec   : > { %13557 = vmatmul.mubr.bf16.gmra.mrb[204].mxu1 %v12075_v57  ;;  %13902 = vmatprep.mubr.bf16.mxu0 %v23685_v39 }
 0x6ed   : > { %v24706_v44 = vadd.f32 %v16646_v31, %v16582_v41  ;;  %13999 = vmatprep.mubr.bf16.mxu1 %v23687_v60 }
 0x6ee   : > { %v16663_v3 = vpop.f32.mrb[144].mxu0 }
 0x6ef   : > { %v16664_v50 = vpop.f32.mrb[145].mxu0  ;;  %v16727_v56 = vpop.f32.mrb[144].mxu1 }
 0x6f0   : > { %v16665_v5 = vadd.f32 %v16664_v50, %v16663_v3  ;;  %v16666_v37 = vpop.f32.mrb[146].mxu0  ;;  %v16728_v17 = vpop.f32.mrb[145].mxu1 }
 0x6f1   : > { %v16667_v36 = vpop.f32.mrb[147].mxu0  ;;  %v16729_v11 = vadd.f32 %v16728_v17, %v16727_v56  ;;  %v16730_v26 = vpop.f32.mrb[146].mxu1 }
 0x6f2   : > { %v12923_v34 = vadd.f32 %v16665_v5, %v24556_v40  ;;  %v16668_v52 = vadd.f32 %v16667_v36, %v16666_v37  ;;  %v16731_v25 = vpop.f32.mrb[147].mxu1  ;;  %v25002_v40 = vld [vmem:[#allocation16_spill] sm:$0xff] }
 0x6f3   : > { %v16732_v30 = vadd.f32 %v16731_v25, %v16730_v26  ;;  %13903 = vmatmul.mubr.bf16.vlgmr.msra.gmra.mrb[208].mxu0 %v24988_v47  ;;  %v25005_v47 = vld [vmem:[#allocation17_spill] sm:$0xff] }
 0x6f4   : > { %v12926_v39 = vadd.f32 %v16668_v52, %v24566_v45  ;;  %v24712_v57 = vadd.f32 %v16729_v11, %v12923_v34  ;;  %14000 = vmatmul.mubr.bf16.vlgmr.msra.gmra.mrb[208].mxu1 %v24989_v51  ;;  %13910 = vmatprep.mubr.bf16.mxu0 %v23737_v9  ;;  %v25006_v45 = vld [vmem:[#allocation18_spill] sm:$0xff]  ;;  %v25008_v51 = vld [vmem:[#allocation24_spill] sm:$0xff]  ;;  %v25009_v9 = vld [vmem:[#allocation21_spill] sm:$0xff] }
 0x6f5   : > { %14007 = vmatprep.mubr.bf16.mxu1 %v23739_v29  ;;  %v25010_v29 = vld [vmem:[#allocation22_spill] sm:$0xff] }
 0x6f6   : > { %v24717_v60 = vadd.f32 %v16732_v30, %v12926_v39 }
 0x6fb   : > { %13911 = vmatmul.mubr.bf16.gmra.mrb[212].mxu0 %v24990_v61  ;;  %v25012_v61 = vld [vmem:[#allocation28_spill] sm:$0xff] }
 0x6fc   : > { %14008 = vmatmul.mubr.bf16.gmra.mrb[212].mxu1 %v25002_v40  ;;  %13918 = vmatprep.mubr.bf16.mxu0 %v25003_v63 }
 0x6fd   : > { %14015 = vmatprep.mubr.bf16.mxu1 %v25004_v13 }
 0x703   : > { %13919 = vmatmul.mubr.bf16.gmra.mrb[216].mxu0 %v25005_v47 }
 0x704   : > { %14016 = vmatmul.mubr.bf16.gmra.mrb[216].mxu1 %v25006_v45  ;;  %13926 = vmatprep.mubr.bf16.mxu0 %v25007_v53 }
 0x705   : > { %14023 = vmatprep.mubr.bf16.mxu1 %v25008_v51 }
 0x70b   : > { %13927 = vmatmul.mubr.bf16.gmra.mrb[220].mxu0 %v25009_v9 }
 0x70c   : > { %14024 = vmatmul.mubr.bf16.gmra.mrb[220].mxu1 %v25010_v29  ;;  %13934 = vmatprep.mubr.bf16.mxu0 %v25011_v48 }
 0x70d   : > { %14031 = vmatprep.mubr.bf16.mxu1 %v25012_v61 }
 0x713   : > { %13935 = vmatmul.mubr.bf16.gmra.mrb[224].mxu0 %v25013_v38 }
 0x714   : > { %14032 = vmatmul.mubr.bf16.gmra.mrb[224].mxu1 %v25014_v33  ;;  %13942 = vmatprep.mubr.bf16.mxu0 %v25015_v1 }
 0x715   : > { %14039 = vmatprep.mubr.bf16.mxu1 %v25016_v28 }
 0x71b   : > { %13943 = vmatmul.mubr.bf16.gmra.mrb[228].mxu0 %v25017_v19 }
 0x71c   : > { %14040 = vmatmul.mubr.bf16.gmra.mrb[228].mxu1 %v25018_v24  ;;  %13950 = vmatprep.mubr.bf16.mxu0 %v25019_v49 }
 0x71d   : > { %14047 = vmatprep.mubr.bf16.mxu1 %v25020_v43 }
 0x723   : > { %13951 = vmatmul.mubr.bf16.gmra.mrb[232].mxu0 %v25021_v54 }
 0x724   : > { %14048 = vmatmul.mubr.bf16.gmra.mrb[232].mxu1 %v25022_v0  ;;  %13958 = vmatprep.mubr.bf16.mxu0 %v25023_v21 }
 0x725   : > { %14055 = vmatprep.mubr.bf16.mxu1 %v25023_v21 }
 0x72b   : > { %13959 = vmatmul.mubr.bf16.gmra.mrb[236].mxu0 %v25023_v21 }
 0x72c   : > { %14056 = vmatmul.mubr.bf16.gmra.mrb[236].mxu1 %v25023_v21 }
 0x74e   : > { %v16669_v32 = vpop.f32.mrb[148].mxu0 }
 0x74f   : > { %v16733_v46 = vpop.f32.mrb[148].mxu1  ;;  %v16670_v10 = vpop.f32.mrb[149].mxu0 }
 0x750   : > { %v16671_v12 = vadd.f32 %v16670_v10, %v16669_v32  ;;  %v16734_v42 = vpop.f32.mrb[149].mxu1  ;;  %v16672_v18 = vpop.f32.mrb[150].mxu0 }
 0x751   : > { %v16735_v4 = vadd.f32 %v16734_v42, %v16733_v46  ;;  %v16736_v15 = vpop.f32.mrb[150].mxu1  ;;  %v16673_v14 = vpop.f32.mrb[151].mxu0 }
 0x752   : > { %v12931_v41 = vadd.f32 %v16671_v12, %v24588_v27  ;;  %v16674_v16 = vadd.f32 %v16673_v14, %v16672_v18  ;;  %v16737_v31 = vpop.f32.mrb[151].mxu1 }
 0x753   : > { %v16738_v3 = vadd.f32 %v16737_v31, %v16736_v15 }
 0x754   : > { %v24746_v50 = vadd.f32 %v16735_v4, %v12931_v41  ;;  %v12934_v56 = vadd.f32 %v16674_v16, %v24596_v35 }
 0x756   : > { %v24749_v5 = vadd.f32 %v16738_v3, %v12934_v56  ;;  %v16675_v37 = vpop.f32.mrb[152].mxu0 }
 0x757   : > { %v16739_v17 = vpop.f32.mrb[152].mxu1  ;;  %v16676_v36 = vpop.f32.mrb[153].mxu0 }
 0x758   : > { %v16677_v11 = vadd.f32 %v16676_v36, %v16675_v37  ;;  %v16740_v26 = vpop.f32.mrb[153].mxu1  ;;  %v16678_v34 = vpop.f32.mrb[154].mxu0 }
 0x759   : > { %v16741_v52 = vadd.f32 %v16740_v26, %v16739_v17  ;;  %v16742_v25 = vpop.f32.mrb[154].mxu1  ;;  %v16679_v30 = vpop.f32.mrb[155].mxu0 }
 0x75a   : > { %v12939_v27 = vadd.f32 %v16677_v11, %v24620_v59  ;;  %v16680_v39 = vadd.f32 %v16679_v30, %v16678_v34  ;;  %v16743_v40 = vpop.f32.mrb[155].mxu1 }
 0x75b   : > { %v16744_v63 = vadd.f32 %v16743_v40, %v16742_v25 }
 0x75c   : > { %v24752_v13 = vadd.f32 %v16741_v52, %v12939_v27  ;;  %v12942_v35 = vadd.f32 %v16680_v39, %v24628_v6 }
 0x75e   : > { %v24755_v47 = vadd.f32 %v16744_v63, %v12942_v35  ;;  %v16681_v45 = vpop.f32.mrb[156].mxu0 }
 0x75f   : > { %v16745_v53 = vpop.f32.mrb[156].mxu1  ;;  %v16682_v51 = vpop.f32.mrb[157].mxu0 }
 0x760   : > { %v16683_v9 = vadd.f32 %v16682_v51, %v16681_v45  ;;  %v16746_v29 = vpop.f32.mrb[157].mxu1  ;;  %v16684_v48 = vpop.f32.mrb[158].mxu0 }
 0x761   : > { %v16747_v61 = vadd.f32 %v16746_v29, %v16745_v53  ;;  %v16748_v38 = vpop.f32.mrb[158].mxu1  ;;  %v16685_v33 = vpop.f32.mrb[159].mxu0 }
 0x762   : > { %v12947_v59 = vadd.f32 %v16683_v9, %v24652_v58  ;;  %v16686_v1 = vadd.f32 %v16685_v33, %v16684_v48  ;;  %v16749_v28 = vpop.f32.mrb[159].mxu1 }
 0x763   : > { %v16750_v19 = vadd.f32 %v16749_v28, %v16748_v38 }
 0x764   : > { %v24758_v24 = vadd.f32 %v16747_v61, %v12947_v59  ;;  %v12950_v6 = vadd.f32 %v16686_v1, %v24660_v2 }
 0x766   : > { %v24761_v49 = vadd.f32 %v16750_v19, %v12950_v6  ;;  %v16687_v43 = vpop.f32.mrb[160].mxu0 }
 0x767   : > { %v16751_v54 = vpop.f32.mrb[160].mxu1  ;;  %v16688_v0 = vpop.f32.mrb[161].mxu0 }
 0x768   : > { %v16689_v21 = vadd.f32 %v16688_v0, %v16687_v43  ;;  %v16752_v32 = vpop.f32.mrb[161].mxu1  ;;  %v16690_v46 = vpop.f32.mrb[162].mxu0 }
 0x769   : > { %v16753_v10 = vadd.f32 %v16752_v32, %v16751_v54  ;;  %v16754_v12 = vpop.f32.mrb[162].mxu1  ;;  %v16691_v42 = vpop.f32.mrb[163].mxu0 }
 0x76a   : > { %v12955_v58 = vadd.f32 %v16689_v21, %v24669_v23  ;;  %v16692_v18 = vadd.f32 %v16691_v42, %v16690_v46  ;;  %v16755_v4 = vpop.f32.mrb[163].mxu1 }
 0x76b   : > { %v16756_v15 = vadd.f32 %v16755_v4, %v16754_v12 }
 0x76c   : > { %v24764_v14 = vadd.f32 %v16753_v10, %v12955_v58  ;;  %v12958_v2 = vadd.f32 %v16692_v18, %v24674_v55 }
 0x76e   : > { %v24767_v41 = vadd.f32 %v16756_v15, %v12958_v2  ;;  %v16693_v16 = vpop.f32.mrb[164].mxu0 }
 0x76f   : > { %v16757_v31 = vpop.f32.mrb[164].mxu1  ;;  %v16694_v3 = vpop.f32.mrb[165].mxu0 }
 0x770   : > { %v16695_v56 = vadd.f32 %v16694_v3, %v16693_v16  ;;  %v16758_v37 = vpop.f32.mrb[165].mxu1  ;;  %v16696_v17 = vpop.f32.mrb[166].mxu0 }
 0x771   : > { %v16759_v36 = vadd.f32 %v16758_v37, %v16757_v31  ;;  %v16760_v11 = vpop.f32.mrb[166].mxu1  ;;  %v16697_v26 = vpop.f32.mrb[167].mxu0 }
 0x772   : > { %v12963_v23 = vadd.f32 %v16695_v56, %v24677_v20  ;;  %v16698_v34 = vadd.f32 %v16697_v26, %v16696_v17  ;;  %v16761_v52 = vpop.f32.mrb[167].mxu1 }
 0x773   : > { %v16762_v25 = vadd.f32 %v16761_v52, %v16760_v11 }
 0x774   : > { %v24770_v30 = vadd.f32 %v16759_v36, %v12963_v23  ;;  %v12966_v55 = vadd.f32 %v16698_v34, %v24682_v22 }
 0x776   : > { %v24773_v27 = vadd.f32 %v16762_v25, %v12966_v55  ;;  %v16699_v39 = vpop.f32.mrb[168].mxu0 }
 0x777   : > { %v16763_v40 = vpop.f32.mrb[168].mxu1  ;;  %v16700_v63 = vpop.f32.mrb[169].mxu0 }
 0x778   : > { %v16701_v35 = vadd.f32 %v16700_v63, %v16699_v39  ;;  %v16764_v45 = vpop.f32.mrb[169].mxu1  ;;  %v16702_v53 = vpop.f32.mrb[170].mxu0 }
 0x779   : > { %v16765_v51 = vadd.f32 %v16764_v45, %v16763_v40  ;;  %v16766_v9 = vpop.f32.mrb[170].mxu1  ;;  %v16703_v29 = vpop.f32.mrb[171].mxu0 }
 0x77a   : > { %v12971_v20 = vadd.f32 %v16701_v35, %v24685_v7  ;;  %v16704_v48 = vadd.f32 %v16703_v29, %v16702_v53  ;;  %v16767_v61 = vpop.f32.mrb[171].mxu1 }
 0x77b   : > { %v16768_v38 = vadd.f32 %v16767_v61, %v16766_v9 }
 0x77c   : > { %v24776_v33 = vadd.f32 %v16765_v51, %v12971_v20  ;;  %v12974_v22 = vadd.f32 %v16704_v48, %v24692_v8 }
 0x77e   : > { %v24779_v59 = vadd.f32 %v16768_v38, %v12974_v22  ;;  %v16705_v1 = vpop.f32.mrb[172].mxu0 }
 0x77f   : > { %v16769_v28 = vpop.f32.mrb[172].mxu1  ;;  %v16706_v19 = vpop.f32.mrb[173].mxu0 }
 0x780   : > { %v16707_v6 = vadd.f32 %v16706_v19, %v16705_v1  ;;  %v16770_v43 = vpop.f32.mrb[173].mxu1  ;;  %v16708_v54 = vpop.f32.mrb[174].mxu0 }
 0x781   : > { %v16771_v0 = vadd.f32 %v16770_v43, %v16769_v28  ;;  %v16772_v21 = vpop.f32.mrb[174].mxu1  ;;  %v16709_v32 = vpop.f32.mrb[175].mxu0 }
 0x782   : > { %v12979_v7 = vadd.f32 %v16707_v6, %v24697_v62  ;;  %v16710_v46 = vadd.f32 %v16709_v32, %v16708_v54  ;;  %v16773_v10 = vpop.f32.mrb[175].mxu1 }
 0x783   : > { %v16774_v12 = vadd.f32 %v16773_v10, %v16772_v21 }
 0x784   : > { %v24782_v42 = vadd.f32 %v16771_v0, %v12979_v7  ;;  %v12982_v8 = vadd.f32 %v16710_v46, %v24706_v44 }
 0x786   : > { %v24785_v58 = vadd.f32 %v16774_v12, %v12982_v8  ;;  %v16791_v18 = vpop.f32.mrb[176].mxu0 }
 0x787   : > { %v16855_v4 = vpop.f32.mrb[176].mxu1  ;;  %v16792_v15 = vpop.f32.mrb[177].mxu0 }
 0x788   : > { %v16793_v2 = vadd.f32 %v16792_v15, %v16791_v18  ;;  %v16856_v16 = vpop.f32.mrb[177].mxu1  ;;  %v16794_v31 = vpop.f32.mrb[178].mxu0 }
 0x789   : > { %v16857_v3 = vadd.f32 %v16856_v16, %v16855_v4  ;;  %v16858_v56 = vpop.f32.mrb[178].mxu1  ;;  %v16795_v37 = vpop.f32.mrb[179].mxu0 }
 0x78a   : > { %v16796_v17 = vadd.f32 %v16795_v37, %v16794_v31  ;;  %v16859_v62 = vpop.f32.mrb[179].mxu1 }
 0x78b   : > { %v13503_v36 = vadd.f32 %v16857_v3, %v16793_v2  ;;  %v16860_v11 = vadd.f32 %v16859_v62, %v16858_v56 }
 0x78d   : > { %v24788_v26 = vadd.f32 %v13503_v36, %v24712_v57  ;;  %v13506_v23 = vadd.f32 %v16860_v11, %v16796_v17 }
 0x78e   : > { %v16797_v44 = vpop.f32.mrb[180].mxu0 }
 0x78f   : > { %v24791_v34 = vadd.f32 %v13506_v23, %v24717_v60  ;;  %v16861_v52 = vpop.f32.mrb[180].mxu1  ;;  %v16798_v25 = vpop.f32.mrb[181].mxu0 }
 0x790   : > { %v16799_v55 = vadd.f32 %v16798_v25, %v16797_v44  ;;  %v16862_v39 = vpop.f32.mrb[181].mxu1  ;;  %v16800_v40 = vpop.f32.mrb[182].mxu0 }
 0x791   : > { %v16863_v63 = vadd.f32 %v16862_v39, %v16861_v52  ;;  %v16864_v35 = vpop.f32.mrb[182].mxu1  ;;  %v16801_v45 = vpop.f32.mrb[183].mxu0 }
 0x792   : > { %v16802_v53 = vadd.f32 %v16801_v45, %v16800_v40  ;;  %v16865_v51 = vpop.f32.mrb[183].mxu1 }
 0x793   : > { %v13511_v9 = vadd.f32 %v16863_v63, %v16799_v55  ;;  %v16866_v29 = vadd.f32 %v16865_v51, %v16864_v35 }
 0x795   : > { %v24794_v57 = vadd.f32 %v13511_v9, %v24746_v50  ;;  %v13514_v20 = vadd.f32 %v16866_v29, %v16802_v53 }
 0x796   : > { %v16803_v48 = vpop.f32.mrb[184].mxu0 }
 0x797   : > { %v24797_v60 = vadd.f32 %v13514_v20, %v24749_v5  ;;  %v16867_v61 = vpop.f32.mrb[184].mxu1  ;;  %v16804_v38 = vpop.f32.mrb[185].mxu0 }
 0x798   : > { %v16805_v22 = vadd.f32 %v16804_v38, %v16803_v48  ;;  %v16868_v1 = vpop.f32.mrb[185].mxu1  ;;  %v16806_v28 = vpop.f32.mrb[186].mxu0 }
 0x799   : > { %v16869_v19 = vadd.f32 %v16868_v1, %v16867_v61  ;;  %v16870_v6 = vpop.f32.mrb[186].mxu1  ;;  %v16807_v43 = vpop.f32.mrb[187].mxu0 }
 0x79a   : > { %v16808_v54 = vadd.f32 %v16807_v43, %v16806_v28  ;;  %v16871_v0 = vpop.f32.mrb[187].mxu1 }
 0x79b   : > { %v13519_v21 = vadd.f32 %v16869_v19, %v16805_v22  ;;  %v16872_v32 = vadd.f32 %v16871_v0, %v16870_v6 }
 0x79d   : > { %v24800_v50 = vadd.f32 %v13519_v21, %v24752_v13  ;;  %v13522_v7 = vadd.f32 %v16872_v32, %v16808_v54 }
 0x79e   : > { %v16809_v46 = vpop.f32.mrb[188].mxu0 }
 0x79f   : > { %v24803_v5 = vadd.f32 %v13522_v7, %v24755_v47  ;;  %v16873_v10 = vpop.f32.mrb[188].mxu1  ;;  %v16810_v12 = vpop.f32.mrb[189].mxu0 }
 0x7a0   : > { %v16811_v8 = vadd.f32 %v16810_v12, %v16809_v46  ;;  %v16874_v18 = vpop.f32.mrb[189].mxu1  ;;  %v16812_v4 = vpop.f32.mrb[190].mxu0 }
 0x7a1   : > { %v16875_v15 = vadd.f32 %v16874_v18, %v16873_v10  ;;  %v16876_v2 = vpop.f32.mrb[190].mxu1  ;;  %v16813_v16 = vpop.f32.mrb[191].mxu0 }
 0x7a2   : > { %v16814_v31 = vadd.f32 %v16813_v16, %v16812_v4  ;;  %v16877_v3 = vpop.f32.mrb[191].mxu1 }
 0x7a3   : > { %v13527_v56 = vadd.f32 %v16875_v15, %v16811_v8  ;;  %v16878_v37 = vadd.f32 %v16877_v3, %v16876_v2 }
 0x7a5   : > { %v24806_v13 = vadd.f32 %v13527_v56, %v24758_v24  ;;  %v13530_v17 = vadd.f32 %v16878_v37, %v16814_v31 }
 0x7a6   : > { %v16815_v62 = vpop.f32.mrb[192].mxu0 }
 0x7a7   : > { %v24809_v47 = vadd.f32 %v13530_v17, %v24761_v49  ;;  %v16879_v36 = vpop.f32.mrb[192].mxu1  ;;  %v16816_v11 = vpop.f32.mrb[193].mxu0 }
 0x7a8   : > { %v16817_v23 = vadd.f32 %v16816_v11, %v16815_v62  ;;  %v16880_v44 = vpop.f32.mrb[193].mxu1  ;;  %v16818_v52 = vpop.f32.mrb[194].mxu0 }
 0x7a9   : > { %v16881_v25 = vadd.f32 %v16880_v44, %v16879_v36  ;;  %v16882_v55 = vpop.f32.mrb[194].mxu1  ;;  %v16819_v39 = vpop.f32.mrb[195].mxu0 }
 0x7aa   : > { %v16820_v40 = vadd.f32 %v16819_v39, %v16818_v52  ;;  %v16883_v63 = vpop.f32.mrb[195].mxu1 }
 0x7ab   : > { %v13535_v35 = vadd.f32 %v16881_v25, %v16817_v23  ;;  %v16884_v45 = vadd.f32 %v16883_v63, %v16882_v55 }
 0x7ad   : > { %v24812_v24 = vadd.f32 %v13535_v35, %v24764_v14  ;;  %v13538_v53 = vadd.f32 %v16884_v45, %v16820_v40 }
 0x7ae   : > { %v16821_v51 = vpop.f32.mrb[196].mxu0 }
 0x7af   : > { %v24815_v49 = vadd.f32 %v13538_v53, %v24767_v41  ;;  %v16885_v9 = vpop.f32.mrb[196].mxu1  ;;  %v16822_v29 = vpop.f32.mrb[197].mxu0 }
 0x7b0   : > { %v16823_v20 = vadd.f32 %v16822_v29, %v16821_v51  ;;  %v16886_v48 = vpop.f32.mrb[197].mxu1  ;;  %v16824_v61 = vpop.f32.mrb[198].mxu0 }
 0x7b1   : > { %v16887_v38 = vadd.f32 %v16886_v48, %v16885_v9  ;;  %v16888_v22 = vpop.f32.mrb[198].mxu1  ;;  %v16825_v1 = vpop.f32.mrb[199].mxu0 }
 0x7b2   : > { %v16826_v28 = vadd.f32 %v16825_v1, %v16824_v61  ;;  %v16889_v19 = vpop.f32.mrb[199].mxu1 }
 0x7b3   : > { %v13543_v6 = vadd.f32 %v16887_v38, %v16823_v20  ;;  %v16890_v43 = vadd.f32 %v16889_v19, %v16888_v22 }
 0x7b5   : > { %v24818_v14 = vadd.f32 %v13543_v6, %v24770_v30  ;;  %v13546_v54 = vadd.f32 %v16890_v43, %v16826_v28 }
 0x7b6   : > { %v16827_v0 = vpop.f32.mrb[200].mxu0 }
 0x7b7   : > { %v24821_v41 = vadd.f32 %v13546_v54, %v24773_v27  ;;  %v16891_v21 = vpop.f32.mrb[200].mxu1  ;;  %v16828_v32 = vpop.f32.mrb[201].mxu0 }
 0x7b8   : > { %v16829_v7 = vadd.f32 %v16828_v32, %v16827_v0  ;;  %v16892_v46 = vpop.f32.mrb[201].mxu1  ;;  %v16830_v10 = vpop.f32.mrb[202].mxu0 }
 0x7b9   : > { %v16893_v12 = vadd.f32 %v16892_v46, %v16891_v21  ;;  %v16894_v8 = vpop.f32.mrb[202].mxu1  ;;  %v16831_v18 = vpop.f32.mrb[203].mxu0 }
 0x7ba   : > { %v16832_v4 = vadd.f32 %v16831_v18, %v16830_v10  ;;  %v16895_v15 = vpop.f32.mrb[203].mxu1 }
 0x7bb   : > { %v13551_v2 = vadd.f32 %v16893_v12, %v16829_v7  ;;  %v16896_v16 = vadd.f32 %v16895_v15, %v16894_v8 }
 0x7bd   : > { %v24824_v30 = vadd.f32 %v13551_v2, %v24776_v33  ;;  %v13554_v31 = vadd.f32 %v16896_v16, %v16832_v4 }
 0x7be   : > { %v16833_v3 = vpop.f32.mrb[204].mxu0 }
 0x7bf   : > { %v24827_v27 = vadd.f32 %v13554_v31, %v24779_v59  ;;  %v16897_v56 = vpop.f32.mrb[204].mxu1  ;;  %v16834_v37 = vpop.f32.mrb[205].mxu0 }
 0x7c0   : > { %v16835_v17 = vadd.f32 %v16834_v37, %v16833_v3  ;;  %v16898_v62 = vpop.f32.mrb[205].mxu1  ;;  %v16836_v36 = vpop.f32.mrb[206].mxu0 }
 0x7c1   : > { %v16899_v11 = vadd.f32 %v16898_v62, %v16897_v56  ;;  %v16900_v23 = vpop.f32.mrb[206].mxu1  ;;  %v16837_v44 = vpop.f32.mrb[207].mxu0 }
 0x7c2   : > { %v16838_v52 = vadd.f32 %v16837_v44, %v16836_v36  ;;  %v16901_v25 = vpop.f32.mrb[207].mxu1 }
 0x7c3   : > { %v13559_v55 = vadd.f32 %v16899_v11, %v16835_v17  ;;  %v16902_v39 = vadd.f32 %v16901_v25, %v16900_v23 }
 0x7c5   : > { %v24830_v33 = vadd.f32 %v13559_v55, %v24782_v42  ;;  %v13562_v40 = vadd.f32 %v16902_v39, %v16838_v52 }
 0x7c6   : > { %v16919_v63 = vpop.f32.mrb[208].mxu0 }
 0x7c7   : > { %v24833_v59 = vadd.f32 %v13562_v40, %v24785_v58  ;;  %v16983_v35 = vpop.f32.mrb[208].mxu1  ;;  %v16920_v45 = vpop.f32.mrb[209].mxu0 }
 0x7c8   : > { %v16921_v53 = vadd.f32 %v16920_v45, %v16919_v63  ;;  %v16984_v51 = vpop.f32.mrb[209].mxu1  ;;  %v16922_v9 = vpop.f32.mrb[210].mxu0 }
 0x7c9   : > { %v16985_v29 = vadd.f32 %v16984_v51, %v16983_v35  ;;  %v16986_v20 = vpop.f32.mrb[210].mxu1  ;;  %v16923_v48 = vpop.f32.mrb[211].mxu0 }
 0x7ca   : > { %v16924_v61 = vadd.f32 %v16923_v48, %v16922_v9  ;;  %v16987_v38 = vpop.f32.mrb[211].mxu1 }
 0x7cb   : > { %v14002_v22 = vadd.f32 %v16985_v29, %v16921_v53  ;;  %v16988_v1 = vadd.f32 %v16987_v38, %v16986_v20 }
 0x7cd   : > { %v14064_v42 = vadd.f32 %v14002_v22, %v24788_v26  ;;  %v14005_v28 = vadd.f32 %v16988_v1, %v16924_v61 }
 0x7ce   : > { %v16925_v19 = vpop.f32.mrb[212].mxu0 }
 0x7cf   : > { %19297 = vtanh.f32 %v14064_v42  ;;  %v14065_v58 = vadd.f32 %v14005_v28, %v24791_v34  ;;  %v16989_v6 = vpop.f32.mrb[212].mxu1  ;;  %v16926_v43 = vpop.f32.mrb[213].mxu0 }
 0x7d0   : > { %v16927_v54 = vadd.f32 %v16926_v43, %v16925_v19  ;;  %v16990_v0 = vpop.f32.mrb[213].mxu1  ;;  %v16928_v21 = vpop.f32.mrb[214].mxu0 }
 0x7d1   : > { %19299 = vtanh.f32 %v14065_v58  ;;  %v16991_v32 = vadd.f32 %v16990_v0, %v16989_v6  ;;  %v16992_v7 = vpop.f32.mrb[214].mxu1  ;;  %v16929_v46 = vpop.f32.mrb[215].mxu0 }
 0x7d2   : > { %v16930_v10 = vadd.f32 %v16929_v46, %v16928_v21  ;;  %v16993_v12 = vpop.f32.mrb[215].mxu1 }
 0x7d3   : > { %v14010_v8 = vadd.f32 %v16991_v32, %v16927_v54  ;;  %v16994_v18 = vadd.f32 %v16993_v12, %v16992_v7 }
 0x7d5   : > { %v14066_v26 = vadd.f32 %v14010_v8, %v24794_v57  ;;  %v14013_v4 = vadd.f32 %v16994_v18, %v16930_v10 }
 0x7d6   : > { %v16931_v15 = vpop.f32.mrb[216].mxu0 }
 0x7d7   : > { %19301 = vtanh.f32 %v14066_v26  ;;  %v14067_v34 = vadd.f32 %v14013_v4, %v24797_v60  ;;  %v16995_v2 = vpop.f32.mrb[216].mxu1  ;;  %v16932_v16 = vpop.f32.mrb[217].mxu0 }
 0x7d8   : > { %v16933_v31 = vadd.f32 %v16932_v16, %v16931_v15  ;;  %v16996_v3 = vpop.f32.mrb[217].mxu1  ;;  %v16934_v56 = vpop.f32.mrb[218].mxu0 }
 0x7d9   : > { %v19298_v37 = vpop.eup %19297  ;;  %19303 = vtanh.f32 %v14067_v34  ;;  %v16997_v17 = vadd.f32 %v16996_v3, %v16995_v2  ;;  %v16998_v62 = vpop.f32.mrb[218].mxu1 }
 0x7da   : > { %v16935_v36 = vpop.f32.mrb[219].mxu0  ;;  %14096 = vst [vmem:[%s24840_s17] sm:$0xff] %v19298_v37  ;;  %v16999_v11 = vpop.f32.mrb[219].mxu1 }
 0x7db   : > { %v16936_v57 = vadd.f32 %v16935_v36, %v16934_v56  ;;  %v19300_v23 = vpop.eup %19299  ;;  %v14018_v44 = vadd.f32 %v16997_v17, %v16933_v31  ;;  %v17000_v60 = vadd.f32 %v16999_v11, %v16998_v62 }
 0x7dc   : > { %14097 = vst [vmem:[%s24840_s17 + $0x8] sm:$0xff] %v19300_v23 }
 0x7dd   : > { %v14068_v52 = vadd.f32 %v14018_v44, %v24800_v50  ;;  %v14021_v25 = vadd.f32 %v17000_v60, %v16936_v57 }
 0x7de   : > { %v16937_v55 = vpop.f32.mrb[220].mxu0 }
 0x7df   : > { %19305 = vtanh.f32 %v14068_v52  ;;  %v14069_v39 = vadd.f32 %v14021_v25, %v24803_v5  ;;  %v17001_v40 = vpop.f32.mrb[220].mxu1  ;;  %v16938_v63 = vpop.f32.mrb[221].mxu0 }
 0x7e0   : > { %v16939_v35 = vadd.f32 %v16938_v63, %v16937_v55  ;;  %v17002_v45 = vpop.f32.mrb[221].mxu1  ;;  %v16940_v53 = vpop.f32.mrb[222].mxu0 }
 0x7e1   : > { %v19302_v51 = vpop.eup %19301  ;;  %19307 = vtanh.f32 %v14069_v39  ;;  %v17003_v9 = vadd.f32 %v17002_v45, %v17001_v40  ;;  %v17004_v29 = vpop.f32.mrb[222].mxu1 }
 0x7e2   : > { %v16941_v20 = vpop.f32.mrb[223].mxu0  ;;  %14098 = vst [vmem:[%s24840_s17 + $0x10] sm:$0xff] %v19302_v51  ;;  %v17005_v61 = vpop.f32.mrb[223].mxu1 }
 0x7e3   : > { %v16942_v48 = vadd.f32 %v16941_v20, %v16940_v53  ;;  %v19304_v50 = vpop.eup %19303  ;;  %v14026_v38 = vadd.f32 %v17003_v9, %v16939_v35  ;;  %v17006_v22 = vadd.f32 %v17005_v61, %v17004_v29 }
 0x7e4   : > { %14099 = vst [vmem:[%s24840_s17 + $0x18] sm:$0xff] %v19304_v50 }
 0x7e5   : > { %v14070_v5 = vadd.f32 %v14026_v38, %v24806_v13  ;;  %v14029_v1 = vadd.f32 %v17006_v22, %v16942_v48 }
 0x7e6   : > { %v16943_v42 = vpop.f32.mrb[224].mxu0 }
 0x7e7   : > { %19309 = vtanh.f32 %v14070_v5  ;;  %v14071_v28 = vadd.f32 %v14029_v1, %v24809_v47  ;;  %v17007_v19 = vpop.f32.mrb[224].mxu1  ;;  %v16944_v58 = vpop.f32.mrb[225].mxu0 }
 0x7e8   : > { %v16945_v6 = vadd.f32 %v16944_v58, %v16943_v42  ;;  %v17008_v43 = vpop.f32.mrb[225].mxu1  ;;  %v16946_v54 = vpop.f32.mrb[226].mxu0 }
 0x7e9   : > { %v19306_v0 = vpop.eup %19305  ;;  %19311 = vtanh.f32 %v14071_v28  ;;  %v17009_v21 = vadd.f32 %v17008_v43, %v17007_v19  ;;  %v17010_v32 = vpop.f32.mrb[226].mxu1 }
 0x7ea   : > { %v16947_v7 = vpop.f32.mrb[227].mxu0  ;;  %14100 = vst [vmem:[%s24840_s17 + $0x20] sm:$0xff] %v19306_v0  ;;  %v17011_v10 = vpop.f32.mrb[227].mxu1 }
 0x7eb   : > { %v16948_v46 = vadd.f32 %v16947_v7, %v16946_v54  ;;  %v19308_v13 = vpop.eup %19307  ;;  %v14034_v12 = vadd.f32 %v17009_v21, %v16945_v6  ;;  %v17012_v8 = vadd.f32 %v17011_v10, %v17010_v32 }
 0x7ec   : > { %14101 = vst [vmem:[%s24840_s17 + $0x28] sm:$0xff] %v19308_v13 }
 0x7ed   : > { %v14072_v47 = vadd.f32 %v14034_v12, %v24812_v24  ;;  %v14037_v18 = vadd.f32 %v17012_v8, %v16948_v46  ;;  %v14183_v8 = vld [vmem:[%s24840_s17 + $0x10] sm:$0xff] (%p19440_p4) }
 0x7ee   : > { %v16949_v26 = vpop.f32.mrb[228].mxu0  ;;  %14184 = vst [vmem:[%s14121_s26 + $0x20] sm:$0xff] (%p19440_p4), %v14183_v8 }
 0x7ef   : > { %19313 = vtanh.f32 %v14072_v47  ;;  %v14073_v4 = vadd.f32 %v14037_v18, %v24815_v49  ;;  %v17013_v15 = vpop.f32.mrb[228].mxu1  ;;  %v16950_v34 = vpop.f32.mrb[229].mxu0  ;;  %v14185_v47 = vld [vmem:[%s24840_s17 + $0x18] sm:$0xff] (%p19440_p4) }
 0x7f0   : > { %v16951_v2 = vadd.f32 %v16950_v34, %v16949_v26  ;;  %v17014_v16 = vpop.f32.mrb[229].mxu1  ;;  %v16952_v31 = vpop.f32.mrb[230].mxu0  ;;  %14186 = vst [vmem:[%s14121_s26 + $0x28] sm:$0xff] (%p19440_p4), %v14185_v47 }
 0x7f1   : > { %v19310_v3 = vpop.eup %19309  ;;  %19315 = vtanh.f32 %v14073_v4  ;;  %v17015_v56 = vadd.f32 %v17014_v16, %v17013_v15  ;;  %v17016_v37 = vpop.f32.mrb[230].mxu1  ;;  %v14187_v18 = vld [vmem:[%s24840_s17 + $0x20] sm:$0xff] (%p19440_p4) }
 0x7f2   : > { %v16953_v17 = vpop.f32.mrb[231].mxu0  ;;  %14102 = vst [vmem:[%s24840_s17 + $0x30] sm:$0xff] %v19310_v3  ;;  %v17017_v36 = vpop.f32.mrb[231].mxu1  ;;  %14188 = vst [vmem:[%s14121_s26 + $0x40] sm:$0xff] (%p19440_p4), %v14187_v18 }
 0x7f3   : > { %v16954_v62 = vadd.f32 %v16953_v17, %v16952_v31  ;;  %v19312_v24 = vpop.eup %19311  ;;  %v14042_v57 = vadd.f32 %v17015_v56, %v16951_v2  ;;  %v17018_v11 = vadd.f32 %v17017_v36, %v17016_v37  ;;  %v14189_v26 = vld [vmem:[%s24840_s17 + $0x28] sm:$0xff] (%p19440_p4) }
 0x7f4   : > { %14103 = vst [vmem:[%s24840_s17 + $0x38] sm:$0xff] %v19312_v24  ;;  %14190 = vst [vmem:[%s14121_s26 + $0x48] sm:$0xff] (%p19440_p4), %v14189_v26 }
 0x7f5   : > { %v14074_v49 = vadd.f32 %v14042_v57, %v24818_v14  ;;  %v14045_v23 = vadd.f32 %v17018_v11, %v16954_v62 }
 0x7f6   : > { %v16955_v44 = vpop.f32.mrb[232].mxu0 }
 0x7f7   : > { %19317 = vtanh.f32 %v14074_v49  ;;  %v14075_v60 = vadd.f32 %v14045_v23, %v24821_v41  ;;  %v17019_v52 = vpop.f32.mrb[232].mxu1  ;;  %v16956_v25 = vpop.f32.mrb[233].mxu0 }
 0x7f8   : > { %v16957_v55 = vadd.f32 %v16956_v25, %v16955_v44  ;;  %v17020_v39 = vpop.f32.mrb[233].mxu1  ;;  %v16958_v40 = vpop.f32.mrb[234].mxu0 }
 0x7f9   : > { %v19314_v63 = vpop.eup %19313  ;;  %19319 = vtanh.f32 %v14075_v60  ;;  %v17021_v35 = vadd.f32 %v17020_v39, %v17019_v52  ;;  %v17022_v45 = vpop.f32.mrb[234].mxu1  ;;  %v14191_v4 = vld [vmem:[%s24840_s17 + $0x30] sm:$0xff] (%p19440_p4) }
 0x7fa   : > { %v16959_v53 = vpop.f32.mrb[235].mxu0  ;;  %14104 = vst [vmem:[%s24840_s17 + $0x40] sm:$0xff] %v19314_v63  ;;  %v17023_v9 = vpop.f32.mrb[235].mxu1  ;;  %14192 = vst [vmem:[%s14121_s26 + $0x60] sm:$0xff] (%p19440_p4), %v14191_v4 }
 0x7fb   : > { %v16960_v51 = vadd.f32 %v16959_v53, %v16958_v40  ;;  %v19316_v14 = vpop.eup %19315  ;;  %v14050_v29 = vadd.f32 %v17021_v35, %v16957_v55  ;;  %v17024_v20 = vadd.f32 %v17023_v9, %v17022_v45  ;;  %v14193_v15 = vld [vmem:[%s24840_s17 + $0x38] sm:$0xff] (%p19440_p4) }
 0x7fc   : > { %14105 = vst [vmem:[%s24840_s17 + $0x48] sm:$0xff] %v19316_v14  ;;  %14194 = vst [vmem:[%s14121_s26 + $0x68] sm:$0xff] (%p19440_p4), %v14193_v15 }
 0x7fd   : > { %v14076_v41 = vadd.f32 %v14050_v29, %v24824_v30  ;;  %v14053_v48 = vadd.f32 %v17024_v20, %v16960_v51 }
 0x7fe   : > { %v16961_v61 = vpop.f32.mrb[236].mxu0 }
 0x7ff   : > { %19321 = vtanh.f32 %v14076_v41  ;;  %v14077_v50 = vadd.f32 %v14053_v48, %v24827_v27  ;;  %v17025_v38 = vpop.f32.mrb[236].mxu1  ;;  %v16962_v22 = vpop.f32.mrb[237].mxu0 }
 0x800   : > { %v16963_v5 = vadd.f32 %v16962_v22, %v16961_v61  ;;  %v17026_v1 = vpop.f32.mrb[237].mxu1  ;;  %v16964_v42 = vpop.f32.mrb[238].mxu0 }
 0x801   : > { %v19318_v28 = vpop.eup %19317  ;;  %19323 = vtanh.f32 %v14077_v50  ;;  %v17027_v19 = vadd.f32 %v17026_v1, %v17025_v38  ;;  %v17028_v58 = vpop.f32.mrb[238].mxu1  ;;  %v14195_v34 = vld [vmem:[%s24840_s17 + $0x40] sm:$0xff] (%p19440_p4) }
 0x802   : > { %v16965_v6 = vpop.f32.mrb[239].mxu0  ;;  %14106 = vst [vmem:[%s24840_s17 + $0x50] sm:$0xff] %v19318_v28  ;;  %v17029_v43 = vpop.f32.mrb[239].mxu1  ;;  %14196 = vst [vmem:[%s14121_s26 + $0x80] sm:$0xff] (%p19440_p4), %v14195_v34 }
 0x803   : > { %v16966_v30 = vadd.f32 %v16965_v6, %v16964_v42  ;;  %v19320_v54 = vpop.eup %19319  ;;  %v14058_v27 = vadd.f32 %v17027_v19, %v16963_v5  ;;  %v17030_v0 = vadd.f32 %v17029_v43, %v17028_v58  ;;  %v14197_v2 = vld [vmem:[%s24840_s17 + $0x48] sm:$0xff] (%p19440_p4) }
 0x804   : > { %14107 = vst [vmem:[%s24840_s17 + $0x58] sm:$0xff] %v19320_v54  ;;  %14198 = vst [vmem:[%s14121_s26 + $0x88] sm:$0xff] (%p19440_p4), %v14197_v2 }
 0x805   : > { %v14078_v21 = vadd.f32 %v14058_v27, %v24830_v33  ;;  %v14061_v32 = vadd.f32 %v17030_v0, %v16966_v30  ;;  %v14179_v33 = vld [vmem:[%s24840_s17] sm:$0xff] (%p19440_p4) }
 0x806   : > { %14180 = vst [vmem:[%s14121_s26] sm:$0xff] (%p19440_p4), %v14179_v33 }
 0x807   : > { %19325 = vtanh.f32 %v14078_v21  ;;  %v14079_v7 = vadd.f32 %v14061_v32, %v24833_v59  ;;  %v14181_v59 = vld [vmem:[%s24840_s17 + $0x8] sm:$0xff] (%p19440_p4) }
 0x808   : > { %14182 = vst [vmem:[%s14121_s26 + $0x8] sm:$0xff] (%p19440_p4), %v14181_v59 }
 0x809   : > { %v19322_v46 = vpop.eup %19321  ;;  %19327 = vtanh.f32 %v14079_v7  ;;  %v14199_v16 = vld [vmem:[%s24840_s17 + $0x50] sm:$0xff] (%p19440_p4) }
 0x80a   : > { %14108 = vst [vmem:[%s24840_s17 + $0x60] sm:$0xff] %v19322_v46  ;;  %14200 = vst [vmem:[%s14121_s26 + $0xa0] sm:$0xff] (%p19440_p4), %v14199_v16 }
 0x80b   : > { %v19324_v10 = vpop.eup %19323  ;;  %v14201_v31 = vld [vmem:[%s24840_s17 + $0x58] sm:$0xff] (%p19440_p4) }
 0x80c   : > { %14109 = vst [vmem:[%s24840_s17 + $0x68] sm:$0xff] %v19324_v10  ;;  %14202 = vst [vmem:[%s14121_s26 + $0xa8] sm:$0xff] (%p19440_p4), %v14201_v31 }
 0x80e   : > { %14118 = sbr.rel (!%p19440_p4) target bundleno = 2077 (0x81d), region = 68 }
 0x811   : > { %v19326_v13 = vpop.eup %19325  ;;  %v14203_v3 = vld [vmem:[%s24840_s17 + $0x60] sm:$0xff] (%p19440_p4) }
 0x812   : > { %14110 = vst [vmem:[%s24840_s17 + $0x70] sm:$0xff] %v19326_v13  ;;  %14204 = vst [vmem:[%s14121_s26 + $0xc0] sm:$0xff] (%p19440_p4), %v14203_v3 }
 0x813   : > { %v19328_v12 = vpop.eup %19327  ;;  %v14205_v56 = vld [vmem:[%s24840_s17 + $0x68] sm:$0xff] (%p19440_p4) }
 0x814   : > { %14111 = vst [vmem:[%s24840_s17 + $0x78] sm:$0xff] %v19328_v12  ;;  %14206 = vst [vmem:[%s14121_s26 + $0xc8] sm:$0xff] (%p19440_p4), %v14205_v56 }
 0x819   : > { %v14207_v37 = vld [vmem:[%s24840_s17 + $0x70] sm:$0xff] }
 0x81a   : > { %14208 = vst [vmem:[%s14121_s26 + $0xe0] sm:$0xff] %v14207_v37 }
 0x81b   : > { %v14209_v17 = vld [vmem:[%s24840_s17 + $0x78] sm:$0xff] }
 0x81c   : > { %14210 = vst [vmem:[%s14121_s26 + $0xe8] sm:$0xff] %v14209_v17 }
 0x81d PF: > { %p18_p8 = scmp.ge.s32.totalorder %s19430_s21, 4   ;;  %s25024_s17 = smov %s19348_s18 }
 0x81e   : > { %s25025_s18 = smov %s19438_s24  ;;  %s25026_s19 = smov %s19430_s21 }
 0x81f   :  { %20 = sbr.rel (!%p18_p8) target bundleno = 2 (0x2), region = 171 }

</bundles_post_ra>
